<compile_context>
chip_gen: v7x
topology: tpu7x:2x2x1
jax: 0.10.0
libtpu: 0.0.40
codegen_flags: <defaults>
</compile_context>

<pallas_src>
import functools

import jax
import jax.numpy as jnp
from jax.experimental import pallas as pl
from jax.experimental.pallas import tpu as pltpu


# ----------------------------- Pallas kernels ------------------------------

def _conv_kernel(x_ref, w_ref, s_ref, b_ref, *rest, taps, relu, has_res):
    """Fused direct conv:  out = relu?((sum_t W_t @ patch_t) * scale + bias) [+ res].

    x_ref : (1, nph*kw, C, Hg*OW)  bf16 grouped input (one image)
    w_ref : (kh*kw, O, C)          bf16 per-tap weights
    s_ref : (O, 1) f32 ; b_ref : (O, 1) f32   folded BatchNorm scale / bias
    res   : (1, O, OH*OW)  optional fused residual (shortcut branch)
    out   : (1, O, OH*OW)
    """
    if has_res:
        res_ref, o_ref = rest
    else:
        (o_ref,) = rest
    msp = o_ref.shape[-1]
    acc = None
    for t, (lead, start) in enumerate(taps):
        patch = x_ref[0, lead, :, pl.ds(start, msp)]           # (C, msp) bf16
        contrib = jnp.dot(w_ref[t], patch,
                          preferred_element_type=jnp.float32)  # MXU, f32 acc
        acc = contrib if acc is None else acc + contrib
    y = acc * s_ref[...] + b_ref[...]
    if relu:
        y = jnp.maximum(y, 0.0)
    if has_res:
        y = y + res_ref[0].astype(jnp.float32)
    o_ref[0] = y.astype(o_ref.dtype)


def _conv_pallas(xg, wk, scale, bias, res, *, taps, relu, out_dtype):
    B, SK, C, SP = xg.shape
    T, O, _ = wk.shape
    msp = res.shape[-1] if res is not None else None
    # msp derived from out spec below when res is None
    return None  # placeholder (replaced below)


def _run_conv(xg, wk, scale, bias, res, *, msp, taps, relu, out_dtype):
    B, SK, C, SP = xg.shape
    T, O, _ = wk.shape
    in_specs = [
        pl.BlockSpec((1, SK, C, SP), lambda b: (b, 0, 0, 0)),
        pl.BlockSpec((T, O, C), lambda b: (0, 0, 0)),
        pl.BlockSpec((O, 1), lambda b: (0, 0)),
        pl.BlockSpec((O, 1), lambda b: (0, 0)),
    ]
    args = [xg, wk, scale, bias]
    if res is not None:
        in_specs.append(pl.BlockSpec((1, O, msp), lambda b: (b, 0, 0)))
        args.append(res)
    kernel = functools.partial(_conv_kernel, taps=tuple(taps), relu=relu,
                               has_res=res is not None)
    return pl.pallas_call(
        kernel,
        out_shape=jax.ShapeDtypeStruct((B, O, msp), out_dtype),
        grid=(B,),
        in_specs=in_specs,
        out_specs=pl.BlockSpec((1, O, msp), lambda b: (b, 0, 0)),
        compiler_params=pltpu.CompilerParams(dimension_semantics=("parallel",)),
    )(*args)


def _linear_kernel(x_ref, w_ref, b_ref, o_ref, *, relu):
    y = jnp.dot(x_ref[...], w_ref[...],
                preferred_element_type=jnp.float32) + b_ref[...]
    if relu:
        y = jnp.maximum(y, 0.0)
    o_ref[...] = y.astype(o_ref.dtype)


def linear(x, w, b, relu, out_dtype=jnp.bfloat16, bn=128):
    """y = maybe_relu(x @ w.T + b); output features padded to 128-lane tiles."""
    B, K = x.shape
    N = w.shape[0]
    Np = ((N + bn - 1) // bn) * bn
    wt = jnp.pad(w.T.astype(jnp.bfloat16), ((0, 0), (0, Np - N)))
    bp = jnp.pad(b.astype(jnp.float32).reshape(1, N), ((0, 0), (0, Np - N)))
    y = pl.pallas_call(
        functools.partial(_linear_kernel, relu=relu),
        out_shape=jax.ShapeDtypeStruct((B, Np), out_dtype),
        grid=(Np // bn,),
        in_specs=[pl.BlockSpec((B, K), lambda j: (0, 0)),
                  pl.BlockSpec((K, bn), lambda j: (0, j)),
                  pl.BlockSpec((1, bn), lambda j: (0, j))],
        out_specs=pl.BlockSpec((B, bn), lambda j: (0, j)),
        compiler_params=pltpu.CompilerParams(dimension_semantics=("parallel",)),
    )(x.astype(jnp.bfloat16), wt, bp)
    return y[:, :N]


# --------------------------- conv lowering (glue) ---------------------------

def conv_bn_act(x, w_oihw, stride, pad, scale, bias, relu=True, res=None,
                out_dtype=jnp.bfloat16):
    """Conv2d + folded BatchNorm + optional ReLU + optional fused residual add."""
    B, C, H, W = x.shape
    O, _, kh, kw = w_oihw.shape
    s = stride
    OH = (H + 2 * pad - kh) // s + 1
    OW = (W + 2 * pad - kw) // s + 1
    Hg = OH + (kh - 1) // s
    Hp = s * Hg
    Wp = (OW - 1) * s + kw
    eh = max(0, Hp - (H + 2 * pad))
    ew = max(0, Wp - (W + 2 * pad))
    xp = jnp.pad(x.astype(jnp.bfloat16),
                 ((0, 0), (0, 0), (pad, pad + eh), (pad, pad + ew)))
    xp = xp[:, :, :Hp, :Wp]
    nph = min(kh, s)                                  # H phases actually used
    xr = xp.reshape(B, C, Hg, s, Wp)[:, :, :, :nph, :]
    cols = [xr[..., j: j + s * (OW - 1) + 1: s] for j in range(kw)]
    xs = jnp.stack(cols, axis=2)                      # (B, C, kw, Hg, nph, OW)
    xg = xs.transpose(0, 4, 2, 1, 3, 5).reshape(B, nph * kw, C, Hg * OW)
    wk = w_oihw.transpose(2, 3, 0, 1).reshape(kh * kw, O, C).astype(jnp.bfloat16)
    taps = [((i % s) * kw + j, (i // s) * OW)
            for i in range(kh) for j in range(kw)]
    sc = scale.astype(jnp.float32).reshape(O, 1)
    bi = bias.astype(jnp.float32).reshape(O, 1)
    res2 = None if res is None else res.reshape(B, O, OH * OW)
    y = _run_conv(xg, wk, sc, bi, res2, msp=OH * OW, taps=taps, relu=relu,
                  out_dtype=out_dtype)
    return y.reshape(B, O, OH, OW)


def _phase_info(p, pad, s, k):
    """Sub-pixel phase p of a stride-s ConvTranspose: tap list + input offset."""
    b = (p + pad) % s
    if b >= k:
        return 0, 0, []
    a = (p + pad) // s
    U = (k - b + s - 1) // s
    off = a - U + 1
    taps = [s * (U - 1 - u) + b for u in range(U)]    # flipped order
    return U, off, taps


def deconv_bn_act(x, w_iohw, stride, pad, out_pad, scale, bias, relu, res=None,
                  out_dtype=jnp.bfloat16):
    """ConvTranspose2d + folded BN + optional ReLU (+ fused residual if s==1)."""
    B, Cin, IH, IW = x.shape
    _, Cout, kh, kw = w_iohw.shape
    s = stride
    if s == 1:  # stride-1 transposed conv == regular conv with flipped kernel
        w_conv = jnp.flip(w_iohw, axis=(-2, -1)).transpose(1, 0, 2, 3)
        return conv_bn_act(x, w_conv, 1, kh - 1 - pad, scale, bias, relu,
                           res=res, out_dtype=out_dtype)
    assert res is None
    OHt = (IH - 1) * s - 2 * pad + kh + out_pad
    OWt = (IW - 1) * s - 2 * pad + kw + out_pad
    assert OHt % s == 0 and OWt % s == 0
    OHp, OWp = OHt // s, OWt // s
    bias_f = bias.astype(jnp.float32)
    rows = []
    for ph in range(s):
        Uh, offh, th = _phase_info(ph, pad, s, kh)
        row = []
        for pw in range(s):
            Uw, offw, tw = _phase_info(pw, pad, s, kw)
            if Uh == 0 or Uw == 0:
                # no kernel tap hits this output phase -> pure (folded) BN bias
                val = jnp.maximum(bias_f, 0.0) if relu else bias_f
                ypp = jnp.broadcast_to(val.reshape(1, Cout, 1, 1),
                                       (B, Cout, OHp, OWp)).astype(out_dtype)
            else:
                hlo, hhi = offh, OHp - 1 + offh + Uh - 1
                wlo, whi = offw, OWp - 1 + offw + Uw - 1
                pad_t, pad_b = max(0, -hlo), max(0, hhi - (IH - 1))
                pad_l, pad_r = max(0, -wlo), max(0, whi - (IW - 1))
                xph = jnp.pad(x, ((0, 0), (0, 0), (pad_t, pad_b), (pad_l, pad_r)))
                xph = xph[:, :, hlo + pad_t:hhi + pad_t + 1,
                          wlo + pad_l:whi + pad_l + 1]
                wsub = jnp.stack(
                    [jnp.stack([w_iohw[:, :, a, b] for b in tw], axis=-1)
                     for a in th], axis=-2)            # (Cin, Cout, Uh, Uw)
                wsub = wsub.transpose(1, 0, 2, 3)      # (Cout, Cin, Uh, Uw)
                ypp = conv_bn_act(xph, wsub, 1, 0, scale, bias, relu,
                                  res=None, out_dtype=out_dtype)
            row.append(ypp)
        rows.append(jnp.stack(row, axis=0))
    y = jnp.stack(rows, axis=0)                        # (s, s, B, Cout, OHp, OWp)
    y = y.transpose(2, 3, 4, 0, 5, 1).reshape(B, Cout, OHt, OWt)
    return y


# ----------------------------- parameters ------------------------------

def _randn(key, shape, std=0.1):
    return std * jax.random.normal(key, shape, dtype=jnp.float32)


def _bn_params(key, c):
    k1, k2, k3, k4 = jax.random.split(key, 4)
    return dict(
        gamma=1.0 + 0.1 * jax.random.normal(k1, (c,), dtype=jnp.float32),
        beta=0.1 * jax.random.normal(k2, (c,), dtype=jnp.float32),
        mean=0.05 * jax.random.normal(k3, (c,), dtype=jnp.float32),
        var=1.0 + 0.1 * jax.random.uniform(k4, (c,), dtype=jnp.float32),
    )


def _fold_bn(gamma, beta, mean, var, conv_bias=None, eps=1e-5):
    scale = gamma / jnp.sqrt(var + eps)
    bias = beta - mean * scale
    if conv_bias is not None:
        bias = bias + conv_bias * scale
    return scale, bias


def build_kart_cnn_params(key, dim_layers, n_input, input_dim, hidden_dim):
    keys = iter(jax.random.split(key, 128))
    p = {}
    p['norm'] = _bn_params(next(keys), n_input)
    c = dim_layers[0]
    p['enc0_w'] = _randn(next(keys), (c, n_input, 7, 7))
    p['enc0_bn'] = _bn_params(next(keys), c)
    p['dec_last_w'] = _randn(next(keys), (c, n_input, 7, 7))   # (Cin, Cout, kh, kw)
    p['dec_last_b'] = _randn(next(keys), (n_input,))
    p['dec_last_bn'] = _bn_params(next(keys), n_input)
    enc_blocks, dec_blocks = [], []
    for l in dim_layers[1:]:
        enc_blocks.append(dict(
            conv1_w=_randn(next(keys), (l, c, 3, 3)), bn1=_bn_params(next(keys), l),
            conv2_w=_randn(next(keys), (l, l, 3, 3)), bn2=_bn_params(next(keys), l),
            down_w=_randn(next(keys), (l, c, 1, 1)), down_bn=_bn_params(next(keys), l),
        ))
        dec_blocks.insert(0, dict(
            t1_w=_randn(next(keys), (l, c, 3, 3)), bn1=_bn_params(next(keys), c),
            t2_w=_randn(next(keys), (c, c, 3, 3)), bn2=_bn_params(next(keys), c),
            t3_w=_randn(next(keys), (c, c, 3, 3)), bn3=_bn_params(next(keys), c),
            up_w=_randn(next(keys), (l, c, 1, 1)), up_bn=_bn_params(next(keys), c),
        ))
        c = l
    p['enc_blocks'] = enc_blocks
    p['dec_blocks'] = dec_blocks
    in_lin_dim = [int(d // 2 ** (len(dim_layers) - 1) // 4) for d in input_dim]
    in_lin_size = in_lin_dim[0] * in_lin_dim[1] * c
    p['enc_lin_w'] = _randn(next(keys), (hidden_dim, in_lin_size))
    p['enc_lin_b'] = _randn(next(keys), (hidden_dim,))
    p['dec_lin_w'] = _randn(next(keys), (in_lin_size, hidden_dim))
    p['dec_lin_b'] = _randn(next(keys), (in_lin_size,))
    p['in_lin_dim'] = in_lin_dim
    p['c_last'] = c
    p['min_size'] = 2 ** len(dim_layers) * 4
    return p


# ------------------------------ forward pass ------------------------------

def kart_cnn_forward(p, x, residual=True):
    B, _, H, W = x.shape
    sc_in, bi_in = _fold_bn(**p['norm'])
    # Input BatchNorm (eval): host affine fused by XLA into enc0's patch build.
    # (A pure fold into enc0's weights would be inexact where the 7x7 window
    #  overlaps zero padding of the *normalized* tensor.)
    xn = x.astype(jnp.float32) * sc_in[None, :, None, None] + bi_in[None, :, None, None]
    ms = p['min_size']
    if H < ms or W < ms:                                      # zero-pad to min_size
        xn = jnp.pad(xn, ((0, 0), (0, 0),
                          (0, max(ms, H) - H), (0, max(ms, W) - W)))
    # ---- encoder ----
    s0, b0 = _fold_bn(**p['enc0_bn'])
    y = conv_bn_act(xn, p['enc0_w'], 4, 3, s0, b0, relu=True)
    for eb in p['enc_blocks']:
        s1, b1 = _fold_bn(**eb['bn1'])
        s2, b2 = _fold_bn(**eb['bn2'])
        z = conv_bn_act(y, eb['conv1_w'], 2, 1, s1, b1, True)
        if residual:
            sd, bd = _fold_bn(**eb['down_bn'])
            d = conv_bn_act(y, eb['down_w'], 2, 0, sd, bd, False)
        else:
            d = None
        y = conv_bn_act(z, eb['conv2_w'], 1, 1, s2, b2, True, res=d)
    flat = y.reshape(y.shape[0], -1)                          # Flatten (NCHW order)
    h = linear(flat, p['enc_lin_w'], p['enc_lin_b'], relu=True)
    # ---- decoder ----
    z = linear(h, p['dec_lin_w'], p['dec_lin_b'], relu=True)
    c, (ih, iw) = p['c_last'], p['in_lin_dim']
    y = z.reshape(z.shape[0], c, ih, iw)                      # Unflatten
    for db in p['dec_blocks']:
        s1, b1 = _fold_bn(**db['bn1'])
        s2, b2 = _fold_bn(**db['bn2'])
        s3, b3 = _fold_bn(**db['bn3'])
        n = deconv_bn_act(y, db['t1_w'], 1, 1, 0, s1, b1, True)
        n = deconv_bn_act(n, db['t2_w'], 2, 1, 1, s2, b2, True)
        if residual:
            su, bu = _fold_bn(**db['up_bn'])
            u = deconv_bn_act(y, db['up_w'], 2, 0, 1, su, bu, False)
        else:
            u = None
        y = deconv_bn_act(n, db['t3_w'], 1, 1, 0, s3, b3, True, res=u)
    sh, bh = _fold_bn(**p['dec_last_bn'], conv_bias=p['dec_last_b'])
    y = deconv_bn_act(y, p['dec_last_w'], 4, 3, 3, sh, bh, True,
                      out_dtype=jnp.float32)
    return y[:, :, :H, :W]


if __name__ == "__main__":
    key = jax.random.PRNGKey(0)
    pkey, xkey = jax.random.split(key)
    # small config: dim_layers=[8,16], n_input=3, input_dim=(32,32), hidden_dim=32
    dim_layers, n_input, input_dim, hidden_dim = [8, 16], 3, (32, 32), 32
    params = build_kart_cnn_params(pkey, dim_layers, n_input, input_dim, hidden_dim)
    x = jax.random.normal(xkey, (2, n_input, *input_dim), dtype=jnp.float32)
    fwd = jax.jit(functools.partial(kart_cnn_forward, params))
    y = fwd(x)
    jax.block_until_ready(y)
    assert y.shape == (2, n_input, *input_dim), y.shape
    assert bool(jnp.all(jnp.isfinite(y)))
    print("KERNEL_OK")
</pallas_src>

<mosaic_0001>
module attributes {stable_mosaic.version = 11 : i64} {
  func.func @_conv_kernel(%arg0: i32, %arg1: memref<1x28x3x72xbf16, #tpu.memory_space<vmem>>, %arg2: memref<49x8x3xbf16, #tpu.memory_space<vmem>>, %arg3: memref<8x1xf32, #tpu.memory_space<vmem>>, %arg4: memref<8x1xf32, #tpu.memory_space<vmem>>, %arg5: memref<1x8x64xbf16, #tpu.memory_space<vmem>>) attributes {dimension_semantics = [#tpu.dimension_semantics<parallel>], iteration_bounds = array<i64: 2>, scalar_prefetch = 0 : i64, scratch_operands = 0 : i64, tpu.core_type = #tpu.core_type<tc>, window_params = [{transform_indices = @transform_0, window_bounds = array<i64: 1, 28, 3, 72>}, {pipeline_mode = #tpu.pipeline_mode<synchronous>, transform_indices = @transform_1, window_bounds = array<i64: 49, 8, 3>}, {pipeline_mode = #tpu.pipeline_mode<synchronous>, transform_indices = @transform_2, window_bounds = array<i64: 8, 1>}, {pipeline_mode = #tpu.pipeline_mode<synchronous>, transform_indices = @transform_3, window_bounds = array<i64: 8, 1>}, {transform_indices = @transform_4, window_bounds = array<i64: 1, 8, 64>}]} {
    %c0 = arith.constant 0 : index
    %c0_0 = arith.constant 0 : index
    %c0_1 = arith.constant 0 : index
    %c0_2 = arith.constant 0 : index
    %0 = vector.load %arg1[%c0, %c0_0, %c0_1, %c0_2] : memref<1x28x3x72xbf16, #tpu.memory_space<vmem>>, vector<1x1x3x64xbf16>
    %1 = vector.shape_cast %0 : vector<1x1x3x64xbf16> to vector<3x64xbf16>
    %c0_3 = arith.constant 0 : index
    %c0_4 = arith.constant 0 : index
    %c0_5 = arith.constant 0 : index
    %2 = vector.load %arg2[%c0_3, %c0_4, %c0_5] : memref<49x8x3xbf16, #tpu.memory_space<vmem>>, vector<1x8x3xbf16>
    %3 = vector.shape_cast %2 : vector<1x8x3xbf16> to vector<8x3xbf16>
    %cst = arith.constant dense<0.000000e+00> : vector<8x64xf32>
    %4 = tpu.matmul %3, %1, %cst {dimension_numbers = #tpu.dot_dimension_numbers<[1], [0], [0], [1], [0, 0, 1, 1], [], []>} : vector<8x3xbf16>, vector<3x64xbf16>, vector<8x64xf32> -> vector<8x64xf32>
    %c0_6 = arith.constant 0 : index
    %c1 = arith.constant 1 : index
    %c0_7 = arith.constant 0 : index
    %c0_8 = arith.constant 0 : index
    %5 = vector.load %arg1[%c0_6, %c1, %c0_7, %c0_8] : memref<1x28x3x72xbf16, #tpu.memory_space<vmem>>, vector<1x1x3x64xbf16>
    %6 = vector.shape_cast %5 : vector<1x1x3x64xbf16> to vector<3x64xbf16>
    %c1_9 = arith.constant 1 : index
    %c0_10 = arith.constant 0 : index
    %c0_11 = arith.constant 0 : index
    %7 = vector.load %arg2[%c1_9, %c0_10, %c0_11] : memref<49x8x3xbf16, #tpu.memory_space<vmem>>, vector<1x8x3xbf16>
    %8 = vector.shape_cast %7 : vector<1x8x3xbf16> to vector<8x3xbf16>
    %cst_12 = arith.constant dense<0.000000e+00> : vector<8x64xf32>
    %9 = tpu.matmul %8, %6, %cst_12 {dimension_numbers = #tpu.dot_dimension_numbers<[1], [0], [0], [1], [0, 0, 1, 1], [], []>} : vector<8x3xbf16>, vector<3x64xbf16>, vector<8x64xf32> -> vector<8x64xf32>
    %10 = arith.addf %4, %9 : vector<8x64xf32>
    %c0_13 = arith.constant 0 : index
    %c2 = arith.constant 2 : index
    %c0_14 = arith.constant 0 : index
    %c0_15 = arith.constant 0 : index
    %11 = vector.load %arg1[%c0_13, %c2, %c0_14, %c0_15] : memref<1x28x3x72xbf16, #tpu.memory_space<vmem>>, vector<1x1x3x64xbf16>
    %12 = vector.shape_cast %11 : vector<1x1x3x64xbf16> to vector<3x64xbf16>
    %c2_16 = arith.constant 2 : index
    %c0_17 = arith.constant 0 : index
    %c0_18 = arith.constant 0 : index
    %13 = vector.load %arg2[%c2_16, %c0_17, %c0_18] : memref<49x8x3xbf16, #tpu.memory_space<vmem>>, vector<1x8x3xbf16>
    %14 = vector.shape_cast %13 : vector<1x8x3xbf16> to vector<8x3xbf16>
    %cst_19 = arith.constant dense<0.000000e+00> : vector<8x64xf32>
    %15 = tpu.matmul %14, %12, %cst_19 {dimension_numbers = #tpu.dot_dimension_numbers<[1], [0], [0], [1], [0, 0, 1, 1], [], []>} : vector<8x3xbf16>, vector<3x64xbf16>, vector<8x64xf32> -> vector<8x64xf32>
    %16 = arith.addf %10, %15 : vector<8x64xf32>
    %c0_20 = arith.constant 0 : index
    %c3 = arith.constant 3 : index
    %c0_21 = arith.constant 0 : index
    %c0_22 = arith.constant 0 : index
    %17 = vector.load %arg1[%c0_20, %c3, %c0_21, %c0_22] : memref<1x28x3x72xbf16, #tpu.memory_space<vmem>>, vector<1x1x3x64xbf16>
    %18 = vector.shape_cast %17 : vector<1x1x3x64xbf16> to vector<3x64xbf16>
    %c3_23 = arith.constant 3 : index
    %c0_24 = arith.constant 0 : index
    %c0_25 = arith.constant 0 : index
    %19 = vector.load %arg2[%c3_23, %c0_24, %c0_25] : memref<49x8x3xbf16, #tpu.memory_space<vmem>>, vector<1x8x3xbf16>
    %20 = vector.shape_cast %19 : vector<1x8x3xbf16> to vector<8x3xbf16>
    %cst_26 = arith.constant dense<0.000000e+00> : vector<8x64xf32>
    %21 = tpu.matmul %20, %18, %cst_26 {dimension_numbers = #tpu.dot_dimension_numbers<[1], [0], [0], [1], [0, 0, 1, 1], [], []>} : vector<8x3xbf16>, vector<3x64xbf16>, vector<8x64xf32> -> vector<8x64xf32>
    %22 = arith.addf %16, %21 : vector<8x64xf32>
    %c0_27 = arith.constant 0 : index
    %c4 = arith.constant 4 : index
    %c0_28 = arith.constant 0 : index
    %c0_29 = arith.constant 0 : index
    %23 = vector.load %arg1[%c0_27, %c4, %c0_28, %c0_29] : memref<1x28x3x72xbf16, #tpu.memory_space<vmem>>, vector<1x1x3x64xbf16>
    %24 = vector.shape_cast %23 : vector<1x1x3x64xbf16> to vector<3x64xbf16>
    %c4_30 = arith.constant 4 : index
    %c0_31 = arith.constant 0 : index
    %c0_32 = arith.constant 0 : index
    %25 = vector.load %arg2[%c4_30, %c0_31, %c0_32] : memref<49x8x3xbf16, #tpu.memory_space<vmem>>, vector<1x8x3xbf16>
    %26 = vector.shape_cast %25 : vector<1x8x3xbf16> to vector<8x3xbf16>
    %cst_33 = arith.constant dense<0.000000e+00> : vector<8x64xf32>
    %27 = tpu.matmul %26, %24, %cst_33 {dimension_numbers = #tpu.dot_dimension_numbers<[1], [0], [0], [1], [0, 0, 1, 1], [], []>} : vector<8x3xbf16>, vector<3x64xbf16>, vector<8x64xf32> -> vector<8x64xf32>
    %28 = arith.addf %22, %27 : vector<8x64xf32>
    %c0_34 = arith.constant 0 : index
    %c5 = arith.constant 5 : index
    %c0_35 = arith.constant 0 : index
    %c0_36 = arith.constant 0 : index
    %29 = vector.load %arg1[%c0_34, %c5, %c0_35, %c0_36] : memref<1x28x3x72xbf16, #tpu.memory_space<vmem>>, vector<1x1x3x64xbf16>
    %30 = vector.shape_cast %29 : vector<1x1x3x64xbf16> to vector<3x64xbf16>
    %c5_37 = arith.constant 5 : index
    %c0_38 = arith.constant 0 : index
    %c0_39 = arith.constant 0 : index
    %31 = vector.load %arg2[%c5_37, %c0_38, %c0_39] : memref<49x8x3xbf16, #tpu.memory_space<vmem>>, vector<1x8x3xbf16>
    %32 = vector.shape_cast %31 : vector<1x8x3xbf16> to vector<8x3xbf16>
    %cst_40 = arith.constant dense<0.000000e+00> : vector<8x64xf32>
    %33 = tpu.matmul %32, %30, %cst_40 {dimension_numbers = #tpu.dot_dimension_numbers<[1], [0], [0], [1], [0, 0, 1, 1], [], []>} : vector<8x3xbf16>, vector<3x64xbf16>, vector<8x64xf32> -> vector<8x64xf32>
    %34 = arith.addf %28, %33 : vector<8x64xf32>
    %c0_41 = arith.constant 0 : index
    %c6 = arith.constant 6 : index
    %c0_42 = arith.constant 0 : index
    %c0_43 = arith.constant 0 : index
    %35 = vector.load %arg1[%c0_41, %c6, %c0_42, %c0_43] : memref<1x28x3x72xbf16, #tpu.memory_space<vmem>>, vector<1x1x3x64xbf16>
    %36 = vector.shape_cast %35 : vector<1x1x3x64xbf16> to vector<3x64xbf16>
    %c6_44 = arith.constant 6 : index
    %c0_45 = arith.constant 0 : index
    %c0_46 = arith.constant 0 : index
    %37 = vector.load %arg2[%c6_44, %c0_45, %c0_46] : memref<49x8x3xbf16, #tpu.memory_space<vmem>>, vector<1x8x3xbf16>
    %38 = vector.shape_cast %37 : vector<1x8x3xbf16> to vector<8x3xbf16>
    %cst_47 = arith.constant dense<0.000000e+00> : vector<8x64xf32>
    %39 = tpu.matmul %38, %36, %cst_47 {dimension_numbers = #tpu.dot_dimension_numbers<[1], [0], [0], [1], [0, 0, 1, 1], [], []>} : vector<8x3xbf16>, vector<3x64xbf16>, vector<8x64xf32> -> vector<8x64xf32>
    %40 = arith.addf %34, %39 : vector<8x64xf32>
    %c0_48 = arith.constant 0 : index
    %c7 = arith.constant 7 : index
    %c0_49 = arith.constant 0 : index
    %c0_50 = arith.constant 0 : index
    %41 = vector.load %arg1[%c0_48, %c7, %c0_49, %c0_50] : memref<1x28x3x72xbf16, #tpu.memory_space<vmem>>, vector<1x1x3x64xbf16>
    %42 = vector.shape_cast %41 : vector<1x1x3x64xbf16> to vector<3x64xbf16>
    %c7_51 = arith.constant 7 : index
    %c0_52 = arith.constant 0 : index
    %c0_53 = arith.constant 0 : index
    %43 = vector.load %arg2[%c7_51, %c0_52, %c0_53] : memref<49x8x3xbf16, #tpu.memory_space<vmem>>, vector<1x8x3xbf16>
    %44 = vector.shape_cast %43 : vector<1x8x3xbf16> to vector<8x3xbf16>
    %cst_54 = arith.constant dense<0.000000e+00> : vector<8x64xf32>
    %45 = tpu.matmul %44, %42, %cst_54 {dimension_numbers = #tpu.dot_dimension_numbers<[1], [0], [0], [1], [0, 0, 1, 1], [], []>} : vector<8x3xbf16>, vector<3x64xbf16>, vector<8x64xf32> -> vector<8x64xf32>
    %46 = arith.addf %40, %45 : vector<8x64xf32>
    %c0_55 = arith.constant 0 : index
    %c8 = arith.constant 8 : index
    %c0_56 = arith.constant 0 : index
    %c0_57 = arith.constant 0 : index
    %47 = vector.load %arg1[%c0_55, %c8, %c0_56, %c0_57] : memref<1x28x3x72xbf16, #tpu.memory_space<vmem>>, vector<1x1x3x64xbf16>
    %48 = vector.shape_cast %47 : vector<1x1x3x64xbf16> to vector<3x64xbf16>
    %c8_58 = arith.constant 8 : index
    %c0_59 = arith.constant 0 : index
    %c0_60 = arith.constant 0 : index
    %49 = vector.load %arg2[%c8_58, %c0_59, %c0_60] : memref<49x8x3xbf16, #tpu.memory_space<vmem>>, vector<1x8x3xbf16>
    %50 = vector.shape_cast %49 : vector<1x8x3xbf16> to vector<8x3xbf16>
    %cst_61 = arith.constant dense<0.000000e+00> : vector<8x64xf32>
    %51 = tpu.matmul %50, %48, %cst_61 {dimension_numbers = #tpu.dot_dimension_numbers<[1], [0], [0], [1], [0, 0, 1, 1], [], []>} : vector<8x3xbf16>, vector<3x64xbf16>, vector<8x64xf32> -> vector<8x64xf32>
    %52 = arith.addf %46, %51 : vector<8x64xf32>
    %c0_62 = arith.constant 0 : index
    %c9 = arith.constant 9 : index
    %c0_63 = arith.constant 0 : index
    %c0_64 = arith.constant 0 : index
    %53 = vector.load %arg1[%c0_62, %c9, %c0_63, %c0_64] : memref<1x28x3x72xbf16, #tpu.memory_space<vmem>>, vector<1x1x3x64xbf16>
    %54 = vector.shape_cast %53 : vector<1x1x3x64xbf16> to vector<3x64xbf16>
    %c9_65 = arith.constant 9 : index
    %c0_66 = arith.constant 0 : index
    %c0_67 = arith.constant 0 : index
    %55 = vector.load %arg2[%c9_65, %c0_66, %c0_67] : memref<49x8x3xbf16, #tpu.memory_space<vmem>>, vector<1x8x3xbf16>
    %56 = vector.shape_cast %55 : vector<1x8x3xbf16> to vector<8x3xbf16>
    %cst_68 = arith.constant dense<0.000000e+00> : vector<8x64xf32>
    %57 = tpu.matmul %56, %54, %cst_68 {dimension_numbers = #tpu.dot_dimension_numbers<[1], [0], [0], [1], [0, 0, 1, 1], [], []>} : vector<8x3xbf16>, vector<3x64xbf16>, vector<8x64xf32> -> vector<8x64xf32>
    %58 = arith.addf %52, %57 : vector<8x64xf32>
    %c0_69 = arith.constant 0 : index
    %c10 = arith.constant 10 : index
    %c0_70 = arith.constant 0 : index
    %c0_71 = arith.constant 0 : index
    %59 = vector.load %arg1[%c0_69, %c10, %c0_70, %c0_71] : memref<1x28x3x72xbf16, #tpu.memory_space<vmem>>, vector<1x1x3x64xbf16>
    %60 = vector.shape_cast %59 : vector<1x1x3x64xbf16> to vector<3x64xbf16>
    %c10_72 = arith.constant 10 : index
    %c0_73 = arith.constant 0 : index
    %c0_74 = arith.constant 0 : index
    %61 = vector.load %arg2[%c10_72, %c0_73, %c0_74] : memref<49x8x3xbf16, #tpu.memory_space<vmem>>, vector<1x8x3xbf16>
    %62 = vector.shape_cast %61 : vector<1x8x3xbf16> to vector<8x3xbf16>
    %cst_75 = arith.constant dense<0.000000e+00> : vector<8x64xf32>
    %63 = tpu.matmul %62, %60, %cst_75 {dimension_numbers = #tpu.dot_dimension_numbers<[1], [0], [0], [1], [0, 0, 1, 1], [], []>} : vector<8x3xbf16>, vector<3x64xbf16>, vector<8x64xf32> -> vector<8x64xf32>
    %64 = arith.addf %58, %63 : vector<8x64xf32>
    %c0_76 = arith.constant 0 : index
    %c11 = arith.constant 11 : index
    %c0_77 = arith.constant 0 : index
    %c0_78 = arith.constant 0 : index
    %65 = vector.load %arg1[%c0_76, %c11, %c0_77, %c0_78] : memref<1x28x3x72xbf16, #tpu.memory_space<vmem>>, vector<1x1x3x64xbf16>
    %66 = vector.shape_cast %65 : vector<1x1x3x64xbf16> to vector<3x64xbf16>
    %c11_79 = arith.constant 11 : index
    %c0_80 = arith.constant 0 : index
    %c0_81 = arith.constant 0 : index
    %67 = vector.load %arg2[%c11_79, %c0_80, %c0_81] : memref<49x8x3xbf16, #tpu.memory_space<vmem>>, vector<1x8x3xbf16>
    %68 = vector.shape_cast %67 : vector<1x8x3xbf16> to vector<8x3xbf16>
    %cst_82 = arith.constant dense<0.000000e+00> : vector<8x64xf32>
    %69 = tpu.matmul %68, %66, %cst_82 {dimension_numbers = #tpu.dot_dimension_numbers<[1], [0], [0], [1], [0, 0, 1, 1], [], []>} : vector<8x3xbf16>, vector<3x64xbf16>, vector<8x64xf32> -> vector<8x64xf32>
    %70 = arith.addf %64, %69 : vector<8x64xf32>
    %c0_83 = arith.constant 0 : index
    %c12 = arith.constant 12 : index
    %c0_84 = arith.constant 0 : index
    %c0_85 = arith.constant 0 : index
    %71 = vector.load %arg1[%c0_83, %c12, %c0_84, %c0_85] : memref<1x28x3x72xbf16, #tpu.memory_space<vmem>>, vector<1x1x3x64xbf16>
    %72 = vector.shape_cast %71 : vector<1x1x3x64xbf16> to vector<3x64xbf16>
    %c12_86 = arith.constant 12 : index
    %c0_87 = arith.constant 0 : index
    %c0_88 = arith.constant 0 : index
    %73 = vector.load %arg2[%c12_86, %c0_87, %c0_88] : memref<49x8x3xbf16, #tpu.memory_space<vmem>>, vector<1x8x3xbf16>
    %74 = vector.shape_cast %73 : vector<1x8x3xbf16> to vector<8x3xbf16>
    %cst_89 = arith.constant dense<0.000000e+00> : vector<8x64xf32>
    %75 = tpu.matmul %74, %72, %cst_89 {dimension_numbers = #tpu.dot_dimension_numbers<[1], [0], [0], [1], [0, 0, 1, 1], [], []>} : vector<8x3xbf16>, vector<3x64xbf16>, vector<8x64xf32> -> vector<8x64xf32>
    %76 = arith.addf %70, %75 : vector<8x64xf32>
    %c0_90 = arith.constant 0 : index
    %c13 = arith.constant 13 : index
    %c0_91 = arith.constant 0 : index
    %c0_92 = arith.constant 0 : index
    %77 = vector.load %arg1[%c0_90, %c13, %c0_91, %c0_92] : memref<1x28x3x72xbf16, #tpu.memory_space<vmem>>, vector<1x1x3x64xbf16>
    %78 = vector.shape_cast %77 : vector<1x1x3x64xbf16> to vector<3x64xbf16>
    %c13_93 = arith.constant 13 : index
    %c0_94 = arith.constant 0 : index
    %c0_95 = arith.constant 0 : index
    %79 = vector.load %arg2[%c13_93, %c0_94, %c0_95] : memref<49x8x3xbf16, #tpu.memory_space<vmem>>, vector<1x8x3xbf16>
    %80 = vector.shape_cast %79 : vector<1x8x3xbf16> to vector<8x3xbf16>
    %cst_96 = arith.constant dense<0.000000e+00> : vector<8x64xf32>
    %81 = tpu.matmul %80, %78, %cst_96 {dimension_numbers = #tpu.dot_dimension_numbers<[1], [0], [0], [1], [0, 0, 1, 1], [], []>} : vector<8x3xbf16>, vector<3x64xbf16>, vector<8x64xf32> -> vector<8x64xf32>
    %82 = arith.addf %76, %81 : vector<8x64xf32>
    %c0_97 = arith.constant 0 : index
    %c14 = arith.constant 14 : index
    %c0_98 = arith.constant 0 : index
    %c0_99 = arith.constant 0 : index
    %83 = vector.load %arg1[%c0_97, %c14, %c0_98, %c0_99] : memref<1x28x3x72xbf16, #tpu.memory_space<vmem>>, vector<1x1x3x64xbf16>
    %84 = vector.shape_cast %83 : vector<1x1x3x64xbf16> to vector<3x64xbf16>
    %c14_100 = arith.constant 14 : index
    %c0_101 = arith.constant 0 : index
    %c0_102 = arith.constant 0 : index
    %85 = vector.load %arg2[%c14_100, %c0_101, %c0_102] : memref<49x8x3xbf16, #tpu.memory_space<vmem>>, vector<1x8x3xbf16>
    %86 = vector.shape_cast %85 : vector<1x8x3xbf16> to vector<8x3xbf16>
    %cst_103 = arith.constant dense<0.000000e+00> : vector<8x64xf32>
    %87 = tpu.matmul %86, %84, %cst_103 {dimension_numbers = #tpu.dot_dimension_numbers<[1], [0], [0], [1], [0, 0, 1, 1], [], []>} : vector<8x3xbf16>, vector<3x64xbf16>, vector<8x64xf32> -> vector<8x64xf32>
    %88 = arith.addf %82, %87 : vector<8x64xf32>
    %c0_104 = arith.constant 0 : index
    %c15 = arith.constant 15 : index
    %c0_105 = arith.constant 0 : index
    %c0_106 = arith.constant 0 : index
    %89 = vector.load %arg1[%c0_104, %c15, %c0_105, %c0_106] : memref<1x28x3x72xbf16, #tpu.memory_space<vmem>>, vector<1x1x3x64xbf16>
    %90 = vector.shape_cast %89 : vector<1x1x3x64xbf16> to vector<3x64xbf16>
    %c15_107 = arith.constant 15 : index
    %c0_108 = arith.constant 0 : index
    %c0_109 = arith.constant 0 : index
    %91 = vector.load %arg2[%c15_107, %c0_108, %c0_109] : memref<49x8x3xbf16, #tpu.memory_space<vmem>>, vector<1x8x3xbf16>
    %92 = vector.shape_cast %91 : vector<1x8x3xbf16> to vector<8x3xbf16>
    %cst_110 = arith.constant dense<0.000000e+00> : vector<8x64xf32>
    %93 = tpu.matmul %92, %90, %cst_110 {dimension_numbers = #tpu.dot_dimension_numbers<[1], [0], [0], [1], [0, 0, 1, 1], [], []>} : vector<8x3xbf16>, vector<3x64xbf16>, vector<8x64xf32> -> vector<8x64xf32>
    %94 = arith.addf %88, %93 : vector<8x64xf32>
    %c0_111 = arith.constant 0 : index
    %c16 = arith.constant 16 : index
    %c0_112 = arith.constant 0 : index
    %c0_113 = arith.constant 0 : index
    %95 = vector.load %arg1[%c0_111, %c16, %c0_112, %c0_113] : memref<1x28x3x72xbf16, #tpu.memory_space<vmem>>, vector<1x1x3x64xbf16>
    %96 = vector.shape_cast %95 : vector<1x1x3x64xbf16> to vector<3x64xbf16>
    %c16_114 = arith.constant 16 : index
    %c0_115 = arith.constant 0 : index
    %c0_116 = arith.constant 0 : index
    %97 = vector.load %arg2[%c16_114, %c0_115, %c0_116] : memref<49x8x3xbf16, #tpu.memory_space<vmem>>, vector<1x8x3xbf16>
    %98 = vector.shape_cast %97 : vector<1x8x3xbf16> to vector<8x3xbf16>
    %cst_117 = arith.constant dense<0.000000e+00> : vector<8x64xf32>
    %99 = tpu.matmul %98, %96, %cst_117 {dimension_numbers = #tpu.dot_dimension_numbers<[1], [0], [0], [1], [0, 0, 1, 1], [], []>} : vector<8x3xbf16>, vector<3x64xbf16>, vector<8x64xf32> -> vector<8x64xf32>
    %100 = arith.addf %94, %99 : vector<8x64xf32>
    %c0_118 = arith.constant 0 : index
    %c17 = arith.constant 17 : index
    %c0_119 = arith.constant 0 : index
    %c0_120 = arith.constant 0 : index
    %101 = vector.load %arg1[%c0_118, %c17, %c0_119, %c0_120] : memref<1x28x3x72xbf16, #tpu.memory_space<vmem>>, vector<1x1x3x64xbf16>
    %102 = vector.shape_cast %101 : vector<1x1x3x64xbf16> to vector<3x64xbf16>
    %c17_121 = arith.constant 17 : index
    %c0_122 = arith.constant 0 : index
    %c0_123 = arith.constant 0 : index
    %103 = vector.load %arg2[%c17_121, %c0_122, %c0_123] : memref<49x8x3xbf16, #tpu.memory_space<vmem>>, vector<1x8x3xbf16>
    %104 = vector.shape_cast %103 : vector<1x8x3xbf16> to vector<8x3xbf16>
    %cst_124 = arith.constant dense<0.000000e+00> : vector<8x64xf32>
    %105 = tpu.matmul %104, %102, %cst_124 {dimension_numbers = #tpu.dot_dimension_numbers<[1], [0], [0], [1], [0, 0, 1, 1], [], []>} : vector<8x3xbf16>, vector<3x64xbf16>, vector<8x64xf32> -> vector<8x64xf32>
    %106 = arith.addf %100, %105 : vector<8x64xf32>
    %c0_125 = arith.constant 0 : index
    %c18 = arith.constant 18 : index
    %c0_126 = arith.constant 0 : index
    %c0_127 = arith.constant 0 : index
    %107 = vector.load %arg1[%c0_125, %c18, %c0_126, %c0_127] : memref<1x28x3x72xbf16, #tpu.memory_space<vmem>>, vector<1x1x3x64xbf16>
    %108 = vector.shape_cast %107 : vector<1x1x3x64xbf16> to vector<3x64xbf16>
    %c18_128 = arith.constant 18 : index
    %c0_129 = arith.constant 0 : index
    %c0_130 = arith.constant 0 : index
    %109 = vector.load %arg2[%c18_128, %c0_129, %c0_130] : memref<49x8x3xbf16, #tpu.memory_space<vmem>>, vector<1x8x3xbf16>
    %110 = vector.shape_cast %109 : vector<1x8x3xbf16> to vector<8x3xbf16>
    %cst_131 = arith.constant dense<0.000000e+00> : vector<8x64xf32>
    %111 = tpu.matmul %110, %108, %cst_131 {dimension_numbers = #tpu.dot_dimension_numbers<[1], [0], [0], [1], [0, 0, 1, 1], [], []>} : vector<8x3xbf16>, vector<3x64xbf16>, vector<8x64xf32> -> vector<8x64xf32>
    %112 = arith.addf %106, %111 : vector<8x64xf32>
    %c0_132 = arith.constant 0 : index
    %c19 = arith.constant 19 : index
    %c0_133 = arith.constant 0 : index
    %c0_134 = arith.constant 0 : index
    %113 = vector.load %arg1[%c0_132, %c19, %c0_133, %c0_134] : memref<1x28x3x72xbf16, #tpu.memory_space<vmem>>, vector<1x1x3x64xbf16>
    %114 = vector.shape_cast %113 : vector<1x1x3x64xbf16> to vector<3x64xbf16>
    %c19_135 = arith.constant 19 : index
    %c0_136 = arith.constant 0 : index
    %c0_137 = arith.constant 0 : index
    %115 = vector.load %arg2[%c19_135, %c0_136, %c0_137] : memref<49x8x3xbf16, #tpu.memory_space<vmem>>, vector<1x8x3xbf16>
    %116 = vector.shape_cast %115 : vector<1x8x3xbf16> to vector<8x3xbf16>
    %cst_138 = arith.constant dense<0.000000e+00> : vector<8x64xf32>
    %117 = tpu.matmul %116, %114, %cst_138 {dimension_numbers = #tpu.dot_dimension_numbers<[1], [0], [0], [1], [0, 0, 1, 1], [], []>} : vector<8x3xbf16>, vector<3x64xbf16>, vector<8x64xf32> -> vector<8x64xf32>
    %118 = arith.addf %112, %117 : vector<8x64xf32>
    %c0_139 = arith.constant 0 : index
    %c20 = arith.constant 20 : index
    %c0_140 = arith.constant 0 : index
    %c0_141 = arith.constant 0 : index
    %119 = vector.load %arg1[%c0_139, %c20, %c0_140, %c0_141] : memref<1x28x3x72xbf16, #tpu.memory_space<vmem>>, vector<1x1x3x64xbf16>
    %120 = vector.shape_cast %119 : vector<1x1x3x64xbf16> to vector<3x64xbf16>
    %c20_142 = arith.constant 20 : index
    %c0_143 = arith.constant 0 : index
    %c0_144 = arith.constant 0 : index
    %121 = vector.load %arg2[%c20_142, %c0_143, %c0_144] : memref<49x8x3xbf16, #tpu.memory_space<vmem>>, vector<1x8x3xbf16>
    %122 = vector.shape_cast %121 : vector<1x8x3xbf16> to vector<8x3xbf16>
    %cst_145 = arith.constant dense<0.000000e+00> : vector<8x64xf32>
    %123 = tpu.matmul %122, %120, %cst_145 {dimension_numbers = #tpu.dot_dimension_numbers<[1], [0], [0], [1], [0, 0, 1, 1], [], []>} : vector<8x3xbf16>, vector<3x64xbf16>, vector<8x64xf32> -> vector<8x64xf32>
    %124 = arith.addf %118, %123 : vector<8x64xf32>
    %c0_146 = arith.constant 0 : index
    %c21 = arith.constant 21 : index
    %c0_147 = arith.constant 0 : index
    %c0_148 = arith.constant 0 : index
    %125 = vector.load %arg1[%c0_146, %c21, %c0_147, %c0_148] : memref<1x28x3x72xbf16, #tpu.memory_space<vmem>>, vector<1x1x3x64xbf16>
    %126 = vector.shape_cast %125 : vector<1x1x3x64xbf16> to vector<3x64xbf16>
    %c21_149 = arith.constant 21 : index
    %c0_150 = arith.constant 0 : index
    %c0_151 = arith.constant 0 : index
    %127 = vector.load %arg2[%c21_149, %c0_150, %c0_151] : memref<49x8x3xbf16, #tpu.memory_space<vmem>>, vector<1x8x3xbf16>
    %128 = vector.shape_cast %127 : vector<1x8x3xbf16> to vector<8x3xbf16>
    %cst_152 = arith.constant dense<0.000000e+00> : vector<8x64xf32>
    %129 = tpu.matmul %128, %126, %cst_152 {dimension_numbers = #tpu.dot_dimension_numbers<[1], [0], [0], [1], [0, 0, 1, 1], [], []>} : vector<8x3xbf16>, vector<3x64xbf16>, vector<8x64xf32> -> vector<8x64xf32>
    %130 = arith.addf %124, %129 : vector<8x64xf32>
    %c0_153 = arith.constant 0 : index
    %c22 = arith.constant 22 : index
    %c0_154 = arith.constant 0 : index
    %c0_155 = arith.constant 0 : index
    %131 = vector.load %arg1[%c0_153, %c22, %c0_154, %c0_155] : memref<1x28x3x72xbf16, #tpu.memory_space<vmem>>, vector<1x1x3x64xbf16>
    %132 = vector.shape_cast %131 : vector<1x1x3x64xbf16> to vector<3x64xbf16>
    %c22_156 = arith.constant 22 : index
    %c0_157 = arith.constant 0 : index
    %c0_158 = arith.constant 0 : index
    %133 = vector.load %arg2[%c22_156, %c0_157, %c0_158] : memref<49x8x3xbf16, #tpu.memory_space<vmem>>, vector<1x8x3xbf16>
    %134 = vector.shape_cast %133 : vector<1x8x3xbf16> to vector<8x3xbf16>
    %cst_159 = arith.constant dense<0.000000e+00> : vector<8x64xf32>
    %135 = tpu.matmul %134, %132, %cst_159 {dimension_numbers = #tpu.dot_dimension_numbers<[1], [0], [0], [1], [0, 0, 1, 1], [], []>} : vector<8x3xbf16>, vector<3x64xbf16>, vector<8x64xf32> -> vector<8x64xf32>
    %136 = arith.addf %130, %135 : vector<8x64xf32>
    %c0_160 = arith.constant 0 : index
    %c23 = arith.constant 23 : index
    %c0_161 = arith.constant 0 : index
    %c0_162 = arith.constant 0 : index
    %137 = vector.load %arg1[%c0_160, %c23, %c0_161, %c0_162] : memref<1x28x3x72xbf16, #tpu.memory_space<vmem>>, vector<1x1x3x64xbf16>
    %138 = vector.shape_cast %137 : vector<1x1x3x64xbf16> to vector<3x64xbf16>
    %c23_163 = arith.constant 23 : index
    %c0_164 = arith.constant 0 : index
    %c0_165 = arith.constant 0 : index
    %139 = vector.load %arg2[%c23_163, %c0_164, %c0_165] : memref<49x8x3xbf16, #tpu.memory_space<vmem>>, vector<1x8x3xbf16>
    %140 = vector.shape_cast %139 : vector<1x8x3xbf16> to vector<8x3xbf16>
    %cst_166 = arith.constant dense<0.000000e+00> : vector<8x64xf32>
    %141 = tpu.matmul %140, %138, %cst_166 {dimension_numbers = #tpu.dot_dimension_numbers<[1], [0], [0], [1], [0, 0, 1, 1], [], []>} : vector<8x3xbf16>, vector<3x64xbf16>, vector<8x64xf32> -> vector<8x64xf32>
    %142 = arith.addf %136, %141 : vector<8x64xf32>
    %c0_167 = arith.constant 0 : index
    %c24 = arith.constant 24 : index
    %c0_168 = arith.constant 0 : index
    %c0_169 = arith.constant 0 : index
    %143 = vector.load %arg1[%c0_167, %c24, %c0_168, %c0_169] : memref<1x28x3x72xbf16, #tpu.memory_space<vmem>>, vector<1x1x3x64xbf16>
    %144 = vector.shape_cast %143 : vector<1x1x3x64xbf16> to vector<3x64xbf16>
    %c24_170 = arith.constant 24 : index
    %c0_171 = arith.constant 0 : index
    %c0_172 = arith.constant 0 : index
    %145 = vector.load %arg2[%c24_170, %c0_171, %c0_172] : memref<49x8x3xbf16, #tpu.memory_space<vmem>>, vector<1x8x3xbf16>
    %146 = vector.shape_cast %145 : vector<1x8x3xbf16> to vector<8x3xbf16>
    %cst_173 = arith.constant dense<0.000000e+00> : vector<8x64xf32>
    %147 = tpu.matmul %146, %144, %cst_173 {dimension_numbers = #tpu.dot_dimension_numbers<[1], [0], [0], [1], [0, 0, 1, 1], [], []>} : vector<8x3xbf16>, vector<3x64xbf16>, vector<8x64xf32> -> vector<8x64xf32>
    %148 = arith.addf %142, %147 : vector<8x64xf32>
    %c0_174 = arith.constant 0 : index
    %c25 = arith.constant 25 : index
    %c0_175 = arith.constant 0 : index
    %c0_176 = arith.constant 0 : index
    %149 = vector.load %arg1[%c0_174, %c25, %c0_175, %c0_176] : memref<1x28x3x72xbf16, #tpu.memory_space<vmem>>, vector<1x1x3x64xbf16>
    %150 = vector.shape_cast %149 : vector<1x1x3x64xbf16> to vector<3x64xbf16>
    %c25_177 = arith.constant 25 : index
    %c0_178 = arith.constant 0 : index
    %c0_179 = arith.constant 0 : index
    %151 = vector.load %arg2[%c25_177, %c0_178, %c0_179] : memref<49x8x3xbf16, #tpu.memory_space<vmem>>, vector<1x8x3xbf16>
    %152 = vector.shape_cast %151 : vector<1x8x3xbf16> to vector<8x3xbf16>
    %cst_180 = arith.constant dense<0.000000e+00> : vector<8x64xf32>
    %153 = tpu.matmul %152, %150, %cst_180 {dimension_numbers = #tpu.dot_dimension_numbers<[1], [0], [0], [1], [0, 0, 1, 1], [], []>} : vector<8x3xbf16>, vector<3x64xbf16>, vector<8x64xf32> -> vector<8x64xf32>
    %154 = arith.addf %148, %153 : vector<8x64xf32>
    %c0_181 = arith.constant 0 : index
    %c26 = arith.constant 26 : index
    %c0_182 = arith.constant 0 : index
    %c0_183 = arith.constant 0 : index
    %155 = vector.load %arg1[%c0_181, %c26, %c0_182, %c0_183] : memref<1x28x3x72xbf16, #tpu.memory_space<vmem>>, vector<1x1x3x64xbf16>
    %156 = vector.shape_cast %155 : vector<1x1x3x64xbf16> to vector<3x64xbf16>
    %c26_184 = arith.constant 26 : index
    %c0_185 = arith.constant 0 : index
    %c0_186 = arith.constant 0 : index
    %157 = vector.load %arg2[%c26_184, %c0_185, %c0_186] : memref<49x8x3xbf16, #tpu.memory_space<vmem>>, vector<1x8x3xbf16>
    %158 = vector.shape_cast %157 : vector<1x8x3xbf16> to vector<8x3xbf16>
    %cst_187 = arith.constant dense<0.000000e+00> : vector<8x64xf32>
    %159 = tpu.matmul %158, %156, %cst_187 {dimension_numbers = #tpu.dot_dimension_numbers<[1], [0], [0], [1], [0, 0, 1, 1], [], []>} : vector<8x3xbf16>, vector<3x64xbf16>, vector<8x64xf32> -> vector<8x64xf32>
    %160 = arith.addf %154, %159 : vector<8x64xf32>
    %c0_188 = arith.constant 0 : index
    %c27 = arith.constant 27 : index
    %c0_189 = arith.constant 0 : index
    %c0_190 = arith.constant 0 : index
    %161 = vector.load %arg1[%c0_188, %c27, %c0_189, %c0_190] : memref<1x28x3x72xbf16, #tpu.memory_space<vmem>>, vector<1x1x3x64xbf16>
    %162 = vector.shape_cast %161 : vector<1x1x3x64xbf16> to vector<3x64xbf16>
    %c27_191 = arith.constant 27 : index
    %c0_192 = arith.constant 0 : index
    %c0_193 = arith.constant 0 : index
    %163 = vector.load %arg2[%c27_191, %c0_192, %c0_193] : memref<49x8x3xbf16, #tpu.memory_space<vmem>>, vector<1x8x3xbf16>
    %164 = vector.shape_cast %163 : vector<1x8x3xbf16> to vector<8x3xbf16>
    %cst_194 = arith.constant dense<0.000000e+00> : vector<8x64xf32>
    %165 = tpu.matmul %164, %162, %cst_194 {dimension_numbers = #tpu.dot_dimension_numbers<[1], [0], [0], [1], [0, 0, 1, 1], [], []>} : vector<8x3xbf16>, vector<3x64xbf16>, vector<8x64xf32> -> vector<8x64xf32>
    %166 = arith.addf %160, %165 : vector<8x64xf32>
    %c0_195 = arith.constant 0 : index
    %c0_196 = arith.constant 0 : index
    %c0_197 = arith.constant 0 : index
    %c8_198 = arith.constant 8 : index
    %167 = vector.load %arg1[%c0_195, %c0_196, %c0_197, %c8_198] : memref<1x28x3x72xbf16, #tpu.memory_space<vmem>>, vector<1x1x3x64xbf16>
    %168 = vector.shape_cast %167 : vector<1x1x3x64xbf16> to vector<3x64xbf16>
    %c28 = arith.constant 28 : index
    %c0_199 = arith.constant 0 : index
    %c0_200 = arith.constant 0 : index
    %169 = vector.load %arg2[%c28, %c0_199, %c0_200] : memref<49x8x3xbf16, #tpu.memory_space<vmem>>, vector<1x8x3xbf16>
    %170 = vector.shape_cast %169 : vector<1x8x3xbf16> to vector<8x3xbf16>
    %cst_201 = arith.constant dense<0.000000e+00> : vector<8x64xf32>
    %171 = tpu.matmul %170, %168, %cst_201 {dimension_numbers = #tpu.dot_dimension_numbers<[1], [0], [0], [1], [0, 0, 1, 1], [], []>} : vector<8x3xbf16>, vector<3x64xbf16>, vector<8x64xf32> -> vector<8x64xf32>
    %172 = arith.addf %166, %171 : vector<8x64xf32>
    %c0_202 = arith.constant 0 : index
    %c1_203 = arith.constant 1 : index
    %c0_204 = arith.constant 0 : index
    %c8_205 = arith.constant 8 : index
    %173 = vector.load %arg1[%c0_202, %c1_203, %c0_204, %c8_205] : memref<1x28x3x72xbf16, #tpu.memory_space<vmem>>, vector<1x1x3x64xbf16>
    %174 = vector.shape_cast %173 : vector<1x1x3x64xbf16> to vector<3x64xbf16>
    %c29 = arith.constant 29 : index
    %c0_206 = arith.constant 0 : index
    %c0_207 = arith.constant 0 : index
    %175 = vector.load %arg2[%c29, %c0_206, %c0_207] : memref<49x8x3xbf16, #tpu.memory_space<vmem>>, vector<1x8x3xbf16>
    %176 = vector.shape_cast %175 : vector<1x8x3xbf16> to vector<8x3xbf16>
    %cst_208 = arith.constant dense<0.000000e+00> : vector<8x64xf32>
    %177 = tpu.matmul %176, %174, %cst_208 {dimension_numbers = #tpu.dot_dimension_numbers<[1], [0], [0], [1], [0, 0, 1, 1], [], []>} : vector<8x3xbf16>, vector<3x64xbf16>, vector<8x64xf32> -> vector<8x64xf32>
    %178 = arith.addf %172, %177 : vector<8x64xf32>
    %c0_209 = arith.constant 0 : index
    %c2_210 = arith.constant 2 : index
    %c0_211 = arith.constant 0 : index
    %c8_212 = arith.constant 8 : index
    %179 = vector.load %arg1[%c0_209, %c2_210, %c0_211, %c8_212] : memref<1x28x3x72xbf16, #tpu.memory_space<vmem>>, vector<1x1x3x64xbf16>
    %180 = vector.shape_cast %179 : vector<1x1x3x64xbf16> to vector<3x64xbf16>
    %c30 = arith.constant 30 : index
    %c0_213 = arith.constant 0 : index
    %c0_214 = arith.constant 0 : index
    %181 = vector.load %arg2[%c30, %c0_213, %c0_214] : memref<49x8x3xbf16, #tpu.memory_space<vmem>>, vector<1x8x3xbf16>
    %182 = vector.shape_cast %181 : vector<1x8x3xbf16> to vector<8x3xbf16>
    %cst_215 = arith.constant dense<0.000000e+00> : vector<8x64xf32>
    %183 = tpu.matmul %182, %180, %cst_215 {dimension_numbers = #tpu.dot_dimension_numbers<[1], [0], [0], [1], [0, 0, 1, 1], [], []>} : vector<8x3xbf16>, vector<3x64xbf16>, vector<8x64xf32> -> vector<8x64xf32>
    %184 = arith.addf %178, %183 : vector<8x64xf32>
    %c0_216 = arith.constant 0 : index
    %c3_217 = arith.constant 3 : index
    %c0_218 = arith.constant 0 : index
    %c8_219 = arith.constant 8 : index
    %185 = vector.load %arg1[%c0_216, %c3_217, %c0_218, %c8_219] : memref<1x28x3x72xbf16, #tpu.memory_space<vmem>>, vector<1x1x3x64xbf16>
    %186 = vector.shape_cast %185 : vector<1x1x3x64xbf16> to vector<3x64xbf16>
    %c31 = arith.constant 31 : index
    %c0_220 = arith.constant 0 : index
    %c0_221 = arith.constant 0 : index
    %187 = vector.load %arg2[%c31, %c0_220, %c0_221] : memref<49x8x3xbf16, #tpu.memory_space<vmem>>, vector<1x8x3xbf16>
    %188 = vector.shape_cast %187 : vector<1x8x3xbf16> to vector<8x3xbf16>
    %cst_222 = arith.constant dense<0.000000e+00> : vector<8x64xf32>
    %189 = tpu.matmul %188, %186, %cst_222 {dimension_numbers = #tpu.dot_dimension_numbers<[1], [0], [0], [1], [0, 0, 1, 1], [], []>} : vector<8x3xbf16>, vector<3x64xbf16>, vector<8x64xf32> -> vector<8x64xf32>
    %190 = arith.addf %184, %189 : vector<8x64xf32>
    %c0_223 = arith.constant 0 : index
    %c4_224 = arith.constant 4 : index
    %c0_225 = arith.constant 0 : index
    %c8_226 = arith.constant 8 : index
    %191 = vector.load %arg1[%c0_223, %c4_224, %c0_225, %c8_226] : memref<1x28x3x72xbf16, #tpu.memory_space<vmem>>, vector<1x1x3x64xbf16>
    %192 = vector.shape_cast %191 : vector<1x1x3x64xbf16> to vector<3x64xbf16>
    %c32 = arith.constant 32 : index
    %c0_227 = arith.constant 0 : index
    %c0_228 = arith.constant 0 : index
    %193 = vector.load %arg2[%c32, %c0_227, %c0_228] : memref<49x8x3xbf16, #tpu.memory_space<vmem>>, vector<1x8x3xbf16>
    %194 = vector.shape_cast %193 : vector<1x8x3xbf16> to vector<8x3xbf16>
    %cst_229 = arith.constant dense<0.000000e+00> : vector<8x64xf32>
    %195 = tpu.matmul %194, %192, %cst_229 {dimension_numbers = #tpu.dot_dimension_numbers<[1], [0], [0], [1], [0, 0, 1, 1], [], []>} : vector<8x3xbf16>, vector<3x64xbf16>, vector<8x64xf32> -> vector<8x64xf32>
    %196 = arith.addf %190, %195 : vector<8x64xf32>
    %c0_230 = arith.constant 0 : index
    %c5_231 = arith.constant 5 : index
    %c0_232 = arith.constant 0 : index
    %c8_233 = arith.constant 8 : index
    %197 = vector.load %arg1[%c0_230, %c5_231, %c0_232, %c8_233] : memref<1x28x3x72xbf16, #tpu.memory_space<vmem>>, vector<1x1x3x64xbf16>
    %198 = vector.shape_cast %197 : vector<1x1x3x64xbf16> to vector<3x64xbf16>
    %c33 = arith.constant 33 : index
    %c0_234 = arith.constant 0 : index
    %c0_235 = arith.constant 0 : index
    %199 = vector.load %arg2[%c33, %c0_234, %c0_235] : memref<49x8x3xbf16, #tpu.memory_space<vmem>>, vector<1x8x3xbf16>
    %200 = vector.shape_cast %199 : vector<1x8x3xbf16> to vector<8x3xbf16>
    %cst_236 = arith.constant dense<0.000000e+00> : vector<8x64xf32>
    %201 = tpu.matmul %200, %198, %cst_236 {dimension_numbers = #tpu.dot_dimension_numbers<[1], [0], [0], [1], [0, 0, 1, 1], [], []>} : vector<8x3xbf16>, vector<3x64xbf16>, vector<8x64xf32> -> vector<8x64xf32>
    %202 = arith.addf %196, %201 : vector<8x64xf32>
    %c0_237 = arith.constant 0 : index
    %c6_238 = arith.constant 6 : index
    %c0_239 = arith.constant 0 : index
    %c8_240 = arith.constant 8 : index
    %203 = vector.load %arg1[%c0_237, %c6_238, %c0_239, %c8_240] : memref<1x28x3x72xbf16, #tpu.memory_space<vmem>>, vector<1x1x3x64xbf16>
    %204 = vector.shape_cast %203 : vector<1x1x3x64xbf16> to vector<3x64xbf16>
    %c34 = arith.constant 34 : index
    %c0_241 = arith.constant 0 : index
    %c0_242 = arith.constant 0 : index
    %205 = vector.load %arg2[%c34, %c0_241, %c0_242] : memref<49x8x3xbf16, #tpu.memory_space<vmem>>, vector<1x8x3xbf16>
    %206 = vector.shape_cast %205 : vector<1x8x3xbf16> to vector<8x3xbf16>
    %cst_243 = arith.constant dense<0.000000e+00> : vector<8x64xf32>
    %207 = tpu.matmul %206, %204, %cst_243 {dimension_numbers = #tpu.dot_dimension_numbers<[1], [0], [0], [1], [0, 0, 1, 1], [], []>} : vector<8x3xbf16>, vector<3x64xbf16>, vector<8x64xf32> -> vector<8x64xf32>
    %208 = arith.addf %202, %207 : vector<8x64xf32>
    %c0_244 = arith.constant 0 : index
    %c7_245 = arith.constant 7 : index
    %c0_246 = arith.constant 0 : index
    %c8_247 = arith.constant 8 : index
    %209 = vector.load %arg1[%c0_244, %c7_245, %c0_246, %c8_247] : memref<1x28x3x72xbf16, #tpu.memory_space<vmem>>, vector<1x1x3x64xbf16>
    %210 = vector.shape_cast %209 : vector<1x1x3x64xbf16> to vector<3x64xbf16>
    %c35 = arith.constant 35 : index
    %c0_248 = arith.constant 0 : index
    %c0_249 = arith.constant 0 : index
    %211 = vector.load %arg2[%c35, %c0_248, %c0_249] : memref<49x8x3xbf16, #tpu.memory_space<vmem>>, vector<1x8x3xbf16>
    %212 = vector.shape_cast %211 : vector<1x8x3xbf16> to vector<8x3xbf16>
    %cst_250 = arith.constant dense<0.000000e+00> : vector<8x64xf32>
    %213 = tpu.matmul %212, %210, %cst_250 {dimension_numbers = #tpu.dot_dimension_numbers<[1], [0], [0], [1], [0, 0, 1, 1], [], []>} : vector<8x3xbf16>, vector<3x64xbf16>, vector<8x64xf32> -> vector<8x64xf32>
    %214 = arith.addf %208, %213 : vector<8x64xf32>
    %c0_251 = arith.constant 0 : index
    %c8_252 = arith.constant 8 : index
    %c0_253 = arith.constant 0 : index
    %c8_254 = arith.constant 8 : index
    %215 = vector.load %arg1[%c0_251, %c8_252, %c0_253, %c8_254] : memref<1x28x3x72xbf16, #tpu.memory_space<vmem>>, vector<1x1x3x64xbf16>
    %216 = vector.shape_cast %215 : vector<1x1x3x64xbf16> to vector<3x64xbf16>
    %c36 = arith.constant 36 : index
    %c0_255 = arith.constant 0 : index
    %c0_256 = arith.constant 0 : index
    %217 = vector.load %arg2[%c36, %c0_255, %c0_256] : memref<49x8x3xbf16, #tpu.memory_space<vmem>>, vector<1x8x3xbf16>
    %218 = vector.shape_cast %217 : vector<1x8x3xbf16> to vector<8x3xbf16>
    %cst_257 = arith.constant dense<0.000000e+00> : vector<8x64xf32>
    %219 = tpu.matmul %218, %216, %cst_257 {dimension_numbers = #tpu.dot_dimension_numbers<[1], [0], [0], [1], [0, 0, 1, 1], [], []>} : vector<8x3xbf16>, vector<3x64xbf16>, vector<8x64xf32> -> vector<8x64xf32>
    %220 = arith.addf %214, %219 : vector<8x64xf32>
    %c0_258 = arith.constant 0 : index
    %c9_259 = arith.constant 9 : index
    %c0_260 = arith.constant 0 : index
    %c8_261 = arith.constant 8 : index
    %221 = vector.load %arg1[%c0_258, %c9_259, %c0_260, %c8_261] : memref<1x28x3x72xbf16, #tpu.memory_space<vmem>>, vector<1x1x3x64xbf16>
    %222 = vector.shape_cast %221 : vector<1x1x3x64xbf16> to vector<3x64xbf16>
    %c37 = arith.constant 37 : index
    %c0_262 = arith.constant 0 : index
    %c0_263 = arith.constant 0 : index
    %223 = vector.load %arg2[%c37, %c0_262, %c0_263] : memref<49x8x3xbf16, #tpu.memory_space<vmem>>, vector<1x8x3xbf16>
    %224 = vector.shape_cast %223 : vector<1x8x3xbf16> to vector<8x3xbf16>
    %cst_264 = arith.constant dense<0.000000e+00> : vector<8x64xf32>
    %225 = tpu.matmul %224, %222, %cst_264 {dimension_numbers = #tpu.dot_dimension_numbers<[1], [0], [0], [1], [0, 0, 1, 1], [], []>} : vector<8x3xbf16>, vector<3x64xbf16>, vector<8x64xf32> -> vector<8x64xf32>
    %226 = arith.addf %220, %225 : vector<8x64xf32>
    %c0_265 = arith.constant 0 : index
    %c10_266 = arith.constant 10 : index
    %c0_267 = arith.constant 0 : index
    %c8_268 = arith.constant 8 : index
    %227 = vector.load %arg1[%c0_265, %c10_266, %c0_267, %c8_268] : memref<1x28x3x72xbf16, #tpu.memory_space<vmem>>, vector<1x1x3x64xbf16>
    %228 = vector.shape_cast %227 : vector<1x1x3x64xbf16> to vector<3x64xbf16>
    %c38 = arith.constant 38 : index
    %c0_269 = arith.constant 0 : index
    %c0_270 = arith.constant 0 : index
    %229 = vector.load %arg2[%c38, %c0_269, %c0_270] : memref<49x8x3xbf16, #tpu.memory_space<vmem>>, vector<1x8x3xbf16>
    %230 = vector.shape_cast %229 : vector<1x8x3xbf16> to vector<8x3xbf16>
    %cst_271 = arith.constant dense<0.000000e+00> : vector<8x64xf32>
    %231 = tpu.matmul %230, %228, %cst_271 {dimension_numbers = #tpu.dot_dimension_numbers<[1], [0], [0], [1], [0, 0, 1, 1], [], []>} : vector<8x3xbf16>, vector<3x64xbf16>, vector<8x64xf32> -> vector<8x64xf32>
    %232 = arith.addf %226, %231 : vector<8x64xf32>
    %c0_272 = arith.constant 0 : index
    %c11_273 = arith.constant 11 : index
    %c0_274 = arith.constant 0 : index
    %c8_275 = arith.constant 8 : index
    %233 = vector.load %arg1[%c0_272, %c11_273, %c0_274, %c8_275] : memref<1x28x3x72xbf16, #tpu.memory_space<vmem>>, vector<1x1x3x64xbf16>
    %234 = vector.shape_cast %233 : vector<1x1x3x64xbf16> to vector<3x64xbf16>
    %c39 = arith.constant 39 : index
    %c0_276 = arith.constant 0 : index
    %c0_277 = arith.constant 0 : index
    %235 = vector.load %arg2[%c39, %c0_276, %c0_277] : memref<49x8x3xbf16, #tpu.memory_space<vmem>>, vector<1x8x3xbf16>
    %236 = vector.shape_cast %235 : vector<1x8x3xbf16> to vector<8x3xbf16>
    %cst_278 = arith.constant dense<0.000000e+00> : vector<8x64xf32>
    %237 = tpu.matmul %236, %234, %cst_278 {dimension_numbers = #tpu.dot_dimension_numbers<[1], [0], [0], [1], [0, 0, 1, 1], [], []>} : vector<8x3xbf16>, vector<3x64xbf16>, vector<8x64xf32> -> vector<8x64xf32>
    %238 = arith.addf %232, %237 : vector<8x64xf32>
    %c0_279 = arith.constant 0 : index
    %c12_280 = arith.constant 12 : index
    %c0_281 = arith.constant 0 : index
    %c8_282 = arith.constant 8 : index
    %239 = vector.load %arg1[%c0_279, %c12_280, %c0_281, %c8_282] : memref<1x28x3x72xbf16, #tpu.memory_space<vmem>>, vector<1x1x3x64xbf16>
    %240 = vector.shape_cast %239 : vector<1x1x3x64xbf16> to vector<3x64xbf16>
    %c40 = arith.constant 40 : index
    %c0_283 = arith.constant 0 : index
    %c0_284 = arith.constant 0 : index
    %241 = vector.load %arg2[%c40, %c0_283, %c0_284] : memref<49x8x3xbf16, #tpu.memory_space<vmem>>, vector<1x8x3xbf16>
    %242 = vector.shape_cast %241 : vector<1x8x3xbf16> to vector<8x3xbf16>
    %cst_285 = arith.constant dense<0.000000e+00> : vector<8x64xf32>
    %243 = tpu.matmul %242, %240, %cst_285 {dimension_numbers = #tpu.dot_dimension_numbers<[1], [0], [0], [1], [0, 0, 1, 1], [], []>} : vector<8x3xbf16>, vector<3x64xbf16>, vector<8x64xf32> -> vector<8x64xf32>
    %244 = arith.addf %238, %243 : vector<8x64xf32>
    %c0_286 = arith.constant 0 : index
    %c13_287 = arith.constant 13 : index
    %c0_288 = arith.constant 0 : index
    %c8_289 = arith.constant 8 : index
    %245 = vector.load %arg1[%c0_286, %c13_287, %c0_288, %c8_289] : memref<1x28x3x72xbf16, #tpu.memory_space<vmem>>, vector<1x1x3x64xbf16>
    %246 = vector.shape_cast %245 : vector<1x1x3x64xbf16> to vector<3x64xbf16>
    %c41 = arith.constant 41 : index
    %c0_290 = arith.constant 0 : index
    %c0_291 = arith.constant 0 : index
    %247 = vector.load %arg2[%c41, %c0_290, %c0_291] : memref<49x8x3xbf16, #tpu.memory_space<vmem>>, vector<1x8x3xbf16>
    %248 = vector.shape_cast %247 : vector<1x8x3xbf16> to vector<8x3xbf16>
    %cst_292 = arith.constant dense<0.000000e+00> : vector<8x64xf32>
    %249 = tpu.matmul %248, %246, %cst_292 {dimension_numbers = #tpu.dot_dimension_numbers<[1], [0], [0], [1], [0, 0, 1, 1], [], []>} : vector<8x3xbf16>, vector<3x64xbf16>, vector<8x64xf32> -> vector<8x64xf32>
    %250 = arith.addf %244, %249 : vector<8x64xf32>
    %c0_293 = arith.constant 0 : index
    %c14_294 = arith.constant 14 : index
    %c0_295 = arith.constant 0 : index
    %c8_296 = arith.constant 8 : index
    %251 = vector.load %arg1[%c0_293, %c14_294, %c0_295, %c8_296] : memref<1x28x3x72xbf16, #tpu.memory_space<vmem>>, vector<1x1x3x64xbf16>
    %252 = vector.shape_cast %251 : vector<1x1x3x64xbf16> to vector<3x64xbf16>
    %c42 = arith.constant 42 : index
    %c0_297 = arith.constant 0 : index
    %c0_298 = arith.constant 0 : index
    %253 = vector.load %arg2[%c42, %c0_297, %c0_298] : memref<49x8x3xbf16, #tpu.memory_space<vmem>>, vector<1x8x3xbf16>
    %254 = vector.shape_cast %253 : vector<1x8x3xbf16> to vector<8x3xbf16>
    %cst_299 = arith.constant dense<0.000000e+00> : vector<8x64xf32>
    %255 = tpu.matmul %254, %252, %cst_299 {dimension_numbers = #tpu.dot_dimension_numbers<[1], [0], [0], [1], [0, 0, 1, 1], [], []>} : vector<8x3xbf16>, vector<3x64xbf16>, vector<8x64xf32> -> vector<8x64xf32>
    %256 = arith.addf %250, %255 : vector<8x64xf32>
    %c0_300 = arith.constant 0 : index
    %c15_301 = arith.constant 15 : index
    %c0_302 = arith.constant 0 : index
    %c8_303 = arith.constant 8 : index
    %257 = vector.load %arg1[%c0_300, %c15_301, %c0_302, %c8_303] : memref<1x28x3x72xbf16, #tpu.memory_space<vmem>>, vector<1x1x3x64xbf16>
    %258 = vector.shape_cast %257 : vector<1x1x3x64xbf16> to vector<3x64xbf16>
    %c43 = arith.constant 43 : index
    %c0_304 = arith.constant 0 : index
    %c0_305 = arith.constant 0 : index
    %259 = vector.load %arg2[%c43, %c0_304, %c0_305] : memref<49x8x3xbf16, #tpu.memory_space<vmem>>, vector<1x8x3xbf16>
    %260 = vector.shape_cast %259 : vector<1x8x3xbf16> to vector<8x3xbf16>
    %cst_306 = arith.constant dense<0.000000e+00> : vector<8x64xf32>
    %261 = tpu.matmul %260, %258, %cst_306 {dimension_numbers = #tpu.dot_dimension_numbers<[1], [0], [0], [1], [0, 0, 1, 1], [], []>} : vector<8x3xbf16>, vector<3x64xbf16>, vector<8x64xf32> -> vector<8x64xf32>
    %262 = arith.addf %256, %261 : vector<8x64xf32>
    %c0_307 = arith.constant 0 : index
    %c16_308 = arith.constant 16 : index
    %c0_309 = arith.constant 0 : index
    %c8_310 = arith.constant 8 : index
    %263 = vector.load %arg1[%c0_307, %c16_308, %c0_309, %c8_310] : memref<1x28x3x72xbf16, #tpu.memory_space<vmem>>, vector<1x1x3x64xbf16>
    %264 = vector.shape_cast %263 : vector<1x1x3x64xbf16> to vector<3x64xbf16>
    %c44 = arith.constant 44 : index
    %c0_311 = arith.constant 0 : index
    %c0_312 = arith.constant 0 : index
    %265 = vector.load %arg2[%c44, %c0_311, %c0_312] : memref<49x8x3xbf16, #tpu.memory_space<vmem>>, vector<1x8x3xbf16>
    %266 = vector.shape_cast %265 : vector<1x8x3xbf16> to vector<8x3xbf16>
    %cst_313 = arith.constant dense<0.000000e+00> : vector<8x64xf32>
    %267 = tpu.matmul %266, %264, %cst_313 {dimension_numbers = #tpu.dot_dimension_numbers<[1], [0], [0], [1], [0, 0, 1, 1], [], []>} : vector<8x3xbf16>, vector<3x64xbf16>, vector<8x64xf32> -> vector<8x64xf32>
    %268 = arith.addf %262, %267 : vector<8x64xf32>
    %c0_314 = arith.constant 0 : index
    %c17_315 = arith.constant 17 : index
    %c0_316 = arith.constant 0 : index
    %c8_317 = arith.constant 8 : index
    %269 = vector.load %arg1[%c0_314, %c17_315, %c0_316, %c8_317] : memref<1x28x3x72xbf16, #tpu.memory_space<vmem>>, vector<1x1x3x64xbf16>
    %270 = vector.shape_cast %269 : vector<1x1x3x64xbf16> to vector<3x64xbf16>
    %c45 = arith.constant 45 : index
    %c0_318 = arith.constant 0 : index
    %c0_319 = arith.constant 0 : index
    %271 = vector.load %arg2[%c45, %c0_318, %c0_319] : memref<49x8x3xbf16, #tpu.memory_space<vmem>>, vector<1x8x3xbf16>
    %272 = vector.shape_cast %271 : vector<1x8x3xbf16> to vector<8x3xbf16>
    %cst_320 = arith.constant dense<0.000000e+00> : vector<8x64xf32>
    %273 = tpu.matmul %272, %270, %cst_320 {dimension_numbers = #tpu.dot_dimension_numbers<[1], [0], [0], [1], [0, 0, 1, 1], [], []>} : vector<8x3xbf16>, vector<3x64xbf16>, vector<8x64xf32> -> vector<8x64xf32>
    %274 = arith.addf %268, %273 : vector<8x64xf32>
    %c0_321 = arith.constant 0 : index
    %c18_322 = arith.constant 18 : index
    %c0_323 = arith.constant 0 : index
    %c8_324 = arith.constant 8 : index
    %275 = vector.load %arg1[%c0_321, %c18_322, %c0_323, %c8_324] : memref<1x28x3x72xbf16, #tpu.memory_space<vmem>>, vector<1x1x3x64xbf16>
    %276 = vector.shape_cast %275 : vector<1x1x3x64xbf16> to vector<3x64xbf16>
    %c46 = arith.constant 46 : index
    %c0_325 = arith.constant 0 : index
    %c0_326 = arith.constant 0 : index
    %277 = vector.load %arg2[%c46, %c0_325, %c0_326] : memref<49x8x3xbf16, #tpu.memory_space<vmem>>, vector<1x8x3xbf16>
    %278 = vector.shape_cast %277 : vector<1x8x3xbf16> to vector<8x3xbf16>
    %cst_327 = arith.constant dense<0.000000e+00> : vector<8x64xf32>
    %279 = tpu.matmul %278, %276, %cst_327 {dimension_numbers = #tpu.dot_dimension_numbers<[1], [0], [0], [1], [0, 0, 1, 1], [], []>} : vector<8x3xbf16>, vector<3x64xbf16>, vector<8x64xf32> -> vector<8x64xf32>
    %280 = arith.addf %274, %279 : vector<8x64xf32>
    %c0_328 = arith.constant 0 : index
    %c19_329 = arith.constant 19 : index
    %c0_330 = arith.constant 0 : index
    %c8_331 = arith.constant 8 : index
    %281 = vector.load %arg1[%c0_328, %c19_329, %c0_330, %c8_331] : memref<1x28x3x72xbf16, #tpu.memory_space<vmem>>, vector<1x1x3x64xbf16>
    %282 = vector.shape_cast %281 : vector<1x1x3x64xbf16> to vector<3x64xbf16>
    %c47 = arith.constant 47 : index
    %c0_332 = arith.constant 0 : index
    %c0_333 = arith.constant 0 : index
    %283 = vector.load %arg2[%c47, %c0_332, %c0_333] : memref<49x8x3xbf16, #tpu.memory_space<vmem>>, vector<1x8x3xbf16>
    %284 = vector.shape_cast %283 : vector<1x8x3xbf16> to vector<8x3xbf16>
    %cst_334 = arith.constant dense<0.000000e+00> : vector<8x64xf32>
    %285 = tpu.matmul %284, %282, %cst_334 {dimension_numbers = #tpu.dot_dimension_numbers<[1], [0], [0], [1], [0, 0, 1, 1], [], []>} : vector<8x3xbf16>, vector<3x64xbf16>, vector<8x64xf32> -> vector<8x64xf32>
    %286 = arith.addf %280, %285 : vector<8x64xf32>
    %c0_335 = arith.constant 0 : index
    %c20_336 = arith.constant 20 : index
    %c0_337 = arith.constant 0 : index
    %c8_338 = arith.constant 8 : index
    %287 = vector.load %arg1[%c0_335, %c20_336, %c0_337, %c8_338] : memref<1x28x3x72xbf16, #tpu.memory_space<vmem>>, vector<1x1x3x64xbf16>
    %288 = vector.shape_cast %287 : vector<1x1x3x64xbf16> to vector<3x64xbf16>
    %c48 = arith.constant 48 : index
    %c0_339 = arith.constant 0 : index
    %c0_340 = arith.constant 0 : index
    %289 = vector.load %arg2[%c48, %c0_339, %c0_340] : memref<49x8x3xbf16, #tpu.memory_space<vmem>>, vector<1x8x3xbf16>
    %290 = vector.shape_cast %289 : vector<1x8x3xbf16> to vector<8x3xbf16>
    %cst_341 = arith.constant dense<0.000000e+00> : vector<8x64xf32>
    %291 = tpu.matmul %290, %288, %cst_341 {dimension_numbers = #tpu.dot_dimension_numbers<[1], [0], [0], [1], [0, 0, 1, 1], [], []>} : vector<8x3xbf16>, vector<3x64xbf16>, vector<8x64xf32> -> vector<8x64xf32>
    %292 = arith.addf %286, %291 : vector<8x64xf32>
    %c0_342 = arith.constant 0 : index
    %c0_343 = arith.constant 0 : index
    %293 = vector.load %arg3[%c0_342, %c0_343] : memref<8x1xf32, #tpu.memory_space<vmem>>, vector<8x1xf32>
    %294 = vector.broadcast %293 : vector<8x1xf32> to vector<8x64xf32>
    %295 = arith.mulf %292, %294 : vector<8x64xf32>
    %c0_344 = arith.constant 0 : index
    %c0_345 = arith.constant 0 : index
    %296 = vector.load %arg4[%c0_344, %c0_345] : memref<8x1xf32, #tpu.memory_space<vmem>>, vector<8x1xf32>
    %297 = vector.broadcast %296 : vector<8x1xf32> to vector<8x64xf32>
    %298 = arith.addf %295, %297 : vector<8x64xf32>
    %cst_346 = arith.constant 0.000000e+00 : f32
    %299 = vector.broadcast %cst_346 : f32 to vector<8x64xf32>
    %300 = arith.maximumf %298, %299 : vector<8x64xf32>
    %301 = arith.truncf %300 : vector<8x64xf32> to vector<8x64xbf16>
    %c0_347 = arith.constant 0 : index
    %c0_348 = arith.constant 0 : index
    %c0_349 = arith.constant 0 : index
    %302 = vector.load %arg5[%c0_347, %c0_348, %c0_349] : memref<1x8x64xbf16, #tpu.memory_space<vmem>>, vector<1x8x64xbf16>
    %303 = vector.shape_cast %302 : vector<1x8x64xbf16> to vector<8x64xbf16>
    %304 = vector.shape_cast %301 : vector<8x64xbf16> to vector<1x8x64xbf16>
    tpu.vector_store %arg5[%c0_347, %c0_348, %c0_349], %304 {strides = array<i32>} : memref<1x8x64xbf16, #tpu.memory_space<vmem>>, vector<1x8x64xbf16>,
    return
  }
  func.func @transform_0(%arg0: i32) -> (i32, i32, i32, i32) {
    %c0_i32 = arith.constant 0 : i32
    %c0_i32_0 = arith.constant 0 : i32
    %c0_i32_1 = arith.constant 0 : i32
    %c0_i32_2 = arith.constant 0 : i32
    return %arg0, %c0_i32, %c0_i32_0, %c0_i32_1 : i32, i32, i32, i32
  }
  func.func @transform_1(%arg0: i32) -> (i32, i32, i32) {
    %c0_i32 = arith.constant 0 : i32
    %c0_i32_0 = arith.constant 0 : i32
    %c0_i32_1 = arith.constant 0 : i32
    %c0_i32_2 = arith.constant 0 : i32
    return %c0_i32, %c0_i32_0, %c0_i32_1 : i32, i32, i32
  }
  func.func @transform_2(%arg0: i32) -> (i32, i32) {
    %c0_i32 = arith.constant 0 : i32
    %c0_i32_0 = arith.constant 0 : i32
    %c0_i32_1 = arith.constant 0 : i32
    return %c0_i32, %c0_i32_0 : i32, i32
  }
  func.func @transform_3(%arg0: i32) -> (i32, i32) {
    %c0_i32 = arith.constant 0 : i32
    %c0_i32_0 = arith.constant 0 : i32
    %c0_i32_1 = arith.constant 0 : i32
    return %c0_i32, %c0_i32_0 : i32, i32
  }
  func.func @transform_4(%arg0: i32) -> (i32, i32, i32) {
    %c0_i32 = arith.constant 0 : i32
    %c0_i32_0 = arith.constant 0 : i32
    %c0_i32_1 = arith.constant 0 : i32
    return %arg0, %c0_i32, %c0_i32_0 : i32, i32, i32
  }
}

module attributes {stable_mosaic.version = 11 : i64} {
  func.func @_conv_kernel(%arg0: i32, %arg1: memref<1x1x8x16xbf16, #tpu.memory_space<vmem>>, %arg2: memref<1x16x8xbf16, #tpu.memory_space<vmem>>, %arg3: memref<16x1xf32, #tpu.memory_space<vmem>>, %arg4: memref<16x1xf32, #tpu.memory_space<vmem>>, %arg5: memref<1x16x16xbf16, #tpu.memory_space<vmem>>) attributes {dimension_semantics = [#tpu.dimension_semantics<parallel>], iteration_bounds = array<i64: 2>, scalar_prefetch = 0 : i64, scratch_operands = 0 : i64, tpu.core_type = #tpu.core_type<tc>, window_params = [{transform_indices = @transform_0, window_bounds = array<i64: 1, 1, 8, 16>}, {pipeline_mode = #tpu.pipeline_mode<synchronous>, transform_indices = @transform_1, window_bounds = array<i64: 1, 16, 8>}, {pipeline_mode = #tpu.pipeline_mode<synchronous>, transform_indices = @transform_2, window_bounds = array<i64: 16, 1>}, {pipeline_mode = #tpu.pipeline_mode<synchronous>, transform_indices = @transform_3, window_bounds = array<i64: 16, 1>}, {transform_indices = @transform_4, window_bounds = array<i64: 1, 16, 16>}]} {
    %c0 = arith.constant 0 : index
    %c0_0 = arith.constant 0 : index
    %c0_1 = arith.constant 0 : index
    %c0_2 = arith.constant 0 : index
    %0 = vector.load %arg1[%c0, %c0_0, %c0_1, %c0_2] : memref<1x1x8x16xbf16, #tpu.memory_space<vmem>>, vector<1x1x8x16xbf16>
    %1 = vector.shape_cast %0 : vector<1x1x8x16xbf16> to vector<8x16xbf16>
    %c0_3 = arith.constant 0 : index
    %c0_4 = arith.constant 0 : index
    %c0_5 = arith.constant 0 : index
    %2 = vector.load %arg2[%c0_3, %c0_4, %c0_5] : memref<1x16x8xbf16, #tpu.memory_space<vmem>>, vector<1x16x8xbf16>
    %3 = vector.shape_cast %2 : vector<1x16x8xbf16> to vector<16x8xbf16>
    %cst = arith.constant dense<0.000000e+00> : vector<16x16xf32>
    %4 = tpu.matmul %3, %1, %cst {dimension_numbers = #tpu.dot_dimension_numbers<[1], [0], [0], [1], [0, 0, 1, 1], [], []>} : vector<16x8xbf16>, vector<8x16xbf16>, vector<16x16xf32> -> vector<16x16xf32>
    %c0_6 = arith.constant 0 : index
    %c0_7 = arith.constant 0 : index
    %5 = vector.load %arg3[%c0_6, %c0_7] : memref<16x1xf32, #tpu.memory_space<vmem>>, vector<16x1xf32>
    %6 = vector.broadcast %5 : vector<16x1xf32> to vector<16x16xf32>
    %7 = arith.mulf %4, %6 : vector<16x16xf32>
    %c0_8 = arith.constant 0 : index
    %c0_9 = arith.constant 0 : index
    %8 = vector.load %arg4[%c0_8, %c0_9] : memref<16x1xf32, #tpu.memory_space<vmem>>, vector<16x1xf32>
    %9 = vector.broadcast %8 : vector<16x1xf32> to vector<16x16xf32>
    %10 = arith.addf %7, %9 : vector<16x16xf32>
    %11 = arith.truncf %10 : vector<16x16xf32> to vector<16x16xbf16>
    %c0_10 = arith.constant 0 : index
    %c0_11 = arith.constant 0 : index
    %c0_12 = arith.constant 0 : index
    %12 = vector.load %arg5[%c0_10, %c0_11, %c0_12] : memref<1x16x16xbf16, #tpu.memory_space<vmem>>, vector<1x16x16xbf16>
    %13 = vector.shape_cast %12 : vector<1x16x16xbf16> to vector<16x16xbf16>
    %14 = vector.shape_cast %11 : vector<16x16xbf16> to vector<1x16x16xbf16>
    tpu.vector_store %arg5[%c0_10, %c0_11, %c0_12], %14 {strides = array<i32>} : memref<1x16x16xbf16, #tpu.memory_space<vmem>>, vector<1x16x16xbf16>,
    return
  }
  func.func @transform_0(%arg0: i32) -> (i32, i32, i32, i32) {
    %c0_i32 = arith.constant 0 : i32
    %c0_i32_0 = arith.constant 0 : i32
    %c0_i32_1 = arith.constant 0 : i32
    %c0_i32_2 = arith.constant 0 : i32
    return %arg0, %c0_i32, %c0_i32_0, %c0_i32_1 : i32, i32, i32, i32
  }
  func.func @transform_1(%arg0: i32) -> (i32, i32, i32) {
    %c0_i32 = arith.constant 0 : i32
    %c0_i32_0 = arith.constant 0 : i32
    %c0_i32_1 = arith.constant 0 : i32
    %c0_i32_2 = arith.constant 0 : i32
    return %c0_i32, %c0_i32_0, %c0_i32_1 : i32, i32, i32
  }
  func.func @transform_2(%arg0: i32) -> (i32, i32) {
    %c0_i32 = arith.constant 0 : i32
    %c0_i32_0 = arith.constant 0 : i32
    %c0_i32_1 = arith.constant 0 : i32
    return %c0_i32, %c0_i32_0 : i32, i32
  }
  func.func @transform_3(%arg0: i32) -> (i32, i32) {
    %c0_i32 = arith.constant 0 : i32
    %c0_i32_0 = arith.constant 0 : i32
    %c0_i32_1 = arith.constant 0 : i32
    return %c0_i32, %c0_i32_0 : i32, i32
  }
  func.func @transform_4(%arg0: i32) -> (i32, i32, i32) {
    %c0_i32 = arith.constant 0 : i32
    %c0_i32_0 = arith.constant 0 : i32
    %c0_i32_1 = arith.constant 0 : i32
    return %arg0, %c0_i32, %c0_i32_0 : i32, i32, i32
  }
}

module attributes {stable_mosaic.version = 11 : i64} {
  func.func @_conv_kernel(%arg0: i32, %arg1: memref<1x6x8x20xbf16, #tpu.memory_space<vmem>>, %arg2: memref<9x16x8xbf16, #tpu.memory_space<vmem>>, %arg3: memref<16x1xf32, #tpu.memory_space<vmem>>, %arg4: memref<16x1xf32, #tpu.memory_space<vmem>>, %arg5: memref<1x16x16xbf16, #tpu.memory_space<vmem>>) attributes {dimension_semantics = [#tpu.dimension_semantics<parallel>], iteration_bounds = array<i64: 2>, scalar_prefetch = 0 : i64, scratch_operands = 0 : i64, tpu.core_type = #tpu.core_type<tc>, window_params = [{transform_indices = @transform_0, window_bounds = array<i64: 1, 6, 8, 20>}, {pipeline_mode = #tpu.pipeline_mode<synchronous>, transform_indices = @transform_1, window_bounds = array<i64: 9, 16, 8>}, {pipeline_mode = #tpu.pipeline_mode<synchronous>, transform_indices = @transform_2, window_bounds = array<i64: 16, 1>}, {pipeline_mode = #tpu.pipeline_mode<synchronous>, transform_indices = @transform_3, window_bounds = array<i64: 16, 1>}, {transform_indices = @transform_4, window_bounds = array<i64: 1, 16, 16>}]} {
    %c0 = arith.constant 0 : index
    %c0_0 = arith.constant 0 : index
    %c0_1 = arith.constant 0 : index
    %c0_2 = arith.constant 0 : index
    %0 = vector.load %arg1[%c0, %c0_0, %c0_1, %c0_2] : memref<1x6x8x20xbf16, #tpu.memory_space<vmem>>, vector<1x1x8x16xbf16>
    %1 = vector.shape_cast %0 : vector<1x1x8x16xbf16> to vector<8x16xbf16>
    %c0_3 = arith.constant 0 : index
    %c0_4 = arith.constant 0 : index
    %c0_5 = arith.constant 0 : index
    %2 = vector.load %arg2[%c0_3, %c0_4, %c0_5] : memref<9x16x8xbf16, #tpu.memory_space<vmem>>, vector<1x16x8xbf16>
    %3 = vector.shape_cast %2 : vector<1x16x8xbf16> to vector<16x8xbf16>
    %cst = arith.constant dense<0.000000e+00> : vector<16x16xf32>
    %4 = tpu.matmul %3, %1, %cst {dimension_numbers = #tpu.dot_dimension_numbers<[1], [0], [0], [1], [0, 0, 1, 1], [], []>} : vector<16x8xbf16>, vector<8x16xbf16>, vector<16x16xf32> -> vector<16x16xf32>
    %c0_6 = arith.constant 0 : index
    %c1 = arith.constant 1 : index
    %c0_7 = arith.constant 0 : index
    %c0_8 = arith.constant 0 : index
    %5 = vector.load %arg1[%c0_6, %c1, %c0_7, %c0_8] : memref<1x6x8x20xbf16, #tpu.memory_space<vmem>>, vector<1x1x8x16xbf16>
    %6 = vector.shape_cast %5 : vector<1x1x8x16xbf16> to vector<8x16xbf16>
    %c1_9 = arith.constant 1 : index
    %c0_10 = arith.constant 0 : index
    %c0_11 = arith.constant 0 : index
    %7 = vector.load %arg2[%c1_9, %c0_10, %c0_11] : memref<9x16x8xbf16, #tpu.memory_space<vmem>>, vector<1x16x8xbf16>
    %8 = vector.shape_cast %7 : vector<1x16x8xbf16> to vector<16x8xbf16>
    %cst_12 = arith.constant dense<0.000000e+00> : vector<16x16xf32>
    %9 = tpu.matmul %8, %6, %cst_12 {dimension_numbers = #tpu.dot_dimension_numbers<[1], [0], [0], [1], [0, 0, 1, 1], [], []>} : vector<16x8xbf16>, vector<8x16xbf16>, vector<16x16xf32> -> vector<16x16xf32>
    %10 = arith.addf %4, %9 : vector<16x16xf32>
    %c0_13 = arith.constant 0 : index
    %c2 = arith.constant 2 : index
    %c0_14 = arith.constant 0 : index
    %c0_15 = arith.constant 0 : index
    %11 = vector.load %arg1[%c0_13, %c2, %c0_14, %c0_15] : memref<1x6x8x20xbf16, #tpu.memory_space<vmem>>, vector<1x1x8x16xbf16>
    %12 = vector.shape_cast %11 : vector<1x1x8x16xbf16> to vector<8x16xbf16>
    %c2_16 = arith.constant 2 : index
    %c0_17 = arith.constant 0 : index
    %c0_18 = arith.constant 0 : index
    %13 = vector.load %arg2[%c2_16, %c0_17, %c0_18] : memref<9x16x8xbf16, #tpu.memory_space<vmem>>, vector<1x16x8xbf16>
    %14 = vector.shape_cast %13 : vector<1x16x8xbf16> to vector<16x8xbf16>
    %cst_19 = arith.constant dense<0.000000e+00> : vector<16x16xf32>
    %15 = tpu.matmul %14, %12, %cst_19 {dimension_numbers = #tpu.dot_dimension_numbers<[1], [0], [0], [1], [0, 0, 1, 1], [], []>} : vector<16x8xbf16>, vector<8x16xbf16>, vector<16x16xf32> -> vector<16x16xf32>
    %16 = arith.addf %10, %15 : vector<16x16xf32>
    %c0_20 = arith.constant 0 : index
    %c3 = arith.constant 3 : index
    %c0_21 = arith.constant 0 : index
    %c0_22 = arith.constant 0 : index
    %17 = vector.load %arg1[%c0_20, %c3, %c0_21, %c0_22] : memref<1x6x8x20xbf16, #tpu.memory_space<vmem>>, vector<1x1x8x16xbf16>
    %18 = vector.shape_cast %17 : vector<1x1x8x16xbf16> to vector<8x16xbf16>
    %c3_23 = arith.constant 3 : index
    %c0_24 = arith.constant 0 : index
    %c0_25 = arith.constant 0 : index
    %19 = vector.load %arg2[%c3_23, %c0_24, %c0_25] : memref<9x16x8xbf16, #tpu.memory_space<vmem>>, vector<1x16x8xbf16>
    %20 = vector.shape_cast %19 : vector<1x16x8xbf16> to vector<16x8xbf16>
    %cst_26 = arith.constant dense<0.000000e+00> : vector<16x16xf32>
    %21 = tpu.matmul %20, %18, %cst_26 {dimension_numbers = #tpu.dot_dimension_numbers<[1], [0], [0], [1], [0, 0, 1, 1], [], []>} : vector<16x8xbf16>, vector<8x16xbf16>, vector<16x16xf32> -> vector<16x16xf32>
    %22 = arith.addf %16, %21 : vector<16x16xf32>
    %c0_27 = arith.constant 0 : index
    %c4 = arith.constant 4 : index
    %c0_28 = arith.constant 0 : index
    %c0_29 = arith.constant 0 : index
    %23 = vector.load %arg1[%c0_27, %c4, %c0_28, %c0_29] : memref<1x6x8x20xbf16, #tpu.memory_space<vmem>>, vector<1x1x8x16xbf16>
    %24 = vector.shape_cast %23 : vector<1x1x8x16xbf16> to vector<8x16xbf16>
    %c4_30 = arith.constant 4 : index
    %c0_31 = arith.constant 0 : index
    %c0_32 = arith.constant 0 : index
    %25 = vector.load %arg2[%c4_30, %c0_31, %c0_32] : memref<9x16x8xbf16, #tpu.memory_space<vmem>>, vector<1x16x8xbf16>
    %26 = vector.shape_cast %25 : vector<1x16x8xbf16> to vector<16x8xbf16>
    %cst_33 = arith.constant dense<0.000000e+00> : vector<16x16xf32>
    %27 = tpu.matmul %26, %24, %cst_33 {dimension_numbers = #tpu.dot_dimension_numbers<[1], [0], [0], [1], [0, 0, 1, 1], [], []>} : vector<16x8xbf16>, vector<8x16xbf16>, vector<16x16xf32> -> vector<16x16xf32>
    %28 = arith.addf %22, %27 : vector<16x16xf32>
    %c0_34 = arith.constant 0 : index
    %c5 = arith.constant 5 : index
    %c0_35 = arith.constant 0 : index
    %c0_36 = arith.constant 0 : index
    %29 = vector.load %arg1[%c0_34, %c5, %c0_35, %c0_36] : memref<1x6x8x20xbf16, #tpu.memory_space<vmem>>, vector<1x1x8x16xbf16>
    %30 = vector.shape_cast %29 : vector<1x1x8x16xbf16> to vector<8x16xbf16>
    %c5_37 = arith.constant 5 : index
    %c0_38 = arith.constant 0 : index
    %c0_39 = arith.constant 0 : index
    %31 = vector.load %arg2[%c5_37, %c0_38, %c0_39] : memref<9x16x8xbf16, #tpu.memory_space<vmem>>, vector<1x16x8xbf16>
    %32 = vector.shape_cast %31 : vector<1x16x8xbf16> to vector<16x8xbf16>
    %cst_40 = arith.constant dense<0.000000e+00> : vector<16x16xf32>
    %33 = tpu.matmul %32, %30, %cst_40 {dimension_numbers = #tpu.dot_dimension_numbers<[1], [0], [0], [1], [0, 0, 1, 1], [], []>} : vector<16x8xbf16>, vector<8x16xbf16>, vector<16x16xf32> -> vector<16x16xf32>
    %34 = arith.addf %28, %33 : vector<16x16xf32>
    %c0_41 = arith.constant 0 : index
    %c0_42 = arith.constant 0 : index
    %c0_43 = arith.constant 0 : index
    %c4_44 = arith.constant 4 : index
    %35 = vector.load %arg1[%c0_41, %c0_42, %c0_43, %c4_44] : memref<1x6x8x20xbf16, #tpu.memory_space<vmem>>, vector<1x1x8x16xbf16>
    %36 = vector.shape_cast %35 : vector<1x1x8x16xbf16> to vector<8x16xbf16>
    %c6 = arith.constant 6 : index
    %c0_45 = arith.constant 0 : index
    %c0_46 = arith.constant 0 : index
    %37 = vector.load %arg2[%c6, %c0_45, %c0_46] : memref<9x16x8xbf16, #tpu.memory_space<vmem>>, vector<1x16x8xbf16>
    %38 = vector.shape_cast %37 : vector<1x16x8xbf16> to vector<16x8xbf16>
    %cst_47 = arith.constant dense<0.000000e+00> : vector<16x16xf32>
    %39 = tpu.matmul %38, %36, %cst_47 {dimension_numbers = #tpu.dot_dimension_numbers<[1], [0], [0], [1], [0, 0, 1, 1], [], []>} : vector<16x8xbf16>, vector<8x16xbf16>, vector<16x16xf32> -> vector<16x16xf32>
    %40 = arith.addf %34, %39 : vector<16x16xf32>
    %c0_48 = arith.constant 0 : index
    %c1_49 = arith.constant 1 : index
    %c0_50 = arith.constant 0 : index
    %c4_51 = arith.constant 4 : index
    %41 = vector.load %arg1[%c0_48, %c1_49, %c0_50, %c4_51] : memref<1x6x8x20xbf16, #tpu.memory_space<vmem>>, vector<1x1x8x16xbf16>
    %42 = vector.shape_cast %41 : vector<1x1x8x16xbf16> to vector<8x16xbf16>
    %c7 = arith.constant 7 : index
    %c0_52 = arith.constant 0 : index
    %c0_53 = arith.constant 0 : index
    %43 = vector.load %arg2[%c7, %c0_52, %c0_53] : memref<9x16x8xbf16, #tpu.memory_space<vmem>>, vector<1x16x8xbf16>
    %44 = vector.shape_cast %43 : vector<1x16x8xbf16> to vector<16x8xbf16>
    %cst_54 = arith.constant dense<0.000000e+00> : vector<16x16xf32>
    %45 = tpu.matmul %44, %42, %cst_54 {dimension_numbers = #tpu.dot_dimension_numbers<[1], [0], [0], [1], [0, 0, 1, 1], [], []>} : vector<16x8xbf16>, vector<8x16xbf16>, vector<16x16xf32> -> vector<16x16xf32>
    %46 = arith.addf %40, %45 : vector<16x16xf32>
    %c0_55 = arith.constant 0 : index
    %c2_56 = arith.constant 2 : index
    %c0_57 = arith.constant 0 : index
    %c4_58 = arith.constant 4 : index
    %47 = vector.load %arg1[%c0_55, %c2_56, %c0_57, %c4_58] : memref<1x6x8x20xbf16, #tpu.memory_space<vmem>>, vector<1x1x8x16xbf16>
    %48 = vector.shape_cast %47 : vector<1x1x8x16xbf16> to vector<8x16xbf16>
    %c8 = arith.constant 8 : index
    %c0_59 = arith.constant 0 : index
    %c0_60 = arith.constant 0 : index
    %49 = vector.load %arg2[%c8, %c0_59, %c0_60] : memref<9x16x8xbf16, #tpu.memory_space<vmem>>, vector<1x16x8xbf16>
    %50 = vector.shape_cast %49 : vector<1x16x8xbf16> to vector<16x8xbf16>
    %cst_61 = arith.constant dense<0.000000e+00> : vector<16x16xf32>
    %51 = tpu.matmul %50, %48, %cst_61 {dimension_numbers = #tpu.dot_dimension_numbers<[1], [0], [0], [1], [0, 0, 1, 1], [], []>} : vector<16x8xbf16>, vector<8x16xbf16>, vector<16x16xf32> -> vector<16x16xf32>
    %52 = arith.addf %46, %51 : vector<16x16xf32>
    %c0_62 = arith.constant 0 : index
    %c0_63 = arith.constant 0 : index
    %53 = vector.load %arg3[%c0_62, %c0_63] : memref<16x1xf32, #tpu.memory_space<vmem>>, vector<16x1xf32>
    %54 = vector.broadcast %53 : vector<16x1xf32> to vector<16x16xf32>
    %55 = arith.mulf %52, %54 : vector<16x16xf32>
    %c0_64 = arith.constant 0 : index
    %c0_65 = arith.constant 0 : index
    %56 = vector.load %arg4[%c0_64, %c0_65] : memref<16x1xf32, #tpu.memory_space<vmem>>, vector<16x1xf32>
    %57 = vector.broadcast %56 : vector<16x1xf32> to vector<16x16xf32>
    %58 = arith.addf %55, %57 : vector<16x16xf32>
    %cst_66 = arith.constant 0.000000e+00 : f32
    %59 = vector.broadcast %cst_66 : f32 to vector<16x16xf32>
    %60 = arith.maximumf %58, %59 : vector<16x16xf32>
    %61 = arith.truncf %60 : vector<16x16xf32> to vector<16x16xbf16>
    %c0_67 = arith.constant 0 : index
    %c0_68 = arith.constant 0 : index
    %c0_69 = arith.constant 0 : index
    %62 = vector.load %arg5[%c0_67, %c0_68, %c0_69] : memref<1x16x16xbf16, #tpu.memory_space<vmem>>, vector<1x16x16xbf16>
    %63 = vector.shape_cast %62 : vector<1x16x16xbf16> to vector<16x16xbf16>
    %64 = vector.shape_cast %61 : vector<16x16xbf16> to vector<1x16x16xbf16>
    tpu.vector_store %arg5[%c0_67, %c0_68, %c0_69], %64 {strides = array<i32>} : memref<1x16x16xbf16, #tpu.memory_space<vmem>>, vector<1x16x16xbf16>,
    return
  }
  func.func @transform_0(%arg0: i32) -> (i32, i32, i32, i32) {
    %c0_i32 = arith.constant 0 : i32
    %c0_i32_0 = arith.constant 0 : i32
    %c0_i32_1 = arith.constant 0 : i32
    %c0_i32_2 = arith.constant 0 : i32
    return %arg0, %c0_i32, %c0_i32_0, %c0_i32_1 : i32, i32, i32, i32
  }
  func.func @transform_1(%arg0: i32) -> (i32, i32, i32) {
    %c0_i32 = arith.constant 0 : i32
    %c0_i32_0 = arith.constant 0 : i32
    %c0_i32_1 = arith.constant 0 : i32
    %c0_i32_2 = arith.constant 0 : i32
    return %c0_i32, %c0_i32_0, %c0_i32_1 : i32, i32, i32
  }
  func.func @transform_2(%arg0: i32) -> (i32, i32) {
    %c0_i32 = arith.constant 0 : i32
    %c0_i32_0 = arith.constant 0 : i32
    %c0_i32_1 = arith.constant 0 : i32
    return %c0_i32, %c0_i32_0 : i32, i32
  }
  func.func @transform_3(%arg0: i32) -> (i32, i32) {
    %c0_i32 = arith.constant 0 : i32
    %c0_i32_0 = arith.constant 0 : i32
    %c0_i32_1 = arith.constant 0 : i32
    return %c0_i32, %c0_i32_0 : i32, i32
  }
  func.func @transform_4(%arg0: i32) -> (i32, i32, i32) {
    %c0_i32 = arith.constant 0 : i32
    %c0_i32_0 = arith.constant 0 : i32
    %c0_i32_1 = arith.constant 0 : i32
    return %arg0, %c0_i32, %c0_i32_0 : i32, i32, i32
  }
}

module attributes {stable_mosaic.version = 11 : i64} {
  func.func @_conv_kernel(%arg0: i32, %arg1: memref<1x3x16x24xbf16, #tpu.memory_space<vmem>>, %arg2: memref<9x16x16xbf16, #tpu.memory_space<vmem>>, %arg3: memref<16x1xf32, #tpu.memory_space<vmem>>, %arg4: memref<16x1xf32, #tpu.memory_space<vmem>>, %arg5: memref<1x16x16xbf16, #tpu.memory_space<vmem>>, %arg6: memref<1x16x16xbf16, #tpu.memory_space<vmem>>) attributes {dimension_semantics = [#tpu.dimension_semantics<parallel>], iteration_bounds = array<i64: 2>, scalar_prefetch = 0 : i64, scratch_operands = 0 : i64, tpu.core_type = #tpu.core_type<tc>, window_params = [{transform_indices = @transform_0, window_bounds = array<i64: 1, 3, 16, 24>}, {pipeline_mode = #tpu.pipeline_mode<synchronous>, transform_indices = @transform_1, window_bounds = array<i64: 9, 16, 16>}, {pipeline_mode = #tpu.pipeline_mode<synchronous>, transform_indices = @transform_2, window_bounds = array<i64: 16, 1>}, {pipeline_mode = #tpu.pipeline_mode<synchronous>, transform_indices = @transform_3, window_bounds = array<i64: 16, 1>}, {transform_indices = @transform_4, window_bounds = array<i64: 1, 16, 16>}, {transform_indices = @transform_5, window_bounds = array<i64: 1, 16, 16>}]} {
    %c0 = arith.constant 0 : index
    %c0_0 = arith.constant 0 : index
    %c0_1 = arith.constant 0 : index
    %c0_2 = arith.constant 0 : index
    %0 = vector.load %arg1[%c0, %c0_0, %c0_1, %c0_2] : memref<1x3x16x24xbf16, #tpu.memory_space<vmem>>, vector<1x1x16x16xbf16>
    %1 = vector.shape_cast %0 : vector<1x1x16x16xbf16> to vector<16x16xbf16>
    %c0_3 = arith.constant 0 : index
    %c0_4 = arith.constant 0 : index
    %c0_5 = arith.constant 0 : index
    %2 = vector.load %arg2[%c0_3, %c0_4, %c0_5] : memref<9x16x16xbf16, #tpu.memory_space<vmem>>, vector<1x16x16xbf16>
    %3 = vector.shape_cast %2 : vector<1x16x16xbf16> to vector<16x16xbf16>
    %cst = arith.constant dense<0.000000e+00> : vector<16x16xf32>
    %4 = tpu.matmul %3, %1, %cst {dimension_numbers = #tpu.dot_dimension_numbers<[1], [0], [0], [1], [0, 0, 1, 1], [], []>} : vector<16x16xbf16>, vector<16x16xbf16>, vector<16x16xf32> -> vector<16x16xf32>
    %c0_6 = arith.constant 0 : index
    %c1 = arith.constant 1 : index
    %c0_7 = arith.constant 0 : index
    %c0_8 = arith.constant 0 : index
    %5 = vector.load %arg1[%c0_6, %c1, %c0_7, %c0_8] : memref<1x3x16x24xbf16, #tpu.memory_space<vmem>>, vector<1x1x16x16xbf16>
    %6 = vector.shape_cast %5 : vector<1x1x16x16xbf16> to vector<16x16xbf16>
    %c1_9 = arith.constant 1 : index
    %c0_10 = arith.constant 0 : index
    %c0_11 = arith.constant 0 : index
    %7 = vector.load %arg2[%c1_9, %c0_10, %c0_11] : memref<9x16x16xbf16, #tpu.memory_space<vmem>>, vector<1x16x16xbf16>
    %8 = vector.shape_cast %7 : vector<1x16x16xbf16> to vector<16x16xbf16>
    %cst_12 = arith.constant dense<0.000000e+00> : vector<16x16xf32>
    %9 = tpu.matmul %8, %6, %cst_12 {dimension_numbers = #tpu.dot_dimension_numbers<[1], [0], [0], [1], [0, 0, 1, 1], [], []>} : vector<16x16xbf16>, vector<16x16xbf16>, vector<16x16xf32> -> vector<16x16xf32>
    %10 = arith.addf %4, %9 : vector<16x16xf32>
    %c0_13 = arith.constant 0 : index
    %c2 = arith.constant 2 : index
    %c0_14 = arith.constant 0 : index
    %c0_15 = arith.constant 0 : index
    %11 = vector.load %arg1[%c0_13, %c2, %c0_14, %c0_15] : memref<1x3x16x24xbf16, #tpu.memory_space<vmem>>, vector<1x1x16x16xbf16>
    %12 = vector.shape_cast %11 : vector<1x1x16x16xbf16> to vector<16x16xbf16>
    %c2_16 = arith.constant 2 : index
    %c0_17 = arith.constant 0 : index
    %c0_18 = arith.constant 0 : index
    %13 = vector.load %arg2[%c2_16, %c0_17, %c0_18] : memref<9x16x16xbf16, #tpu.memory_space<vmem>>, vector<1x16x16xbf16>
    %14 = vector.shape_cast %13 : vector<1x16x16xbf16> to vector<16x16xbf16>
    %cst_19 = arith.constant dense<0.000000e+00> : vector<16x16xf32>
    %15 = tpu.matmul %14, %12, %cst_19 {dimension_numbers = #tpu.dot_dimension_numbers<[1], [0], [0], [1], [0, 0, 1, 1], [], []>} : vector<16x16xbf16>, vector<16x16xbf16>, vector<16x16xf32> -> vector<16x16xf32>
    %16 = arith.addf %10, %15 : vector<16x16xf32>
    %c0_20 = arith.constant 0 : index
    %c0_21 = arith.constant 0 : index
    %c0_22 = arith.constant 0 : index
    %c4 = arith.constant 4 : index
    %17 = vector.load %arg1[%c0_20, %c0_21, %c0_22, %c4] : memref<1x3x16x24xbf16, #tpu.memory_space<vmem>>, vector<1x1x16x16xbf16>
    %18 = vector.shape_cast %17 : vector<1x1x16x16xbf16> to vector<16x16xbf16>
    %c3 = arith.constant 3 : index
    %c0_23 = arith.constant 0 : index
    %c0_24 = arith.constant 0 : index
    %19 = vector.load %arg2[%c3, %c0_23, %c0_24] : memref<9x16x16xbf16, #tpu.memory_space<vmem>>, vector<1x16x16xbf16>
    %20 = vector.shape_cast %19 : vector<1x16x16xbf16> to vector<16x16xbf16>
    %cst_25 = arith.constant dense<0.000000e+00> : vector<16x16xf32>
    %21 = tpu.matmul %20, %18, %cst_25 {dimension_numbers = #tpu.dot_dimension_numbers<[1], [0], [0], [1], [0, 0, 1, 1], [], []>} : vector<16x16xbf16>, vector<16x16xbf16>, vector<16x16xf32> -> vector<16x16xf32>
    %22 = arith.addf %16, %21 : vector<16x16xf32>
    %c0_26 = arith.constant 0 : index
    %c1_27 = arith.constant 1 : index
    %c0_28 = arith.constant 0 : index
    %c4_29 = arith.constant 4 : index
    %23 = vector.load %arg1[%c0_26, %c1_27, %c0_28, %c4_29] : memref<1x3x16x24xbf16, #tpu.memory_space<vmem>>, vector<1x1x16x16xbf16>
    %24 = vector.shape_cast %23 : vector<1x1x16x16xbf16> to vector<16x16xbf16>
    %c4_30 = arith.constant 4 : index
    %c0_31 = arith.constant 0 : index
    %c0_32 = arith.constant 0 : index
    %25 = vector.load %arg2[%c4_30, %c0_31, %c0_32] : memref<9x16x16xbf16, #tpu.memory_space<vmem>>, vector<1x16x16xbf16>
    %26 = vector.shape_cast %25 : vector<1x16x16xbf16> to vector<16x16xbf16>
    %cst_33 = arith.constant dense<0.000000e+00> : vector<16x16xf32>
    %27 = tpu.matmul %26, %24, %cst_33 {dimension_numbers = #tpu.dot_dimension_numbers<[1], [0], [0], [1], [0, 0, 1, 1], [], []>} : vector<16x16xbf16>, vector<16x16xbf16>, vector<16x16xf32> -> vector<16x16xf32>
    %28 = arith.addf %22, %27 : vector<16x16xf32>
    %c0_34 = arith.constant 0 : index
    %c2_35 = arith.constant 2 : index
    %c0_36 = arith.constant 0 : index
    %c4_37 = arith.constant 4 : index
    %29 = vector.load %arg1[%c0_34, %c2_35, %c0_36, %c4_37] : memref<1x3x16x24xbf16, #tpu.memory_space<vmem>>, vector<1x1x16x16xbf16>
    %30 = vector.shape_cast %29 : vector<1x1x16x16xbf16> to vector<16x16xbf16>
    %c5 = arith.constant 5 : index
    %c0_38 = arith.constant 0 : index
    %c0_39 = arith.constant 0 : index
    %31 = vector.load %arg2[%c5, %c0_38, %c0_39] : memref<9x16x16xbf16, #tpu.memory_space<vmem>>, vector<1x16x16xbf16>
    %32 = vector.shape_cast %31 : vector<1x16x16xbf16> to vector<16x16xbf16>
    %cst_40 = arith.constant dense<0.000000e+00> : vector<16x16xf32>
    %33 = tpu.matmul %32, %30, %cst_40 {dimension_numbers = #tpu.dot_dimension_numbers<[1], [0], [0], [1], [0, 0, 1, 1], [], []>} : vector<16x16xbf16>, vector<16x16xbf16>, vector<16x16xf32> -> vector<16x16xf32>
    %34 = arith.addf %28, %33 : vector<16x16xf32>
    %c0_41 = arith.constant 0 : index
    %c0_42 = arith.constant 0 : index
    %c0_43 = arith.constant 0 : index
    %c8 = arith.constant 8 : index
    %35 = vector.load %arg1[%c0_41, %c0_42, %c0_43, %c8] : memref<1x3x16x24xbf16, #tpu.memory_space<vmem>>, vector<1x1x16x16xbf16>
    %36 = vector.shape_cast %35 : vector<1x1x16x16xbf16> to vector<16x16xbf16>
    %c6 = arith.constant 6 : index
    %c0_44 = arith.constant 0 : index
    %c0_45 = arith.constant 0 : index
    %37 = vector.load %arg2[%c6, %c0_44, %c0_45] : memref<9x16x16xbf16, #tpu.memory_space<vmem>>, vector<1x16x16xbf16>
    %38 = vector.shape_cast %37 : vector<1x16x16xbf16> to vector<16x16xbf16>
    %cst_46 = arith.constant dense<0.000000e+00> : vector<16x16xf32>
    %39 = tpu.matmul %38, %36, %cst_46 {dimension_numbers = #tpu.dot_dimension_numbers<[1], [0], [0], [1], [0, 0, 1, 1], [], []>} : vector<16x16xbf16>, vector<16x16xbf16>, vector<16x16xf32> -> vector<16x16xf32>
    %40 = arith.addf %34, %39 : vector<16x16xf32>
    %c0_47 = arith.constant 0 : index
    %c1_48 = arith.constant 1 : index
    %c0_49 = arith.constant 0 : index
    %c8_50 = arith.constant 8 : index
    %41 = vector.load %arg1[%c0_47, %c1_48, %c0_49, %c8_50] : memref<1x3x16x24xbf16, #tpu.memory_space<vmem>>, vector<1x1x16x16xbf16>
    %42 = vector.shape_cast %41 : vector<1x1x16x16xbf16> to vector<16x16xbf16>
    %c7 = arith.constant 7 : index
    %c0_51 = arith.constant 0 : index
    %c0_52 = arith.constant 0 : index
    %43 = vector.load %arg2[%c7, %c0_51, %c0_52] : memref<9x16x16xbf16, #tpu.memory_space<vmem>>, vector<1x16x16xbf16>
    %44 = vector.shape_cast %43 : vector<1x16x16xbf16> to vector<16x16xbf16>
    %cst_53 = arith.constant dense<0.000000e+00> : vector<16x16xf32>
    %45 = tpu.matmul %44, %42, %cst_53 {dimension_numbers = #tpu.dot_dimension_numbers<[1], [0], [0], [1], [0, 0, 1, 1], [], []>} : vector<16x16xbf16>, vector<16x16xbf16>, vector<16x16xf32> -> vector<16x16xf32>
    %46 = arith.addf %40, %45 : vector<16x16xf32>
    %c0_54 = arith.constant 0 : index
    %c2_55 = arith.constant 2 : index
    %c0_56 = arith.constant 0 : index
    %c8_57 = arith.constant 8 : index
    %47 = vector.load %arg1[%c0_54, %c2_55, %c0_56, %c8_57] : memref<1x3x16x24xbf16, #tpu.memory_space<vmem>>, vector<1x1x16x16xbf16>
    %48 = vector.shape_cast %47 : vector<1x1x16x16xbf16> to vector<16x16xbf16>
    %c8_58 = arith.constant 8 : index
    %c0_59 = arith.constant 0 : index
    %c0_60 = arith.constant 0 : index
    %49 = vector.load %arg2[%c8_58, %c0_59, %c0_60] : memref<9x16x16xbf16, #tpu.memory_space<vmem>>, vector<1x16x16xbf16>
    %50 = vector.shape_cast %49 : vector<1x16x16xbf16> to vector<16x16xbf16>
    %cst_61 = arith.constant dense<0.000000e+00> : vector<16x16xf32>
    %51 = tpu.matmul %50, %48, %cst_61 {dimension_numbers = #tpu.dot_dimension_numbers<[1], [0], [0], [1], [0, 0, 1, 1], [], []>} : vector<16x16xbf16>, vector<16x16xbf16>, vector<16x16xf32> -> vector<16x16xf32>
    %52 = arith.addf %46, %51 : vector<16x16xf32>
    %c0_62 = arith.constant 0 : index
    %c0_63 = arith.constant 0 : index
    %53 = vector.load %arg3[%c0_62, %c0_63] : memref<16x1xf32, #tpu.memory_space<vmem>>, vector<16x1xf32>
    %54 = vector.broadcast %53 : vector<16x1xf32> to vector<16x16xf32>
    %55 = arith.mulf %52, %54 : vector<16x16xf32>
    %c0_64 = arith.constant 0 : index
    %c0_65 = arith.constant 0 : index
    %56 = vector.load %arg4[%c0_64, %c0_65] : memref<16x1xf32, #tpu.memory_space<vmem>>, vector<16x1xf32>
    %57 = vector.broadcast %56 : vector<16x1xf32> to vector<16x16xf32>
    %58 = arith.addf %55, %57 : vector<16x16xf32>
    %cst_66 = arith.constant 0.000000e+00 : f32
    %59 = vector.broadcast %cst_66 : f32 to vector<16x16xf32>
    %60 = arith.maximumf %58, %59 : vector<16x16xf32>
    %c0_67 = arith.constant 0 : index
    %c0_68 = arith.constant 0 : index
    %c0_69 = arith.constant 0 : index
    %61 = vector.load %arg5[%c0_67, %c0_68, %c0_69] : memref<1x16x16xbf16, #tpu.memory_space<vmem>>, vector<1x16x16xbf16>
    %62 = vector.shape_cast %61 : vector<1x16x16xbf16> to vector<16x16xbf16>
    %63 = arith.extf %62 : vector<16x16xbf16> to vector<16x16xf32>
    %64 = arith.addf %60, %63 : vector<16x16xf32>
    %65 = arith.truncf %64 : vector<16x16xf32> to vector<16x16xbf16>
    %c0_70 = arith.constant 0 : index
    %c0_71 = arith.constant 0 : index
    %c0_72 = arith.constant 0 : index
    %66 = vector.load %arg6[%c0_70, %c0_71, %c0_72] : memref<1x16x16xbf16, #tpu.memory_space<vmem>>, vector<1x16x16xbf16>
    %67 = vector.shape_cast %66 : vector<1x16x16xbf16> to vector<16x16xbf16>
    %68 = vector.shape_cast %65 : vector<16x16xbf16> to vector<1x16x16xbf16>
    tpu.vector_store %arg6[%c0_70, %c0_71, %c0_72], %68 {strides = array<i32>} : memref<1x16x16xbf16, #tpu.memory_space<vmem>>, vector<1x16x16xbf16>,
    return
  }
  func.func @transform_0(%arg0: i32) -> (i32, i32, i32, i32) {
    %c0_i32 = arith.constant 0 : i32
    %c0_i32_0 = arith.constant 0 : i32
    %c0_i32_1 = arith.constant 0 : i32
    %c0_i32_2 = arith.constant 0 : i32
    return %arg0, %c0_i32, %c0_i32_0, %c0_i32_1 : i32, i32, i32, i32
  }
  func.func @transform_1(%arg0: i32) -> (i32, i32, i32) {
    %c0_i32 = arith.constant 0 : i32
    %c0_i32_0 = arith.constant 0 : i32
    %c0_i32_1 = arith.constant 0 : i32
    %c0_i32_2 = arith.constant 0 : i32
    return %c0_i32, %c0_i32_0, %c0_i32_1 : i32, i32, i32
  }
  func.func @transform_2(%arg0: i32) -> (i32, i32) {
    %c0_i32 = arith.constant 0 : i32
    %c0_i32_0 = arith.constant 0 : i32
    %c0_i32_1 = arith.constant 0 : i32
    return %c0_i32, %c0_i32_0 : i32, i32
  }
  func.func @transform_3(%arg0: i32) -> (i32, i32) {
    %c0_i32 = arith.constant 0 : i32
    %c0_i32_0 = arith.constant 0 : i32
    %c0_i32_1 = arith.constant 0 : i32
    return %c0_i32, %c0_i32_0 : i32, i32
  }
  func.func @transform_4(%arg0: i32) -> (i32, i32, i32) {
    %c0_i32 = arith.constant 0 : i32
    %c0_i32_0 = arith.constant 0 : i32
    %c0_i32_1 = arith.constant 0 : i32
    return %arg0, %c0_i32, %c0_i32_0 : i32, i32, i32
  }
  func.func @transform_5(%arg0: i32) -> (i32, i32, i32) {
    %c0_i32 = arith.constant 0 : i32
    %c0_i32_0 = arith.constant 0 : i32
    %c0_i32_1 = arith.constant 0 : i32
    return %arg0, %c0_i32, %c0_i32_0 : i32, i32, i32
  }
}

module attributes {stable_mosaic.version = 11 : i64} {
  func.func @_linear_kernel(%arg0: i32, %arg1: memref<2x256xbf16, #tpu.memory_space<vmem>>, %arg2: memref<256x128xbf16, #tpu.memory_space<vmem>>, %arg3: memref<1x128xf32, #tpu.memory_space<vmem>>, %arg4: memref<2x128xbf16, #tpu.memory_space<vmem>>) attributes {dimension_semantics = [#tpu.dimension_semantics<parallel>], iteration_bounds = array<i64: 1>, scalar_prefetch = 0 : i64, scratch_operands = 0 : i64, tpu.core_type = #tpu.core_type<tc>, window_params = [{pipeline_mode = #tpu.pipeline_mode<synchronous>, transform_indices = @transform_0, window_bounds = array<i64: 2, 256>}, {transform_indices = @transform_1, window_bounds = array<i64: 256, 128>}, {transform_indices = @transform_2, window_bounds = array<i64: 1, 128>}, {transform_indices = @transform_3, window_bounds = array<i64: 2, 128>}]} {
    %c0 = arith.constant 0 : index
    %c0_0 = arith.constant 0 : index
    %0 = vector.load %arg1[%c0, %c0_0] : memref<2x256xbf16, #tpu.memory_space<vmem>>, vector<2x256xbf16>
    %c0_1 = arith.constant 0 : index
    %c0_2 = arith.constant 0 : index
    %1 = vector.load %arg2[%c0_1, %c0_2] : memref<256x128xbf16, #tpu.memory_space<vmem>>, vector<256x128xbf16>
    %cst = arith.constant dense<0.000000e+00> : vector<2x128xf32>
    %2 = tpu.matmul %0, %1, %cst {dimension_numbers = #tpu.dot_dimension_numbers<[1], [0], [0], [1], [0, 0, 1, 1], [], []>} : vector<2x256xbf16>, vector<256x128xbf16>, vector<2x128xf32> -> vector<2x128xf32>
    %c0_3 = arith.constant 0 : index
    %c0_4 = arith.constant 0 : index
    %3 = vector.load %arg3[%c0_3, %c0_4] : memref<1x128xf32, #tpu.memory_space<vmem>>, vector<1x128xf32>
    %4 = vector.broadcast %3 : vector<1x128xf32> to vector<2x128xf32>
    %5 = arith.addf %2, %4 : vector<2x128xf32>
    %cst_5 = arith.constant 0.000000e+00 : f32
    %6 = vector.broadcast %cst_5 : f32 to vector<2x128xf32>
    %7 = arith.maximumf %5, %6 : vector<2x128xf32>
    %8 = arith.truncf %7 : vector<2x128xf32> to vector<2x128xbf16>
    %c0_6 = arith.constant 0 : index
    %c0_7 = arith.constant 0 : index
    %9 = vector.load %arg4[%c0_6, %c0_7] : memref<2x128xbf16, #tpu.memory_space<vmem>>, vector<2x128xbf16>
    tpu.vector_store %arg4[%c0_6, %c0_7], %8 {strides = array<i32>} : memref<2x128xbf16, #tpu.memory_space<vmem>>, vector<2x128xbf16>,
    return
  }
  func.func @transform_0(%arg0: i32) -> (i32, i32) {
    %c0_i32 = arith.constant 0 : i32
    %c0_i32_0 = arith.constant 0 : i32
    %c0_i32_1 = arith.constant 0 : i32
    return %c0_i32, %c0_i32_0 : i32, i32
  }
  func.func @transform_1(%arg0: i32) -> (i32, i32) {
    %c0_i32 = arith.constant 0 : i32
    %c0_i32_0 = arith.constant 0 : i32
    return %c0_i32, %arg0 : i32, i32
  }
  func.func @transform_2(%arg0: i32) -> (i32, i32) {
    %c0_i32 = arith.constant 0 : i32
    %c0_i32_0 = arith.constant 0 : i32
    return %c0_i32, %arg0 : i32, i32
  }
  func.func @transform_3(%arg0: i32) -> (i32, i32) {
    %c0_i32 = arith.constant 0 : i32
    %c0_i32_0 = arith.constant 0 : i32
    return %c0_i32, %arg0 : i32, i32
  }
}

module attributes {stable_mosaic.version = 11 : i64} {
  func.func @_linear_kernel(%arg0: i32, %arg1: memref<2x32xbf16, #tpu.memory_space<vmem>>, %arg2: memref<32x128xbf16, #tpu.memory_space<vmem>>, %arg3: memref<1x128xf32, #tpu.memory_space<vmem>>, %arg4: memref<2x128xbf16, #tpu.memory_space<vmem>>) attributes {dimension_semantics = [#tpu.dimension_semantics<parallel>], iteration_bounds = array<i64: 2>, scalar_prefetch = 0 : i64, scratch_operands = 0 : i64, tpu.core_type = #tpu.core_type<tc>, window_params = [{pipeline_mode = #tpu.pipeline_mode<synchronous>, transform_indices = @transform_0, window_bounds = array<i64: 2, 32>}, {transform_indices = @transform_1, window_bounds = array<i64: 32, 128>}, {transform_indices = @transform_2, window_bounds = array<i64: 1, 128>}, {transform_indices = @transform_3, window_bounds = array<i64: 2, 128>}]} {
    %c0 = arith.constant 0 : index
    %c0_0 = arith.constant 0 : index
    %0 = vector.load %arg1[%c0, %c0_0] : memref<2x32xbf16, #tpu.memory_space<vmem>>, vector<2x32xbf16>
    %c0_1 = arith.constant 0 : index
    %c0_2 = arith.constant 0 : index
    %1 = vector.load %arg2[%c0_1, %c0_2] : memref<32x128xbf16, #tpu.memory_space<vmem>>, vector<32x128xbf16>
    %cst = arith.constant dense<0.000000e+00> : vector<2x128xf32>
    %2 = tpu.matmul %0, %1, %cst {dimension_numbers = #tpu.dot_dimension_numbers<[1], [0], [0], [1], [0, 0, 1, 1], [], []>} : vector<2x32xbf16>, vector<32x128xbf16>, vector<2x128xf32> -> vector<2x128xf32>
    %c0_3 = arith.constant 0 : index
    %c0_4 = arith.constant 0 : index
    %3 = vector.load %arg3[%c0_3, %c0_4] : memref<1x128xf32, #tpu.memory_space<vmem>>, vector<1x128xf32>
    %4 = vector.broadcast %3 : vector<1x128xf32> to vector<2x128xf32>
    %5 = arith.addf %2, %4 : vector<2x128xf32>
    %cst_5 = arith.constant 0.000000e+00 : f32
    %6 = vector.broadcast %cst_5 : f32 to vector<2x128xf32>
    %7 = arith.maximumf %5, %6 : vector<2x128xf32>
    %8 = arith.truncf %7 : vector<2x128xf32> to vector<2x128xbf16>
    %c0_6 = arith.constant 0 : index
    %c0_7 = arith.constant 0 : index
    %9 = vector.load %arg4[%c0_6, %c0_7] : memref<2x128xbf16, #tpu.memory_space<vmem>>, vector<2x128xbf16>
    tpu.vector_store %arg4[%c0_6, %c0_7], %8 {strides = array<i32>} : memref<2x128xbf16, #tpu.memory_space<vmem>>, vector<2x128xbf16>,
    return
  }
  func.func @transform_0(%arg0: i32) -> (i32, i32) {
    %c0_i32 = arith.constant 0 : i32
    %c0_i32_0 = arith.constant 0 : i32
    %c0_i32_1 = arith.constant 0 : i32
    return %c0_i32, %c0_i32_0 : i32, i32
  }
  func.func @transform_1(%arg0: i32) -> (i32, i32) {
    %c0_i32 = arith.constant 0 : i32
    %c0_i32_0 = arith.constant 0 : i32
    return %c0_i32, %arg0 : i32, i32
  }
  func.func @transform_2(%arg0: i32) -> (i32, i32) {
    %c0_i32 = arith.constant 0 : i32
    %c0_i32_0 = arith.constant 0 : i32
    return %c0_i32, %arg0 : i32, i32
  }
  func.func @transform_3(%arg0: i32) -> (i32, i32) {
    %c0_i32 = arith.constant 0 : i32
    %c0_i32_0 = arith.constant 0 : i32
    return %c0_i32, %arg0 : i32, i32
  }
}

module attributes {stable_mosaic.version = 11 : i64} {
  func.func @_conv_kernel(%arg0: i32, %arg1: memref<1x1x16x16xbf16, #tpu.memory_space<vmem>>, %arg2: memref<1x8x16xbf16, #tpu.memory_space<vmem>>, %arg3: memref<8x1xf32, #tpu.memory_space<vmem>>, %arg4: memref<8x1xf32, #tpu.memory_space<vmem>>, %arg5: memref<1x8x16xbf16, #tpu.memory_space<vmem>>) attributes {dimension_semantics = [#tpu.dimension_semantics<parallel>], iteration_bounds = array<i64: 2>, scalar_prefetch = 0 : i64, scratch_operands = 0 : i64, tpu.core_type = #tpu.core_type<tc>, window_params = [{transform_indices = @transform_0, window_bounds = array<i64: 1, 1, 16, 16>}, {pipeline_mode = #tpu.pipeline_mode<synchronous>, transform_indices = @transform_1, window_bounds = array<i64: 1, 8, 16>}, {pipeline_mode = #tpu.pipeline_mode<synchronous>, transform_indices = @transform_2, window_bounds = array<i64: 8, 1>}, {pipeline_mode = #tpu.pipeline_mode<synchronous>, transform_indices = @transform_3, window_bounds = array<i64: 8, 1>}, {transform_indices = @transform_4, window_bounds = array<i64: 1, 8, 16>}]} {
    %c0 = arith.constant 0 : index
    %c0_0 = arith.constant 0 : index
    %c0_1 = arith.constant 0 : index
    %c0_2 = arith.constant 0 : index
    %0 = vector.load %arg1[%c0, %c0_0, %c0_1, %c0_2] : memref<1x1x16x16xbf16, #tpu.memory_space<vmem>>, vector<1x1x16x16xbf16>
    %1 = vector.shape_cast %0 : vector<1x1x16x16xbf16> to vector<16x16xbf16>
    %c0_3 = arith.constant 0 : index
    %c0_4 = arith.constant 0 : index
    %c0_5 = arith.constant 0 : index
    %2 = vector.load %arg2[%c0_3, %c0_4, %c0_5] : memref<1x8x16xbf16, #tpu.memory_space<vmem>>, vector<1x8x16xbf16>
    %3 = vector.shape_cast %2 : vector<1x8x16xbf16> to vector<8x16xbf16>
    %cst = arith.constant dense<0.000000e+00> : vector<8x16xf32>
    %4 = tpu.matmul %3, %1, %cst {dimension_numbers = #tpu.dot_dimension_numbers<[1], [0], [0], [1], [0, 0, 1, 1], [], []>} : vector<8x16xbf16>, vector<16x16xbf16>, vector<8x16xf32> -> vector<8x16xf32>
    %c0_6 = arith.constant 0 : index
    %c0_7 = arith.constant 0 : index
    %5 = vector.load %arg3[%c0_6, %c0_7] : memref<8x1xf32, #tpu.memory_space<vmem>>, vector<8x1xf32>
    %6 = vector.broadcast %5 : vector<8x1xf32> to vector<8x16xf32>
    %7 = arith.mulf %4, %6 : vector<8x16xf32>
    %c0_8 = arith.constant 0 : index
    %c0_9 = arith.constant 0 : index
    %8 = vector.load %arg4[%c0_8, %c0_9] : memref<8x1xf32, #tpu.memory_space<vmem>>, vector<8x1xf32>
    %9 = vector.broadcast %8 : vector<8x1xf32> to vector<8x16xf32>
    %10 = arith.addf %7, %9 : vector<8x16xf32>
    %11 = arith.truncf %10 : vector<8x16xf32> to vector<8x16xbf16>
    %c0_10 = arith.constant 0 : index
    %c0_11 = arith.constant 0 : index
    %c0_12 = arith.constant 0 : index
    %12 = vector.load %arg5[%c0_10, %c0_11, %c0_12] : memref<1x8x16xbf16, #tpu.memory_space<vmem>>, vector<1x8x16xbf16>
    %13 = vector.shape_cast %12 : vector<1x8x16xbf16> to vector<8x16xbf16>
    %14 = vector.shape_cast %11 : vector<8x16xbf16> to vector<1x8x16xbf16>
    tpu.vector_store %arg5[%c0_10, %c0_11, %c0_12], %14 {strides = array<i32>} : memref<1x8x16xbf16, #tpu.memory_space<vmem>>, vector<1x8x16xbf16>,
    return
  }
  func.func @transform_0(%arg0: i32) -> (i32, i32, i32, i32) {
    %c0_i32 = arith.constant 0 : i32
    %c0_i32_0 = arith.constant 0 : i32
    %c0_i32_1 = arith.constant 0 : i32
    %c0_i32_2 = arith.constant 0 : i32
    return %arg0, %c0_i32, %c0_i32_0, %c0_i32_1 : i32, i32, i32, i32
  }
  func.func @transform_1(%arg0: i32) -> (i32, i32, i32) {
    %c0_i32 = arith.constant 0 : i32
    %c0_i32_0 = arith.constant 0 : i32
    %c0_i32_1 = arith.constant 0 : i32
    %c0_i32_2 = arith.constant 0 : i32
    return %c0_i32, %c0_i32_0, %c0_i32_1 : i32, i32, i32
  }
  func.func @transform_2(%arg0: i32) -> (i32, i32) {
    %c0_i32 = arith.constant 0 : i32
    %c0_i32_0 = arith.constant 0 : i32
    %c0_i32_1 = arith.constant 0 : i32
    return %c0_i32, %c0_i32_0 : i32, i32
  }
  func.func @transform_3(%arg0: i32) -> (i32, i32) {
    %c0_i32 = arith.constant 0 : i32
    %c0_i32_0 = arith.constant 0 : i32
    %c0_i32_1 = arith.constant 0 : i32
    return %c0_i32, %c0_i32_0 : i32, i32
  }
  func.func @transform_4(%arg0: i32) -> (i32, i32, i32) {
    %c0_i32 = arith.constant 0 : i32
    %c0_i32_0 = arith.constant 0 : i32
    %c0_i32_1 = arith.constant 0 : i32
    return %arg0, %c0_i32, %c0_i32_0 : i32, i32, i32
  }
}

module attributes {stable_mosaic.version = 11 : i64} {
  func.func @_conv_kernel(%arg0: i32, %arg1: memref<1x3x16x24xbf16, #tpu.memory_space<vmem>>, %arg2: memref<9x8x16xbf16, #tpu.memory_space<vmem>>, %arg3: memref<8x1xf32, #tpu.memory_space<vmem>>, %arg4: memref<8x1xf32, #tpu.memory_space<vmem>>, %arg5: memref<1x8x16xbf16, #tpu.memory_space<vmem>>) attributes {dimension_semantics = [#tpu.dimension_semantics<parallel>], iteration_bounds = array<i64: 2>, scalar_prefetch = 0 : i64, scratch_operands = 0 : i64, tpu.core_type = #tpu.core_type<tc>, window_params = [{transform_indices = @transform_0, window_bounds = array<i64: 1, 3, 16, 24>}, {pipeline_mode = #tpu.pipeline_mode<synchronous>, transform_indices = @transform_1, window_bounds = array<i64: 9, 8, 16>}, {pipeline_mode = #tpu.pipeline_mode<synchronous>, transform_indices = @transform_2, window_bounds = array<i64: 8, 1>}, {pipeline_mode = #tpu.pipeline_mode<synchronous>, transform_indices = @transform_3, window_bounds = array<i64: 8, 1>}, {transform_indices = @transform_4, window_bounds = array<i64: 1, 8, 16>}]} {
    %c0 = arith.constant 0 : index
    %c0_0 = arith.constant 0 : index
    %c0_1 = arith.constant 0 : index
    %c0_2 = arith.constant 0 : index
    %0 = vector.load %arg1[%c0, %c0_0, %c0_1, %c0_2] : memref<1x3x16x24xbf16, #tpu.memory_space<vmem>>, vector<1x1x16x16xbf16>
    %1 = vector.shape_cast %0 : vector<1x1x16x16xbf16> to vector<16x16xbf16>
    %c0_3 = arith.constant 0 : index
    %c0_4 = arith.constant 0 : index
    %c0_5 = arith.constant 0 : index
    %2 = vector.load %arg2[%c0_3, %c0_4, %c0_5] : memref<9x8x16xbf16, #tpu.memory_space<vmem>>, vector<1x8x16xbf16>
    %3 = vector.shape_cast %2 : vector<1x8x16xbf16> to vector<8x16xbf16>
    %cst = arith.constant dense<0.000000e+00> : vector<8x16xf32>
    %4 = tpu.matmul %3, %1, %cst {dimension_numbers = #tpu.dot_dimension_numbers<[1], [0], [0], [1], [0, 0, 1, 1], [], []>} : vector<8x16xbf16>, vector<16x16xbf16>, vector<8x16xf32> -> vector<8x16xf32>
    %c0_6 = arith.constant 0 : index
    %c1 = arith.constant 1 : index
    %c0_7 = arith.constant 0 : index
    %c0_8 = arith.constant 0 : index
    %5 = vector.load %arg1[%c0_6, %c1, %c0_7, %c0_8] : memref<1x3x16x24xbf16, #tpu.memory_space<vmem>>, vector<1x1x16x16xbf16>
    %6 = vector.shape_cast %5 : vector<1x1x16x16xbf16> to vector<16x16xbf16>
    %c1_9 = arith.constant 1 : index
    %c0_10 = arith.constant 0 : index
    %c0_11 = arith.constant 0 : index
    %7 = vector.load %arg2[%c1_9, %c0_10, %c0_11] : memref<9x8x16xbf16, #tpu.memory_space<vmem>>, vector<1x8x16xbf16>
    %8 = vector.shape_cast %7 : vector<1x8x16xbf16> to vector<8x16xbf16>
    %cst_12 = arith.constant dense<0.000000e+00> : vector<8x16xf32>
    %9 = tpu.matmul %8, %6, %cst_12 {dimension_numbers = #tpu.dot_dimension_numbers<[1], [0], [0], [1], [0, 0, 1, 1], [], []>} : vector<8x16xbf16>, vector<16x16xbf16>, vector<8x16xf32> -> vector<8x16xf32>
    %10 = arith.addf %4, %9 : vector<8x16xf32>
    %c0_13 = arith.constant 0 : index
    %c2 = arith.constant 2 : index
    %c0_14 = arith.constant 0 : index
    %c0_15 = arith.constant 0 : index
    %11 = vector.load %arg1[%c0_13, %c2, %c0_14, %c0_15] : memref<1x3x16x24xbf16, #tpu.memory_space<vmem>>, vector<1x1x16x16xbf16>
    %12 = vector.shape_cast %11 : vector<1x1x16x16xbf16> to vector<16x16xbf16>
    %c2_16 = arith.constant 2 : index
    %c0_17 = arith.constant 0 : index
    %c0_18 = arith.constant 0 : index
    %13 = vector.load %arg2[%c2_16, %c0_17, %c0_18] : memref<9x8x16xbf16, #tpu.memory_space<vmem>>, vector<1x8x16xbf16>
    %14 = vector.shape_cast %13 : vector<1x8x16xbf16> to vector<8x16xbf16>
    %cst_19 = arith.constant dense<0.000000e+00> : vector<8x16xf32>
    %15 = tpu.matmul %14, %12, %cst_19 {dimension_numbers = #tpu.dot_dimension_numbers<[1], [0], [0], [1], [0, 0, 1, 1], [], []>} : vector<8x16xbf16>, vector<16x16xbf16>, vector<8x16xf32> -> vector<8x16xf32>
    %16 = arith.addf %10, %15 : vector<8x16xf32>
    %c0_20 = arith.constant 0 : index
    %c0_21 = arith.constant 0 : index
    %c0_22 = arith.constant 0 : index
    %c4 = arith.constant 4 : index
    %17 = vector.load %arg1[%c0_20, %c0_21, %c0_22, %c4] : memref<1x3x16x24xbf16, #tpu.memory_space<vmem>>, vector<1x1x16x16xbf16>
    %18 = vector.shape_cast %17 : vector<1x1x16x16xbf16> to vector<16x16xbf16>
    %c3 = arith.constant 3 : index
    %c0_23 = arith.constant 0 : index
    %c0_24 = arith.constant 0 : index
    %19 = vector.load %arg2[%c3, %c0_23, %c0_24] : memref<9x8x16xbf16, #tpu.memory_space<vmem>>, vector<1x8x16xbf16>
    %20 = vector.shape_cast %19 : vector<1x8x16xbf16> to vector<8x16xbf16>
    %cst_25 = arith.constant dense<0.000000e+00> : vector<8x16xf32>
    %21 = tpu.matmul %20, %18, %cst_25 {dimension_numbers = #tpu.dot_dimension_numbers<[1], [0], [0], [1], [0, 0, 1, 1], [], []>} : vector<8x16xbf16>, vector<16x16xbf16>, vector<8x16xf32> -> vector<8x16xf32>
    %22 = arith.addf %16, %21 : vector<8x16xf32>
    %c0_26 = arith.constant 0 : index
    %c1_27 = arith.constant 1 : index
    %c0_28 = arith.constant 0 : index
    %c4_29 = arith.constant 4 : index
    %23 = vector.load %arg1[%c0_26, %c1_27, %c0_28, %c4_29] : memref<1x3x16x24xbf16, #tpu.memory_space<vmem>>, vector<1x1x16x16xbf16>
    %24 = vector.shape_cast %23 : vector<1x1x16x16xbf16> to vector<16x16xbf16>
    %c4_30 = arith.constant 4 : index
    %c0_31 = arith.constant 0 : index
    %c0_32 = arith.constant 0 : index
    %25 = vector.load %arg2[%c4_30, %c0_31, %c0_32] : memref<9x8x16xbf16, #tpu.memory_space<vmem>>, vector<1x8x16xbf16>
    %26 = vector.shape_cast %25 : vector<1x8x16xbf16> to vector<8x16xbf16>
    %cst_33 = arith.constant dense<0.000000e+00> : vector<8x16xf32>
    %27 = tpu.matmul %26, %24, %cst_33 {dimension_numbers = #tpu.dot_dimension_numbers<[1], [0], [0], [1], [0, 0, 1, 1], [], []>} : vector<8x16xbf16>, vector<16x16xbf16>, vector<8x16xf32> -> vector<8x16xf32>
    %28 = arith.addf %22, %27 : vector<8x16xf32>
    %c0_34 = arith.constant 0 : index
    %c2_35 = arith.constant 2 : index
    %c0_36 = arith.constant 0 : index
    %c4_37 = arith.constant 4 : index
    %29 = vector.load %arg1[%c0_34, %c2_35, %c0_36, %c4_37] : memref<1x3x16x24xbf16, #tpu.memory_space<vmem>>, vector<1x1x16x16xbf16>
    %30 = vector.shape_cast %29 : vector<1x1x16x16xbf16> to vector<16x16xbf16>
    %c5 = arith.constant 5 : index
    %c0_38 = arith.constant 0 : index
    %c0_39 = arith.constant 0 : index
    %31 = vector.load %arg2[%c5, %c0_38, %c0_39] : memref<9x8x16xbf16, #tpu.memory_space<vmem>>, vector<1x8x16xbf16>
    %32 = vector.shape_cast %31 : vector<1x8x16xbf16> to vector<8x16xbf16>
    %cst_40 = arith.constant dense<0.000000e+00> : vector<8x16xf32>
    %33 = tpu.matmul %32, %30, %cst_40 {dimension_numbers = #tpu.dot_dimension_numbers<[1], [0], [0], [1], [0, 0, 1, 1], [], []>} : vector<8x16xbf16>, vector<16x16xbf16>, vector<8x16xf32> -> vector<8x16xf32>
    %34 = arith.addf %28, %33 : vector<8x16xf32>
    %c0_41 = arith.constant 0 : index
    %c0_42 = arith.constant 0 : index
    %c0_43 = arith.constant 0 : index
    %c8 = arith.constant 8 : index
    %35 = vector.load %arg1[%c0_41, %c0_42, %c0_43, %c8] : memref<1x3x16x24xbf16, #tpu.memory_space<vmem>>, vector<1x1x16x16xbf16>
    %36 = vector.shape_cast %35 : vector<1x1x16x16xbf16> to vector<16x16xbf16>
    %c6 = arith.constant 6 : index
    %c0_44 = arith.constant 0 : index
    %c0_45 = arith.constant 0 : index
    %37 = vector.load %arg2[%c6, %c0_44, %c0_45] : memref<9x8x16xbf16, #tpu.memory_space<vmem>>, vector<1x8x16xbf16>
    %38 = vector.shape_cast %37 : vector<1x8x16xbf16> to vector<8x16xbf16>
    %cst_46 = arith.constant dense<0.000000e+00> : vector<8x16xf32>
    %39 = tpu.matmul %38, %36, %cst_46 {dimension_numbers = #tpu.dot_dimension_numbers<[1], [0], [0], [1], [0, 0, 1, 1], [], []>} : vector<8x16xbf16>, vector<16x16xbf16>, vector<8x16xf32> -> vector<8x16xf32>
    %40 = arith.addf %34, %39 : vector<8x16xf32>
    %c0_47 = arith.constant 0 : index
    %c1_48 = arith.constant 1 : index
    %c0_49 = arith.constant 0 : index
    %c8_50 = arith.constant 8 : index
    %41 = vector.load %arg1[%c0_47, %c1_48, %c0_49, %c8_50] : memref<1x3x16x24xbf16, #tpu.memory_space<vmem>>, vector<1x1x16x16xbf16>
    %42 = vector.shape_cast %41 : vector<1x1x16x16xbf16> to vector<16x16xbf16>
    %c7 = arith.constant 7 : index
    %c0_51 = arith.constant 0 : index
    %c0_52 = arith.constant 0 : index
    %43 = vector.load %arg2[%c7, %c0_51, %c0_52] : memref<9x8x16xbf16, #tpu.memory_space<vmem>>, vector<1x8x16xbf16>
    %44 = vector.shape_cast %43 : vector<1x8x16xbf16> to vector<8x16xbf16>
    %cst_53 = arith.constant dense<0.000000e+00> : vector<8x16xf32>
    %45 = tpu.matmul %44, %42, %cst_53 {dimension_numbers = #tpu.dot_dimension_numbers<[1], [0], [0], [1], [0, 0, 1, 1], [], []>} : vector<8x16xbf16>, vector<16x16xbf16>, vector<8x16xf32> -> vector<8x16xf32>
    %46 = arith.addf %40, %45 : vector<8x16xf32>
    %c0_54 = arith.constant 0 : index
    %c2_55 = arith.constant 2 : index
    %c0_56 = arith.constant 0 : index
    %c8_57 = arith.constant 8 : index
    %47 = vector.load %arg1[%c0_54, %c2_55, %c0_56, %c8_57] : memref<1x3x16x24xbf16, #tpu.memory_space<vmem>>, vector<1x1x16x16xbf16>
    %48 = vector.shape_cast %47 : vector<1x1x16x16xbf16> to vector<16x16xbf16>
    %c8_58 = arith.constant 8 : index
    %c0_59 = arith.constant 0 : index
    %c0_60 = arith.constant 0 : index
    %49 = vector.load %arg2[%c8_58, %c0_59, %c0_60] : memref<9x8x16xbf16, #tpu.memory_space<vmem>>, vector<1x8x16xbf16>
    %50 = vector.shape_cast %49 : vector<1x8x16xbf16> to vector<8x16xbf16>
    %cst_61 = arith.constant dense<0.000000e+00> : vector<8x16xf32>
    %51 = tpu.matmul %50, %48, %cst_61 {dimension_numbers = #tpu.dot_dimension_numbers<[1], [0], [0], [1], [0, 0, 1, 1], [], []>} : vector<8x16xbf16>, vector<16x16xbf16>, vector<8x16xf32> -> vector<8x16xf32>
    %52 = arith.addf %46, %51 : vector<8x16xf32>
    %c0_62 = arith.constant 0 : index
    %c0_63 = arith.constant 0 : index
    %53 = vector.load %arg3[%c0_62, %c0_63] : memref<8x1xf32, #tpu.memory_space<vmem>>, vector<8x1xf32>
    %54 = vector.broadcast %53 : vector<8x1xf32> to vector<8x16xf32>
    %55 = arith.mulf %52, %54 : vector<8x16xf32>
    %c0_64 = arith.constant 0 : index
    %c0_65 = arith.constant 0 : index
    %56 = vector.load %arg4[%c0_64, %c0_65] : memref<8x1xf32, #tpu.memory_space<vmem>>, vector<8x1xf32>
    %57 = vector.broadcast %56 : vector<8x1xf32> to vector<8x16xf32>
    %58 = arith.addf %55, %57 : vector<8x16xf32>
    %cst_66 = arith.constant 0.000000e+00 : f32
    %59 = vector.broadcast %cst_66 : f32 to vector<8x16xf32>
    %60 = arith.maximumf %58, %59 : vector<8x16xf32>
    %61 = arith.truncf %60 : vector<8x16xf32> to vector<8x16xbf16>
    %c0_67 = arith.constant 0 : index
    %c0_68 = arith.constant 0 : index
    %c0_69 = arith.constant 0 : index
    %62 = vector.load %arg5[%c0_67, %c0_68, %c0_69] : memref<1x8x16xbf16, #tpu.memory_space<vmem>>, vector<1x8x16xbf16>
    %63 = vector.shape_cast %62 : vector<1x8x16xbf16> to vector<8x16xbf16>
    %64 = vector.shape_cast %61 : vector<8x16xbf16> to vector<1x8x16xbf16>
    tpu.vector_store %arg5[%c0_67, %c0_68, %c0_69], %64 {strides = array<i32>} : memref<1x8x16xbf16, #tpu.memory_space<vmem>>, vector<1x8x16xbf16>,
    return
  }
  func.func @transform_0(%arg0: i32) -> (i32, i32, i32, i32) {
    %c0_i32 = arith.constant 0 : i32
    %c0_i32_0 = arith.constant 0 : i32
    %c0_i32_1 = arith.constant 0 : i32
    %c0_i32_2 = arith.constant 0 : i32
    return %arg0, %c0_i32, %c0_i32_0, %c0_i32_1 : i32, i32, i32, i32
  }
  func.func @transform_1(%arg0: i32) -> (i32, i32, i32) {
    %c0_i32 = arith.constant 0 : i32
    %c0_i32_0 = arith.constant 0 : i32
    %c0_i32_1 = arith.constant 0 : i32
    %c0_i32_2 = arith.constant 0 : i32
    return %c0_i32, %c0_i32_0, %c0_i32_1 : i32, i32, i32
  }
  func.func @transform_2(%arg0: i32) -> (i32, i32) {
    %c0_i32 = arith.constant 0 : i32
    %c0_i32_0 = arith.constant 0 : i32
    %c0_i32_1 = arith.constant 0 : i32
    return %c0_i32, %c0_i32_0 : i32, i32
  }
  func.func @transform_3(%arg0: i32) -> (i32, i32) {
    %c0_i32 = arith.constant 0 : i32
    %c0_i32_0 = arith.constant 0 : i32
    %c0_i32_1 = arith.constant 0 : i32
    return %c0_i32, %c0_i32_0 : i32, i32
  }
  func.func @transform_4(%arg0: i32) -> (i32, i32, i32) {
    %c0_i32 = arith.constant 0 : i32
    %c0_i32_0 = arith.constant 0 : i32
    %c0_i32_1 = arith.constant 0 : i32
    return %arg0, %c0_i32, %c0_i32_0 : i32, i32, i32
  }
}

module attributes {stable_mosaic.version = 11 : i64} {
  func.func @_conv_kernel(%arg0: i32, %arg1: memref<1x1x8x16xbf16, #tpu.memory_space<vmem>>, %arg2: memref<1x8x8xbf16, #tpu.memory_space<vmem>>, %arg3: memref<8x1xf32, #tpu.memory_space<vmem>>, %arg4: memref<8x1xf32, #tpu.memory_space<vmem>>, %arg5: memref<1x8x16xbf16, #tpu.memory_space<vmem>>) attributes {dimension_semantics = [#tpu.dimension_semantics<parallel>], iteration_bounds = array<i64: 2>, scalar_prefetch = 0 : i64, scratch_operands = 0 : i64, tpu.core_type = #tpu.core_type<tc>, window_params = [{transform_indices = @transform_0, window_bounds = array<i64: 1, 1, 8, 16>}, {pipeline_mode = #tpu.pipeline_mode<synchronous>, transform_indices = @transform_1, window_bounds = array<i64: 1, 8, 8>}, {pipeline_mode = #tpu.pipeline_mode<synchronous>, transform_indices = @transform_2, window_bounds = array<i64: 8, 1>}, {pipeline_mode = #tpu.pipeline_mode<synchronous>, transform_indices = @transform_3, window_bounds = array<i64: 8, 1>}, {transform_indices = @transform_4, window_bounds = array<i64: 1, 8, 16>}]} {
    %c0 = arith.constant 0 : index
    %c0_0 = arith.constant 0 : index
    %c0_1 = arith.constant 0 : index
    %c0_2 = arith.constant 0 : index
    %0 = vector.load %arg1[%c0, %c0_0, %c0_1, %c0_2] : memref<1x1x8x16xbf16, #tpu.memory_space<vmem>>, vector<1x1x8x16xbf16>
    %1 = vector.shape_cast %0 : vector<1x1x8x16xbf16> to vector<8x16xbf16>
    %c0_3 = arith.constant 0 : index
    %c0_4 = arith.constant 0 : index
    %c0_5 = arith.constant 0 : index
    %2 = vector.load %arg2[%c0_3, %c0_4, %c0_5] : memref<1x8x8xbf16, #tpu.memory_space<vmem>>, vector<1x8x8xbf16>
    %3 = vector.shape_cast %2 : vector<1x8x8xbf16> to vector<8x8xbf16>
    %cst = arith.constant dense<0.000000e+00> : vector<8x16xf32>
    %4 = tpu.matmul %3, %1, %cst {dimension_numbers = #tpu.dot_dimension_numbers<[1], [0], [0], [1], [0, 0, 1, 1], [], []>} : vector<8x8xbf16>, vector<8x16xbf16>, vector<8x16xf32> -> vector<8x16xf32>
    %c0_6 = arith.constant 0 : index
    %c0_7 = arith.constant 0 : index
    %5 = vector.load %arg3[%c0_6, %c0_7] : memref<8x1xf32, #tpu.memory_space<vmem>>, vector<8x1xf32>
    %6 = vector.broadcast %5 : vector<8x1xf32> to vector<8x16xf32>
    %7 = arith.mulf %4, %6 : vector<8x16xf32>
    %c0_8 = arith.constant 0 : index
    %c0_9 = arith.constant 0 : index
    %8 = vector.load %arg4[%c0_8, %c0_9] : memref<8x1xf32, #tpu.memory_space<vmem>>, vector<8x1xf32>
    %9 = vector.broadcast %8 : vector<8x1xf32> to vector<8x16xf32>
    %10 = arith.addf %7, %9 : vector<8x16xf32>
    %cst_10 = arith.constant 0.000000e+00 : f32
    %11 = vector.broadcast %cst_10 : f32 to vector<8x16xf32>
    %12 = arith.maximumf %10, %11 : vector<8x16xf32>
    %13 = arith.truncf %12 : vector<8x16xf32> to vector<8x16xbf16>
    %c0_11 = arith.constant 0 : index
    %c0_12 = arith.constant 0 : index
    %c0_13 = arith.constant 0 : index
    %14 = vector.load %arg5[%c0_11, %c0_12, %c0_13] : memref<1x8x16xbf16, #tpu.memory_space<vmem>>, vector<1x8x16xbf16>
    %15 = vector.shape_cast %14 : vector<1x8x16xbf16> to vector<8x16xbf16>
    %16 = vector.shape_cast %13 : vector<8x16xbf16> to vector<1x8x16xbf16>
    tpu.vector_store %arg5[%c0_11, %c0_12, %c0_13], %16 {strides = array<i32>} : memref<1x8x16xbf16, #tpu.memory_space<vmem>>, vector<1x8x16xbf16>,
    return
  }
  func.func @transform_0(%arg0: i32) -> (i32, i32, i32, i32) {
    %c0_i32 = arith.constant 0 : i32
    %c0_i32_0 = arith.constant 0 : i32
    %c0_i32_1 = arith.constant 0 : i32
    %c0_i32_2 = arith.constant 0 : i32
    return %arg0, %c0_i32, %c0_i32_0, %c0_i32_1 : i32, i32, i32, i32
  }
  func.func @transform_1(%arg0: i32) -> (i32, i32, i32) {
    %c0_i32 = arith.constant 0 : i32
    %c0_i32_0 = arith.constant 0 : i32
    %c0_i32_1 = arith.constant 0 : i32
    %c0_i32_2 = arith.constant 0 : i32
    return %c0_i32, %c0_i32_0, %c0_i32_1 : i32, i32, i32
  }
  func.func @transform_2(%arg0: i32) -> (i32, i32) {
    %c0_i32 = arith.constant 0 : i32
    %c0_i32_0 = arith.constant 0 : i32
    %c0_i32_1 = arith.constant 0 : i32
    return %c0_i32, %c0_i32_0 : i32, i32
  }
  func.func @transform_3(%arg0: i32) -> (i32, i32) {
    %c0_i32 = arith.constant 0 : i32
    %c0_i32_0 = arith.constant 0 : i32
    %c0_i32_1 = arith.constant 0 : i32
    return %c0_i32, %c0_i32_0 : i32, i32
  }
  func.func @transform_4(%arg0: i32) -> (i32, i32, i32) {
    %c0_i32 = arith.constant 0 : i32
    %c0_i32_0 = arith.constant 0 : i32
    %c0_i32_1 = arith.constant 0 : i32
    return %arg0, %c0_i32, %c0_i32_0 : i32, i32, i32
  }
}

module attributes {stable_mosaic.version = 11 : i64} {
  func.func @_conv_kernel(%arg0: i32, %arg1: memref<1x1x8x20xbf16, #tpu.memory_space<vmem>>, %arg2: memref<2x8x8xbf16, #tpu.memory_space<vmem>>, %arg3: memref<8x1xf32, #tpu.memory_space<vmem>>, %arg4: memref<8x1xf32, #tpu.memory_space<vmem>>, %arg5: memref<1x8x16xbf16, #tpu.memory_space<vmem>>) attributes {dimension_semantics = [#tpu.dimension_semantics<parallel>], iteration_bounds = array<i64: 2>, scalar_prefetch = 0 : i64, scratch_operands = 0 : i64, tpu.core_type = #tpu.core_type<tc>, window_params = [{transform_indices = @transform_0, window_bounds = array<i64: 1, 1, 8, 20>}, {pipeline_mode = #tpu.pipeline_mode<synchronous>, transform_indices = @transform_1, window_bounds = array<i64: 2, 8, 8>}, {pipeline_mode = #tpu.pipeline_mode<synchronous>, transform_indices = @transform_2, window_bounds = array<i64: 8, 1>}, {pipeline_mode = #tpu.pipeline_mode<synchronous>, transform_indices = @transform_3, window_bounds = array<i64: 8, 1>}, {transform_indices = @transform_4, window_bounds = array<i64: 1, 8, 16>}]} {
    %c0 = arith.constant 0 : index
    %c0_0 = arith.constant 0 : index
    %c0_1 = arith.constant 0 : index
    %c0_2 = arith.constant 0 : index
    %0 = vector.load %arg1[%c0, %c0_0, %c0_1, %c0_2] : memref<1x1x8x20xbf16, #tpu.memory_space<vmem>>, vector<1x1x8x16xbf16>
    %1 = vector.shape_cast %0 : vector<1x1x8x16xbf16> to vector<8x16xbf16>
    %c0_3 = arith.constant 0 : index
    %c0_4 = arith.constant 0 : index
    %c0_5 = arith.constant 0 : index
    %2 = vector.load %arg2[%c0_3, %c0_4, %c0_5] : memref<2x8x8xbf16, #tpu.memory_space<vmem>>, vector<1x8x8xbf16>
    %3 = vector.shape_cast %2 : vector<1x8x8xbf16> to vector<8x8xbf16>
    %cst = arith.constant dense<0.000000e+00> : vector<8x16xf32>
    %4 = tpu.matmul %3, %1, %cst {dimension_numbers = #tpu.dot_dimension_numbers<[1], [0], [0], [1], [0, 0, 1, 1], [], []>} : vector<8x8xbf16>, vector<8x16xbf16>, vector<8x16xf32> -> vector<8x16xf32>
    %c0_6 = arith.constant 0 : index
    %c0_7 = arith.constant 0 : index
    %c0_8 = arith.constant 0 : index
    %c4 = arith.constant 4 : index
    %5 = vector.load %arg1[%c0_6, %c0_7, %c0_8, %c4] : memref<1x1x8x20xbf16, #tpu.memory_space<vmem>>, vector<1x1x8x16xbf16>
    %6 = vector.shape_cast %5 : vector<1x1x8x16xbf16> to vector<8x16xbf16>
    %c1 = arith.constant 1 : index
    %c0_9 = arith.constant 0 : index
    %c0_10 = arith.constant 0 : index
    %7 = vector.load %arg2[%c1, %c0_9, %c0_10] : memref<2x8x8xbf16, #tpu.memory_space<vmem>>, vector<1x8x8xbf16>
    %8 = vector.shape_cast %7 : vector<1x8x8xbf16> to vector<8x8xbf16>
    %cst_11 = arith.constant dense<0.000000e+00> : vector<8x16xf32>
    %9 = tpu.matmul %8, %6, %cst_11 {dimension_numbers = #tpu.dot_dimension_numbers<[1], [0], [0], [1], [0, 0, 1, 1], [], []>} : vector<8x8xbf16>, vector<8x16xbf16>, vector<8x16xf32> -> vector<8x16xf32>
    %10 = arith.addf %4, %9 : vector<8x16xf32>
    %c0_12 = arith.constant 0 : index
    %c0_13 = arith.constant 0 : index
    %11 = vector.load %arg3[%c0_12, %c0_13] : memref<8x1xf32, #tpu.memory_space<vmem>>, vector<8x1xf32>
    %12 = vector.broadcast %11 : vector<8x1xf32> to vector<8x16xf32>
    %13 = arith.mulf %10, %12 : vector<8x16xf32>
    %c0_14 = arith.constant 0 : index
    %c0_15 = arith.constant 0 : index
    %14 = vector.load %arg4[%c0_14, %c0_15] : memref<8x1xf32, #tpu.memory_space<vmem>>, vector<8x1xf32>
    %15 = vector.broadcast %14 : vector<8x1xf32> to vector<8x16xf32>
    %16 = arith.addf %13, %15 : vector<8x16xf32>
    %cst_16 = arith.constant 0.000000e+00 : f32
    %17 = vector.broadcast %cst_16 : f32 to vector<8x16xf32>
    %18 = arith.maximumf %16, %17 : vector<8x16xf32>
    %19 = arith.truncf %18 : vector<8x16xf32> to vector<8x16xbf16>
    %c0_17 = arith.constant 0 : index
    %c0_18 = arith.constant 0 : index
    %c0_19 = arith.constant 0 : index
    %20 = vector.load %arg5[%c0_17, %c0_18, %c0_19] : memref<1x8x16xbf16, #tpu.memory_space<vmem>>, vector<1x8x16xbf16>
    %21 = vector.shape_cast %20 : vector<1x8x16xbf16> to vector<8x16xbf16>
    %22 = vector.shape_cast %19 : vector<8x16xbf16> to vector<1x8x16xbf16>
    tpu.vector_store %arg5[%c0_17, %c0_18, %c0_19], %22 {strides = array<i32>} : memref<1x8x16xbf16, #tpu.memory_space<vmem>>, vector<1x8x16xbf16>,
    return
  }
  func.func @transform_0(%arg0: i32) -> (i32, i32, i32, i32) {
    %c0_i32 = arith.constant 0 : i32
    %c0_i32_0 = arith.constant 0 : i32
    %c0_i32_1 = arith.constant 0 : i32
    %c0_i32_2 = arith.constant 0 : i32
    return %arg0, %c0_i32, %c0_i32_0, %c0_i32_1 : i32, i32, i32, i32
  }
  func.func @transform_1(%arg0: i32) -> (i32, i32, i32) {
    %c0_i32 = arith.constant 0 : i32
    %c0_i32_0 = arith.constant 0 : i32
    %c0_i32_1 = arith.constant 0 : i32
    %c0_i32_2 = arith.constant 0 : i32
    return %c0_i32, %c0_i32_0, %c0_i32_1 : i32, i32, i32
  }
  func.func @transform_2(%arg0: i32) -> (i32, i32) {
    %c0_i32 = arith.constant 0 : i32
    %c0_i32_0 = arith.constant 0 : i32
    %c0_i32_1 = arith.constant 0 : i32
    return %c0_i32, %c0_i32_0 : i32, i32
  }
  func.func @transform_3(%arg0: i32) -> (i32, i32) {
    %c0_i32 = arith.constant 0 : i32
    %c0_i32_0 = arith.constant 0 : i32
    %c0_i32_1 = arith.constant 0 : i32
    return %c0_i32, %c0_i32_0 : i32, i32
  }
  func.func @transform_4(%arg0: i32) -> (i32, i32, i32) {
    %c0_i32 = arith.constant 0 : i32
    %c0_i32_0 = arith.constant 0 : i32
    %c0_i32_1 = arith.constant 0 : i32
    return %arg0, %c0_i32, %c0_i32_0 : i32, i32, i32
  }
}

module attributes {stable_mosaic.version = 11 : i64} {
  func.func @_conv_kernel(%arg0: i32, %arg1: memref<1x2x8x16xbf16, #tpu.memory_space<vmem>>, %arg2: memref<2x8x8xbf16, #tpu.memory_space<vmem>>, %arg3: memref<8x1xf32, #tpu.memory_space<vmem>>, %arg4: memref<8x1xf32, #tpu.memory_space<vmem>>, %arg5: memref<1x8x16xbf16, #tpu.memory_space<vmem>>) attributes {dimension_semantics = [#tpu.dimension_semantics<parallel>], iteration_bounds = array<i64: 2>, scalar_prefetch = 0 : i64, scratch_operands = 0 : i64, tpu.core_type = #tpu.core_type<tc>, window_params = [{transform_indices = @transform_0, window_bounds = array<i64: 1, 2, 8, 16>}, {pipeline_mode = #tpu.pipeline_mode<synchronous>, transform_indices = @transform_1, window_bounds = array<i64: 2, 8, 8>}, {pipeline_mode = #tpu.pipeline_mode<synchronous>, transform_indices = @transform_2, window_bounds = array<i64: 8, 1>}, {pipeline_mode = #tpu.pipeline_mode<synchronous>, transform_indices = @transform_3, window_bounds = array<i64: 8, 1>}, {transform_indices = @transform_4, window_bounds = array<i64: 1, 8, 16>}]} {
    %c0 = arith.constant 0 : index
    %c0_0 = arith.constant 0 : index
    %c0_1 = arith.constant 0 : index
    %c0_2 = arith.constant 0 : index
    %0 = vector.load %arg1[%c0, %c0_0, %c0_1, %c0_2] : memref<1x2x8x16xbf16, #tpu.memory_space<vmem>>, vector<1x1x8x16xbf16>
    %1 = vector.shape_cast %0 : vector<1x1x8x16xbf16> to vector<8x16xbf16>
    %c0_3 = arith.constant 0 : index
    %c0_4 = arith.constant 0 : index
    %c0_5 = arith.constant 0 : index
    %2 = vector.load %arg2[%c0_3, %c0_4, %c0_5] : memref<2x8x8xbf16, #tpu.memory_space<vmem>>, vector<1x8x8xbf16>
    %3 = vector.shape_cast %2 : vector<1x8x8xbf16> to vector<8x8xbf16>
    %cst = arith.constant dense<0.000000e+00> : vector<8x16xf32>
    %4 = tpu.matmul %3, %1, %cst {dimension_numbers = #tpu.dot_dimension_numbers<[1], [0], [0], [1], [0, 0, 1, 1], [], []>} : vector<8x8xbf16>, vector<8x16xbf16>, vector<8x16xf32> -> vector<8x16xf32>
    %c0_6 = arith.constant 0 : index
    %c1 = arith.constant 1 : index
    %c0_7 = arith.constant 0 : index
    %c0_8 = arith.constant 0 : index
    %5 = vector.load %arg1[%c0_6, %c1, %c0_7, %c0_8] : memref<1x2x8x16xbf16, #tpu.memory_space<vmem>>, vector<1x1x8x16xbf16>
    %6 = vector.shape_cast %5 : vector<1x1x8x16xbf16> to vector<8x16xbf16>
    %c1_9 = arith.constant 1 : index
    %c0_10 = arith.constant 0 : index
    %c0_11 = arith.constant 0 : index
    %7 = vector.load %arg2[%c1_9, %c0_10, %c0_11] : memref<2x8x8xbf16, #tpu.memory_space<vmem>>, vector<1x8x8xbf16>
    %8 = vector.shape_cast %7 : vector<1x8x8xbf16> to vector<8x8xbf16>
    %cst_12 = arith.constant dense<0.000000e+00> : vector<8x16xf32>
    %9 = tpu.matmul %8, %6, %cst_12 {dimension_numbers = #tpu.dot_dimension_numbers<[1], [0], [0], [1], [0, 0, 1, 1], [], []>} : vector<8x8xbf16>, vector<8x16xbf16>, vector<8x16xf32> -> vector<8x16xf32>
    %10 = arith.addf %4, %9 : vector<8x16xf32>
    %c0_13 = arith.constant 0 : index
    %c0_14 = arith.constant 0 : index
    %11 = vector.load %arg3[%c0_13, %c0_14] : memref<8x1xf32, #tpu.memory_space<vmem>>, vector<8x1xf32>
    %12 = vector.broadcast %11 : vector<8x1xf32> to vector<8x16xf32>
    %13 = arith.mulf %10, %12 : vector<8x16xf32>
    %c0_15 = arith.constant 0 : index
    %c0_16 = arith.constant 0 : index
    %14 = vector.load %arg4[%c0_15, %c0_16] : memref<8x1xf32, #tpu.memory_space<vmem>>, vector<8x1xf32>
    %15 = vector.broadcast %14 : vector<8x1xf32> to vector<8x16xf32>
    %16 = arith.addf %13, %15 : vector<8x16xf32>
    %cst_17 = arith.constant 0.000000e+00 : f32
    %17 = vector.broadcast %cst_17 : f32 to vector<8x16xf32>
    %18 = arith.maximumf %16, %17 : vector<8x16xf32>
    %19 = arith.truncf %18 : vector<8x16xf32> to vector<8x16xbf16>
    %c0_18 = arith.constant 0 : index
    %c0_19 = arith.constant 0 : index
    %c0_20 = arith.constant 0 : index
    %20 = vector.load %arg5[%c0_18, %c0_19, %c0_20] : memref<1x8x16xbf16, #tpu.memory_space<vmem>>, vector<1x8x16xbf16>
    %21 = vector.shape_cast %20 : vector<1x8x16xbf16> to vector<8x16xbf16>
    %22 = vector.shape_cast %19 : vector<8x16xbf16> to vector<1x8x16xbf16>
    tpu.vector_store %arg5[%c0_18, %c0_19, %c0_20], %22 {strides = array<i32>} : memref<1x8x16xbf16, #tpu.memory_space<vmem>>, vector<1x8x16xbf16>,
    return
  }
  func.func @transform_0(%arg0: i32) -> (i32, i32, i32, i32) {
    %c0_i32 = arith.constant 0 : i32
    %c0_i32_0 = arith.constant 0 : i32
    %c0_i32_1 = arith.constant 0 : i32
    %c0_i32_2 = arith.constant 0 : i32
    return %arg0, %c0_i32, %c0_i32_0, %c0_i32_1 : i32, i32, i32, i32
  }
  func.func @transform_1(%arg0: i32) -> (i32, i32, i32) {
    %c0_i32 = arith.constant 0 : i32
    %c0_i32_0 = arith.constant 0 : i32
    %c0_i32_1 = arith.constant 0 : i32
    %c0_i32_2 = arith.constant 0 : i32
    return %c0_i32, %c0_i32_0, %c0_i32_1 : i32, i32, i32
  }
  func.func @transform_2(%arg0: i32) -> (i32, i32) {
    %c0_i32 = arith.constant 0 : i32
    %c0_i32_0 = arith.constant 0 : i32
    %c0_i32_1 = arith.constant 0 : i32
    return %c0_i32, %c0_i32_0 : i32, i32
  }
  func.func @transform_3(%arg0: i32) -> (i32, i32) {
    %c0_i32 = arith.constant 0 : i32
    %c0_i32_0 = arith.constant 0 : i32
    %c0_i32_1 = arith.constant 0 : i32
    return %c0_i32, %c0_i32_0 : i32, i32
  }
  func.func @transform_4(%arg0: i32) -> (i32, i32, i32) {
    %c0_i32 = arith.constant 0 : i32
    %c0_i32_0 = arith.constant 0 : i32
    %c0_i32_1 = arith.constant 0 : i32
    return %arg0, %c0_i32, %c0_i32_0 : i32, i32, i32
  }
}

module attributes {stable_mosaic.version = 11 : i64} {
  func.func @_conv_kernel(%arg0: i32, %arg1: memref<1x2x8x20xbf16, #tpu.memory_space<vmem>>, %arg2: memref<4x8x8xbf16, #tpu.memory_space<vmem>>, %arg3: memref<8x1xf32, #tpu.memory_space<vmem>>, %arg4: memref<8x1xf32, #tpu.memory_space<vmem>>, %arg5: memref<1x8x16xbf16, #tpu.memory_space<vmem>>) attributes {dimension_semantics = [#tpu.dimension_semantics<parallel>], iteration_bounds = array<i64: 2>, scalar_prefetch = 0 : i64, scratch_operands = 0 : i64, tpu.core_type = #tpu.core_type<tc>, window_params = [{transform_indices = @transform_0, window_bounds = array<i64: 1, 2, 8, 20>}, {pipeline_mode = #tpu.pipeline_mode<synchronous>, transform_indices = @transform_1, window_bounds = array<i64: 4, 8, 8>}, {pipeline_mode = #tpu.pipeline_mode<synchronous>, transform_indices = @transform_2, window_bounds = array<i64: 8, 1>}, {pipeline_mode = #tpu.pipeline_mode<synchronous>, transform_indices = @transform_3, window_bounds = array<i64: 8, 1>}, {transform_indices = @transform_4, window_bounds = array<i64: 1, 8, 16>}]} {
    %c0 = arith.constant 0 : index
    %c0_0 = arith.constant 0 : index
    %c0_1 = arith.constant 0 : index
    %c0_2 = arith.constant 0 : index
    %0 = vector.load %arg1[%c0, %c0_0, %c0_1, %c0_2] : memref<1x2x8x20xbf16, #tpu.memory_space<vmem>>, vector<1x1x8x16xbf16>
    %1 = vector.shape_cast %0 : vector<1x1x8x16xbf16> to vector<8x16xbf16>
    %c0_3 = arith.constant 0 : index
    %c0_4 = arith.constant 0 : index
    %c0_5 = arith.constant 0 : index
    %2 = vector.load %arg2[%c0_3, %c0_4, %c0_5] : memref<4x8x8xbf16, #tpu.memory_space<vmem>>, vector<1x8x8xbf16>
    %3 = vector.shape_cast %2 : vector<1x8x8xbf16> to vector<8x8xbf16>
    %cst = arith.constant dense<0.000000e+00> : vector<8x16xf32>
    %4 = tpu.matmul %3, %1, %cst {dimension_numbers = #tpu.dot_dimension_numbers<[1], [0], [0], [1], [0, 0, 1, 1], [], []>} : vector<8x8xbf16>, vector<8x16xbf16>, vector<8x16xf32> -> vector<8x16xf32>
    %c0_6 = arith.constant 0 : index
    %c1 = arith.constant 1 : index
    %c0_7 = arith.constant 0 : index
    %c0_8 = arith.constant 0 : index
    %5 = vector.load %arg1[%c0_6, %c1, %c0_7, %c0_8] : memref<1x2x8x20xbf16, #tpu.memory_space<vmem>>, vector<1x1x8x16xbf16>
    %6 = vector.shape_cast %5 : vector<1x1x8x16xbf16> to vector<8x16xbf16>
    %c1_9 = arith.constant 1 : index
    %c0_10 = arith.constant 0 : index
    %c0_11 = arith.constant 0 : index
    %7 = vector.load %arg2[%c1_9, %c0_10, %c0_11] : memref<4x8x8xbf16, #tpu.memory_space<vmem>>, vector<1x8x8xbf16>
    %8 = vector.shape_cast %7 : vector<1x8x8xbf16> to vector<8x8xbf16>
    %cst_12 = arith.constant dense<0.000000e+00> : vector<8x16xf32>
    %9 = tpu.matmul %8, %6, %cst_12 {dimension_numbers = #tpu.dot_dimension_numbers<[1], [0], [0], [1], [0, 0, 1, 1], [], []>} : vector<8x8xbf16>, vector<8x16xbf16>, vector<8x16xf32> -> vector<8x16xf32>
    %10 = arith.addf %4, %9 : vector<8x16xf32>
    %c0_13 = arith.constant 0 : index
    %c0_14 = arith.constant 0 : index
    %c0_15 = arith.constant 0 : index
    %c4 = arith.constant 4 : index
    %11 = vector.load %arg1[%c0_13, %c0_14, %c0_15, %c4] : memref<1x2x8x20xbf16, #tpu.memory_space<vmem>>, vector<1x1x8x16xbf16>
    %12 = vector.shape_cast %11 : vector<1x1x8x16xbf16> to vector<8x16xbf16>
    %c2 = arith.constant 2 : index
    %c0_16 = arith.constant 0 : index
    %c0_17 = arith.constant 0 : index
    %13 = vector.load %arg2[%c2, %c0_16, %c0_17] : memref<4x8x8xbf16, #tpu.memory_space<vmem>>, vector<1x8x8xbf16>
    %14 = vector.shape_cast %13 : vector<1x8x8xbf16> to vector<8x8xbf16>
    %cst_18 = arith.constant dense<0.000000e+00> : vector<8x16xf32>
    %15 = tpu.matmul %14, %12, %cst_18 {dimension_numbers = #tpu.dot_dimension_numbers<[1], [0], [0], [1], [0, 0, 1, 1], [], []>} : vector<8x8xbf16>, vector<8x16xbf16>, vector<8x16xf32> -> vector<8x16xf32>
    %16 = arith.addf %10, %15 : vector<8x16xf32>
    %c0_19 = arith.constant 0 : index
    %c1_20 = arith.constant 1 : index
    %c0_21 = arith.constant 0 : index
    %c4_22 = arith.constant 4 : index
    %17 = vector.load %arg1[%c0_19, %c1_20, %c0_21, %c4_22] : memref<1x2x8x20xbf16, #tpu.memory_space<vmem>>, vector<1x1x8x16xbf16>
    %18 = vector.shape_cast %17 : vector<1x1x8x16xbf16> to vector<8x16xbf16>
    %c3 = arith.constant 3 : index
    %c0_23 = arith.constant 0 : index
    %c0_24 = arith.constant 0 : index
    %19 = vector.load %arg2[%c3, %c0_23, %c0_24] : memref<4x8x8xbf16, #tpu.memory_space<vmem>>, vector<1x8x8xbf16>
    %20 = vector.shape_cast %19 : vector<1x8x8xbf16> to vector<8x8xbf16>
    %cst_25 = arith.constant dense<0.000000e+00> : vector<8x16xf32>
    %21 = tpu.matmul %20, %18, %cst_25 {dimension_numbers = #tpu.dot_dimension_numbers<[1], [0], [0], [1], [0, 0, 1, 1], [], []>} : vector<8x8xbf16>, vector<8x16xbf16>, vector<8x16xf32> -> vector<8x16xf32>
    %22 = arith.addf %16, %21 : vector<8x16xf32>
    %c0_26 = arith.constant 0 : index
    %c0_27 = arith.constant 0 : index
    %23 = vector.load %arg3[%c0_26, %c0_27] : memref<8x1xf32, #tpu.memory_space<vmem>>, vector<8x1xf32>
    %24 = vector.broadcast %23 : vector<8x1xf32> to vector<8x16xf32>
    %25 = arith.mulf %22, %24 : vector<8x16xf32>
    %c0_28 = arith.constant 0 : index
    %c0_29 = arith.constant 0 : index
    %26 = vector.load %arg4[%c0_28, %c0_29] : memref<8x1xf32, #tpu.memory_space<vmem>>, vector<8x1xf32>
    %27 = vector.broadcast %26 : vector<8x1xf32> to vector<8x16xf32>
    %28 = arith.addf %25, %27 : vector<8x16xf32>
    %cst_30 = arith.constant 0.000000e+00 : f32
    %29 = vector.broadcast %cst_30 : f32 to vector<8x16xf32>
    %30 = arith.maximumf %28, %29 : vector<8x16xf32>
    %31 = arith.truncf %30 : vector<8x16xf32> to vector<8x16xbf16>
    %c0_31 = arith.constant 0 : index
    %c0_32 = arith.constant 0 : index
    %c0_33 = arith.constant 0 : index
    %32 = vector.load %arg5[%c0_31, %c0_32, %c0_33] : memref<1x8x16xbf16, #tpu.memory_space<vmem>>, vector<1x8x16xbf16>
    %33 = vector.shape_cast %32 : vector<1x8x16xbf16> to vector<8x16xbf16>
    %34 = vector.shape_cast %31 : vector<8x16xbf16> to vector<1x8x16xbf16>
    tpu.vector_store %arg5[%c0_31, %c0_32, %c0_33], %34 {strides = array<i32>} : memref<1x8x16xbf16, #tpu.memory_space<vmem>>, vector<1x8x16xbf16>,
    return
  }
  func.func @transform_0(%arg0: i32) -> (i32, i32, i32, i32) {
    %c0_i32 = arith.constant 0 : i32
    %c0_i32_0 = arith.constant 0 : i32
    %c0_i32_1 = arith.constant 0 : i32
    %c0_i32_2 = arith.constant 0 : i32
    return %arg0, %c0_i32, %c0_i32_0, %c0_i32_1 : i32, i32, i32, i32
  }
  func.func @transform_1(%arg0: i32) -> (i32, i32, i32) {
    %c0_i32 = arith.constant 0 : i32
    %c0_i32_0 = arith.constant 0 : i32
    %c0_i32_1 = arith.constant 0 : i32
    %c0_i32_2 = arith.constant 0 : i32
    return %c0_i32, %c0_i32_0, %c0_i32_1 : i32, i32, i32
  }
  func.func @transform_2(%arg0: i32) -> (i32, i32) {
    %c0_i32 = arith.constant 0 : i32
    %c0_i32_0 = arith.constant 0 : i32
    %c0_i32_1 = arith.constant 0 : i32
    return %c0_i32, %c0_i32_0 : i32, i32
  }
  func.func @transform_3(%arg0: i32) -> (i32, i32) {
    %c0_i32 = arith.constant 0 : i32
    %c0_i32_0 = arith.constant 0 : i32
    %c0_i32_1 = arith.constant 0 : i32
    return %c0_i32, %c0_i32_0 : i32, i32
  }
  func.func @transform_4(%arg0: i32) -> (i32, i32, i32) {
    %c0_i32 = arith.constant 0 : i32
    %c0_i32_0 = arith.constant 0 : i32
    %c0_i32_1 = arith.constant 0 : i32
    return %arg0, %c0_i32, %c0_i32_0 : i32, i32, i32
  }
}

module attributes {stable_mosaic.version = 11 : i64} {
  func.func @_conv_kernel(%arg0: i32, %arg1: memref<1x1x8x64xbf16, #tpu.memory_space<vmem>>, %arg2: memref<1x3x8xbf16, #tpu.memory_space<vmem>>, %arg3: memref<3x1xf32, #tpu.memory_space<vmem>>, %arg4: memref<3x1xf32, #tpu.memory_space<vmem>>, %arg5: memref<1x3x64xf32, #tpu.memory_space<vmem>>) attributes {dimension_semantics = [#tpu.dimension_semantics<parallel>], iteration_bounds = array<i64: 2>, scalar_prefetch = 0 : i64, scratch_operands = 0 : i64, tpu.core_type = #tpu.core_type<tc>, window_params = [{transform_indices = @transform_0, window_bounds = array<i64: 1, 1, 8, 64>}, {pipeline_mode = #tpu.pipeline_mode<synchronous>, transform_indices = @transform_1, window_bounds = array<i64: 1, 3, 8>}, {pipeline_mode = #tpu.pipeline_mode<synchronous>, transform_indices = @transform_2, window_bounds = array<i64: 3, 1>}, {pipeline_mode = #tpu.pipeline_mode<synchronous>, transform_indices = @transform_3, window_bounds = array<i64: 3, 1>}, {transform_indices = @transform_4, window_bounds = array<i64: 1, 3, 64>}]} {
    %c0 = arith.constant 0 : index
    %c0_0 = arith.constant 0 : index
    %c0_1 = arith.constant 0 : index
    %c0_2 = arith.constant 0 : index
    %0 = vector.load %arg1[%c0, %c0_0, %c0_1, %c0_2] : memref<1x1x8x64xbf16, #tpu.memory_space<vmem>>, vector<1x1x8x64xbf16>
    %1 = vector.shape_cast %0 : vector<1x1x8x64xbf16> to vector<8x64xbf16>
    %c0_3 = arith.constant 0 : index
    %c0_4 = arith.constant 0 : index
    %c0_5 = arith.constant 0 : index
    %2 = vector.load %arg2[%c0_3, %c0_4, %c0_5] : memref<1x3x8xbf16, #tpu.memory_space<vmem>>, vector<1x3x8xbf16>
    %3 = vector.shape_cast %2 : vector<1x3x8xbf16> to vector<3x8xbf16>
    %cst = arith.constant dense<0.000000e+00> : vector<3x64xf32>
    %4 = tpu.matmul %3, %1, %cst {dimension_numbers = #tpu.dot_dimension_numbers<[1], [0], [0], [1], [0, 0, 1, 1], [], []>} : vector<3x8xbf16>, vector<8x64xbf16>, vector<3x64xf32> -> vector<3x64xf32>
    %c0_6 = arith.constant 0 : index
    %c0_7 = arith.constant 0 : index
    %5 = vector.load %arg3[%c0_6, %c0_7] : memref<3x1xf32, #tpu.memory_space<vmem>>, vector<3x1xf32>
    %6 = vector.broadcast %5 : vector<3x1xf32> to vector<3x64xf32>
    %7 = arith.mulf %4, %6 : vector<3x64xf32>
    %c0_8 = arith.constant 0 : index
    %c0_9 = arith.constant 0 : index
    %8 = vector.load %arg4[%c0_8, %c0_9] : memref<3x1xf32, #tpu.memory_space<vmem>>, vector<3x1xf32>
    %9 = vector.broadcast %8 : vector<3x1xf32> to vector<3x64xf32>
    %10 = arith.addf %7, %9 : vector<3x64xf32>
    %cst_10 = arith.constant 0.000000e+00 : f32
    %11 = vector.broadcast %cst_10 : f32 to vector<3x64xf32>
    %12 = arith.maximumf %10, %11 : vector<3x64xf32>
    %c0_11 = arith.constant 0 : index
    %c0_12 = arith.constant 0 : index
    %c0_13 = arith.constant 0 : index
    %13 = vector.load %arg5[%c0_11, %c0_12, %c0_13] : memref<1x3x64xf32, #tpu.memory_space<vmem>>, vector<1x3x64xf32>
    %14 = vector.shape_cast %13 : vector<1x3x64xf32> to vector<3x64xf32>
    %15 = vector.shape_cast %12 : vector<3x64xf32> to vector<1x3x64xf32>
    tpu.vector_store %arg5[%c0_11, %c0_12, %c0_13], %15 {strides = array<i32>} : memref<1x3x64xf32, #tpu.memory_space<vmem>>, vector<1x3x64xf32>,
    return
  }
  func.func @transform_0(%arg0: i32) -> (i32, i32, i32, i32) {
    %c0_i32 = arith.constant 0 : i32
    %c0_i32_0 = arith.constant 0 : i32
    %c0_i32_1 = arith.constant 0 : i32
    %c0_i32_2 = arith.constant 0 : i32
    return %arg0, %c0_i32, %c0_i32_0, %c0_i32_1 : i32, i32, i32, i32
  }
  func.func @transform_1(%arg0: i32) -> (i32, i32, i32) {
    %c0_i32 = arith.constant 0 : i32
    %c0_i32_0 = arith.constant 0 : i32
    %c0_i32_1 = arith.constant 0 : i32
    %c0_i32_2 = arith.constant 0 : i32
    return %c0_i32, %c0_i32_0, %c0_i32_1 : i32, i32, i32
  }
  func.func @transform_2(%arg0: i32) -> (i32, i32) {
    %c0_i32 = arith.constant 0 : i32
    %c0_i32_0 = arith.constant 0 : i32
    %c0_i32_1 = arith.constant 0 : i32
    return %c0_i32, %c0_i32_0 : i32, i32
  }
  func.func @transform_3(%arg0: i32) -> (i32, i32) {
    %c0_i32 = arith.constant 0 : i32
    %c0_i32_0 = arith.constant 0 : i32
    %c0_i32_1 = arith.constant 0 : i32
    return %c0_i32, %c0_i32_0 : i32, i32
  }
  func.func @transform_4(%arg0: i32) -> (i32, i32, i32) {
    %c0_i32 = arith.constant 0 : i32
    %c0_i32_0 = arith.constant 0 : i32
    %c0_i32_1 = arith.constant 0 : i32
    return %arg0, %c0_i32, %c0_i32_0 : i32, i32, i32
  }
}

module attributes {stable_mosaic.version = 11 : i64} {
  func.func @_conv_kernel(%arg0: i32, %arg1: memref<1x3x8x80xbf16, #tpu.memory_space<vmem>>, %arg2: memref<9x8x8xbf16, #tpu.memory_space<vmem>>, %arg3: memref<8x1xf32, #tpu.memory_space<vmem>>, %arg4: memref<8x1xf32, #tpu.memory_space<vmem>>, %arg5: memref<1x8x64xbf16, #tpu.memory_space<vmem>>, %arg6: memref<1x8x64xbf16, #tpu.memory_space<vmem>>) attributes {dimension_semantics = [#tpu.dimension_semantics<parallel>], iteration_bounds = array<i64: 2>, scalar_prefetch = 0 : i64, scratch_operands = 0 : i64, tpu.core_type = #tpu.core_type<tc>, window_params = [{transform_indices = @transform_0, window_bounds = array<i64: 1, 3, 8, 80>}, {pipeline_mode = #tpu.pipeline_mode<synchronous>, transform_indices = @transform_1, window_bounds = array<i64: 9, 8, 8>}, {pipeline_mode = #tpu.pipeline_mode<synchronous>, transform_indices = @transform_2, window_bounds = array<i64: 8, 1>}, {pipeline_mode = #tpu.pipeline_mode<synchronous>, transform_indices = @transform_3, window_bounds = array<i64: 8, 1>}, {transform_indices = @transform_4, window_bounds = array<i64: 1, 8, 64>}, {transform_indices = @transform_5, window_bounds = array<i64: 1, 8, 64>}]} {
    %c0 = arith.constant 0 : index
    %c0_0 = arith.constant 0 : index
    %c0_1 = arith.constant 0 : index
    %c0_2 = arith.constant 0 : index
    %0 = vector.load %arg1[%c0, %c0_0, %c0_1, %c0_2] : memref<1x3x8x80xbf16, #tpu.memory_space<vmem>>, vector<1x1x8x64xbf16>
    %1 = vector.shape_cast %0 : vector<1x1x8x64xbf16> to vector<8x64xbf16>
    %c0_3 = arith.constant 0 : index
    %c0_4 = arith.constant 0 : index
    %c0_5 = arith.constant 0 : index
    %2 = vector.load %arg2[%c0_3, %c0_4, %c0_5] : memref<9x8x8xbf16, #tpu.memory_space<vmem>>, vector<1x8x8xbf16>
    %3 = vector.shape_cast %2 : vector<1x8x8xbf16> to vector<8x8xbf16>
    %cst = arith.constant dense<0.000000e+00> : vector<8x64xf32>
    %4 = tpu.matmul %3, %1, %cst {dimension_numbers = #tpu.dot_dimension_numbers<[1], [0], [0], [1], [0, 0, 1, 1], [], []>} : vector<8x8xbf16>, vector<8x64xbf16>, vector<8x64xf32> -> vector<8x64xf32>
    %c0_6 = arith.constant 0 : index
    %c1 = arith.constant 1 : index
    %c0_7 = arith.constant 0 : index
    %c0_8 = arith.constant 0 : index
    %5 = vector.load %arg1[%c0_6, %c1, %c0_7, %c0_8] : memref<1x3x8x80xbf16, #tpu.memory_space<vmem>>, vector<1x1x8x64xbf16>
    %6 = vector.shape_cast %5 : vector<1x1x8x64xbf16> to vector<8x64xbf16>
    %c1_9 = arith.constant 1 : index
    %c0_10 = arith.constant 0 : index
    %c0_11 = arith.constant 0 : index
    %7 = vector.load %arg2[%c1_9, %c0_10, %c0_11] : memref<9x8x8xbf16, #tpu.memory_space<vmem>>, vector<1x8x8xbf16>
    %8 = vector.shape_cast %7 : vector<1x8x8xbf16> to vector<8x8xbf16>
    %cst_12 = arith.constant dense<0.000000e+00> : vector<8x64xf32>
    %9 = tpu.matmul %8, %6, %cst_12 {dimension_numbers = #tpu.dot_dimension_numbers<[1], [0], [0], [1], [0, 0, 1, 1], [], []>} : vector<8x8xbf16>, vector<8x64xbf16>, vector<8x64xf32> -> vector<8x64xf32>
    %10 = arith.addf %4, %9 : vector<8x64xf32>
    %c0_13 = arith.constant 0 : index
    %c2 = arith.constant 2 : index
    %c0_14 = arith.constant 0 : index
    %c0_15 = arith.constant 0 : index
    %11 = vector.load %arg1[%c0_13, %c2, %c0_14, %c0_15] : memref<1x3x8x80xbf16, #tpu.memory_space<vmem>>, vector<1x1x8x64xbf16>
    %12 = vector.shape_cast %11 : vector<1x1x8x64xbf16> to vector<8x64xbf16>
    %c2_16 = arith.constant 2 : index
    %c0_17 = arith.constant 0 : index
    %c0_18 = arith.constant 0 : index
    %13 = vector.load %arg2[%c2_16, %c0_17, %c0_18] : memref<9x8x8xbf16, #tpu.memory_space<vmem>>, vector<1x8x8xbf16>
    %14 = vector.shape_cast %13 : vector<1x8x8xbf16> to vector<8x8xbf16>
    %cst_19 = arith.constant dense<0.000000e+00> : vector<8x64xf32>
    %15 = tpu.matmul %14, %12, %cst_19 {dimension_numbers = #tpu.dot_dimension_numbers<[1], [0], [0], [1], [0, 0, 1, 1], [], []>} : vector<8x8xbf16>, vector<8x64xbf16>, vector<8x64xf32> -> vector<8x64xf32>
    %16 = arith.addf %10, %15 : vector<8x64xf32>
    %c0_20 = arith.constant 0 : index
    %c0_21 = arith.constant 0 : index
    %c0_22 = arith.constant 0 : index
    %c8 = arith.constant 8 : index
    %17 = vector.load %arg1[%c0_20, %c0_21, %c0_22, %c8] : memref<1x3x8x80xbf16, #tpu.memory_space<vmem>>, vector<1x1x8x64xbf16>
    %18 = vector.shape_cast %17 : vector<1x1x8x64xbf16> to vector<8x64xbf16>
    %c3 = arith.constant 3 : index
    %c0_23 = arith.constant 0 : index
    %c0_24 = arith.constant 0 : index
    %19 = vector.load %arg2[%c3, %c0_23, %c0_24] : memref<9x8x8xbf16, #tpu.memory_space<vmem>>, vector<1x8x8xbf16>
    %20 = vector.shape_cast %19 : vector<1x8x8xbf16> to vector<8x8xbf16>
    %cst_25 = arith.constant dense<0.000000e+00> : vector<8x64xf32>
    %21 = tpu.matmul %20, %18, %cst_25 {dimension_numbers = #tpu.dot_dimension_numbers<[1], [0], [0], [1], [0, 0, 1, 1], [], []>} : vector<8x8xbf16>, vector<8x64xbf16>, vector<8x64xf32> -> vector<8x64xf32>
    %22 = arith.addf %16, %21 : vector<8x64xf32>
    %c0_26 = arith.constant 0 : index
    %c1_27 = arith.constant 1 : index
    %c0_28 = arith.constant 0 : index
    %c8_29 = arith.constant 8 : index
    %23 = vector.load %arg1[%c0_26, %c1_27, %c0_28, %c8_29] : memref<1x3x8x80xbf16, #tpu.memory_space<vmem>>, vector<1x1x8x64xbf16>
    %24 = vector.shape_cast %23 : vector<1x1x8x64xbf16> to vector<8x64xbf16>
    %c4 = arith.constant 4 : index
    %c0_30 = arith.constant 0 : index
    %c0_31 = arith.constant 0 : index
    %25 = vector.load %arg2[%c4, %c0_30, %c0_31] : memref<9x8x8xbf16, #tpu.memory_space<vmem>>, vector<1x8x8xbf16>
    %26 = vector.shape_cast %25 : vector<1x8x8xbf16> to vector<8x8xbf16>
    %cst_32 = arith.constant dense<0.000000e+00> : vector<8x64xf32>
    %27 = tpu.matmul %26, %24, %cst_32 {dimension_numbers = #tpu.dot_dimension_numbers<[1], [0], [0], [1], [0, 0, 1, 1], [], []>} : vector<8x8xbf16>, vector<8x64xbf16>, vector<8x64xf32> -> vector<8x64xf32>
    %28 = arith.addf %22, %27 : vector<8x64xf32>
    %c0_33 = arith.constant 0 : index
    %c2_34 = arith.constant 2 : index
    %c0_35 = arith.constant 0 : index
    %c8_36 = arith.constant 8 : index
    %29 = vector.load %arg1[%c0_33, %c2_34, %c0_35, %c8_36] : memref<1x3x8x80xbf16, #tpu.memory_space<vmem>>, vector<1x1x8x64xbf16>
    %30 = vector.shape_cast %29 : vector<1x1x8x64xbf16> to vector<8x64xbf16>
    %c5 = arith.constant 5 : index
    %c0_37 = arith.constant 0 : index
    %c0_38 = arith.constant 0 : index
    %31 = vector.load %arg2[%c5, %c0_37, %c0_38] : memref<9x8x8xbf16, #tpu.memory_space<vmem>>, vector<1x8x8xbf16>
    %32 = vector.shape_cast %31 : vector<1x8x8xbf16> to vector<8x8xbf16>
    %cst_39 = arith.constant dense<0.000000e+00> : vector<8x64xf32>
    %33 = tpu.matmul %32, %30, %cst_39 {dimension_numbers = #tpu.dot_dimension_numbers<[1], [0], [0], [1], [0, 0, 1, 1], [], []>} : vector<8x8xbf16>, vector<8x64xbf16>, vector<8x64xf32> -> vector<8x64xf32>
    %34 = arith.addf %28, %33 : vector<8x64xf32>
    %c0_40 = arith.constant 0 : index
    %c0_41 = arith.constant 0 : index
    %c0_42 = arith.constant 0 : index
    %c16 = arith.constant 16 : index
    %35 = vector.load %arg1[%c0_40, %c0_41, %c0_42, %c16] : memref<1x3x8x80xbf16, #tpu.memory_space<vmem>>, vector<1x1x8x64xbf16>
    %36 = vector.shape_cast %35 : vector<1x1x8x64xbf16> to vector<8x64xbf16>
    %c6 = arith.constant 6 : index
    %c0_43 = arith.constant 0 : index
    %c0_44 = arith.constant 0 : index
    %37 = vector.load %arg2[%c6, %c0_43, %c0_44] : memref<9x8x8xbf16, #tpu.memory_space<vmem>>, vector<1x8x8xbf16>
    %38 = vector.shape_cast %37 : vector<1x8x8xbf16> to vector<8x8xbf16>
    %cst_45 = arith.constant dense<0.000000e+00> : vector<8x64xf32>
    %39 = tpu.matmul %38, %36, %cst_45 {dimension_numbers = #tpu.dot_dimension_numbers<[1], [0], [0], [1], [0, 0, 1, 1], [], []>} : vector<8x8xbf16>, vector<8x64xbf16>, vector<8x64xf32> -> vector<8x64xf32>
    %40 = arith.addf %34, %39 : vector<8x64xf32>
    %c0_46 = arith.constant 0 : index
    %c1_47 = arith.constant 1 : index
    %c0_48 = arith.constant 0 : index
    %c16_49 = arith.constant 16 : index
    %41 = vector.load %arg1[%c0_46, %c1_47, %c0_48, %c16_49] : memref<1x3x8x80xbf16, #tpu.memory_space<vmem>>, vector<1x1x8x64xbf16>
    %42 = vector.shape_cast %41 : vector<1x1x8x64xbf16> to vector<8x64xbf16>
    %c7 = arith.constant 7 : index
    %c0_50 = arith.constant 0 : index
    %c0_51 = arith.constant 0 : index
    %43 = vector.load %arg2[%c7, %c0_50, %c0_51] : memref<9x8x8xbf16, #tpu.memory_space<vmem>>, vector<1x8x8xbf16>
    %44 = vector.shape_cast %43 : vector<1x8x8xbf16> to vector<8x8xbf16>
    %cst_52 = arith.constant dense<0.000000e+00> : vector<8x64xf32>
    %45 = tpu.matmul %44, %42, %cst_52 {dimension_numbers = #tpu.dot_dimension_numbers<[1], [0], [0], [1], [0, 0, 1, 1], [], []>} : vector<8x8xbf16>, vector<8x64xbf16>, vector<8x64xf32> -> vector<8x64xf32>
    %46 = arith.addf %40, %45 : vector<8x64xf32>
    %c0_53 = arith.constant 0 : index
    %c2_54 = arith.constant 2 : index
    %c0_55 = arith.constant 0 : index
    %c16_56 = arith.constant 16 : index
    %47 = vector.load %arg1[%c0_53, %c2_54, %c0_55, %c16_56] : memref<1x3x8x80xbf16, #tpu.memory_space<vmem>>, vector<1x1x8x64xbf16>
    %48 = vector.shape_cast %47 : vector<1x1x8x64xbf16> to vector<8x64xbf16>
    %c8_57 = arith.constant 8 : index
    %c0_58 = arith.constant 0 : index
    %c0_59 = arith.constant 0 : index
    %49 = vector.load %arg2[%c8_57, %c0_58, %c0_59] : memref<9x8x8xbf16, #tpu.memory_space<vmem>>, vector<1x8x8xbf16>
    %50 = vector.shape_cast %49 : vector<1x8x8xbf16> to vector<8x8xbf16>
    %cst_60 = arith.constant dense<0.000000e+00> : vector<8x64xf32>
    %51 = tpu.matmul %50, %48, %cst_60 {dimension_numbers = #tpu.dot_dimension_numbers<[1], [0], [0], [1], [0, 0, 1, 1], [], []>} : vector<8x8xbf16>, vector<8x64xbf16>, vector<8x64xf32> -> vector<8x64xf32>
    %52 = arith.addf %46, %51 : vector<8x64xf32>
    %c0_61 = arith.constant 0 : index
    %c0_62 = arith.constant 0 : index
    %53 = vector.load %arg3[%c0_61, %c0_62] : memref<8x1xf32, #tpu.memory_space<vmem>>, vector<8x1xf32>
    %54 = vector.broadcast %53 : vector<8x1xf32> to vector<8x64xf32>
    %55 = arith.mulf %52, %54 : vector<8x64xf32>
    %c0_63 = arith.constant 0 : index
    %c0_64 = arith.constant 0 : index
    %56 = vector.load %arg4[%c0_63, %c0_64] : memref<8x1xf32, #tpu.memory_space<vmem>>, vector<8x1xf32>
    %57 = vector.broadcast %56 : vector<8x1xf32> to vector<8x64xf32>
    %58 = arith.addf %55, %57 : vector<8x64xf32>
    %cst_65 = arith.constant 0.000000e+00 : f32
    %59 = vector.broadcast %cst_65 : f32 to vector<8x64xf32>
    %60 = arith.maximumf %58, %59 : vector<8x64xf32>
    %c0_66 = arith.constant 0 : index
    %c0_67 = arith.constant 0 : index
    %c0_68 = arith.constant 0 : index
    %61 = vector.load %arg5[%c0_66, %c0_67, %c0_68] : memref<1x8x64xbf16, #tpu.memory_space<vmem>>, vector<1x8x64xbf16>
    %62 = vector.shape_cast %61 : vector<1x8x64xbf16> to vector<8x64xbf16>
    %63 = arith.extf %62 : vector<8x64xbf16> to vector<8x64xf32>
    %64 = arith.addf %60, %63 : vector<8x64xf32>
    %65 = arith.truncf %64 : vector<8x64xf32> to vector<8x64xbf16>
    %c0_69 = arith.constant 0 : index
    %c0_70 = arith.constant 0 : index
    %c0_71 = arith.constant 0 : index
    %66 = vector.load %arg6[%c0_69, %c0_70, %c0_71] : memref<1x8x64xbf16, #tpu.memory_space<vmem>>, vector<1x8x64xbf16>
    %67 = vector.shape_cast %66 : vector<1x8x64xbf16> to vector<8x64xbf16>
    %68 = vector.shape_cast %65 : vector<8x64xbf16> to vector<1x8x64xbf16>
    tpu.vector_store %arg6[%c0_69, %c0_70, %c0_71], %68 {strides = array<i32>} : memref<1x8x64xbf16, #tpu.memory_space<vmem>>, vector<1x8x64xbf16>,
    return
  }
  func.func @transform_0(%arg0: i32) -> (i32, i32, i32, i32) {
    %c0_i32 = arith.constant 0 : i32
    %c0_i32_0 = arith.constant 0 : i32
    %c0_i32_1 = arith.constant 0 : i32
    %c0_i32_2 = arith.constant 0 : i32
    return %arg0, %c0_i32, %c0_i32_0, %c0_i32_1 : i32, i32, i32, i32
  }
  func.func @transform_1(%arg0: i32) -> (i32, i32, i32) {
    %c0_i32 = arith.constant 0 : i32
    %c0_i32_0 = arith.constant 0 : i32
    %c0_i32_1 = arith.constant 0 : i32
    %c0_i32_2 = arith.constant 0 : i32
    return %c0_i32, %c0_i32_0, %c0_i32_1 : i32, i32, i32
  }
  func.func @transform_2(%arg0: i32) -> (i32, i32) {
    %c0_i32 = arith.constant 0 : i32
    %c0_i32_0 = arith.constant 0 : i32
    %c0_i32_1 = arith.constant 0 : i32
    return %c0_i32, %c0_i32_0 : i32, i32
  }
  func.func @transform_3(%arg0: i32) -> (i32, i32) {
    %c0_i32 = arith.constant 0 : i32
    %c0_i32_0 = arith.constant 0 : i32
    %c0_i32_1 = arith.constant 0 : i32
    return %c0_i32, %c0_i32_0 : i32, i32
  }
  func.func @transform_4(%arg0: i32) -> (i32, i32, i32) {
    %c0_i32 = arith.constant 0 : i32
    %c0_i32_0 = arith.constant 0 : i32
    %c0_i32_1 = arith.constant 0 : i32
    return %arg0, %c0_i32, %c0_i32_0 : i32, i32, i32
  }
  func.func @transform_5(%arg0: i32) -> (i32, i32, i32) {
    %c0_i32 = arith.constant 0 : i32
    %c0_i32_0 = arith.constant 0 : i32
    %c0_i32_1 = arith.constant 0 : i32
    return %arg0, %c0_i32, %c0_i32_0 : i32, i32, i32
  }
}

module attributes {stable_mosaic.version = 11 : i64} {
  func.func @_conv_kernel(%arg0: i32, %arg1: memref<1x2x8x64xbf16, #tpu.memory_space<vmem>>, %arg2: memref<2x3x8xbf16, #tpu.memory_space<vmem>>, %arg3: memref<3x1xf32, #tpu.memory_space<vmem>>, %arg4: memref<3x1xf32, #tpu.memory_space<vmem>>, %arg5: memref<1x3x64xf32, #tpu.memory_space<vmem>>) attributes {dimension_semantics = [#tpu.dimension_semantics<parallel>], iteration_bounds = array<i64: 2>, scalar_prefetch = 0 : i64, scratch_operands = 0 : i64, tpu.core_type = #tpu.core_type<tc>, window_params = [{transform_indices = @transform_0, window_bounds = array<i64: 1, 2, 8, 64>}, {pipeline_mode = #tpu.pipeline_mode<synchronous>, transform_indices = @transform_1, window_bounds = array<i64: 2, 3, 8>}, {pipeline_mode = #tpu.pipeline_mode<synchronous>, transform_indices = @transform_2, window_bounds = array<i64: 3, 1>}, {pipeline_mode = #tpu.pipeline_mode<synchronous>, transform_indices = @transform_3, window_bounds = array<i64: 3, 1>}, {transform_indices = @transform_4, window_bounds = array<i64: 1, 3, 64>}]} {
    %c0 = arith.constant 0 : index
    %c0_0 = arith.constant 0 : index
    %c0_1 = arith.constant 0 : index
    %c0_2 = arith.constant 0 : index
    %0 = vector.load %arg1[%c0, %c0_0, %c0_1, %c0_2] : memref<1x2x8x64xbf16, #tpu.memory_space<vmem>>, vector<1x1x8x64xbf16>
    %1 = vector.shape_cast %0 : vector<1x1x8x64xbf16> to vector<8x64xbf16>
    %c0_3 = arith.constant 0 : index
    %c0_4 = arith.constant 0 : index
    %c0_5 = arith.constant 0 : index
    %2 = vector.load %arg2[%c0_3, %c0_4, %c0_5] : memref<2x3x8xbf16, #tpu.memory_space<vmem>>, vector<1x3x8xbf16>
    %3 = vector.shape_cast %2 : vector<1x3x8xbf16> to vector<3x8xbf16>
    %cst = arith.constant dense<0.000000e+00> : vector<3x64xf32>
    %4 = tpu.matmul %3, %1, %cst {dimension_numbers = #tpu.dot_dimension_numbers<[1], [0], [0], [1], [0, 0, 1, 1], [], []>} : vector<3x8xbf16>, vector<8x64xbf16>, vector<3x64xf32> -> vector<3x64xf32>
    %c0_6 = arith.constant 0 : index
    %c1 = arith.constant 1 : index
    %c0_7 = arith.constant 0 : index
    %c0_8 = arith.constant 0 : index
    %5 = vector.load %arg1[%c0_6, %c1, %c0_7, %c0_8] : memref<1x2x8x64xbf16, #tpu.memory_space<vmem>>, vector<1x1x8x64xbf16>
    %6 = vector.shape_cast %5 : vector<1x1x8x64xbf16> to vector<8x64xbf16>
    %c1_9 = arith.constant 1 : index
    %c0_10 = arith.constant 0 : index
    %c0_11 = arith.constant 0 : index
    %7 = vector.load %arg2[%c1_9, %c0_10, %c0_11] : memref<2x3x8xbf16, #tpu.memory_space<vmem>>, vector<1x3x8xbf16>
    %8 = vector.shape_cast %7 : vector<1x3x8xbf16> to vector<3x8xbf16>
    %cst_12 = arith.constant dense<0.000000e+00> : vector<3x64xf32>
    %9 = tpu.matmul %8, %6, %cst_12 {dimension_numbers = #tpu.dot_dimension_numbers<[1], [0], [0], [1], [0, 0, 1, 1], [], []>} : vector<3x8xbf16>, vector<8x64xbf16>, vector<3x64xf32> -> vector<3x64xf32>
    %10 = arith.addf %4, %9 : vector<3x64xf32>
    %c0_13 = arith.constant 0 : index
    %c0_14 = arith.constant 0 : index
    %11 = vector.load %arg3[%c0_13, %c0_14] : memref<3x1xf32, #tpu.memory_space<vmem>>, vector<3x1xf32>
    %12 = vector.broadcast %11 : vector<3x1xf32> to vector<3x64xf32>
    %13 = arith.mulf %10, %12 : vector<3x64xf32>
    %c0_15 = arith.constant 0 : index
    %c0_16 = arith.constant 0 : index
    %14 = vector.load %arg4[%c0_15, %c0_16] : memref<3x1xf32, #tpu.memory_space<vmem>>, vector<3x1xf32>
    %15 = vector.broadcast %14 : vector<3x1xf32> to vector<3x64xf32>
    %16 = arith.addf %13, %15 : vector<3x64xf32>
    %cst_17 = arith.constant 0.000000e+00 : f32
    %17 = vector.broadcast %cst_17 : f32 to vector<3x64xf32>
    %18 = arith.maximumf %16, %17 : vector<3x64xf32>
    %c0_18 = arith.constant 0 : index
    %c0_19 = arith.constant 0 : index
    %c0_20 = arith.constant 0 : index
    %19 = vector.load %arg5[%c0_18, %c0_19, %c0_20] : memref<1x3x64xf32, #tpu.memory_space<vmem>>, vector<1x3x64xf32>
    %20 = vector.shape_cast %19 : vector<1x3x64xf32> to vector<3x64xf32>
    %21 = vector.shape_cast %18 : vector<3x64xf32> to vector<1x3x64xf32>
    tpu.vector_store %arg5[%c0_18, %c0_19, %c0_20], %21 {strides = array<i32>} : memref<1x3x64xf32, #tpu.memory_space<vmem>>, vector<1x3x64xf32>,
    return
  }
  func.func @transform_0(%arg0: i32) -> (i32, i32, i32, i32) {
    %c0_i32 = arith.constant 0 : i32
    %c0_i32_0 = arith.constant 0 : i32
    %c0_i32_1 = arith.constant 0 : i32
    %c0_i32_2 = arith.constant 0 : i32
    return %arg0, %c0_i32, %c0_i32_0, %c0_i32_1 : i32, i32, i32, i32
  }
  func.func @transform_1(%arg0: i32) -> (i32, i32, i32) {
    %c0_i32 = arith.constant 0 : i32
    %c0_i32_0 = arith.constant 0 : i32
    %c0_i32_1 = arith.constant 0 : i32
    %c0_i32_2 = arith.constant 0 : i32
    return %c0_i32, %c0_i32_0, %c0_i32_1 : i32, i32, i32
  }
  func.func @transform_2(%arg0: i32) -> (i32, i32) {
    %c0_i32 = arith.constant 0 : i32
    %c0_i32_0 = arith.constant 0 : i32
    %c0_i32_1 = arith.constant 0 : i32
    return %c0_i32, %c0_i32_0 : i32, i32
  }
  func.func @transform_3(%arg0: i32) -> (i32, i32) {
    %c0_i32 = arith.constant 0 : i32
    %c0_i32_0 = arith.constant 0 : i32
    %c0_i32_1 = arith.constant 0 : i32
    return %c0_i32, %c0_i32_0 : i32, i32
  }
  func.func @transform_4(%arg0: i32) -> (i32, i32, i32) {
    %c0_i32 = arith.constant 0 : i32
    %c0_i32_0 = arith.constant 0 : i32
    %c0_i32_1 = arith.constant 0 : i32
    return %arg0, %c0_i32, %c0_i32_0 : i32, i32, i32
  }
}

module attributes {stable_mosaic.version = 11 : i64} {
  func.func @_conv_kernel(%arg0: i32, %arg1: memref<1x1x8x72xbf16, #tpu.memory_space<vmem>>, %arg2: memref<2x3x8xbf16, #tpu.memory_space<vmem>>, %arg3: memref<3x1xf32, #tpu.memory_space<vmem>>, %arg4: memref<3x1xf32, #tpu.memory_space<vmem>>, %arg5: memref<1x3x64xf32, #tpu.memory_space<vmem>>) attributes {dimension_semantics = [#tpu.dimension_semantics<parallel>], iteration_bounds = array<i64: 2>, scalar_prefetch = 0 : i64, scratch_operands = 0 : i64, tpu.core_type = #tpu.core_type<tc>, window_params = [{transform_indices = @transform_0, window_bounds = array<i64: 1, 1, 8, 72>}, {pipeline_mode = #tpu.pipeline_mode<synchronous>, transform_indices = @transform_1, window_bounds = array<i64: 2, 3, 8>}, {pipeline_mode = #tpu.pipeline_mode<synchronous>, transform_indices = @transform_2, window_bounds = array<i64: 3, 1>}, {pipeline_mode = #tpu.pipeline_mode<synchronous>, transform_indices = @transform_3, window_bounds = array<i64: 3, 1>}, {transform_indices = @transform_4, window_bounds = array<i64: 1, 3, 64>}]} {
    %c0 = arith.constant 0 : index
    %c0_0 = arith.constant 0 : index
    %c0_1 = arith.constant 0 : index
    %c0_2 = arith.constant 0 : index
    %0 = vector.load %arg1[%c0, %c0_0, %c0_1, %c0_2] : memref<1x1x8x72xbf16, #tpu.memory_space<vmem>>, vector<1x1x8x64xbf16>
    %1 = vector.shape_cast %0 : vector<1x1x8x64xbf16> to vector<8x64xbf16>
    %c0_3 = arith.constant 0 : index
    %c0_4 = arith.constant 0 : index
    %c0_5 = arith.constant 0 : index
    %2 = vector.load %arg2[%c0_3, %c0_4, %c0_5] : memref<2x3x8xbf16, #tpu.memory_space<vmem>>, vector<1x3x8xbf16>
    %3 = vector.shape_cast %2 : vector<1x3x8xbf16> to vector<3x8xbf16>
    %cst = arith.constant dense<0.000000e+00> : vector<3x64xf32>
    %4 = tpu.matmul %3, %1, %cst {dimension_numbers = #tpu.dot_dimension_numbers<[1], [0], [0], [1], [0, 0, 1, 1], [], []>} : vector<3x8xbf16>, vector<8x64xbf16>, vector<3x64xf32> -> vector<3x64xf32>
    %c0_6 = arith.constant 0 : index
    %c0_7 = arith.constant 0 : index
    %c0_8 = arith.constant 0 : index
    %c8 = arith.constant 8 : index
    %5 = vector.load %arg1[%c0_6, %c0_7, %c0_8, %c8] : memref<1x1x8x72xbf16, #tpu.memory_space<vmem>>, vector<1x1x8x64xbf16>
    %6 = vector.shape_cast %5 : vector<1x1x8x64xbf16> to vector<8x64xbf16>
    %c1 = arith.constant 1 : index
    %c0_9 = arith.constant 0 : index
    %c0_10 = arith.constant 0 : index
    %7 = vector.load %arg2[%c1, %c0_9, %c0_10] : memref<2x3x8xbf16, #tpu.memory_space<vmem>>, vector<1x3x8xbf16>
    %8 = vector.shape_cast %7 : vector<1x3x8xbf16> to vector<3x8xbf16>
    %cst_11 = arith.constant dense<0.000000e+00> : vector<3x64xf32>
    %9 = tpu.matmul %8, %6, %cst_11 {dimension_numbers = #tpu.dot_dimension_numbers<[1], [0], [0], [1], [0, 0, 1, 1], [], []>} : vector<3x8xbf16>, vector<8x64xbf16>, vector<3x64xf32> -> vector<3x64xf32>
    %10 = arith.addf %4, %9 : vector<3x64xf32>
    %c0_12 = arith.constant 0 : index
    %c0_13 = arith.constant 0 : index
    %11 = vector.load %arg3[%c0_12, %c0_13] : memref<3x1xf32, #tpu.memory_space<vmem>>, vector<3x1xf32>
    %12 = vector.broadcast %11 : vector<3x1xf32> to vector<3x64xf32>
    %13 = arith.mulf %10, %12 : vector<3x64xf32>
    %c0_14 = arith.constant 0 : index
    %c0_15 = arith.constant 0 : index
    %14 = vector.load %arg4[%c0_14, %c0_15] : memref<3x1xf32, #tpu.memory_space<vmem>>, vector<3x1xf32>
    %15 = vector.broadcast %14 : vector<3x1xf32> to vector<3x64xf32>
    %16 = arith.addf %13, %15 : vector<3x64xf32>
    %cst_16 = arith.constant 0.000000e+00 : f32
    %17 = vector.broadcast %cst_16 : f32 to vector<3x64xf32>
    %18 = arith.maximumf %16, %17 : vector<3x64xf32>
    %c0_17 = arith.constant 0 : index
    %c0_18 = arith.constant 0 : index
    %c0_19 = arith.constant 0 : index
    %19 = vector.load %arg5[%c0_17, %c0_18, %c0_19] : memref<1x3x64xf32, #tpu.memory_space<vmem>>, vector<1x3x64xf32>
    %20 = vector.shape_cast %19 : vector<1x3x64xf32> to vector<3x64xf32>
    %21 = vector.shape_cast %18 : vector<3x64xf32> to vector<1x3x64xf32>
    tpu.vector_store %arg5[%c0_17, %c0_18, %c0_19], %21 {strides = array<i32>} : memref<1x3x64xf32, #tpu.memory_space<vmem>>, vector<1x3x64xf32>,
    return
  }
  func.func @transform_0(%arg0: i32) -> (i32, i32, i32, i32) {
    %c0_i32 = arith.constant 0 : i32
    %c0_i32_0 = arith.constant 0 : i32
    %c0_i32_1 = arith.constant 0 : i32
    %c0_i32_2 = arith.constant 0 : i32
    return %arg0, %c0_i32, %c0_i32_0, %c0_i32_1 : i32, i32, i32, i32
  }
  func.func @transform_1(%arg0: i32) -> (i32, i32, i32) {
    %c0_i32 = arith.constant 0 : i32
    %c0_i32_0 = arith.constant 0 : i32
    %c0_i32_1 = arith.constant 0 : i32
    %c0_i32_2 = arith.constant 0 : i32
    return %c0_i32, %c0_i32_0, %c0_i32_1 : i32, i32, i32
  }
  func.func @transform_2(%arg0: i32) -> (i32, i32) {
    %c0_i32 = arith.constant 0 : i32
    %c0_i32_0 = arith.constant 0 : i32
    %c0_i32_1 = arith.constant 0 : i32
    return %c0_i32, %c0_i32_0 : i32, i32
  }
  func.func @transform_3(%arg0: i32) -> (i32, i32) {
    %c0_i32 = arith.constant 0 : i32
    %c0_i32_0 = arith.constant 0 : i32
    %c0_i32_1 = arith.constant 0 : i32
    return %c0_i32, %c0_i32_0 : i32, i32
  }
  func.func @transform_4(%arg0: i32) -> (i32, i32, i32) {
    %c0_i32 = arith.constant 0 : i32
    %c0_i32_0 = arith.constant 0 : i32
    %c0_i32_1 = arith.constant 0 : i32
    return %arg0, %c0_i32, %c0_i32_0 : i32, i32, i32
  }
}

module attributes {stable_mosaic.version = 11 : i64} {
  func.func @_conv_kernel(%arg0: i32, %arg1: memref<1x2x8x72xbf16, #tpu.memory_space<vmem>>, %arg2: memref<4x3x8xbf16, #tpu.memory_space<vmem>>, %arg3: memref<3x1xf32, #tpu.memory_space<vmem>>, %arg4: memref<3x1xf32, #tpu.memory_space<vmem>>, %arg5: memref<1x3x64xf32, #tpu.memory_space<vmem>>) attributes {dimension_semantics = [#tpu.dimension_semantics<parallel>], iteration_bounds = array<i64: 2>, scalar_prefetch = 0 : i64, scratch_operands = 0 : i64, tpu.core_type = #tpu.core_type<tc>, window_params = [{transform_indices = @transform_0, window_bounds = array<i64: 1, 2, 8, 72>}, {pipeline_mode = #tpu.pipeline_mode<synchronous>, transform_indices = @transform_1, window_bounds = array<i64: 4, 3, 8>}, {pipeline_mode = #tpu.pipeline_mode<synchronous>, transform_indices = @transform_2, window_bounds = array<i64: 3, 1>}, {pipeline_mode = #tpu.pipeline_mode<synchronous>, transform_indices = @transform_3, window_bounds = array<i64: 3, 1>}, {transform_indices = @transform_4, window_bounds = array<i64: 1, 3, 64>}]} {
    %c0 = arith.constant 0 : index
    %c0_0 = arith.constant 0 : index
    %c0_1 = arith.constant 0 : index
    %c0_2 = arith.constant 0 : index
    %0 = vector.load %arg1[%c0, %c0_0, %c0_1, %c0_2] : memref<1x2x8x72xbf16, #tpu.memory_space<vmem>>, vector<1x1x8x64xbf16>
    %1 = vector.shape_cast %0 : vector<1x1x8x64xbf16> to vector<8x64xbf16>
    %c0_3 = arith.constant 0 : index
    %c0_4 = arith.constant 0 : index
    %c0_5 = arith.constant 0 : index
    %2 = vector.load %arg2[%c0_3, %c0_4, %c0_5] : memref<4x3x8xbf16, #tpu.memory_space<vmem>>, vector<1x3x8xbf16>
    %3 = vector.shape_cast %2 : vector<1x3x8xbf16> to vector<3x8xbf16>
    %cst = arith.constant dense<0.000000e+00> : vector<3x64xf32>
    %4 = tpu.matmul %3, %1, %cst {dimension_numbers = #tpu.dot_dimension_numbers<[1], [0], [0], [1], [0, 0, 1, 1], [], []>} : vector<3x8xbf16>, vector<8x64xbf16>, vector<3x64xf32> -> vector<3x64xf32>
    %c0_6 = arith.constant 0 : index
    %c1 = arith.constant 1 : index
    %c0_7 = arith.constant 0 : index
    %c0_8 = arith.constant 0 : index
    %5 = vector.load %arg1[%c0_6, %c1, %c0_7, %c0_8] : memref<1x2x8x72xbf16, #tpu.memory_space<vmem>>, vector<1x1x8x64xbf16>
    %6 = vector.shape_cast %5 : vector<1x1x8x64xbf16> to vector<8x64xbf16>
    %c1_9 = arith.constant 1 : index
    %c0_10 = arith.constant 0 : index
    %c0_11 = arith.constant 0 : index
    %7 = vector.load %arg2[%c1_9, %c0_10, %c0_11] : memref<4x3x8xbf16, #tpu.memory_space<vmem>>, vector<1x3x8xbf16>
    %8 = vector.shape_cast %7 : vector<1x3x8xbf16> to vector<3x8xbf16>
    %cst_12 = arith.constant dense<0.000000e+00> : vector<3x64xf32>
    %9 = tpu.matmul %8, %6, %cst_12 {dimension_numbers = #tpu.dot_dimension_numbers<[1], [0], [0], [1], [0, 0, 1, 1], [], []>} : vector<3x8xbf16>, vector<8x64xbf16>, vector<3x64xf32> -> vector<3x64xf32>
    %10 = arith.addf %4, %9 : vector<3x64xf32>
    %c0_13 = arith.constant 0 : index
    %c0_14 = arith.constant 0 : index
    %c0_15 = arith.constant 0 : index
    %c8 = arith.constant 8 : index
    %11 = vector.load %arg1[%c0_13, %c0_14, %c0_15, %c8] : memref<1x2x8x72xbf16, #tpu.memory_space<vmem>>, vector<1x1x8x64xbf16>
    %12 = vector.shape_cast %11 : vector<1x1x8x64xbf16> to vector<8x64xbf16>
    %c2 = arith.constant 2 : index
    %c0_16 = arith.constant 0 : index
    %c0_17 = arith.constant 0 : index
    %13 = vector.load %arg2[%c2, %c0_16, %c0_17] : memref<4x3x8xbf16, #tpu.memory_space<vmem>>, vector<1x3x8xbf16>
    %14 = vector.shape_cast %13 : vector<1x3x8xbf16> to vector<3x8xbf16>
    %cst_18 = arith.constant dense<0.000000e+00> : vector<3x64xf32>
    %15 = tpu.matmul %14, %12, %cst_18 {dimension_numbers = #tpu.dot_dimension_numbers<[1], [0], [0], [1], [0, 0, 1, 1], [], []>} : vector<3x8xbf16>, vector<8x64xbf16>, vector<3x64xf32> -> vector<3x64xf32>
    %16 = arith.addf %10, %15 : vector<3x64xf32>
    %c0_19 = arith.constant 0 : index
    %c1_20 = arith.constant 1 : index
    %c0_21 = arith.constant 0 : index
    %c8_22 = arith.constant 8 : index
    %17 = vector.load %arg1[%c0_19, %c1_20, %c0_21, %c8_22] : memref<1x2x8x72xbf16, #tpu.memory_space<vmem>>, vector<1x1x8x64xbf16>
    %18 = vector.shape_cast %17 : vector<1x1x8x64xbf16> to vector<8x64xbf16>
    %c3 = arith.constant 3 : index
    %c0_23 = arith.constant 0 : index
    %c0_24 = arith.constant 0 : index
    %19 = vector.load %arg2[%c3, %c0_23, %c0_24] : memref<4x3x8xbf16, #tpu.memory_space<vmem>>, vector<1x3x8xbf16>
    %20 = vector.shape_cast %19 : vector<1x3x8xbf16> to vector<3x8xbf16>
    %cst_25 = arith.constant dense<0.000000e+00> : vector<3x64xf32>
    %21 = tpu.matmul %20, %18, %cst_25 {dimension_numbers = #tpu.dot_dimension_numbers<[1], [0], [0], [1], [0, 0, 1, 1], [], []>} : vector<3x8xbf16>, vector<8x64xbf16>, vector<3x64xf32> -> vector<3x64xf32>
    %22 = arith.addf %16, %21 : vector<3x64xf32>
    %c0_26 = arith.constant 0 : index
    %c0_27 = arith.constant 0 : index
    %23 = vector.load %arg3[%c0_26, %c0_27] : memref<3x1xf32, #tpu.memory_space<vmem>>, vector<3x1xf32>
    %24 = vector.broadcast %23 : vector<3x1xf32> to vector<3x64xf32>
    %25 = arith.mulf %22, %24 : vector<3x64xf32>
    %c0_28 = arith.constant 0 : index
    %c0_29 = arith.constant 0 : index
    %26 = vector.load %arg4[%c0_28, %c0_29] : memref<3x1xf32, #tpu.memory_space<vmem>>, vector<3x1xf32>
    %27 = vector.broadcast %26 : vector<3x1xf32> to vector<3x64xf32>
    %28 = arith.addf %25, %27 : vector<3x64xf32>
    %cst_30 = arith.constant 0.000000e+00 : f32
    %29 = vector.broadcast %cst_30 : f32 to vector<3x64xf32>
    %30 = arith.maximumf %28, %29 : vector<3x64xf32>
    %c0_31 = arith.constant 0 : index
    %c0_32 = arith.constant 0 : index
    %c0_33 = arith.constant 0 : index
    %31 = vector.load %arg5[%c0_31, %c0_32, %c0_33] : memref<1x3x64xf32, #tpu.memory_space<vmem>>, vector<1x3x64xf32>
    %32 = vector.shape_cast %31 : vector<1x3x64xf32> to vector<3x64xf32>
    %33 = vector.shape_cast %30 : vector<3x64xf32> to vector<1x3x64xf32>
    tpu.vector_store %arg5[%c0_31, %c0_32, %c0_33], %33 {strides = array<i32>} : memref<1x3x64xf32, #tpu.memory_space<vmem>>, vector<1x3x64xf32>,
    return
  }
  func.func @transform_0(%arg0: i32) -> (i32, i32, i32, i32) {
    %c0_i32 = arith.constant 0 : i32
    %c0_i32_0 = arith.constant 0 : i32
    %c0_i32_1 = arith.constant 0 : i32
    %c0_i32_2 = arith.constant 0 : i32
    return %arg0, %c0_i32, %c0_i32_0, %c0_i32_1 : i32, i32, i32, i32
  }
  func.func @transform_1(%arg0: i32) -> (i32, i32, i32) {
    %c0_i32 = arith.constant 0 : i32
    %c0_i32_0 = arith.constant 0 : i32
    %c0_i32_1 = arith.constant 0 : i32
    %c0_i32_2 = arith.constant 0 : i32
    return %c0_i32, %c0_i32_0, %c0_i32_1 : i32, i32, i32
  }
  func.func @transform_2(%arg0: i32) -> (i32, i32) {
    %c0_i32 = arith.constant 0 : i32
    %c0_i32_0 = arith.constant 0 : i32
    %c0_i32_1 = arith.constant 0 : i32
    return %c0_i32, %c0_i32_0 : i32, i32
  }
  func.func @transform_3(%arg0: i32) -> (i32, i32) {
    %c0_i32 = arith.constant 0 : i32
    %c0_i32_0 = arith.constant 0 : i32
    %c0_i32_1 = arith.constant 0 : i32
    return %c0_i32, %c0_i32_0 : i32, i32
  }
  func.func @transform_4(%arg0: i32) -> (i32, i32, i32) {
    %c0_i32 = arith.constant 0 : i32
    %c0_i32_0 = arith.constant 0 : i32
    %c0_i32_1 = arith.constant 0 : i32
    return %arg0, %c0_i32, %c0_i32_0 : i32, i32, i32
  }
}

</mosaic_0001>

<bundles_post_ra>
// kernel: kart_cnn_forward.31
= control target key start
LH: loop header
LB: loop body
LE: loop exit
PB: predicated region body
PF: predicated region fallthrough
CT: control target
= control target key end

     0   :  { %s422_s15 = smov 0   ;;  %s458_s0 = inlined_call_operand.vmem [shape: bf16[2,1,8,16], index: 0, kind: input, shape index: {}]   ;;  %s459_s1 = inlined_call_operand.vmem [shape: bf16[1,16,8], index: 1, kind: input, shape index: {}]   ;;  %s460_s2 = inlined_call_operand.vmem [shape: f32[16,1], index: 2, kind: input, shape index: {}]   ;;  %s461_s3 = inlined_call_operand.vmem [shape: f32[16,1], index: 3, kind: input, shape index: {}]   ;;  %s462_s4 = inlined_call_operand.vmem [shape: bf16[2,16,16], index: 4, kind: output, shape index: {}]  }
   0x1 LB: > { %s347_s16 = sadd.s32 4294967295, %s392_s15   ;;  %p351_p0 = scmp.ge.s32.totalorder %s392_s15, 1  ;;  %s392_s15 = sphi %s422_s15, %s14_s15  }
   0x2   : > { %p161_p1 = scmp.lt.s32.totalorder %s392_s15, 3 }
   0x4   : > { %p162_p2 = pnand %p351_p0, %p161_p1 }
   0x5   : > { %p186_p3 = scmp.lt.s32.totalorder (!%p162_p2), %s347_s16, 1  ;;  %v394_v0 = vmov (!%p162_p2), 0.0   ;;  %vm395_vm0 = vmmov (!%p162_p2), 0   ;;  %v253_v1 = vld [vmem:[%s460_s2] sm:$0xff] (!%p162_p2)  ;;  %v396_v2 = vmov (!%p162_p2), 0   ;;  %vm208_vm1 = vcmask (!%p162_p2), 1043456  }
   0x6   : > { %165 = sbr.rel (%p162_p2) target bundleno = 242 (0xf2), region = 36  ;;  %366 = vmatprep.subr.bf16.mxu0 (!%p162_p2), %v394_v0  ;;  %368 = vmatprep.mubr.msk.bf16.mxu0 (!%p162_p2), %vm395_vm0, %v394_v0  ;;  %v267_v3 = vld [vmem:[%s461_s3] sm:$0xff] (!%p162_p2)  ;;  %v254_v4 = vld [vmem:[%s460_s2 + $0x8] sm:$0xff] (!%p162_p2)  ;;  %vm204_vm2 = vcmask (!%p162_p2), 64512   ;;  %vm289_vm3 = vcmask (!%p162_p2), 125952  }
   0x7   : > { %383 = vset.pattern.permute.xlu0 (!%p162_p2), %v396_v2  ;;  %384 = vset.pattern.permute.xlu1 (!%p162_p2), %v396_v2  ;;  %v268_v5 = vld [vmem:[%s461_s3 + $0x8] sm:$0xff] (!%p162_p2)  ;;  %v385_v8 = vld [vmem:[%s459_s1] sm:$0xff] (!%p162_p2)  }
   0x8   : > { %257 = vperm.xlu0 (!%p162_p2), %383, %v253_v1   ;;  %271 = vperm.xlu1 (!%p162_p2), %384, %v267_v3  }
   0xc   : > { %262 = vperm.xlu0 (!%p162_p2), %383, %v254_v4   ;;  %276 = vperm.xlu1 (!%p162_p2), %384, %v268_v5  }
   0xd   : > { %s464_s16 = smov (!%p186_p3, %s347_s16), 1 }
   0xe   : > { %s352_s21 = sshll.u32 %s464_s16, 2  ;;  %s361_s5 = sshll.u32 %s464_s16, 3 }
   0xf   : > { %s189_s28 = scalar_lea.vmem %s458_s0, %s352_s21  ;;  %s194_s8 = scalar_lea.vmem %s462_s4, %s361_s5 }
  0x10   : > { %v196_v6 = vld [vmem:[%s189_s28] sm:$0xf] }
  0x11   : > { %v210_v7 = vsel %vm208_vm1, %v196_v6, 0 }
  0x12   : > { %367 = vmatpush3.bf16.msra.mxu0 %v210_v7 }
  0x15   : > { %369 = vmatmul.mubr.msk.bf16.vlgmr.msra.gmra.mrb[0].mxu0 %vm204_vm2, %v385_v8 }
  0x87   : > { %v258_v9 = vpop.permute.xlu0 %257  ;;  %v272_v10 = vpop.permute.xlu1 %271 }
  0x8b   : > { %v263_v14 = vpop.permute.xlu0 %262  ;;  %v277_v19 = vpop.permute.xlu1 %276 }
  0xe8   : > { %v246_v11 = vpop.f32.mrb[0].mxu0 }
  0xe9   : > { %v265_v12 = vmul.f32 %v258_v9, %v246_v11  ;;  %v370_v13 = vpop.f32.mrb[1].mxu0 }
  0xea   : > { %v249_v15 = vpop.f32.mrb[2].mxu0 }
  0xeb   : > { %v279_v16 = vadd.f32 %v272_v10, %v265_v12  ;;  %v266_v17 = vmul.f32 %v263_v14, %v249_v15  ;;  %v371_v18 = vpop.f32.mrb[3].mxu0 }
  0xed   : > { %v362_v20 = vpack.c.bf16 %v279_v16, %v279_v16  ;;  %v280_v21 = vadd.f32 %v277_v19, %v266_v17 }
  0xef   : > { %290 = vst.msk [vmem:[%s194_s8] sm:$0xf] %vm289_vm3, %v362_v20  ;;  %v363_v22 = vpack.c.bf16 %v280_v21, %v280_v21 }
  0xf1   : > { %291 = vst.msk [vmem:[%s194_s8 + $0x4] sm:$0xf] %vm289_vm3, %v363_v22 }
  0xf2 PF: > { %s14_s15 = sadd.s32 1, %s392_s15  }
  0xf3   : > { %p11_p4 = scmp.ge.s32.totalorder %s14_s15, 4  }
  0xf5   :  { %13 = sbr.rel (!%p11_p4) target bundleno = 1 (0x1), region = 66 }

// kernel: kart_cnn_forward.29
= control target key start
LH: loop header
LB: loop body
LE: loop exit
PB: predicated region body
PF: predicated region fallthrough
CT: control target
= control target key end

     0   :  { %s3766_s15 = smov 0   ;;  %s4258_s0 = inlined_call_operand.vmem [shape: bf16[2,28,3,72], index: 0, kind: input, shape index: {}]   ;;  %s4259_s1 = inlined_call_operand.vmem [shape: bf16[49,8,3], index: 1, kind: input, shape index: {}]   ;;  %s4260_s2 = inlined_call_operand.vmem [shape: f32[8,1], index: 2, kind: input, shape index: {}]   ;;  %s4261_s3 = inlined_call_operand.vmem [shape: f32[8,1], index: 3, kind: input, shape index: {}]   ;;  %s4262_s4 = inlined_call_operand.vmem [shape: bf16[2,8,64], index: 4, kind: output, shape index: {}]  }
   0x1 LB: > { %s2956_s16 = sadd.s32 4294967295, %s3733_s15   ;;  %p2960_p0 = scmp.ge.s32.totalorder %s3733_s15, 1  ;;  %s3733_s15 = sphi %s3766_s15, %s14_s15  }
   0x2   : > { %p162_p1 = scmp.lt.s32.totalorder %s3733_s15, 3 }
   0x4   : > { %p163_p2 = pnand %p2960_p0, %p162_p1 }
   0x5   : > { %p187_p3 = scmp.lt.s32.totalorder (!%p163_p2), %s2956_s16, 1  ;;  %vm207_vm0 = vcmask (!%p163_p2), 1040384   ;;  %v3735_v0 = vmov (!%p163_p2), 0.0   ;;  %v1632_v1 = vlaneseq (!%p163_p2)  ;;  %vm208_vm1 = vcmask (!%p163_p2), 1041408   ;;  %s3739_s21 = smov (!%p163_p2), 120  }
   0x6   : > { %166 = sbr.rel (%p163_p2) target bundleno = 603 (0x25b), region = 36  ;;  %3227 = vmatprep.subr.bf16.mxu1 (!%p163_p2), %v3735_v0  ;;  %3371 = vmatprep.subr.bf16.mxu0 (!%p163_p2), %v3735_v0  ;;  %v3736_v2 = vmov (!%p163_p2), 65535   ;;  %v3737_v4 = vmov (!%p163_p2), 1983009808   ;;  %vm3738_vm2 = vmmov (!%p163_p2), 0   ;;  %vm203_vm3 = vcmask (!%p163_p2), 23552  }
   0x7   : > { %v209_v3 = vsel (!%p163_p2), %vm207_vm0, 4294967295, %v3736_v2  ;;  %v1630_v5 = vunpack.c.l.s4 (!%p163_p2), %v3737_v4  ;;  %3229 = vmatprep.mubr.msk.bf16.mxu1 (!%p163_p2), %vm3738_vm2, %v3735_v0  ;;  %3373 = vmatprep.mubr.msk.bf16.mxu0 (!%p163_p2), %vm3738_vm2, %v3735_v0  ;;  %v1633_v6 = vshrl.u32 (!%p163_p2), %v1632_v1, 7  ;;  %v2964_v16 = vld [vmem:[%s4259_s1 + $0x4] sm:$0xf] (!%p163_p2)  ;;  %v3034_v23 = vld [vmem:[%s4259_s1 + $0x60] sm:$0xf] (!%p163_p2) }
   0x8   : > { %v3783_v8 = vsel (!%p163_p2), %vm208_vm1, %v209_v3, 0  ;;  %v198_v29 = vld [vmem:[%s4259_s1] sm:$0xf] (!%p163_p2)  ;;  %v3037_v34 = vld [vmem:[%s4259_s1 + $0x64] sm:$0xf] (!%p163_p2)  ;;  %vm2901_vm4 = vcmask (!%p163_p2), 519168  }
   0x9   : > { %v1631_v7 = vunpack.c.0.s8 (!%p163_p2), %v1630_v5  ;;  %v2968_v40 = vld [vmem:[%s4259_s1 + $0x8] sm:$0xf] (!%p163_p2)  ;;  %v2971_v48 = vld [vmem:[%s4259_s1 + $0xc] sm:$0xf] (!%p163_p2)  ;;  %v2974_v53 = vld [vmem:[%s4259_s1 + $0x10] sm:$0xf] (!%p163_p2) }
   0xa   : > { %v3040_v44 = vld [vmem:[%s4259_s1 + $0x68] sm:$0xf] (!%p163_p2)  ;;  %v3043_v50 = vld [vmem:[%s4259_s1 + $0x6c] sm:$0xf] (!%p163_p2)  ;;  %v2977_v57 = vld [vmem:[%s4259_s1 + $0x14] sm:$0xf] (!%p163_p2) }
   0xb   : > { %v1634_v9 = vsub.s32 (!%p163_p2), %v1631_v7, %v1633_v6  ;;  %v2980_v61 = vld [vmem:[%s4259_s1 + $0x18] sm:$0xf] (!%p163_p2)  ;;  %v2983_v2 = vld [vmem:[%s4259_s1 + $0x1c] sm:$0xf] (!%p163_p2)  ;;  %v2986_v6 = vld [vmem:[%s4259_s1 + $0x20] sm:$0xf] (!%p163_p2) }
   0xd   : > { %s4264_s16 = smov (!%p187_p3, %s2956_s16), 1 }
   0xe   : > { %s3710_s17 = smul.u32 56, %s4264_s16  ;;  %s2962_s5 = sshll.u32 %s4264_s16, 2 }
   0xf   : > { %s195_s8 = scalar_lea.vmem %s4262_s4, %s2962_s5 }
  0x10   : > { %s3788_s20 = scalar_lea.vmem %s4258_s0, %s3710_s17 }
  0x11   : > { %v2963_v10 = vld [vmem:[%s3788_s20 + $0x2] sm:$0x3]  ;;  %v197_v11 = vld [vmem:[%s3788_s20] sm:$0x3]  ;;  %v3033_v18 = vld [vmem:[%s3788_s20 + $0x30] sm:$0x3] }
  0x12   : > { %v212_v12 = vand.u32 %v2963_v10, %v3783_v8  ;;  %v1635_v13 = vrot.slane %v197_v11, %v1634_v9  ;;  %v3053_v14 = vld.sshfl [vmem:[%s3788_s20 + $0x4] sm:$0x3 pattern:$0x76325410]  ;;  %v258_v15 = vand.u32 %v3783_v8, %v197_v11  ;;  %v1430_v19 = vand.u32 %v3033_v18, %v3783_v8  ;;  %v3036_v21 = vld [vmem:[%s3788_s20 + $0x32] sm:$0x3] }
  0x13   : > { %v3049_v17 = vld.sshfl [vmem:[%s3788_s20 + $0x2] sm:$0x3 pattern:$0x76325410]  ;;  %1756 = vrot.lane.b32.xlu1 %v3053_v14, %s3739_s21  ;;  %v1481_v24 = vand.u32 %v3036_v21, %v3783_v8  ;;  %v2967_v26 = vld [vmem:[%s3788_s20 + $0x4] sm:$0x3] }
  0x14   : > { %3228 = vmatpush3.bf16.msra.mxu1 %v212_v12  ;;  %1636 = vrot.lane.b32.xlu0 %v1635_v13, %s3739_s21  ;;  %v3057_v20 = vld.sshfl [vmem:[%s3788_s20 + $0x6] sm:$0x3 pattern:$0x76325410]  ;;  %v308_v30 = vand.u32 %v2967_v26, %v3783_v8  ;;  %v3039_v32 = vld [vmem:[%s3788_s20 + $0x34] sm:$0x3] }
  0x15   : > { %3233 = vmatprep.subr.bf16.mxu1 %v3735_v0  ;;  %v3061_v22 = vld.sshfl [vmem:[%s3788_s20 + $0x8] sm:$0x3 pattern:$0x76325410]  ;;  %3372 = vmatpush3.bf16.msra.mxu0 %v1430_v19  ;;  %v1532_v35 = vand.u32 %v3039_v32, %v3783_v8  ;;  %v2970_v38 = vld [vmem:[%s3788_s20 + $0x6] sm:$0x3] }
  0x16   : > { %v3065_v25 = vld.sshfl [vmem:[%s3788_s20 + $0xa] sm:$0x3 pattern:$0x76325410]  ;;  %3377 = vmatprep.subr.bf16.mxu0 %v3735_v0  ;;  %v359_v41 = vand.u32 %v2970_v38, %v3783_v8  ;;  %v3042_v43 = vld [vmem:[%s3788_s20 + $0x36] sm:$0x3] }
  0x17   : > { %3230 = vmatmul.mubr.msk.bf16.vlgmr.msra.gmra.mrb[0].mxu1 %vm203_vm3, %v2964_v16  ;;  %1816 = vrot.lane.b32.xlu1 %v3057_v20, %s3739_s21  ;;  %v3069_v27 = vld.sshfl [vmem:[%s3788_s20 + $0xc] sm:$0x3 pattern:$0x76325410]  ;;  %v1583_v45 = vand.u32 %v3042_v43, %v3783_v8  ;;  %v2973_v47 = vld [vmem:[%s3788_s20 + $0x8] sm:$0x3] }
  0x18   : > { %1696 = vrot.lane.b32.xlu0 %v3049_v17, %s3739_s21  ;;  %3234 = vmatpush3.bf16.msra.mxu1 %v258_v15  ;;  %v3073_v28 = vld.sshfl [vmem:[%s3788_s20 + $0xe] sm:$0x3 pattern:$0x76325410]  ;;  %v410_v49 = vand.u32 %v2973_v47, %v3783_v8  ;;  %v2976_v52 = vld [vmem:[%s3788_s20 + $0xa] sm:$0x3] }
  0x19   : > { %3235 = vmatprep.mubr.msk.bf16.mxu1 %vm3738_vm2, %v3735_v0  ;;  %3239 = vmatprep.subr.bf16.mxu1 %v3735_v0  ;;  %v3077_v31 = vld.sshfl [vmem:[%s3788_s20 + $0x10] sm:$0x3 pattern:$0x76325410]  ;;  %v461_v54 = vand.u32 %v2976_v52, %v3783_v8  ;;  %v2979_v56 = vld [vmem:[%s3788_s20 + $0xc] sm:$0x3] }
  0x1a   : > { %3374 = vmatmul.mubr.msk.bf16.vlgmr.msra.gmra.mrb[0].mxu0 %vm203_vm3, %v3034_v23  ;;  %v3081_v33 = vld.sshfl [vmem:[%s3788_s20 + $0x12] sm:$0x3 pattern:$0x76325410]  ;;  %v512_v58 = vand.u32 %v2979_v56, %v3783_v8  ;;  %v2982_v60 = vld [vmem:[%s3788_s20 + $0xe] sm:$0x3] }
  0x1b   : > { %1936 = vrot.lane.b32.xlu1 %v3065_v25, %s3739_s21  ;;  %3378 = vmatpush3.bf16.msra.mxu0 %v1481_v24  ;;  %v3085_v36 = vld.sshfl [vmem:[%s3788_s20 + $0x14] sm:$0x3 pattern:$0x76325410]  ;;  %v563_v62 = vand.u32 %v2982_v60, %v3783_v8  ;;  %v2985_v1 = vld [vmem:[%s3788_s20 + $0x10] sm:$0x3] }
  0x1c   : > { %1876 = vrot.lane.b32.xlu0 %v3061_v22, %s3739_s21  ;;  %3379 = vmatprep.mubr.msk.bf16.mxu0 %vm3738_vm2, %v3735_v0  ;;  %v3089_v37 = vld.sshfl [vmem:[%s3788_s20 + $0x16] sm:$0x3 pattern:$0x76325410]  ;;  %v614_v3 = vand.u32 %v2985_v1, %v3783_v8  ;;  %v2988_v5 = vld [vmem:[%s3788_s20 + $0x12] sm:$0x3] }
  0x1d   : > { %3383 = vmatprep.subr.bf16.mxu0 %v3735_v0  ;;  %v3093_v39 = vld.sshfl [vmem:[%s3788_s20 + $0x18] sm:$0x3 pattern:$0x76325410]  ;;  %v665_v7 = vand.u32 %v2988_v5, %v3783_v8  ;;  %v2991_v10 = vld [vmem:[%s3788_s20 + $0x14] sm:$0x3] }
  0x1e   : > { %v3097_v42 = vld.sshfl [vmem:[%s3788_s20 + $0x1a] sm:$0x3 pattern:$0x76325410]  ;;  %v2989_v11 = vld [vmem:[%s4259_s1 + $0x24] sm:$0xf]  ;;  %v716_v12 = vand.u32 %v2991_v10, %v3783_v8 }
  0x1f   : > { %2056 = vrot.lane.b32.xlu1 %v3073_v28, %s3739_s21  ;;  %v3101_v46 = vld.sshfl [vmem:[%s3788_s20 + $0x1c] sm:$0x3 pattern:$0x76325410]  ;;  %v3045_v15 = vld [vmem:[%s4259_s1 + $0x70] sm:$0xf] }
  0x20   : > { %1996 = vrot.lane.b32.xlu0 %v3069_v27, %s3739_s21  ;;  %v3105_v51 = vld.sshfl [vmem:[%s3788_s20 + $0x1e] sm:$0x3 pattern:$0x76325410]  ;;  %v2994_v16 = vld [vmem:[%s3788_s20 + $0x16] sm:$0x3] }
  0x21   : > { %v3109_v55 = vld.sshfl [vmem:[%s3788_s20 + $0x20] sm:$0x3 pattern:$0x76325410]  ;;  %v2992_v19 = vld [vmem:[%s4259_s1 + $0x28] sm:$0xf]  ;;  %v767_v20 = vand.u32 %v2994_v16, %v3783_v8 }
  0x22   : > { %v3113_v59 = vld.sshfl [vmem:[%s3788_s20 + $0x22] sm:$0x3 pattern:$0x76325410]  ;;  %v3048_v22 = vld [vmem:[%s4259_s1 + $0x74] sm:$0xf] }
  0x23   : > { %3236 = vmatmul.mubr.msk.bf16.vlgmr.msra.gmra.mrb[0].mxu1 %vm203_vm3, %v198_v29  ;;  %2176 = vrot.lane.b32.xlu1 %v3081_v33, %s3739_s21  ;;  %v3117_v63 = vld.sshfl [vmem:[%s3788_s20 + $0x24] sm:$0x3 pattern:$0x76325410]  ;;  %v2997_v24 = vld [vmem:[%s3788_s20 + $0x18] sm:$0x3] }
  0x24   : > { %3240 = vmatpush3.bf16.msra.mxu1 %v308_v30  ;;  %3241 = vmatprep.mubr.msk.bf16.mxu1 %vm3738_vm2, %v3735_v0  ;;  %v3121_v4 = vld.sshfl [vmem:[%s3788_s20 + $0x26] sm:$0x3 pattern:$0x76325410]  ;;  %v2995_v25 = vld [vmem:[%s4259_s1 + $0x2c] sm:$0xf]  ;;  %v818_v26 = vand.u32 %v2997_v24, %v3783_v8 }
  0x25   : > { %3245 = vmatprep.subr.bf16.mxu1 %v3735_v0  ;;  %2116 = vrot.lane.b32.xlu0 %v3077_v31, %s3739_s21  ;;  %v3125_v9 = vld.sshfl [vmem:[%s3788_s20 + $0x28] sm:$0x3 pattern:$0x76325410]  ;;  %v3052_v28 = vld [vmem:[%s4259_s1 + $0x78] sm:$0xf] }
  0x26   : > { %3380 = vmatmul.mubr.msk.bf16.vlgmr.msra.gmra.mrb[0].mxu0 %vm203_vm3, %v3037_v34  ;;  %v3000_v30 = vld [vmem:[%s3788_s20 + $0x1a] sm:$0x3]  ;;  %v2998_v31 = vld [vmem:[%s4259_s1 + $0x30] sm:$0xf]  ;;  %v3056_v34 = vld [vmem:[%s4259_s1 + $0x7c] sm:$0xf] }
  0x27   : > { %3384 = vmatpush3.bf16.msra.mxu0 %v1532_v35  ;;  %3385 = vmatprep.mubr.msk.bf16.mxu0 %vm3738_vm2, %v3735_v0  ;;  %v869_v32 = vand.u32 %v3000_v30, %v3783_v8  ;;  %v3004_v43 = vld [vmem:[%s4259_s1 + $0x38] sm:$0xf]  ;;  %v3068_v52 = vld [vmem:[%s4259_s1 + $0x88] sm:$0xf]  ;;  %v3015_v60 = vld [vmem:[%s3788_s20 + $0x24] sm:$0x3] }
  0x28   : > { %3389 = vmatprep.subr.bf16.mxu0 %v3735_v0  ;;  %2296 = vrot.lane.b32.xlu1 %v3089_v37, %s3739_s21  ;;  %v3001_v37 = vld [vmem:[%s4259_s1 + $0x34] sm:$0xf]  ;;  %v3076_v1 = vld [vmem:[%s4259_s1 + $0x90] sm:$0xf]  ;;  %v3021_v10 = vld [vmem:[%s3788_s20 + $0x28] sm:$0x3] }
  0x29   : > { %2236 = vrot.lane.b32.xlu0 %v3085_v36, %s3739_s21  ;;  %v3003_v36 = vld [vmem:[%s3788_s20 + $0x1c] sm:$0x3] }
  0x2a   : > { %v920_v38 = vand.u32 %v3003_v36, %v3783_v8 }
  0x2c   : > { %2416 = vrot.lane.b32.xlu1 %v3097_v42, %s3739_s21  ;;  %v3006_v42 = vld [vmem:[%s3788_s20 + $0x1e] sm:$0x3] }
  0x2d   : > { %2356 = vrot.lane.b32.xlu0 %v3093_v39, %s3739_s21 }
  0x2f   : > { %3242 = vmatmul.mubr.msk.bf16.vlgmr.msra.gmra.mrb[0].mxu1 %vm203_vm3, %v2968_v40  ;;  %v3060_v40 = vld [vmem:[%s4259_s1 + $0x80] sm:$0xf] }
  0x30   : > { %3246 = vmatpush3.bf16.msra.mxu1 %v359_v41  ;;  %3247 = vmatprep.mubr.msk.bf16.mxu1 %vm3738_vm2, %v3735_v0 }
  0x31   : > { %3251 = vmatprep.subr.bf16.mxu1 %v3735_v0  ;;  %2476 = vrot.lane.b32.xlu0 %v3101_v46, %s3739_s21  ;;  %v3064_v46 = vld [vmem:[%s4259_s1 + $0x84] sm:$0xf] }
  0x32   : > { %3386 = vmatmul.mubr.msk.bf16.vlgmr.msra.gmra.mrb[0].mxu0 %vm203_vm3, %v3040_v44  ;;  %2536 = vrot.lane.b32.xlu1 %v3105_v51, %s3739_s21  ;;  %v971_v44 = vand.u32 %v3006_v42, %v3783_v8  ;;  %v3104_v42 = vld [vmem:[%s4259_s1 + $0xac] sm:$0xf] }
  0x33   : > { %3390 = vmatpush3.bf16.msra.mxu0 %v1583_v45  ;;  %3391 = vmatprep.mubr.msk.bf16.mxu0 %vm3738_vm2, %v3735_v0 }
  0x34   : > { %3395 = vmatprep.subr.bf16.mxu0 %v3735_v0 }
  0x35   : > { %2596 = vrot.lane.b32.xlu0 %v3109_v55, %s3739_s21  ;;  %v3010_v55 = vld [vmem:[%s4259_s1 + $0x40] sm:$0xf] }
  0x36   : > { %2656 = vrot.lane.b32.xlu1 %v3113_v59, %s3739_s21 }
  0x39   : > { %2716 = vrot.lane.b32.xlu0 %v3117_v63, %s3739_s21 }
  0x3a   : > { %2776 = vrot.lane.b32.xlu1 %v3121_v4, %s3739_s21  ;;  %v3016_v4 = vld [vmem:[%s4259_s1 + $0x48] sm:$0xf] }
  0x3b   : > { %3248 = vmatmul.mubr.msk.bf16.vlgmr.msra.gmra.mrb[0].mxu1 %vm203_vm3, %v2971_v48  ;;  %v3009_v48 = vld [vmem:[%s3788_s20 + $0x20] sm:$0x3] }
  0x3c   : > { %3252 = vmatpush3.bf16.msra.mxu1 %v410_v49  ;;  %3253 = vmatprep.mubr.msk.bf16.mxu1 %vm3738_vm2, %v3735_v0  ;;  %v3007_v49 = vld [vmem:[%s4259_s1 + $0x3c] sm:$0xf] }
  0x3d   : > { %3257 = vmatprep.subr.bf16.mxu1 %v3735_v0  ;;  %2836 = vrot.lane.b32.xlu0 %v3125_v9, %s3739_s21 }
  0x3e   : > { %3392 = vmatmul.mubr.msk.bf16.vlgmr.msra.gmra.mrb[0].mxu0 %vm203_vm3, %v3043_v50  ;;  %v1022_v50 = vand.u32 %v3009_v48, %v3783_v8  ;;  %v3112_v48 = vld [vmem:[%s4259_s1 + $0xb4] sm:$0xf] }
  0x3f   : > { %3397 = vmatprep.mubr.msk.bf16.mxu0 %vm3738_vm2, %v3735_v0 }
  0x47   : > { %3254 = vmatmul.mubr.msk.bf16.vlgmr.msra.gmra.mrb[0].mxu1 %vm203_vm3, %v2974_v53 }
  0x48   : > { %3258 = vmatpush3.bf16.msra.mxu1 %v461_v54  ;;  %3259 = vmatprep.mubr.msk.bf16.mxu1 %vm3738_vm2, %v3735_v0  ;;  %v3012_v54 = vld [vmem:[%s3788_s20 + $0x22] sm:$0x3] }
  0x49   : > { %3263 = vmatprep.subr.bf16.mxu1 %v3735_v0  ;;  %v1073_v56 = vand.u32 %v3012_v54, %v3783_v8  ;;  %v3120_v54 = vld [vmem:[%s4259_s1 + $0xbc] sm:$0xf] }
  0x53   : > { %3260 = vmatmul.mubr.msk.bf16.vlgmr.msra.gmra.mrb[0].mxu1 %vm203_vm3, %v2977_v57 }
  0x54   : > { %3264 = vmatpush3.bf16.msra.mxu1 %v512_v58  ;;  %3265 = vmatprep.mubr.msk.bf16.mxu1 %vm3738_vm2, %v3735_v0  ;;  %v3072_v58 = vld [vmem:[%s4259_s1 + $0x8c] sm:$0xf] }
  0x55   : > { %3269 = vmatprep.subr.bf16.mxu1 %v3735_v0 }
  0x5f   : > { %3266 = vmatmul.mubr.msk.bf16.vlgmr.msra.gmra.mrb[0].mxu1 %vm203_vm3, %v2980_v61  ;;  %v3013_v61 = vld [vmem:[%s4259_s1 + $0x44] sm:$0xf] }
  0x60   : > { %3270 = vmatpush3.bf16.msra.mxu1 %v563_v62  ;;  %3271 = vmatprep.mubr.msk.bf16.mxu1 %vm3738_vm2, %v3735_v0  ;;  %v1124_v62 = vand.u32 %v3015_v60, %v3783_v8 }
  0x61   : > { %3275 = vmatprep.subr.bf16.mxu1 %v3735_v0 }
  0x6b   : > { %3272 = vmatmul.mubr.msk.bf16.vlgmr.msra.gmra.mrb[0].mxu1 %vm203_vm3, %v2983_v2 }
  0x6c   : > { %3276 = vmatpush3.bf16.msra.mxu1 %v614_v3  ;;  %3277 = vmatprep.mubr.msk.bf16.mxu1 %vm3738_vm2, %v3735_v0  ;;  %v3018_v3 = vld [vmem:[%s3788_s20 + $0x26] sm:$0x3] }
  0x6d   : > { %3281 = vmatprep.subr.bf16.mxu1 %v3735_v0  ;;  %v1175_v5 = vand.u32 %v3018_v3, %v3783_v8 }
  0x77   : > { %3278 = vmatmul.mubr.msk.bf16.vlgmr.msra.gmra.mrb[0].mxu1 %vm203_vm3, %v2986_v6 }
  0x78   : > { %3282 = vmatpush3.bf16.msra.mxu1 %v665_v7  ;;  %3283 = vmatprep.mubr.msk.bf16.mxu1 %vm3738_vm2, %v3735_v0  ;;  %v3080_v7 = vld [vmem:[%s4259_s1 + $0x94] sm:$0xf] }
  0x79   : > { %3287 = vmatprep.subr.bf16.mxu1 %v3735_v0 }
  0x83   : > { %3284 = vmatmul.mubr.msk.bf16.vlgmr.msra.gmra.mrb[0].mxu1 %vm203_vm3, %v2989_v11  ;;  %v3019_v11 = vld [vmem:[%s4259_s1 + $0x4c] sm:$0xf] }
  0x84   : > { %3288 = vmatpush3.bf16.msra.mxu1 %v716_v12  ;;  %3289 = vmatprep.mubr.msk.bf16.mxu1 %vm3738_vm2, %v3735_v0  ;;  %v1226_v12 = vand.u32 %v3021_v10, %v3783_v8 }
  0x85   : > { %3293 = vmatprep.subr.bf16.mxu1 %v3735_v0  ;;  %v1757_v21 = vpop.permute.xlu1 %1756 }
  0x86   : > { %v1637_v13 = vpop.permute.xlu0 %1636  ;;  %v1762_v23 = vand.u32 %v1757_v21, %v3783_v8 }
  0x87   : > { %v1642_v14 = vand.u32 %v1637_v13, %v3783_v8  ;;  %v2885_v13 = vld [vmem:[%s4260_s2] sm:$0xff] }
  0x89   : > { %3396 = vmatpush3.bf16.msra.mxu0 %v1642_v14  ;;  %v1817_v27 = vpop.permute.xlu1 %1816  ;;  %v2892_v14 = vld [vmem:[%s4261_s3] sm:$0xff] }
  0x8a   : > { %v1697_v17 = vpop.permute.xlu0 %1696  ;;  %3401 = vmatprep.subr.bf16.mxu0 %v3735_v0  ;;  %v1822_v29 = vand.u32 %v1817_v27, %v3783_v8 }
  0x8b   : > { %v1702_v18 = vand.u32 %v1697_v17, %v3783_v8  ;;  %v3084_v17 = vld [vmem:[%s4259_s1 + $0x98] sm:$0xf] }
  0x8c   : > { %3398 = vmatmul.mubr.msk.bf16.vlgmr.msra.gmra.mrb[0].mxu0 %vm203_vm3, %v3045_v15  ;;  %v3740_v15 = vmov 0  }
  0x8d   : > { %3402 = vmatpush3.bf16.msra.mxu0 %v1702_v18  ;;  %3403 = vmatprep.mubr.msk.bf16.mxu0 %vm3738_vm2, %v3735_v0  ;;  %v1937_v39 = vpop.permute.xlu1 %1936 }
  0x8e   : > { %3407 = vmatprep.subr.bf16.mxu0 %v3735_v0  ;;  %v1877_v33 = vpop.permute.xlu0 %1876  ;;  %v1942_v41 = vand.u32 %v1937_v39, %v3783_v8  ;;  %3725 = vset.pattern.permute.xlu1 %v3740_v15  ;;  %v3100_v39 = vld [vmem:[%s4259_s1 + $0xa8] sm:$0xf] }
  0x8f   : > { %3290 = vmatmul.mubr.msk.bf16.vlgmr.msra.gmra.mrb[0].mxu1 %vm203_vm3, %v2992_v19  ;;  %v1882_v35 = vand.u32 %v1877_v33, %v3783_v8  ;;  %2888 = vperm.xlu1 %3725, %v2885_v13   ;;  %v3024_v19 = vld [vmem:[%s3788_s20 + $0x2a] sm:$0x3] }
  0x90   : > { %3294 = vmatpush3.bf16.msra.mxu1 %v767_v20  ;;  %3295 = vmatprep.mubr.msk.bf16.mxu1 %vm3738_vm2, %v3735_v0  ;;  %v3022_v20 = vld [vmem:[%s4259_s1 + $0x50] sm:$0xf]  ;;  %v1277_v21 = vand.u32 %v3024_v19, %v3783_v8 }
  0x91   : > { %3299 = vmatprep.subr.bf16.mxu1 %v3735_v0  ;;  %v2057_v51 = vpop.permute.xlu1 %2056  ;;  %3726 = vset.pattern.permute.xlu0 %v3740_v15 }
  0x92   : > { %v1997_v45 = vpop.permute.xlu0 %1996  ;;  %v2062_v53 = vand.u32 %v2057_v51, %v3783_v8  ;;  %2895 = vperm.xlu0 %3726, %v2892_v14   ;;  %v3116_v51 = vld [vmem:[%s4259_s1 + $0xb8] sm:$0xf] }
  0x93   : > { %v2002_v47 = vand.u32 %v1997_v45, %v3783_v8  ;;  %v3108_v45 = vld [vmem:[%s4259_s1 + $0xb0] sm:$0xf] }
  0x95   : > { %v2177_v63 = vpop.permute.xlu1 %2176 }
  0x96   : > { %v2182_v2 = vand.u32 %v2177_v63, %v3783_v8 }
  0x97   : > { %v2117_v57 = vpop.permute.xlu0 %2116 }
  0x98   : > { %3404 = vmatmul.mubr.msk.bf16.vlgmr.msra.gmra.mrb[0].mxu0 %vm203_vm3, %v3048_v22  ;;  %v2122_v59 = vand.u32 %v2117_v57, %v3783_v8 }
  0x99   : > { %3408 = vmatpush3.bf16.msra.mxu0 %v1762_v23  ;;  %3409 = vmatprep.mubr.msk.bf16.mxu0 %vm3738_vm2, %v3735_v0  ;;  %v3088_v23 = vld [vmem:[%s4259_s1 + $0x9c] sm:$0xf] }
  0x9a   : > { %3413 = vmatprep.subr.bf16.mxu0 %v3735_v0  ;;  %v2297_v16 = vpop.permute.xlu1 %2296 }
  0x9b   : > { %3296 = vmatmul.mubr.msk.bf16.vlgmr.msra.gmra.mrb[0].mxu1 %vm203_vm3, %v2995_v25  ;;  %v2237_v6 = vpop.permute.xlu0 %2236  ;;  %v2302_v18 = vand.u32 %v2297_v16, %v3783_v8  ;;  %v3027_v25 = vld [vmem:[%s3788_s20 + $0x2c] sm:$0x3] }
  0x9c   : > { %3300 = vmatpush3.bf16.msra.mxu1 %v818_v26  ;;  %3301 = vmatprep.mubr.msk.bf16.mxu1 %vm3738_vm2, %v3735_v0  ;;  %v2242_v9 = vand.u32 %v2237_v6, %v3783_v8  ;;  %v3025_v26 = vld [vmem:[%s4259_s1 + $0x54] sm:$0xf]  ;;  %v1328_v27 = vand.u32 %v3027_v25, %v3783_v8 }
  0x9d   : > { %3305 = vmatprep.subr.bf16.mxu1 %v3735_v0 }
  0x9f   : > { %v2357_v22 = vpop.permute.xlu0 %2356 }
  0xa0   : > { %v2362_v24 = vand.u32 %v2357_v22, %v3783_v8 }
  0xa4   : > { %3410 = vmatmul.mubr.msk.bf16.vlgmr.msra.gmra.mrb[0].mxu0 %vm203_vm3, %v3052_v28  ;;  %v2417_v28 = vpop.permute.xlu1 %2416 }
  0xa5   : > { %3414 = vmatpush3.bf16.msra.mxu0 %v1822_v29  ;;  %3415 = vmatprep.mubr.msk.bf16.mxu0 %vm3738_vm2, %v3735_v0  ;;  %v3092_v29 = vld [vmem:[%s4259_s1 + $0xa0] sm:$0xf]  ;;  %v2422_v30 = vand.u32 %v2417_v28, %v3783_v8 }
  0xa6   : > { %3419 = vmatprep.subr.bf16.mxu0 %v3735_v0 }
  0xa7   : > { %3302 = vmatmul.mubr.msk.bf16.vlgmr.msra.gmra.mrb[0].mxu1 %vm203_vm3, %v2998_v31  ;;  %v3030_v31 = vld [vmem:[%s3788_s20 + $0x2e] sm:$0x3] }
  0xa8   : > { %3306 = vmatpush3.bf16.msra.mxu1 %v869_v32  ;;  %3307 = vmatprep.mubr.msk.bf16.mxu1 %vm3738_vm2, %v3735_v0  ;;  %v3028_v32 = vld [vmem:[%s4259_s1 + $0x58] sm:$0xf]  ;;  %v1379_v33 = vand.u32 %v3030_v31, %v3783_v8 }
  0xa9   : > { %3311 = vmatprep.subr.bf16.mxu1 %v3735_v0 }
  0xb0   : > { %3416 = vmatmul.mubr.msk.bf16.vlgmr.msra.gmra.mrb[0].mxu0 %vm203_vm3, %v3056_v34  ;;  %v2477_v34 = vpop.permute.xlu0 %2476 }
  0xb1   : > { %3420 = vmatpush3.bf16.msra.mxu0 %v1882_v35  ;;  %3421 = vmatprep.mubr.msk.bf16.mxu0 %vm3738_vm2, %v3735_v0  ;;  %v3096_v35 = vld [vmem:[%s4259_s1 + $0xa4] sm:$0xf]  ;;  %v2482_v36 = vand.u32 %v2477_v34, %v3783_v8 }
  0xb2   : > { %3425 = vmatprep.subr.bf16.mxu0 %v3735_v0 }
  0xb3   : > { %3308 = vmatmul.mubr.msk.bf16.vlgmr.msra.gmra.mrb[0].mxu1 %vm203_vm3, %v3001_v37  ;;  %v3031_v37 = vld [vmem:[%s4259_s1 + $0x5c] sm:$0xf] }
  0xb4   : > { %3312 = vmatpush3.bf16.msra.mxu1 %v920_v38  ;;  %3313 = vmatprep.mubr.msk.bf16.mxu1 %vm3738_vm2, %v3735_v0  ;;  %v2537_v38 = vpop.permute.xlu1 %2536 }
  0xb5   : > { %3317 = vmatprep.subr.bf16.mxu1 %v3735_v0 }
  0xbc   : > { %3422 = vmatmul.mubr.msk.bf16.vlgmr.msra.gmra.mrb[0].mxu0 %vm203_vm3, %v3060_v40  ;;  %v2542_v40 = vand.u32 %v2537_v38, %v3783_v8 }
  0xbd   : > { %3426 = vmatpush3.bf16.msra.mxu0 %v1942_v41  ;;  %3427 = vmatprep.mubr.msk.bf16.mxu0 %vm3738_vm2, %v3735_v0  ;;  %v2597_v41 = vpop.permute.xlu0 %2596 }
  0xbe   : > { %3431 = vmatprep.subr.bf16.mxu0 %v3735_v0 }
  0xbf   : > { %3314 = vmatmul.mubr.msk.bf16.vlgmr.msra.gmra.mrb[0].mxu1 %vm203_vm3, %v3004_v43  ;;  %v2602_v43 = vand.u32 %v2597_v41, %v3783_v8 }
  0xc0   : > { %3318 = vmatpush3.bf16.msra.mxu1 %v971_v44  ;;  %3319 = vmatprep.mubr.msk.bf16.mxu1 %vm3738_vm2, %v3735_v0  ;;  %v2657_v44 = vpop.permute.xlu1 %2656 }
  0xc1   : > { %3323 = vmatprep.subr.bf16.mxu1 %v3735_v0 }
  0xc8   : > { %3428 = vmatmul.mubr.msk.bf16.vlgmr.msra.gmra.mrb[0].mxu0 %vm203_vm3, %v3064_v46  ;;  %v2662_v46 = vand.u32 %v2657_v44, %v3783_v8 }
  0xc9   : > { %3432 = vmatpush3.bf16.msra.mxu0 %v2002_v47  ;;  %3433 = vmatprep.mubr.msk.bf16.mxu0 %vm3738_vm2, %v3735_v0  ;;  %v2717_v47 = vpop.permute.xlu0 %2716 }
  0xca   : > { %3437 = vmatprep.subr.bf16.mxu0 %v3735_v0 }
  0xcb   : > { %3320 = vmatmul.mubr.msk.bf16.vlgmr.msra.gmra.mrb[0].mxu1 %vm203_vm3, %v3007_v49  ;;  %v2722_v49 = vand.u32 %v2717_v47, %v3783_v8 }
  0xcc   : > { %3324 = vmatpush3.bf16.msra.mxu1 %v1022_v50  ;;  %3325 = vmatprep.mubr.msk.bf16.mxu1 %vm3738_vm2, %v3735_v0  ;;  %v2777_v50 = vpop.permute.xlu1 %2776 }
  0xcd   : > { %3329 = vmatprep.subr.bf16.mxu1 %v3735_v0 }
  0xd4   : > { %3434 = vmatmul.mubr.msk.bf16.vlgmr.msra.gmra.mrb[0].mxu0 %vm203_vm3, %v3068_v52  ;;  %v2782_v52 = vand.u32 %v2777_v50, %v3783_v8 }
  0xd5   : > { %3438 = vmatpush3.bf16.msra.mxu0 %v2062_v53  ;;  %3439 = vmatprep.mubr.msk.bf16.mxu0 %vm3738_vm2, %v3735_v0  ;;  %v2837_v53 = vpop.permute.xlu0 %2836 }
  0xd6   : > { %3443 = vmatprep.subr.bf16.mxu0 %v3735_v0 }
  0xd7   : > { %3326 = vmatmul.mubr.msk.bf16.vlgmr.msra.gmra.mrb[0].mxu1 %vm203_vm3, %v3010_v55  ;;  %v2842_v55 = vand.u32 %v2837_v53, %v3783_v8 }
  0xd8   : > { %3330 = vmatpush3.bf16.msra.mxu1 %v1073_v56  ;;  %3331 = vmatprep.mubr.msk.bf16.mxu1 %vm3738_vm2, %v3735_v0  ;;  %v3124_v56 = vld [vmem:[%s4259_s1 + $0xc0] sm:$0xf] }
  0xd9   : > { %3335 = vmatprep.subr.bf16.mxu1 %v3735_v0 }
  0xe0   : > { %3440 = vmatmul.mubr.msk.bf16.vlgmr.msra.gmra.mrb[0].mxu0 %vm203_vm3, %v3072_v58 }
  0xe1   : > { %3444 = vmatpush3.bf16.msra.mxu0 %v2122_v59  ;;  %3445 = vmatprep.mubr.msk.bf16.mxu0 %vm3738_vm2, %v3735_v0 }
  0xe2   : > { %3449 = vmatprep.subr.bf16.mxu0 %v3735_v0 }
  0xe3   : > { %3332 = vmatmul.mubr.msk.bf16.vlgmr.msra.gmra.mrb[0].mxu1 %vm203_vm3, %v3013_v61 }
  0xe4   : > { %3336 = vmatpush3.bf16.msra.mxu1 %v1124_v62  ;;  %3337 = vmatprep.mubr.msk.bf16.mxu1 %vm3738_vm2, %v3735_v0 }
  0xe5   : > { %3341 = vmatprep.subr.bf16.mxu1 %v3735_v0 }
  0xec   : > { %3446 = vmatmul.mubr.msk.bf16.vlgmr.msra.gmra.mrb[0].mxu0 %vm203_vm3, %v3076_v1 }
  0xed   : > { %3450 = vmatpush3.bf16.msra.mxu0 %v2182_v2  ;;  %3451 = vmatprep.mubr.msk.bf16.mxu0 %vm3738_vm2, %v3735_v0 }
  0xee   : > { %3455 = vmatprep.subr.bf16.mxu0 %v3735_v0 }
  0xef   : > { %3338 = vmatmul.mubr.msk.bf16.vlgmr.msra.gmra.mrb[0].mxu1 %vm203_vm3, %v3016_v4 }
  0xf0   : > { %3342 = vmatpush3.bf16.msra.mxu1 %v1175_v5  ;;  %3343 = vmatprep.mubr.msk.bf16.mxu1 %vm3738_vm2, %v3735_v0 }
  0xf1   : > { %3347 = vmatprep.subr.bf16.mxu1 %v3735_v0 }
  0xf8   : > { %3452 = vmatmul.mubr.msk.bf16.vlgmr.msra.gmra.mrb[0].mxu0 %vm203_vm3, %v3080_v7 }
  0xf9   : > { %3456 = vmatpush3.bf16.msra.mxu0 %v2242_v9  ;;  %3457 = vmatprep.mubr.msk.bf16.mxu0 %vm3738_vm2, %v3735_v0 }
  0xfa   : > { %3461 = vmatprep.subr.bf16.mxu0 %v3735_v0 }
  0xfb   : > { %3344 = vmatmul.mubr.msk.bf16.vlgmr.msra.gmra.mrb[0].mxu1 %vm203_vm3, %v3019_v11 }
  0xfc   : > { %3348 = vmatpush3.bf16.msra.mxu1 %v1226_v12  ;;  %3349 = vmatprep.mubr.msk.bf16.mxu1 %vm3738_vm2, %v3735_v0 }
  0xfd   : > { %3353 = vmatprep.subr.bf16.mxu1 %v3735_v0 }
 0x104   : > { %3458 = vmatmul.mubr.msk.bf16.vlgmr.msra.gmra.mrb[0].mxu0 %vm203_vm3, %v3084_v17 }
 0x105   : > { %3462 = vmatpush3.bf16.msra.mxu0 %v2302_v18  ;;  %3463 = vmatprep.mubr.msk.bf16.mxu0 %vm3738_vm2, %v3735_v0 }
 0x106   : > { %3467 = vmatprep.subr.bf16.mxu0 %v3735_v0 }
 0x107   : > { %3350 = vmatmul.mubr.msk.bf16.vlgmr.msra.gmra.mrb[0].mxu1 %vm203_vm3, %v3022_v20 }
 0x108   : > { %3354 = vmatpush3.bf16.msra.mxu1 %v1277_v21  ;;  %3355 = vmatprep.mubr.msk.bf16.mxu1 %vm3738_vm2, %v3735_v0 }
 0x109   : > { %3359 = vmatprep.subr.bf16.mxu1 %v3735_v0 }
 0x10e   : > { %v2889_v62 = vpop.permute.xlu1 %2888 }
 0x110   : > { %3464 = vmatmul.mubr.msk.bf16.vlgmr.msra.gmra.mrb[0].mxu0 %vm203_vm3, %v3088_v23 }
 0x111   : > { %3468 = vmatpush3.bf16.msra.mxu0 %v2362_v24  ;;  %3469 = vmatprep.mubr.msk.bf16.mxu0 %vm3738_vm2, %v3735_v0  ;;  %v2896_v2 = vpop.permute.xlu0 %2895 }
 0x112   : > { %3473 = vmatprep.subr.bf16.mxu0 %v3735_v0 }
 0x113   : > { %3356 = vmatmul.mubr.msk.bf16.vlgmr.msra.gmra.mrb[0].mxu1 %vm203_vm3, %v3025_v26 }
 0x114   : > { %3360 = vmatpush3.bf16.msra.mxu1 %v1328_v27  ;;  %3361 = vmatprep.mubr.msk.bf16.mxu1 %vm3738_vm2, %v3735_v0 }
 0x115   : > { %3365 = vmatprep.subr.bf16.mxu1 %v3735_v0 }
 0x11c   : > { %3470 = vmatmul.mubr.msk.bf16.vlgmr.msra.gmra.mrb[0].mxu0 %vm203_vm3, %v3092_v29 }
 0x11d   : > { %3474 = vmatpush3.bf16.msra.mxu0 %v2422_v30  ;;  %3475 = vmatprep.mubr.msk.bf16.mxu0 %vm3738_vm2, %v3735_v0 }
 0x11e   : > { %3479 = vmatprep.subr.bf16.mxu0 %v3735_v0 }
 0x11f   : > { %3362 = vmatmul.mubr.msk.bf16.vlgmr.msra.gmra.mrb[0].mxu1 %vm203_vm3, %v3028_v32 }
 0x120   : > { %3366 = vmatpush3.bf16.msra.mxu1 %v1379_v33  ;;  %3367 = vmatprep.mubr.msk.bf16.mxu1 %vm3738_vm2, %v3735_v0 }
 0x128   : > { %3476 = vmatmul.mubr.msk.bf16.vlgmr.msra.gmra.mrb[0].mxu0 %vm203_vm3, %v3096_v35 }
 0x129   : > { %3480 = vmatpush3.bf16.msra.mxu0 %v2482_v36  ;;  %3481 = vmatprep.mubr.msk.bf16.mxu0 %vm3738_vm2, %v3735_v0 }
 0x12a   : > { %3485 = vmatprep.subr.bf16.mxu0 %v3735_v0 }
 0x12b   : > { %3368 = vmatmul.mubr.msk.bf16.vlgmr.msra.gmra.mrb[0].mxu1 %vm203_vm3, %v3031_v37 }
 0x134   : > { %3482 = vmatmul.mubr.msk.bf16.vlgmr.msra.gmra.mrb[0].mxu0 %vm203_vm3, %v3100_v39 }
 0x135   : > { %3486 = vmatpush3.bf16.msra.mxu0 %v2542_v40  ;;  %3487 = vmatprep.mubr.msk.bf16.mxu0 %vm3738_vm2, %v3735_v0 }
 0x136   : > { %3491 = vmatprep.subr.bf16.mxu0 %v3735_v0 }
 0x140   : > { %3488 = vmatmul.mubr.msk.bf16.vlgmr.msra.gmra.mrb[0].mxu0 %vm203_vm3, %v3104_v42 }
 0x141   : > { %3492 = vmatpush3.bf16.msra.mxu0 %v2602_v43  ;;  %3493 = vmatprep.mubr.msk.bf16.mxu0 %vm3738_vm2, %v3735_v0 }
 0x142   : > { %3497 = vmatprep.subr.bf16.mxu0 %v3735_v0 }
 0x14c   : > { %3494 = vmatmul.mubr.msk.bf16.vlgmr.msra.gmra.mrb[0].mxu0 %vm203_vm3, %v3108_v45 }
 0x14d   : > { %3498 = vmatpush3.bf16.msra.mxu0 %v2662_v46  ;;  %3499 = vmatprep.mubr.msk.bf16.mxu0 %vm3738_vm2, %v3735_v0 }
 0x14e   : > { %3503 = vmatprep.subr.bf16.mxu0 %v3735_v0 }
 0x158   : > { %3500 = vmatmul.mubr.msk.bf16.vlgmr.msra.gmra.mrb[0].mxu0 %vm203_vm3, %v3112_v48 }
 0x159   : > { %3504 = vmatpush3.bf16.msra.mxu0 %v2722_v49  ;;  %3505 = vmatprep.mubr.msk.bf16.mxu0 %vm3738_vm2, %v3735_v0 }
 0x15a   : > { %3509 = vmatprep.subr.bf16.mxu0 %v3735_v0 }
 0x164   : > { %3506 = vmatmul.mubr.msk.bf16.vlgmr.msra.gmra.mrb[0].mxu0 %vm203_vm3, %v3116_v51 }
 0x165   : > { %3510 = vmatpush3.bf16.msra.mxu0 %v2782_v52  ;;  %3511 = vmatprep.mubr.msk.bf16.mxu0 %vm3738_vm2, %v3735_v0 }
 0x166   : > { %3515 = vmatprep.subr.bf16.mxu0 %v3735_v0 }
 0x170   : > { %3512 = vmatmul.mubr.msk.bf16.vlgmr.msra.gmra.mrb[0].mxu0 %vm203_vm3, %v3120_v54 }
 0x171   : > { %3516 = vmatpush3.bf16.msra.mxu0 %v2842_v55  ;;  %3517 = vmatprep.mubr.msk.bf16.mxu0 %vm3738_vm2, %v3735_v0 }
 0x17c   : > { %3518 = vmatmul.mubr.msk.bf16.vlgmr.msra.gmra.mrb[0].mxu0 %vm203_vm3, %v3124_v56 }
 0x1fe   : > { %v1415_v57 = vpop.f32.mrb[0].mxu1 }
 0x1ff   : > { %v3369_v58 = vpop.f32.mrb[1].mxu1 }
 0x200   : > { %v1418_v59 = vpop.f32.mrb[2].mxu1 }
 0x201   : > { %v3370_v60 = vpop.f32.mrb[3].mxu1 }
 0x24f   : > { %v2878_v61 = vpop.f32.mrb[0].mxu0 }
 0x250   : > { %v3521_v8 = vadd.f32 %v2878_v61, %v1415_v57  ;;  %v3519_v63 = vpop.f32.mrb[1].mxu0 }
 0x251   : > { %v2881_v1 = vpop.f32.mrb[2].mxu0 }
 0x252   : > { %v2891_v3 = vmul.f32 %v3521_v8, %v2889_v62  ;;  %v3520_v4 = vpop.f32.mrb[3].mxu0 }
 0x254   : > { %v2898_v0 = vadd.f32 %v2896_v2, %v2891_v3 }
 0x256   : > { %v2899_v5 = vmax.f32 %v2898_v0, 0.0 }
 0x258   : > { %v2900_v6 = vpack.c.bf16 %v2899_v5, %v2899_v5 }
 0x25a   : > { %2902 = vst.msk [vmem:[%s195_s8] sm:$0xf] %vm2901_vm4, %v2900_v6 }
 0x25b PF: > { %s14_s15 = sadd.s32 1, %s3733_s15  }
 0x25c   : > { %p11_p4 = scmp.ge.s32.totalorder %s14_s15, 4  }
 0x25e   :  { %13 = sbr.rel (!%p11_p4) target bundleno = 1 (0x1), region = 141 }

// kernel: kart_cnn_forward.30
= control target key start
LH: loop header
LB: loop body
LE: loop exit
PB: predicated region body
PF: predicated region fallthrough
CT: control target
= control target key end

     0   :  { %s1054_s15 = smov 0   ;;  %s1167_s0 = inlined_call_operand.vmem [shape: bf16[2,6,8,20], index: 0, kind: input, shape index: {}]   ;;  %s1168_s1 = inlined_call_operand.vmem [shape: bf16[9,16,8], index: 1, kind: input, shape index: {}]   ;;  %s1169_s2 = inlined_call_operand.vmem [shape: f32[16,1], index: 2, kind: input, shape index: {}]   ;;  %s1170_s3 = inlined_call_operand.vmem [shape: f32[16,1], index: 3, kind: input, shape index: {}]   ;;  %s1171_s4 = inlined_call_operand.vmem [shape: bf16[2,16,16], index: 4, kind: output, shape index: {}]  }
   0x1 LB: > { %s831_s16 = sadd.s32 4294967295, %s1023_s15   ;;  %p835_p0 = scmp.ge.s32.totalorder %s1023_s15, 1  ;;  %s1023_s15 = sphi %s1054_s15, %s14_s15  }
   0x2   : > { %p162_p1 = scmp.lt.s32.totalorder %s1023_s15, 3 }
   0x4   : > { %p163_p2 = pnand %p835_p0, %p162_p1 }
   0x5   : > { %p188_p3 = scmp.lt.s32.totalorder (!%p163_p2), %s831_s16, 1  ;;  %v1025_v0 = vmov (!%p163_p2), 0.0   ;;  %vm1026_vm0 = vmmov (!%p163_p2), 0   ;;  %vm216_vm1 = vcmask (!%p163_p2), 1043456   ;;  %v1008_v7 = vld [vmem:[%s1168_s1 + $0x8] sm:$0xff] (!%p163_p2)   ;;  %vm212_vm2 = vcmask (!%p163_p2), 64512  }
   0x6   : > { %166 = sbr.rel (%p163_p2) target bundleno = 388 (0x184), region = 36  ;;  %906 = vmatprep.subr.bf16.mxu1 (!%p163_p2), %v1025_v0  ;;  %908 = vmatprep.mubr.msk.bf16.mxu1 (!%p163_p2), %vm1026_vm0, %v1025_v0  ;;  %v1010_v10 = vld [vmem:[%s1168_s1 + $0x20] sm:$0xff] (!%p163_p2)   ;;  %s1027_s25 = smov (!%p163_p2), 124   ;;  %v1012_v17 = vld [vmem:[%s1168_s1 + $0x28] sm:$0xff] (!%p163_p2)   ;;  %v1028_v20 = vmov (!%p163_p2), 0   ;;  %v1011_v23 = vld [vmem:[%s1168_s1 + $0x10] sm:$0xff] (!%p163_p2)  }
   0x7   : > { %930 = vmatprep.subr.bf16.mxu0 (!%p163_p2), %v1025_v0  ;;  %932 = vmatprep.mubr.msk.bf16.mxu0 (!%p163_p2), %vm1026_vm0, %v1025_v0  ;;  %v1009_v15 = vld [vmem:[%s1168_s1] sm:$0xff] (!%p163_p2)   ;;  %v736_v19 = vld [vmem:[%s1169_s2 + $0x8] sm:$0xff] (!%p163_p2)  ;;  %v1013_v26 = vld [vmem:[%s1168_s1 + $0x18] sm:$0xff] (!%p163_p2)   ;;  %vm773_vm3 = vcmask (!%p163_p2), 125952  }
   0x8   : > { %v735_v18 = vld [vmem:[%s1169_s2] sm:$0xff] (!%p163_p2)  ;;  %1003 = vset.pattern.permute.xlu1 (!%p163_p2), %v1028_v20  ;;  %1004 = vset.pattern.permute.xlu0 (!%p163_p2), %v1028_v20  ;;  %v750_v24 = vld [vmem:[%s1170_s3 + $0x8] sm:$0xff] (!%p163_p2)  ;;  %v1014_v29 = vld [vmem:[%s1168_s1 + $0x30] sm:$0xff] (!%p163_p2)  }
   0x9   : > { %v749_v21 = vld [vmem:[%s1170_s3] sm:$0xff] (!%p163_p2)  ;;  %v1015_v33 = vld [vmem:[%s1168_s1 + $0x38] sm:$0xff] (!%p163_p2)  }
   0xa   : > { %v1016_v35 = vld [vmem:[%s1168_s1 + $0x40] sm:$0xff] (!%p163_p2)  }
   0xd   : > { %s1173_s16 = smov (!%p188_p3, %s831_s16), 1 }
   0xe   : > { %s990_s17 = smul.u32 24, %s1173_s16  ;;  %s885_s24 = sshll.u32 %s1173_s16, 3 }
   0xf   : > { %s197_s27 = scalar_lea.vmem %s1171_s4, %s885_s24 }
  0x10   : > { %s1074_s20 = scalar_lea.vmem %s1167_s0, %s990_s17 }
  0x11   : > { %v199_v1 = vld [vmem:[%s1074_s20] sm:$0xf]  ;;  %v839_v2 = vld [vmem:[%s1074_s20 + $0x4] sm:$0xf]  ;;  %v846_v3 = vld [vmem:[%s1074_s20 + $0x8] sm:$0xf] }
  0x12   : > { %v869_v4 = vcombine.low %v199_v1, %v199_v1  ;;  %v879_v5 = vcombine.low %v846_v3, %v846_v3  ;;  %v218_v6 = vsel %vm216_vm1, %v839_v2, 0  ;;  %v856_v8 = vld [vmem:[%s1074_s20 + $0x10] sm:$0xf]  ;;  %v861_v11 = vld [vmem:[%s1074_s20 + $0x14] sm:$0xf]  ;;  %v874_v12 = vcombine.low %v839_v2, %v839_v2 }
  0x13   : > { %907 = vmatpush3.bf16.msra.mxu1 %v218_v6  ;;  %v445_v9 = vsel %vm216_vm1, %v856_v8, 0  ;;  %v270_v13 = vsel %vm216_vm1, %v199_v1, 0  ;;  %v504_v14 = vsel %vm216_vm1, %v861_v11, 0  ;;  %v327_v16 = vsel %vm216_vm1, %v846_v3, 0  ;;  %v851_v22 = vld [vmem:[%s1074_s20 + $0xc] sm:$0xf] }
  0x14   : > { %560 = vrot.lane.b32.xlu0 %v869_v4, %s1027_s25  ;;  %684 = vrot.lane.b32.xlu1 %v879_v5, %s1027_s25  ;;  %v386_v25 = vsel %vm216_vm1, %v851_v22, 0 }
  0x15   : > { %912 = vmatprep.subr.bf16.mxu1 %v1025_v0  ;;  %931 = vmatpush3.bf16.msra.mxu0 %v445_v9 }
  0x16   : > { %909 = vmatmul.mubr.msk.bf16.vlgmr.msra.gmra.mrb[0].mxu1 %vm212_vm2, %v1008_v7  ;;  %936 = vmatprep.subr.bf16.mxu0 %v1025_v0 }
  0x17   : > { %913 = vmatpush3.bf16.msra.mxu1 %v270_v13  ;;  %914 = vmatprep.mubr.msk.bf16.mxu1 %vm1026_vm0, %v1025_v0 }
  0x18   : > { %622 = vrot.lane.b32.xlu0 %v874_v12, %s1027_s25  ;;  %933 = vmatmul.mubr.msk.bf16.vlgmr.msra.gmra.mrb[0].mxu0 %vm212_vm2, %v1010_v10 }
  0x19   : > { %918 = vmatprep.subr.bf16.mxu1 %v1025_v0  ;;  %937 = vmatpush3.bf16.msra.mxu0 %v504_v14 }
  0x1a   : > { %938 = vmatprep.mubr.msk.bf16.mxu0 %vm1026_vm0, %v1025_v0  ;;  %942 = vmatprep.subr.bf16.mxu0 %v1025_v0 }
  0x1b   : > { %739 = vperm.xlu1 %1003, %v735_v18  }
  0x1c   : > { %744 = vperm.xlu0 %1004, %v736_v19  }
  0x1f   : > { %753 = vperm.xlu1 %1003, %v749_v21  }
  0x22   : > { %915 = vmatmul.mubr.msk.bf16.vlgmr.msra.gmra.mrb[0].mxu1 %vm212_vm2, %v1009_v15 }
  0x23   : > { %919 = vmatpush3.bf16.msra.mxu1 %v327_v16  ;;  %920 = vmatprep.mubr.msk.bf16.mxu1 %vm1026_vm0, %v1025_v0 }
  0x24   : > { %939 = vmatmul.mubr.msk.bf16.vlgmr.msra.gmra.mrb[0].mxu0 %vm212_vm2, %v1012_v17  ;;  %924 = vmatprep.subr.bf16.mxu1 %v1025_v0 }
  0x25   : > { %944 = vmatprep.mubr.msk.bf16.mxu0 %vm1026_vm0, %v1025_v0  ;;  %758 = vperm.xlu1 %1003, %v750_v24  }
  0x2e   : > { %921 = vmatmul.mubr.msk.bf16.vlgmr.msra.gmra.mrb[0].mxu1 %vm212_vm2, %v1011_v23 }
  0x2f   : > { %925 = vmatpush3.bf16.msra.mxu1 %v386_v25  ;;  %926 = vmatprep.mubr.msk.bf16.mxu1 %vm1026_vm0, %v1025_v0 }
  0x3a   : > { %927 = vmatmul.mubr.msk.bf16.vlgmr.msra.gmra.mrb[0].mxu1 %vm212_vm2, %v1013_v26 }
  0x86   : > { %v561_v27 = vpop.permute.xlu0 %560  ;;  %v685_v32 = vpop.permute.xlu1 %684 }
  0x87   : > { %v566_v28 = vsel %vm216_vm1, %v561_v27, 0  ;;  %v690_v34 = vsel %vm216_vm1, %v685_v32, 0 }
  0x88   : > { %943 = vmatpush3.bf16.msra.mxu0 %v566_v28 }
  0x89   : > { %948 = vmatprep.subr.bf16.mxu0 %v1025_v0 }
  0x8a   : > { %v623_v30 = vpop.permute.xlu0 %622 }
  0x8b   : > { %945 = vmatmul.mubr.msk.bf16.vlgmr.msra.gmra.mrb[0].mxu0 %vm212_vm2, %v1014_v29  ;;  %v628_v31 = vsel %vm216_vm1, %v623_v30, 0 }
  0x8c   : > { %949 = vmatpush3.bf16.msra.mxu0 %v628_v31  ;;  %950 = vmatprep.mubr.msk.bf16.mxu0 %vm1026_vm0, %v1025_v0 }
  0x8d   : > { %954 = vmatprep.subr.bf16.mxu0 %v1025_v0 }
  0x97   : > { %951 = vmatmul.mubr.msk.bf16.vlgmr.msra.gmra.mrb[0].mxu0 %vm212_vm2, %v1015_v33 }
  0x98   : > { %955 = vmatpush3.bf16.msra.mxu0 %v690_v34  ;;  %956 = vmatprep.mubr.msk.bf16.mxu0 %vm1026_vm0, %v1025_v0 }
  0x9a   : > { %v740_v40 = vpop.permute.xlu1 %739 }
  0x9b   : > { %v745_v46 = vpop.permute.xlu0 %744 }
  0x9e   : > { %v754_v42 = vpop.permute.xlu1 %753 }
  0xa3   : > { %957 = vmatmul.mubr.msk.bf16.vlgmr.msra.gmra.mrb[0].mxu0 %vm212_vm2, %v1016_v35 }
  0xa4   : > { %v759_v52 = vpop.permute.xlu1 %758 }
 0x10d   : > { %v422_v36 = vpop.f32.mrb[0].mxu1 }
 0x10e   : > { %v928_v37 = vpop.f32.mrb[1].mxu1 }
 0x10f   : > { %v425_v38 = vpop.f32.mrb[2].mxu1 }
 0x110   : > { %v929_v39 = vpop.f32.mrb[3].mxu1 }
 0x176   : > { %v726_v41 = vpop.f32.mrb[0].mxu0 }
 0x177   : > { %v960_v43 = vadd.f32 %v726_v41, %v422_v36  ;;  %v958_v44 = vpop.f32.mrb[1].mxu0 }
 0x178   : > { %v729_v45 = vpop.f32.mrb[2].mxu0 }
 0x179   : > { %v747_v47 = vmul.f32 %v960_v43, %v740_v40  ;;  %v961_v48 = vadd.f32 %v729_v45, %v425_v38  ;;  %v959_v49 = vpop.f32.mrb[3].mxu0 }
 0x17b   : > { %v761_v50 = vadd.f32 %v754_v42, %v747_v47  ;;  %v748_v51 = vmul.f32 %v961_v48, %v745_v46 }
 0x17d   : > { %v763_v53 = vmax.f32 %v761_v50, 0.0  ;;  %v762_v54 = vadd.f32 %v759_v52, %v748_v51 }
 0x17f   : > { %v886_v55 = vpack.c.bf16 %v763_v53, %v763_v53  ;;  %v764_v56 = vmax.f32 %v762_v54, 0.0 }
 0x181   : > { %774 = vst.msk [vmem:[%s197_s27] sm:$0xf] %vm773_vm3, %v886_v55  ;;  %v887_v57 = vpack.c.bf16 %v764_v56, %v764_v56 }
 0x183   : > { %775 = vst.msk [vmem:[%s197_s27 + $0x4] sm:$0xf] %vm773_vm3, %v887_v57 }
 0x184 PF: > { %s14_s15 = sadd.s32 1, %s1023_s15  }
 0x185   : > { %p11_p4 = scmp.ge.s32.totalorder %s14_s15, 4  }
 0x187   :  { %13 = sbr.rel (!%p11_p4) target bundleno = 1 (0x1), region = 79 }

// kernel: kart_cnn_forward.33
= control target key start
LH: loop header
LB: loop body
LE: loop exit
PB: predicated region body
PF: predicated region fallthrough
CT: control target
= control target key end

     0   :  { %v280_v6 = vmov 1966171168   ;;  %v67_v8 = vlaneseq  ;;  %s358_s1 = inlined_call_operand.vmem [shape: bf16[256,128], index: 1, kind: input, shape index: {}]   ;;  %s359_s0 = inlined_call_operand.vmem [shape: bf16[2,256], index: 0, kind: input, shape index: {}]   ;;  %s360_s2 = inlined_call_operand.vmem [shape: f32[1,128], index: 2, kind: input, shape index: {}]   ;;  %s361_s3 = inlined_call_operand.vmem [shape: bf16[2,128], index: 3, kind: output, shape index: {}]  }
   0x1   :  { %v264_v0 = vld [vmem:[%s358_s1 + $0x40] sm:$0xff]   ;;  %v266_v2 = vld [vmem:[%s358_s1 + $0x48] sm:$0xff]   ;;  %v268_v4 = vld [vmem:[%s358_s1 + $0x50] sm:$0xff]   ;;  %v65_v7 = vunpack.c.l.s4 %v280_v6 }
   0x2   :  { %v265_v1 = vld [vmem:[%s358_s1] sm:$0xff]   ;;  %241 = vmatprep.subr.bf16.mxu0 %v264_v0  ;;  %v267_v3 = vld [vmem:[%s358_s1 + $0x8] sm:$0xff]   ;;  %v269_v5 = vld [vmem:[%s358_s1 + $0x10] sm:$0xff]   ;;  %v68_v12 = vshrl.u32 %v67_v8, 7 }
   0x3   :  { %242 = vmatpush3.bf16.msra.mxu0 %v265_v1  ;;  %v270_v9 = vld [vmem:[%s358_s1 + $0x58] sm:$0xff]   ;;  %v66_v11 = vunpack.c.0.s8 %v65_v7  ;;  %v272_v13 = vld [vmem:[%s358_s1 + $0x60] sm:$0xff]   ;;  %v274_v16 = vld [vmem:[%s358_s1 + $0x68] sm:$0xff]  }
   0x4   :  { %243 = vmatprep.subr.bf16.mxu0 %v266_v2  ;;  %v271_v10 = vld [vmem:[%s358_s1 + $0x18] sm:$0xff]   ;;  %v273_v14 = vld [vmem:[%s358_s1 + $0x20] sm:$0xff]   ;;  %v275_v19 = vld [vmem:[%s358_s1 + $0x28] sm:$0xff]  }
   0x5   :  { %v69_v15 = vsub.s32 %v66_v11, %v68_v12  ;;  %v224_v17 = vld.sshfl [vmem:[%s359_s0] sm:$0x11 pattern:$0x75316420]  ;;  %v276_v21 = vld [vmem:[%s358_s1 + $0x70] sm:$0xff]   ;;  %v278_v23 = vld [vmem:[%s358_s1 + $0x78] sm:$0xff]  }
   0x6   :  { %v63_v18 = vcombine.high %v224_v17, %v224_v17  ;;  %v277_v22 = vld [vmem:[%s358_s1 + $0x30] sm:$0xff]   ;;  %v279_v24 = vld [vmem:[%s358_s1 + $0x38] sm:$0xff]   ;;  %v223_v27 = vld [vmem:[%s360_s2] ss:$0 sm:$0xff] }
   0x7   :  { %244 = vmatpush3.bf16.msra.mxu0 %v267_v3  ;;  %v70_v25 = vrot.slane %v224_v17, %v69_v15 }
   0x8   :  { %245 = vmatprep.subr.bf16.mxu0 %v268_v4  ;;  %v77_v20 = vrot.slane %v63_v18, %v69_v15 }
   0xa   :  { %208 = vmatprep.mubr.bf16.mxu0 %v77_v20 }
   0xb   :  { %246 = vmatpush3.bf16.msra.mxu0 %v269_v5 }
   0xc   :  { %247 = vmatprep.subr.bf16.mxu0 %v270_v9 }
   0xf   :  { %248 = vmatpush3.bf16.msra.mxu0 %v271_v10 }
  0x10   :  { %249 = vmatprep.subr.bf16.mxu0 %v272_v13 }
  0x13   :  { %250 = vmatpush3.bf16.msra.mxu0 %v273_v14 }
  0x14   :  { %251 = vmatprep.subr.bf16.mxu0 %v274_v16 }
  0x17   :  { %252 = vmatpush3.bf16.msra.mxu0 %v275_v19 }
  0x18   :  { %253 = vmatprep.subr.bf16.mxu0 %v276_v21 }
  0x1b   :  { %254 = vmatpush3.bf16.msra.mxu0 %v277_v22 }
  0x1c   :  { %255 = vmatprep.subr.bf16.mxu0 %v278_v23 }
  0x1f   :  { %256 = vmatpush3.bf16.msra.mxu0 %v279_v24 }
  0x22   :  { %209 = vmatmul.mubr.bf16.vlgmr.msra.gmra.mrb[0].mxu0 %v70_v25 }
  0xf5   :  { %v257_v26 = vpop.f32.mrb[0].mxu0 }
  0xf6   :  { %v258_v28 = vpop.f32.mrb[1].mxu0 }
  0xf7   :  { %v259_v29 = vadd.f32 %v258_v28, %v257_v26  ;;  %v260_v30 = vpop.f32.mrb[2].mxu0 }
  0xf8   :  { %v261_v31 = vpop.f32.mrb[3].mxu0 }
  0xf9   :  { %v211_v32 = vadd.f32 %v259_v29, %v223_v27 }
  0xfb   :  { %v216_v33 = vmax.f32 %v211_v32, 0.0 }
  0xfd   :  { %v217_v34 = vpack.c.bf16 %v216_v33, %v216_v33 }
  0xff   :  { %218 = vst [vmem:[%s361_s3] sm:$0x1] %v217_v34 }

// kernel: kart_cnn_forward.32
= control target key start
LH: loop header
LB: loop body
LE: loop exit
PB: predicated region body
PF: predicated region fallthrough
CT: control target
= control target key end

     0   :  { %s1122_s18 = smov 0   ;;  %s1221_s0 = inlined_call_operand.vmem [shape: bf16[2,3,16,24], index: 0, kind: input, shape index: {}]   ;;  %s1222_s1 = inlined_call_operand.vmem [shape: bf16[9,16,16], index: 1, kind: input, shape index: {}]   ;;  %s1223_s2 = inlined_call_operand.vmem [shape: f32[16,1], index: 2, kind: input, shape index: {}]   ;;  %s1224_s3 = inlined_call_operand.vmem [shape: f32[16,1], index: 3, kind: input, shape index: {}]   ;;  %s1225_s4 = inlined_call_operand.vmem [shape: bf16[2,16,16], index: 4, kind: input, shape index: {}]   ;;  %s1226_s5 = inlined_call_operand.vmem [shape: bf16[2,16,16], index: 5, kind: output, shape index: {}]  }
   0x1 LB: > { %s886_s19 = sadd.s32 4294967295, %s1085_s18   ;;  %p890_p0 = scmp.ge.s32.totalorder %s1085_s18, 1  ;;  %s1085_s18 = sphi %s1122_s18, %s15_s18  }
   0x2   : > { %p197_p1 = scmp.lt.s32.totalorder %s1085_s18, 3 }
   0x4   : > { %p198_p2 = pnand %p890_p0, %p197_p1 }
   0x5   : > { %p230_p3 = scmp.lt.s32.totalorder (!%p198_p2), %s886_s19, 1  ;;  %v1087_v0 = vmov (!%p198_p2), 0.0   ;;  %vm1088_vm0 = vmmov (!%p198_p2), 0   ;;  %v1070_v1 = vld [vmem:[%s1222_s1 + $0x8] sm:$0xff] (!%p198_p2)   ;;  %s1089_s26 = smov (!%p198_p2), 124   ;;  %vm267_vm1 = vcmask (!%p198_p2), 130048  }
   0x6   : > { %201 = sbr.rel (%p198_p2) target bundleno = 411 (0x19b), region = 40  ;;  %967 = vmatprep.subr.bf16.mxu1 (!%p198_p2), %v1087_v0  ;;  %969 = vmatprep.mubr.msk.bf16.mxu1 (!%p198_p2), %vm1088_vm0, %v1087_v0  ;;  %s1090_s27 = smov (!%p198_p2), 120   ;;  %v1071_v5 = vld [vmem:[%s1222_s1] sm:$0xff] (!%p198_p2)   ;;  %v1072_v6 = vld [vmem:[%s1222_s1 + $0x10] sm:$0xff] (!%p198_p2)   ;;  %v773_v8 = vld [vmem:[%s1223_s2 + $0x8] sm:$0xff] (!%p198_p2)  ;;  %v1091_v9 = vmov (!%p198_p2), 0  }
   0x7   : > { %991 = vmatprep.subr.bf16.mxu0 (!%p198_p2), %v1087_v0  ;;  %993 = vmatprep.mubr.msk.bf16.mxu0 (!%p198_p2), %vm1088_vm0, %v1087_v0  ;;  %v772_v7 = vld [vmem:[%s1223_s2] sm:$0xff] (!%p198_p2)  ;;  %v787_v10 = vld [vmem:[%s1224_s3 + $0x8] sm:$0xff] (!%p198_p2)  ;;  %v1074_v16 = vld [vmem:[%s1222_s1 + $0x18] sm:$0xff] (!%p198_p2)   ;;  %vm816_vm2 = vcmask (!%p198_p2), 125952  }
   0x8   : > { %1066 = vset.pattern.permute.xlu1 (!%p198_p2), %v1091_v9  ;;  %1065 = vset.pattern.permute.xlu0 (!%p198_p2), %v1091_v9  ;;  %v786_v11 = vld [vmem:[%s1224_s3] sm:$0xff] (!%p198_p2)  ;;  %v1075_v17 = vld [vmem:[%s1222_s1 + $0x28] sm:$0xff] (!%p198_p2)   ;;  %v1076_v19 = vld [vmem:[%s1222_s1 + $0x30] sm:$0xff] (!%p198_p2)  }
   0x9   : > { %v1073_v13 = vld [vmem:[%s1222_s1 + $0x20] sm:$0xff] (!%p198_p2)   ;;  %v1077_v21 = vld [vmem:[%s1222_s1 + $0x38] sm:$0xff] (!%p198_p2)  }
   0xa   : > { %v1078_v23 = vld [vmem:[%s1222_s1 + $0x40] sm:$0xff] (!%p198_p2)  }
   0xd   : > { %s1228_s19 = smov (!%p230_p3, %s886_s19), 1 }
   0xe   : > { %s1051_s20 = smul.u32 24, %s1228_s19  ;;  %s941_s29 = sshll.u32 %s1228_s19, 3 }
   0xf   : > { %s239_s7 = scalar_lea.vmem %s1225_s4, %s941_s29  ;;  %s244_s9 = scalar_lea.vmem %s1226_s5, %s941_s29 }
  0x10   : > { %s234_s23 = scalar_lea.vmem %s1221_s0, %s1051_s20  ;;  %v946_v34 = vld [vmem:[%s239_s7] sm:$0xff]  }
  0x11   : > { %v1067_v2 = vld [vmem:[%s234_s23 + $0x8] sm:$0xff]   ;;  %v1068_v3 = vld [vmem:[%s234_s23 + $0x10] sm:$0xff]   ;;  %v1069_v4 = vld [vmem:[%s234_s23] sm:$0xff]   ;;  %v947_v40 = vunpack.c.l.bf16 %v946_v34  ;;  %v948_v43 = vunpack.c.h.bf16 %v946_v34 }
  0x12   : > { %495 = vrot.lane.b32.xlu0 %v1067_v2, %s1089_s26  ;;  %968 = vmatpush3.bf16.msra.mxu1 %v1067_v2 }
  0x13   : > { %973 = vmatprep.subr.bf16.mxu1 %v1087_v0  ;;  %609 = vrot.lane.b32.xlu1 %v1069_v4, %s1090_s27 }
  0x15   : > { %970 = vmatmul.mubr.msk.bf16.vlgmr.msra.gmra.mrb[0].mxu1 %vm267_vm1, %v1070_v1 }
  0x16   : > { %552 = vrot.lane.b32.xlu0 %v1068_v3, %s1089_s26  ;;  %974 = vmatpush3.bf16.msra.mxu1 %v1069_v4 }
  0x17   : > { %975 = vmatprep.mubr.msk.bf16.mxu1 %vm1088_vm0, %v1087_v0  ;;  %979 = vmatprep.subr.bf16.mxu1 %v1087_v0 }
  0x18   : > { %666 = vrot.lane.b32.xlu1 %v1067_v2, %s1090_s27 }
  0x1a   : > { %438 = vrot.lane.b32.xlu0 %v1069_v4, %s1089_s26 }
  0x1c   : > { %723 = vrot.lane.b32.xlu1 %v1068_v3, %s1090_s27 }
  0x1e   : > { %776 = vperm.xlu0 %1065, %v772_v7  }
  0x20   : > { %781 = vperm.xlu1 %1066, %v773_v8  }
  0x21   : > { %976 = vmatmul.mubr.msk.bf16.vlgmr.msra.gmra.mrb[0].mxu1 %vm267_vm1, %v1071_v5 }
  0x22   : > { %980 = vmatpush3.bf16.msra.mxu1 %v1068_v3  ;;  %981 = vmatprep.mubr.msk.bf16.mxu1 %vm1088_vm0, %v1087_v0 }
  0x23   : > { %985 = vmatprep.subr.bf16.mxu1 %v1087_v0  ;;  %795 = vperm.xlu0 %1065, %v787_v10  }
  0x24   : > { %790 = vperm.xlu1 %1066, %v786_v11  }
  0x2d   : > { %982 = vmatmul.mubr.msk.bf16.vlgmr.msra.gmra.mrb[0].mxu1 %vm267_vm1, %v1072_v6 }
  0x2e   : > { %987 = vmatprep.mubr.msk.bf16.mxu1 %vm1088_vm0, %v1087_v0 }
  0x84   : > { %v496_v12 = vpop.permute.xlu0 %495 }
  0x85   : > { %992 = vmatpush3.bf16.msra.mxu0 %v496_v12  ;;  %v610_v18 = vpop.permute.xlu1 %609 }
  0x86   : > { %997 = vmatprep.subr.bf16.mxu0 %v1087_v0 }
  0x88   : > { %994 = vmatmul.mubr.msk.bf16.vlgmr.msra.gmra.mrb[0].mxu0 %vm267_vm1, %v1073_v13  ;;  %v553_v14 = vpop.permute.xlu0 %552 }
  0x89   : > { %998 = vmatpush3.bf16.msra.mxu0 %v553_v14  ;;  %999 = vmatprep.mubr.msk.bf16.mxu0 %vm1088_vm0, %v1087_v0 }
  0x8a   : > { %1003 = vmatprep.subr.bf16.mxu0 %v1087_v0  ;;  %v667_v20 = vpop.permute.xlu1 %666 }
  0x8c   : > { %v439_v15 = vpop.permute.xlu0 %438 }
  0x8d   : > { %986 = vmatpush3.bf16.msra.mxu1 %v439_v15 }
  0x8e   : > { %v724_v22 = vpop.permute.xlu1 %723 }
  0x90   : > { %988 = vmatmul.mubr.msk.bf16.vlgmr.msra.gmra.mrb[0].mxu1 %vm267_vm1, %v1074_v16 }
  0x94   : > { %1000 = vmatmul.mubr.msk.bf16.vlgmr.msra.gmra.mrb[0].mxu0 %vm267_vm1, %v1075_v17 }
  0x95   : > { %1004 = vmatpush3.bf16.msra.mxu0 %v610_v18  ;;  %1005 = vmatprep.mubr.msk.bf16.mxu0 %vm1088_vm0, %v1087_v0 }
  0x96   : > { %1009 = vmatprep.subr.bf16.mxu0 %v1087_v0 }
  0x9d   : > { %v777_v29 = vpop.permute.xlu0 %776 }
  0x9f   : > { %v782_v28 = vpop.permute.xlu1 %781 }
  0xa0   : > { %1006 = vmatmul.mubr.msk.bf16.vlgmr.msra.gmra.mrb[0].mxu0 %vm267_vm1, %v1076_v19 }
  0xa1   : > { %1010 = vmatpush3.bf16.msra.mxu0 %v667_v20  ;;  %1011 = vmatprep.mubr.msk.bf16.mxu0 %vm1088_vm0, %v1087_v0 }
  0xa2   : > { %1015 = vmatprep.subr.bf16.mxu0 %v1087_v0  ;;  %v796_v42 = vpop.permute.xlu0 %795 }
  0xa3   : > { %v791_v38 = vpop.permute.xlu1 %790 }
  0xac   : > { %1012 = vmatmul.mubr.msk.bf16.vlgmr.msra.gmra.mrb[0].mxu0 %vm267_vm1, %v1077_v21 }
  0xad   : > { %1016 = vmatpush3.bf16.msra.mxu0 %v724_v22  ;;  %1017 = vmatprep.mubr.msk.bf16.mxu0 %vm1088_vm0, %v1087_v0 }
  0xb8   : > { %1018 = vmatmul.mubr.msk.bf16.vlgmr.msra.gmra.mrb[0].mxu0 %vm267_vm1, %v1078_v23 }
 0x163   : > { %v478_v24 = vpop.f32.mrb[0].mxu1 }
 0x164   : > { %v989_v25 = vpop.f32.mrb[1].mxu1 }
 0x165   : > { %v481_v26 = vpop.f32.mrb[2].mxu1 }
 0x166   : > { %v990_v27 = vpop.f32.mrb[3].mxu1 }
 0x18b   : > { %v763_v30 = vpop.f32.mrb[0].mxu0 }
 0x18c   : > { %v1021_v31 = vadd.f32 %v763_v30, %v478_v24  ;;  %v1019_v32 = vpop.f32.mrb[1].mxu0 }
 0x18d   : > { %v766_v33 = vpop.f32.mrb[2].mxu0 }
 0x18e   : > { %v1022_v35 = vadd.f32 %v766_v33, %v481_v26  ;;  %v1020_v36 = vpop.f32.mrb[3].mxu0  ;;  %v784_v37 = vmul.f32 %v1021_v31, %v777_v29 }
 0x190   : > { %v785_v39 = vmul.f32 %v1022_v35, %v782_v28  ;;  %v798_v41 = vadd.f32 %v791_v38, %v784_v37 }
 0x192   : > { %v799_v44 = vadd.f32 %v796_v42, %v785_v39  ;;  %v800_v45 = vmax.f32 %v798_v41, 0.0 }
 0x194   : > { %v801_v46 = vmax.f32 %v799_v44, 0.0  ;;  %v806_v47 = vadd.f32 %v947_v40, %v800_v45 }
 0x196   : > { %v807_v48 = vadd.f32 %v948_v43, %v801_v46  ;;  %v943_v49 = vpack.c.bf16 %v806_v47, %v806_v47 }
 0x198   : > { %v944_v50 = vpack.c.bf16 %v807_v48, %v807_v48  ;;  %817 = vst.msk [vmem:[%s244_s9] sm:$0xf] %vm816_vm2, %v943_v49 }
 0x19a   : > { %818 = vst.msk [vmem:[%s244_s9 + $0x4] sm:$0xf] %vm816_vm2, %v944_v50 }
 0x19b PF: > { %s15_s18 = sadd.s32 1, %s1085_s18  }
 0x19c   : > { %p12_p4 = scmp.ge.s32.totalorder %s15_s18, 4  }
 0x19e   :  { %14 = sbr.rel (!%p12_p4) target bundleno = 1 (0x1), region = 83 }

// kernel: kart_cnn_forward.34
= control target key start
LH: loop header
LB: loop body
LE: loop exit
PB: predicated region body
PF: predicated region fallthrough
CT: control target
= control target key end

     0   :  { %s467_s12 = smov 0   ;;  %s469_s13 = smov 0   ;;  %s527_s0 = inlined_call_operand.vmem [shape: bf16[2,32], index: 0, kind: input, shape index: {}]   ;;  %s528_s1 = inlined_call_operand.vmem [shape: bf16[32,256], index: 1, kind: input, shape index: {}]   ;;  %s529_s2 = inlined_call_operand.vmem [shape: f32[1,256], index: 2, kind: input, shape index: {}]   ;;  %s530_s3 = inlined_call_operand.vmem [shape: bf16[2,256], index: 3, kind: output, shape index: {}]  }
   0x1   :  { %s471_s14 = smov 0  }
   0x2 LB: > { %s368_s15 = sadd.s32 4294967295, %s443_s14   ;;  %s484_s16 = sadd.s32 1, %s443_s14   ;;  %s443_s14 = sphi %s471_s14, %s533_s14   ;;  %s439_s13 = sphi %s469_s13, %s532_s13   ;;  %s435_s12 = sphi %s467_s12, %s531_s12  }
   0x3   : > { %s38_s17 = ssub.s32 %s443_s14, %s484_s16  ;;  %s41_s18 = sadd.s32 1, %s439_s13 }
   0x4   : > { %p39_p0 = scmp.eq.s32.totalorder %s38_s17, 0  ;;  %p48_p1 = scmp.ne.s32.totalorder %s439_s13, %s435_s12 }
   0x5   : > { %p49_p2 = scmp.eq.s32.totalorder %s443_s14, 0  ;;  %p371_p4 = scmp.ge.s32.totalorder %s443_s14, 2 }
   0x6   : > { %s493_s19 = scalar_select %p39_p0, %s439_s13, %s41_s18  }
   0x7   : > { %p50_p3 = por %p49_p2, %p48_p1  ;;  %129 = sbr.rel (%p371_p4) target bundleno = 21 (0x15), region = 20 }
   0xe   : > { %132 = sbr.rel (!%p50_p3) target bundleno = 21 (0x15), region = 24  ;;  %s134_s20 = sand.u32 (%p50_p3), 1, %s439_s13  }
   0xf   : > { %s373_s21 = sshll.u32 (%p50_p3), %s443_s14, 2  ;;  %s372_s22 = sshll.u32 (%p50_p3), %s134_s20, 4 }
  0x10   : > { %s138_s25 = scalar_lea.vmem (%p50_p3), %s528_s1, %s373_s21  ;;  %s136_s26 = scalar_lea.vmem (%p50_p3), [#allocation2], %s372_s22 }
  0x11   : > { %v154_v0 = vld [vmem:[%s138_s25] sm:$0xf] (%p50_p3)  ;;  %v156_v1 = vld [vmem:[%s138_s25 + $0x8] sm:$0xf] (%p50_p3)  ;;  %v158_v2 = vld [vmem:[%s138_s25 + $0x10] sm:$0xf] (%p50_p3) }
  0x12   : > { %155 = vst [vmem:[%s136_s26] sm:$0xf] (%p50_p3), %v154_v0  ;;  %157 = vst [vmem:[%s136_s26 + $0x4] sm:$0xf] (%p50_p3), %v156_v1  ;;  %v160_v3 = vld [vmem:[%s138_s25 + $0x18] sm:$0xf] (%p50_p3) }
  0x13   : > { %159 = vst [vmem:[%s136_s26 + $0x8] sm:$0xf] (%p50_p3), %v158_v2  ;;  %161 = vst [vmem:[%s136_s26 + $0xc] sm:$0xf] (%p50_p3), %v160_v3 }
  0x15 PF: > { %p374_p5 = scmp.ge.s32.totalorder %s443_s14, 1  ;;  %p197_p6 = scmp.lt.s32.totalorder %s443_s14, 3 }
  0x17   : > { %p198_p7 = pnand %p374_p5, %p197_p6 }
  0x18   : > { %s204_s27 = sand.u32 (!%p198_p7), 1, %s435_s12   ;;  %v445_v4 = vmov (!%p198_p7), 0.0   ;;  %vm446_vm0 = vmmov (!%p198_p7), 0   ;;  %v235_v7 = vld [vmem:[%s527_s0] sm:$0x1] (!%p198_p7)  ;;  %vm259_vm1 = vcmask (!%p198_p7), 261120  }
  0x19   : > { %201 = sbr.rel (%p198_p7) target bundleno = 254 (0xfe), region = 69  ;;  %385 = vmatprep.subr.bf16.mxu0 (!%p198_p7), %v445_v4  ;;  %s375_s28 = sshll.u32 (!%p198_p7), %s204_s27, 4  ;;  %389 = vmatprep.mubr.msk.bf16.mxu0 (!%p198_p7), %vm446_vm0, %v445_v4 }
  0x1a   : > { %s206_s29 = scalar_lea.vmem (!%p198_p7), [#allocation2], %s375_s28  ;;  %p228_p8 = scmp.lt.s32.totalorder (!%p198_p7), %s368_s15, 1 }
  0x1b   : > { %v419_v5 = vld [vmem:[%s206_s29] sm:$0xff] (!%p198_p7)   ;;  %v420_v6 = vld [vmem:[%s206_s29 + $0x8] sm:$0xff] (!%p198_p7)  }
  0x1c   : > { %386 = vmatpush3.bf16.msra.mxu0 (!%p198_p7), %v419_v5 }
  0x1d   : > { %387 = vmatprep.subr.bf16.mxu0 (!%p198_p7), %v445_v4 }
  0x20   : > { %388 = vmatpush3.bf16.msra.mxu0 %v420_v6  ;;  %s535_s15 = smov (!%p228_p8, %s368_s15), 1 }
  0x21   : > { %s230_s7 = scalar_lea.vmem %s529_s2, %s535_s15  ;;  %s233_s10 = scalar_lea.vmem %s530_s3, %s535_s15 }
  0x22   : > { %v376_v8 = vld [vmem:[%s230_s7] ss:$0 sm:$0xff] }
  0x23   : > { %390 = vmatmul.mubr.msk.bf16.vlgmr.msra.gmra.mrb[0].mxu0 %vm259_vm1, %v235_v7 }
  0xf6   : > { %v297_v9 = vpop.f32.mrb[0].mxu0 }
  0xf7   : > { %v298_v10 = vadd.f32 %v376_v8, %v297_v9  ;;  %v391_v11 = vpop.f32.mrb[1].mxu0 }
  0xf8   : > { %v300_v12 = vpop.f32.mrb[2].mxu0 }
  0xf9   : > { %v303_v13 = vmax.f32 %v298_v10, 0.0  ;;  %v392_v14 = vpop.f32.mrb[3].mxu0 }
  0xfb   : > { %v304_v15 = vpack.c.bf16 %v303_v13, %v303_v13 }
  0xfd   : > { %305 = vst [vmem:[%s233_s10] sm:$0x1] %v304_v15 }
  0xfe PF: > { %p10_p9 = scmp.ge.s32.totalorder %s484_s16, 4   ;;  %s531_s12 = smov %s439_s13 }
  0xff   : > { %s532_s13 = smov %s493_s19  ;;  %s533_s14 = smov %s484_s16 }
 0x100   :  { %12 = sbr.rel (!%p10_p9) target bundleno = 2 (0x2), region = 111 }

// kernel: kart_cnn_forward.40
= control target key start
LH: loop header
LB: loop body
LE: loop exit
PB: predicated region body
PF: predicated region fallthrough
CT: control target
= control target key end

     0   :  { %s390_s15 = smov 0   ;;  %s416_s0 = inlined_call_operand.vmem [shape: bf16[2,1,16,16], index: 0, kind: input, shape index: {}]   ;;  %s417_s1 = inlined_call_operand.vmem [shape: bf16[1,8,16], index: 1, kind: input, shape index: {}]   ;;  %s418_s2 = inlined_call_operand.vmem [shape: f32[8,1], index: 2, kind: input, shape index: {}]   ;;  %s419_s3 = inlined_call_operand.vmem [shape: f32[8,1], index: 3, kind: input, shape index: {}]   ;;  %s420_s4 = inlined_call_operand.vmem [shape: bf16[2,8,16], index: 4, kind: output, shape index: {}]  }
   0x1 LB: > { %s320_s16 = sadd.s32 4294967295, %s360_s15   ;;  %p324_p0 = scmp.ge.s32.totalorder %s360_s15, 1  ;;  %s360_s15 = sphi %s390_s15, %s14_s15  }
   0x2   : > { %p162_p1 = scmp.lt.s32.totalorder %s360_s15, 3 }
   0x4   : > { %p163_p2 = pnand %p324_p0, %p162_p1 }
   0x5   : > { %p187_p3 = scmp.lt.s32.totalorder (!%p163_p2), %s320_s16, 1  ;;  %v362_v0 = vmov (!%p163_p2), 0.0   ;;  %vm363_vm0 = vmmov (!%p163_p2), 0   ;;  %v250_v1 = vld [vmem:[%s418_s2] sm:$0xff] (!%p163_p2)  ;;  %v364_v2 = vmov (!%p163_p2), 0   ;;  %vm206_vm1 = vcmask (!%p163_p2), 130048  }
   0x6   : > { %166 = sbr.rel (%p163_p2) target bundleno = 239 (0xef), region = 36  ;;  %335 = vmatprep.subr.bf16.mxu0 (!%p163_p2), %v362_v0  ;;  %337 = vmatprep.mubr.msk.bf16.mxu0 (!%p163_p2), %vm363_vm0, %v362_v0  ;;  %v257_v3 = vld [vmem:[%s419_s3] sm:$0xff] (!%p163_p2)  ;;  %vm265_vm2 = vcmask (!%p163_p2), 125952  }
   0x7   : > { %352 = vset.pattern.permute.xlu0 (!%p163_p2), %v364_v2  ;;  %v199_v5 = vld [vmem:[%s417_s1] sm:$0xf] (!%p163_p2) }
   0x8   : > { %253 = vperm.xlu0 (!%p163_p2), %352, %v250_v1  }
   0xc   : > { %260 = vperm.xlu0 (!%p163_p2), %352, %v257_v3  }
   0xd   : > { %s422_s16 = smov (!%p187_p3, %s320_s16), 1 }
   0xe   : > { %s332_s19 = sshll.u32 %s422_s16, 3  ;;  %s327_s27 = sshll.u32 %s422_s16, 2 }
   0xf   : > { %s191_s24 = scalar_lea.vmem %s416_s0, %s332_s19  ;;  %s195_s30 = scalar_lea.vmem %s420_s4, %s327_s27 }
  0x10   : > { %v353_v4 = vld [vmem:[%s191_s24] sm:$0xff]  }
  0x11   : > { %336 = vmatpush3.bf16.msra.mxu0 %v353_v4 }
  0x14   : > { %338 = vmatmul.mubr.msk.bf16.vlgmr.msra.gmra.mrb[0].mxu0 %vm206_vm1, %v199_v5 }
  0x87   : > { %v254_v6 = vpop.permute.xlu0 %253 }
  0x8b   : > { %v261_v10 = vpop.permute.xlu0 %260 }
  0xe7   : > { %v244_v7 = vpop.f32.mrb[0].mxu0 }
  0xe8   : > { %v256_v8 = vmul.f32 %v254_v6, %v244_v7  ;;  %v339_v9 = vpop.f32.mrb[1].mxu0 }
  0xe9   : > { %v247_v11 = vpop.f32.mrb[2].mxu0 }
  0xea   : > { %v263_v12 = vadd.f32 %v261_v10, %v256_v8  ;;  %v340_v13 = vpop.f32.mrb[3].mxu0 }
  0xec   : > { %v264_v14 = vpack.c.bf16 %v263_v12, %v263_v12 }
  0xee   : > { %266 = vst.msk [vmem:[%s195_s30] sm:$0xf] %vm265_vm2, %v264_v14 }
  0xef PF: > { %s14_s15 = sadd.s32 1, %s360_s15  }
  0xf0   : > { %p11_p4 = scmp.ge.s32.totalorder %s14_s15, 4  }
  0xf2   :  { %13 = sbr.rel (!%p11_p4) target bundleno = 1 (0x1), region = 66 }

// kernel: kart_cnn_forward.36
= control target key start
LH: loop header
LB: loop body
LE: loop exit
PB: predicated region body
PF: predicated region fallthrough
CT: control target
= control target key end

     0   :  { %s381_s15 = smov 0   ;;  %s407_s0 = inlined_call_operand.vmem [shape: bf16[2,1,8,16], index: 0, kind: input, shape index: {}]   ;;  %s408_s1 = inlined_call_operand.vmem [shape: bf16[1,8,8], index: 1, kind: input, shape index: {}]   ;;  %s409_s2 = inlined_call_operand.vmem [shape: f32[8,1], index: 2, kind: input, shape index: {}]   ;;  %s410_s3 = inlined_call_operand.vmem [shape: f32[8,1], index: 3, kind: input, shape index: {}]   ;;  %s411_s4 = inlined_call_operand.vmem [shape: bf16[2,8,16], index: 4, kind: output, shape index: {}]  }
   0x1 LB: > { %s315_s16 = sadd.s32 4294967295, %s351_s15   ;;  %p319_p0 = scmp.ge.s32.totalorder %s351_s15, 1  ;;  %s351_s15 = sphi %s381_s15, %s14_s15  }
   0x2   : > { %p161_p1 = scmp.lt.s32.totalorder %s351_s15, 3 }
   0x4   : > { %p162_p2 = pnand %p319_p0, %p161_p1 }
   0x5   : > { %p185_p3 = scmp.lt.s32.totalorder (!%p162_p2), %s315_s16, 1  ;;  %v353_v0 = vmov (!%p162_p2), 0.0   ;;  %vm354_vm0 = vmmov (!%p162_p2), 0   ;;  %v244_v1 = vld [vmem:[%s409_s2] sm:$0xff] (!%p162_p2)  ;;  %v355_v2 = vmov (!%p162_p2), 0   ;;  %vm200_vm1 = vcmask (!%p162_p2), 1043456  }
   0x6   : > { %165 = sbr.rel (%p162_p2) target bundleno = 242 (0xf2), region = 36  ;;  %327 = vmatprep.subr.bf16.mxu0 (!%p162_p2), %v353_v0  ;;  %329 = vmatprep.mubr.msk.bf16.mxu0 (!%p162_p2), %vm354_vm0, %v353_v0  ;;  %v251_v3 = vld [vmem:[%s410_s3] sm:$0xff] (!%p162_p2)  ;;  %vm196_vm2 = vcmask (!%p162_p2), 64512   ;;  %vm260_vm3 = vcmask (!%p162_p2), 125952  }
   0x7   : > { %344 = vset.pattern.permute.xlu0 (!%p162_p2), %v355_v2  ;;  %v195_v6 = vld [vmem:[%s408_s1] sm:$0xf] (!%p162_p2) }
   0x8   : > { %247 = vperm.xlu0 (!%p162_p2), %344, %v244_v1  }
   0xc   : > { %254 = vperm.xlu0 (!%p162_p2), %344, %v251_v3  }
   0xd   : > { %s413_s16 = smov (!%p185_p3, %s315_s16), 1 }
   0xe   : > { %s320_s19 = sshll.u32 %s413_s16, 2 }
   0xf   : > { %s188_s24 = scalar_lea.vmem %s407_s0, %s320_s19  ;;  %s192_s29 = scalar_lea.vmem %s411_s4, %s320_s19 }
  0x10   : > { %v194_v4 = vld [vmem:[%s188_s24] sm:$0xf] }
  0x11   : > { %v202_v5 = vsel %vm200_vm1, %v194_v4, 0 }
  0x12   : > { %328 = vmatpush3.bf16.msra.mxu0 %v202_v5 }
  0x15   : > { %330 = vmatmul.mubr.msk.bf16.vlgmr.msra.gmra.mrb[0].mxu0 %vm196_vm2, %v195_v6 }
  0x87   : > { %v248_v7 = vpop.permute.xlu0 %247 }
  0x8b   : > { %v255_v11 = vpop.permute.xlu0 %254 }
  0xe8   : > { %v238_v8 = vpop.f32.mrb[0].mxu0 }
  0xe9   : > { %v250_v9 = vmul.f32 %v248_v7, %v238_v8  ;;  %v331_v10 = vpop.f32.mrb[1].mxu0 }
  0xea   : > { %v241_v12 = vpop.f32.mrb[2].mxu0 }
  0xeb   : > { %v257_v13 = vadd.f32 %v255_v11, %v250_v9  ;;  %v332_v14 = vpop.f32.mrb[3].mxu0 }
  0xed   : > { %v258_v15 = vmax.f32 %v257_v13, 0.0 }
  0xef   : > { %v259_v16 = vpack.c.bf16 %v258_v15, %v258_v15 }
  0xf1   : > { %261 = vst.msk [vmem:[%s192_s29] sm:$0xf] %vm260_vm3, %v259_v16 }
  0xf2 PF: > { %s14_s15 = sadd.s32 1, %s351_s15  }
  0xf3   : > { %p11_p4 = scmp.ge.s32.totalorder %s14_s15, 4  }
  0xf5   :  { %13 = sbr.rel (!%p11_p4) target bundleno = 1 (0x1), region = 66 }

// kernel: kart_cnn_forward.35
= control target key start
LH: loop header
LB: loop body
LE: loop exit
PB: predicated region body
PF: predicated region fallthrough
CT: control target
= control target key end

     0   :  { %s915_s15 = smov 0   ;;  %s1005_s0 = inlined_call_operand.vmem [shape: bf16[2,3,16,24], index: 0, kind: input, shape index: {}]   ;;  %s1006_s1 = inlined_call_operand.vmem [shape: bf16[9,8,16], index: 1, kind: input, shape index: {}]   ;;  %s1007_s2 = inlined_call_operand.vmem [shape: f32[8,1], index: 2, kind: input, shape index: {}]   ;;  %s1008_s3 = inlined_call_operand.vmem [shape: f32[8,1], index: 3, kind: input, shape index: {}]   ;;  %s1009_s4 = inlined_call_operand.vmem [shape: bf16[2,8,16], index: 4, kind: output, shape index: {}]  }
   0x1 LB: > { %s724_s16 = sadd.s32 4294967295, %s883_s15   ;;  %p728_p0 = scmp.ge.s32.totalorder %s883_s15, 1  ;;  %s883_s15 = sphi %s915_s15, %s14_s15  }
   0x2   : > { %p162_p1 = scmp.lt.s32.totalorder %s883_s15, 3 }
   0x4   : > { %p163_p2 = pnand %p728_p0, %p162_p1 }
   0x5   : > { %p187_p3 = scmp.lt.s32.totalorder (!%p163_p2), %s724_s16, 1  ;;  %v885_v0 = vmov (!%p163_p2), 0.0   ;;  %vm886_vm0 = vmmov (!%p163_p2), 0   ;;  %v733_v2 = vld [vmem:[%s1006_s1 + $0x4] sm:$0xf] (!%p163_p2)  ;;  %s887_s23 = smov (!%p163_p2), 124  }
   0x6   : > { %166 = sbr.rel (%p163_p2) target bundleno = 407 (0x197), region = 36  ;;  %775 = vmatprep.subr.bf16.mxu1 (!%p163_p2), %v885_v0  ;;  %777 = vmatprep.mubr.msk.bf16.mxu1 (!%p163_p2), %vm886_vm0, %v885_v0  ;;  %vm211_vm1 = vcmask (!%p163_p2), 130048   ;;  %s888_s24 = smov (!%p163_p2), 120   ;;  %v199_v5 = vld [vmem:[%s1006_s1] sm:$0xf] (!%p163_p2)  ;;  %v889_v9 = vmov (!%p163_p2), 0  }
   0x7   : > { %799 = vmatprep.subr.bf16.mxu0 (!%p163_p2), %v885_v0  ;;  %801 = vmatprep.mubr.msk.bf16.mxu0 (!%p163_p2), %vm886_vm0, %v885_v0  ;;  %v740_v6 = vld [vmem:[%s1006_s1 + $0x8] sm:$0xf] (!%p163_p2)  ;;  %v653_v7 = vld [vmem:[%s1007_s2] sm:$0xff] (!%p163_p2)  ;;  %v745_v11 = vld [vmem:[%s1006_s1 + $0x10] sm:$0xf] (!%p163_p2)  ;;  %vm669_vm2 = vcmask (!%p163_p2), 125952  }
   0x8   : > { %v660_v8 = vld [vmem:[%s1008_s3] sm:$0xff] (!%p163_p2)  ;;  %872 = vset.pattern.permute.xlu0 (!%p163_p2), %v889_v9  ;;  %873 = vset.pattern.permute.xlu1 (!%p163_p2), %v889_v9  ;;  %v743_v14 = vld [vmem:[%s1006_s1 + $0xc] sm:$0xf] (!%p163_p2)  ;;  %v747_v15 = vld [vmem:[%s1006_s1 + $0x14] sm:$0xf] (!%p163_p2) }
   0x9   : > { %v749_v17 = vld [vmem:[%s1006_s1 + $0x18] sm:$0xf] (!%p163_p2)  ;;  %v751_v19 = vld [vmem:[%s1006_s1 + $0x1c] sm:$0xf] (!%p163_p2)  ;;  %v753_v21 = vld [vmem:[%s1006_s1 + $0x20] sm:$0xf] (!%p163_p2) }
   0xd   : > { %s1011_s16 = smov (!%p187_p3, %s724_s16), 1 }
   0xe   : > { %s858_s17 = smul.u32 24, %s1011_s16  ;;  %s730_s21 = sshll.u32 %s1011_s16, 2 }
  0x10   : > { %s191_s20 = scalar_lea.vmem %s1005_s0, %s858_s17 }
  0x11   : > { %v874_v1 = vld [vmem:[%s191_s20 + $0x8] sm:$0xff]   ;;  %v875_v3 = vld [vmem:[%s191_s20 + $0x10] sm:$0xff]   ;;  %v876_v4 = vld [vmem:[%s191_s20] sm:$0xff]  }
  0x12   : > { %410 = vrot.lane.b32.xlu0 %v874_v1, %s887_s23  ;;  %776 = vmatpush3.bf16.msra.mxu1 %v874_v1 }
  0x13   : > { %781 = vmatprep.subr.bf16.mxu1 %v885_v0  ;;  %508 = vrot.lane.b32.xlu1 %v876_v4, %s888_s24 }
  0x15   : > { %778 = vmatmul.mubr.msk.bf16.vlgmr.msra.gmra.mrb[0].mxu1 %vm211_vm1, %v733_v2 }
  0x16   : > { %459 = vrot.lane.b32.xlu0 %v875_v3, %s887_s23  ;;  %782 = vmatpush3.bf16.msra.mxu1 %v876_v4 }
  0x17   : > { %783 = vmatprep.mubr.msk.bf16.mxu1 %vm886_vm0, %v885_v0  ;;  %787 = vmatprep.subr.bf16.mxu1 %v885_v0 }
  0x18   : > { %557 = vrot.lane.b32.xlu1 %v874_v1, %s888_s24 }
  0x1a   : > { %361 = vrot.lane.b32.xlu0 %v876_v4, %s887_s23 }
  0x1c   : > { %606 = vrot.lane.b32.xlu1 %v875_v3, %s888_s24  ;;  %s195_s24 = scalar_lea.vmem %s1009_s4, %s730_s21 }
  0x1e   : > { %656 = vperm.xlu0 %872, %v653_v7  }
  0x20   : > { %663 = vperm.xlu1 %873, %v660_v8  }
  0x21   : > { %784 = vmatmul.mubr.msk.bf16.vlgmr.msra.gmra.mrb[0].mxu1 %vm211_vm1, %v199_v5 }
  0x22   : > { %788 = vmatpush3.bf16.msra.mxu1 %v875_v3  ;;  %789 = vmatprep.mubr.msk.bf16.mxu1 %vm886_vm0, %v885_v0 }
  0x23   : > { %793 = vmatprep.subr.bf16.mxu1 %v885_v0 }
  0x2d   : > { %790 = vmatmul.mubr.msk.bf16.vlgmr.msra.gmra.mrb[0].mxu1 %vm211_vm1, %v740_v6 }
  0x2e   : > { %795 = vmatprep.mubr.msk.bf16.mxu1 %vm886_vm0, %v885_v0 }
  0x84   : > { %v411_v10 = vpop.permute.xlu0 %410 }
  0x85   : > { %800 = vmatpush3.bf16.msra.mxu0 %v411_v10  ;;  %v509_v16 = vpop.permute.xlu1 %508 }
  0x86   : > { %805 = vmatprep.subr.bf16.mxu0 %v885_v0 }
  0x88   : > { %802 = vmatmul.mubr.msk.bf16.vlgmr.msra.gmra.mrb[0].mxu0 %vm211_vm1, %v745_v11  ;;  %v460_v12 = vpop.permute.xlu0 %459 }
  0x89   : > { %806 = vmatpush3.bf16.msra.mxu0 %v460_v12  ;;  %807 = vmatprep.mubr.msk.bf16.mxu0 %vm886_vm0, %v885_v0 }
  0x8a   : > { %811 = vmatprep.subr.bf16.mxu0 %v885_v0  ;;  %v558_v18 = vpop.permute.xlu1 %557 }
  0x8c   : > { %v362_v13 = vpop.permute.xlu0 %361 }
  0x8d   : > { %794 = vmatpush3.bf16.msra.mxu1 %v362_v13 }
  0x8e   : > { %v607_v20 = vpop.permute.xlu1 %606 }
  0x90   : > { %796 = vmatmul.mubr.msk.bf16.vlgmr.msra.gmra.mrb[0].mxu1 %vm211_vm1, %v743_v14 }
  0x94   : > { %808 = vmatmul.mubr.msk.bf16.vlgmr.msra.gmra.mrb[0].mxu0 %vm211_vm1, %v747_v15 }
  0x95   : > { %812 = vmatpush3.bf16.msra.mxu0 %v509_v16  ;;  %813 = vmatprep.mubr.msk.bf16.mxu0 %vm886_vm0, %v885_v0 }
  0x96   : > { %817 = vmatprep.subr.bf16.mxu0 %v885_v0 }
  0x9d   : > { %v657_v27 = vpop.permute.xlu0 %656 }
  0x9f   : > { %v664_v31 = vpop.permute.xlu1 %663 }
  0xa0   : > { %814 = vmatmul.mubr.msk.bf16.vlgmr.msra.gmra.mrb[0].mxu0 %vm211_vm1, %v749_v17 }
  0xa1   : > { %818 = vmatpush3.bf16.msra.mxu0 %v558_v18  ;;  %819 = vmatprep.mubr.msk.bf16.mxu0 %vm886_vm0, %v885_v0 }
  0xa2   : > { %823 = vmatprep.subr.bf16.mxu0 %v885_v0 }
  0xac   : > { %820 = vmatmul.mubr.msk.bf16.vlgmr.msra.gmra.mrb[0].mxu0 %vm211_vm1, %v751_v19 }
  0xad   : > { %824 = vmatpush3.bf16.msra.mxu0 %v607_v20  ;;  %825 = vmatprep.mubr.msk.bf16.mxu0 %vm886_vm0, %v885_v0 }
  0xb8   : > { %826 = vmatmul.mubr.msk.bf16.vlgmr.msra.gmra.mrb[0].mxu0 %vm211_vm1, %v753_v21 }
 0x163   : > { %v401_v22 = vpop.f32.mrb[0].mxu1 }
 0x164   : > { %v797_v23 = vpop.f32.mrb[1].mxu1 }
 0x165   : > { %v404_v24 = vpop.f32.mrb[2].mxu1 }
 0x166   : > { %v798_v25 = vpop.f32.mrb[3].mxu1 }
 0x18b   : > { %v646_v26 = vpop.f32.mrb[0].mxu0 }
 0x18c   : > { %v829_v28 = vadd.f32 %v646_v26, %v401_v22  ;;  %v827_v29 = vpop.f32.mrb[1].mxu0 }
 0x18d   : > { %v649_v30 = vpop.f32.mrb[2].mxu0 }
 0x18e   : > { %v659_v32 = vmul.f32 %v829_v28, %v657_v27  ;;  %v828_v33 = vpop.f32.mrb[3].mxu0 }
 0x190   : > { %v666_v34 = vadd.f32 %v664_v31, %v659_v32 }
 0x192   : > { %v667_v35 = vmax.f32 %v666_v34, 0.0 }
 0x194   : > { %v668_v36 = vpack.c.bf16 %v667_v35, %v667_v35 }
 0x196   : > { %670 = vst.msk [vmem:[%s195_s24] sm:$0xf] %vm669_vm2, %v668_v36 }
 0x197 PF: > { %s14_s15 = sadd.s32 1, %s883_s15  }
 0x198   : > { %p11_p4 = scmp.ge.s32.totalorder %s14_s15, 4  }
 0x19a   :  { %13 = sbr.rel (!%p11_p4) target bundleno = 1 (0x1), region = 76 }

// kernel: kart_cnn_forward.38
= control target key start
LH: loop header
LB: loop body
LE: loop exit
PB: predicated region body
PF: predicated region fallthrough
CT: control target
= control target key end

     0   :  { %s450_s15 = smov 0   ;;  %s486_s0 = inlined_call_operand.vmem [shape: bf16[2,1,8,20], index: 0, kind: input, shape index: {}]   ;;  %s487_s1 = inlined_call_operand.vmem [shape: bf16[2,8,8], index: 1, kind: input, shape index: {}]   ;;  %s488_s2 = inlined_call_operand.vmem [shape: f32[8,1], index: 2, kind: input, shape index: {}]   ;;  %s489_s3 = inlined_call_operand.vmem [shape: f32[8,1], index: 3, kind: input, shape index: {}]   ;;  %s490_s4 = inlined_call_operand.vmem [shape: bf16[2,8,16], index: 4, kind: output, shape index: {}]  }
   0x1 LB: > { %s368_s16 = sadd.s32 4294967295, %s419_s15   ;;  %p372_p0 = scmp.ge.s32.totalorder %s419_s15, 1  ;;  %s419_s15 = sphi %s450_s15, %s14_s15  }
   0x2   : > { %p161_p1 = scmp.lt.s32.totalorder %s419_s15, 3 }
   0x4   : > { %p162_p2 = pnand %p372_p0, %p161_p1 }
   0x5   : > { %p185_p3 = scmp.lt.s32.totalorder (!%p162_p2), %s368_s16, 1  ;;  %v421_v0 = vmov (!%p162_p2), 0.0   ;;  %vm422_vm0 = vmmov (!%p162_p2), 0   ;;  %v304_v1 = vld [vmem:[%s489_s3] sm:$0xff] (!%p162_p2)  ;;  %v423_v2 = vmov (!%p162_p2), 0   ;;  %vm207_vm1 = vcmask (!%p162_p2), 1043456  }
   0x6   : > { %165 = sbr.rel (%p162_p2) target bundleno = 361 (0x169), region = 36  ;;  %391 = vmatprep.subr.bf16.mxu0 (!%p162_p2), %v421_v0  ;;  %385 = vmatprep.subr.bf16.mxu1 (!%p162_p2), %v421_v0  ;;  %v195_v6 = vld [vmem:[%s487_s1] sm:$0xf] (!%p162_p2)  ;;  %vm203_vm2 = vcmask (!%p162_p2), 64512   ;;  %s424_s25 = smov (!%p162_p2), 124   ;;  %vm313_vm3 = vcmask (!%p162_p2), 125952  }
   0x7   : > { %393 = vmatprep.mubr.msk.bf16.mxu0 (!%p162_p2), %vm422_vm0, %v421_v0  ;;  %387 = vmatprep.mubr.msk.bf16.mxu1 (!%p162_p2), %vm422_vm0, %v421_v0  ;;  %v297_v7 = vld [vmem:[%s488_s2] sm:$0xff] (!%p162_p2) }
   0x8   : > { %410 = vset.pattern.permute.xlu0 (!%p162_p2), %v423_v2  ;;  %411 = vset.pattern.permute.xlu1 (!%p162_p2), %v423_v2  ;;  %v375_v10 = vld [vmem:[%s487_s1 + $0x4] sm:$0xf] (!%p162_p2) }
   0x9   : > { %307 = vperm.xlu1 (!%p162_p2), %411, %v304_v1  }
   0xd   : > { %s492_s16 = smov (!%p185_p3, %s368_s16), 1 }
   0xe   : > { %s373_s19 = sshll.u32 %s492_s16, 2 }
   0xf   : > { %s188_s22 = scalar_lea.vmem %s486_s0, %s373_s19  ;;  %s192_s6 = scalar_lea.vmem %s490_s4, %s373_s19 }
  0x10   : > { %v194_v3 = vld [vmem:[%s188_s22] sm:$0xf] }
  0x11   : > { %v376_v4 = vcombine.low %v194_v3, %v194_v3  ;;  %v255_v5 = vsel %vm207_vm1, %v194_v3, 0 }
  0x12   : > { %392 = vmatpush3.bf16.msra.mxu0 %v255_v5 }
  0x13   : > { %201 = vrot.lane.b32.xlu0 %v376_v4, %s424_s25 }
  0x15   : > { %394 = vmatmul.mubr.msk.bf16.vlgmr.msra.gmra.mrb[0].mxu0 %vm203_vm2, %v195_v6 }
  0x17   : > { %300 = vperm.xlu0 %410, %v297_v7  }
  0x85   : > { %v202_v8 = vpop.permute.xlu0 %201 }
  0x86   : > { %v209_v9 = vsel %vm207_vm1, %v202_v8, 0 }
  0x87   : > { %386 = vmatpush3.bf16.msra.mxu1 %v209_v9 }
  0x88   : > { %v308_v20 = vpop.permute.xlu1 %307 }
  0x8a   : > { %388 = vmatmul.mubr.msk.bf16.vlgmr.msra.gmra.mrb[0].mxu1 %vm203_vm2, %v375_v10 }
  0x96   : > { %v301_v16 = vpop.permute.xlu0 %300 }
  0xe8   : > { %v291_v11 = vpop.f32.mrb[0].mxu0 }
  0xe9   : > { %v395_v12 = vpop.f32.mrb[1].mxu0 }
  0xea   : > { %v294_v13 = vpop.f32.mrb[2].mxu0 }
  0xeb   : > { %v396_v14 = vpop.f32.mrb[3].mxu0 }
 0x15d   : > { %v245_v15 = vpop.f32.mrb[0].mxu1 }
 0x15e   : > { %v292_v17 = vadd.f32 %v291_v11, %v245_v15  ;;  %v389_v18 = vpop.f32.mrb[1].mxu1 }
 0x15f   : > { %v248_v19 = vpop.f32.mrb[2].mxu1 }
 0x160   : > { %v303_v21 = vmul.f32 %v301_v16, %v292_v17  ;;  %v390_v22 = vpop.f32.mrb[3].mxu1 }
 0x162   : > { %v310_v23 = vadd.f32 %v308_v20, %v303_v21 }
 0x164   : > { %v311_v24 = vmax.f32 %v310_v23, 0.0 }
 0x166   : > { %v312_v25 = vpack.c.bf16 %v311_v24, %v311_v24 }
 0x168   : > { %314 = vst.msk [vmem:[%s192_s6] sm:$0xf] %vm313_vm3, %v312_v25 }
 0x169 PF: > { %s14_s15 = sadd.s32 1, %s419_s15  }
 0x16a   : > { %p11_p4 = scmp.ge.s32.totalorder %s14_s15, 4  }
 0x16c   :  { %13 = sbr.rel (!%p11_p4) target bundleno = 1 (0x1), region = 67 }

// kernel: kart_cnn_forward.37
= control target key start
LH: loop header
LB: loop body
LE: loop exit
PB: predicated region body
PF: predicated region fallthrough
CT: control target
= control target key end

     0   :  { %s448_s15 = smov 0   ;;  %s481_s0 = inlined_call_operand.vmem [shape: bf16[2,2,8,16], index: 0, kind: input, shape index: {}]   ;;  %s482_s1 = inlined_call_operand.vmem [shape: bf16[2,8,8], index: 1, kind: input, shape index: {}]   ;;  %s483_s2 = inlined_call_operand.vmem [shape: f32[8,1], index: 2, kind: input, shape index: {}]   ;;  %s484_s3 = inlined_call_operand.vmem [shape: f32[8,1], index: 3, kind: input, shape index: {}]   ;;  %s485_s4 = inlined_call_operand.vmem [shape: bf16[2,8,16], index: 4, kind: output, shape index: {}]  }
   0x1 LB: > { %s368_s16 = sadd.s32 4294967295, %s418_s15   ;;  %p372_p0 = scmp.ge.s32.totalorder %s418_s15, 1  ;;  %s418_s15 = sphi %s448_s15, %s14_s15  }
   0x2   : > { %p162_p1 = scmp.lt.s32.totalorder %s418_s15, 3 }
   0x4   : > { %p163_p2 = pnand %p372_p0, %p162_p1 }
   0x5   : > { %p187_p3 = scmp.lt.s32.totalorder (!%p163_p2), %s368_s16, 1  ;;  %v420_v0 = vmov (!%p163_p2), 0.0   ;;  %v297_v1 = vld [vmem:[%s483_s2] sm:$0xff] (!%p163_p2)  ;;  %vm421_vm0 = vmmov (!%p163_p2), 0   ;;  %v422_v2 = vmov (!%p163_p2), 0   ;;  %vm207_vm1 = vcmask (!%p163_p2), 1043456  }
   0x6   : > { %166 = sbr.rel (%p163_p2) target bundleno = 244 (0xf4), region = 36  ;;  %387 = vmatprep.subr.bf16.mxu1 (!%p163_p2), %v420_v0  ;;  %393 = vmatprep.subr.bf16.mxu0 (!%p163_p2), %v420_v0  ;;  %v304_v5 = vld [vmem:[%s484_s3] sm:$0xff] (!%p163_p2)  ;;  %vm203_vm2 = vcmask (!%p163_p2), 64512   ;;  %vm313_vm3 = vcmask (!%p163_p2), 125952  }
   0x7   : > { %389 = vmatprep.mubr.msk.bf16.mxu1 (!%p163_p2), %vm421_vm0, %v420_v0  ;;  %395 = vmatprep.mubr.msk.bf16.mxu0 (!%p163_p2), %vm421_vm0, %v420_v0  ;;  %v377_v8 = vld [vmem:[%s482_s1 + $0x4] sm:$0xf] (!%p163_p2)  ;;  %v198_v9 = vld [vmem:[%s482_s1] sm:$0xf] (!%p163_p2) }
   0x8   : > { %411 = vset.pattern.permute.xlu0 (!%p163_p2), %v422_v2 }
   0x9   : > { %300 = vperm.xlu0 (!%p163_p2), %411, %v297_v1  }
   0xd   : > { %s487_s16 = smov (!%p187_p3, %s368_s16), 1  ;;  %307 = vperm.xlu0 %411, %v304_v5  }
   0xe   : > { %s382_s19 = sshll.u32 %s487_s16, 3  ;;  %s375_s29 = sshll.u32 %s487_s16, 2 }
   0xf   : > { %s191_s22 = scalar_lea.vmem %s481_s0, %s382_s19  ;;  %s195_s6 = scalar_lea.vmem %s485_s4, %s375_s29 }
  0x10   : > { %v376_v3 = vld [vmem:[%s191_s22 + $0x4] sm:$0xf]  ;;  %v197_v4 = vld [vmem:[%s191_s22] sm:$0xf] }
  0x11   : > { %v209_v6 = vsel %vm207_vm1, %v376_v3, 0  ;;  %v255_v7 = vsel %vm207_vm1, %v197_v4, 0 }
  0x12   : > { %388 = vmatpush3.bf16.msra.mxu1 %v209_v6  ;;  %394 = vmatpush3.bf16.msra.mxu0 %v255_v7 }
  0x15   : > { %390 = vmatmul.mubr.msk.bf16.vlgmr.msra.gmra.mrb[0].mxu1 %vm203_vm2, %v377_v8  ;;  %396 = vmatmul.mubr.msk.bf16.vlgmr.msra.gmra.mrb[0].mxu0 %vm203_vm2, %v198_v9 }
  0x88   : > { %v301_v10 = vpop.permute.xlu0 %300 }
  0x8c   : > { %v308_v21 = vpop.permute.xlu0 %307 }
  0xe8   : > { %v245_v11 = vpop.f32.mrb[0].mxu1  ;;  %v291_v12 = vpop.f32.mrb[0].mxu0 }
  0xe9   : > { %v292_v13 = vadd.f32 %v291_v12, %v245_v11  ;;  %v391_v14 = vpop.f32.mrb[1].mxu1  ;;  %v397_v15 = vpop.f32.mrb[1].mxu0 }
  0xea   : > { %v248_v16 = vpop.f32.mrb[2].mxu1  ;;  %v294_v17 = vpop.f32.mrb[2].mxu0 }
  0xeb   : > { %v303_v18 = vmul.f32 %v301_v10, %v292_v13  ;;  %v392_v19 = vpop.f32.mrb[3].mxu1  ;;  %v398_v20 = vpop.f32.mrb[3].mxu0 }
  0xed   : > { %v310_v22 = vadd.f32 %v308_v21, %v303_v18 }
  0xef   : > { %v311_v23 = vmax.f32 %v310_v22, 0.0 }
  0xf1   : > { %v312_v24 = vpack.c.bf16 %v311_v23, %v311_v23 }
  0xf3   : > { %314 = vst.msk [vmem:[%s195_s6] sm:$0xf] %vm313_vm3, %v312_v24 }
  0xf4 PF: > { %s14_s15 = sadd.s32 1, %s418_s15  }
  0xf5   : > { %p11_p4 = scmp.ge.s32.totalorder %s14_s15, 4  }
  0xf7   :  { %13 = sbr.rel (!%p11_p4) target bundleno = 1 (0x1), region = 68 }

// kernel: kart_cnn_forward.39
= control target key start
LH: loop header
LB: loop body
LE: loop exit
PB: predicated region body
PF: predicated region fallthrough
CT: control target
= control target key end

     0   :  { %s591_s15 = smov 0   ;;  %s642_s0 = inlined_call_operand.vmem [shape: bf16[2,2,8,20], index: 0, kind: input, shape index: {}]   ;;  %s643_s1 = inlined_call_operand.vmem [shape: bf16[4,8,8], index: 1, kind: input, shape index: {}]   ;;  %s644_s2 = inlined_call_operand.vmem [shape: f32[8,1], index: 2, kind: input, shape index: {}]   ;;  %s645_s3 = inlined_call_operand.vmem [shape: f32[8,1], index: 3, kind: input, shape index: {}]   ;;  %s646_s4 = inlined_call_operand.vmem [shape: bf16[2,8,16], index: 4, kind: output, shape index: {}]  }
   0x1 LB: > { %s476_s16 = sadd.s32 4294967295, %s560_s15   ;;  %p480_p0 = scmp.ge.s32.totalorder %s560_s15, 1  ;;  %s560_s15 = sphi %s591_s15, %s14_s15  }
   0x2   : > { %p162_p1 = scmp.lt.s32.totalorder %s560_s15, 3 }
   0x4   : > { %p163_p2 = pnand %p480_p0, %p162_p1 }
   0x5   : > { %p187_p3 = scmp.lt.s32.totalorder (!%p163_p2), %s476_s16, 1  ;;  %v562_v0 = vmov (!%p163_p2), 0.0   ;;  %vm563_vm0 = vmmov (!%p163_p2), 0   ;;  %vm207_vm1 = vcmask (!%p163_p2), 1043456   ;;  %v485_v5 = vld [vmem:[%s643_s1 + $0x4] sm:$0xf] (!%p163_p2) }
   0x6   : > { %166 = sbr.rel (%p163_p2) target bundleno = 373 (0x175), region = 36  ;;  %505 = vmatprep.subr.bf16.mxu1 (!%p163_p2), %v562_v0  ;;  %507 = vmatprep.mubr.msk.bf16.mxu1 (!%p163_p2), %vm563_vm0, %v562_v0  ;;  %vm203_vm2 = vcmask (!%p163_p2), 64512   ;;  %s564_s23 = smov (!%p163_p2), 124   ;;  %v405_v8 = vld [vmem:[%s644_s2] sm:$0xff] (!%p163_p2)  ;;  %v565_v9 = vmov (!%p163_p2), 0   ;;  %vm421_vm3 = vcmask (!%p163_p2), 125952  }
   0x7   : > { %517 = vmatprep.subr.bf16.mxu0 (!%p163_p2), %v562_v0  ;;  %519 = vmatprep.mubr.msk.bf16.mxu0 (!%p163_p2), %vm563_vm0, %v562_v0  ;;  %v412_v10 = vld [vmem:[%s645_s3] sm:$0xff] (!%p163_p2)  ;;  %v488_v14 = vld [vmem:[%s643_s1 + $0x8] sm:$0xf] (!%p163_p2)  ;;  %v491_v17 = vld [vmem:[%s643_s1 + $0xc] sm:$0xf] (!%p163_p2) }
   0x8   : > { %550 = vset.pattern.permute.xlu1 (!%p163_p2), %v565_v9  ;;  %551 = vset.pattern.permute.xlu0 (!%p163_p2), %v565_v9  ;;  %v198_v11 = vld [vmem:[%s643_s1] sm:$0xf] (!%p163_p2) }
   0x9   : > { %408 = vperm.xlu1 (!%p163_p2), %550, %v405_v8  }
   0xd   : > { %s648_s16 = smov (!%p187_p3, %s476_s16), 1  ;;  %415 = vperm.xlu1 %550, %v412_v10  }
   0xe   : > { %s496_s17 = sshll.u32 %s648_s16, 3  ;;  %s483_s8 = sshll.u32 %s648_s16, 2 }
   0xf   : > { %s191_s20 = scalar_lea.vmem %s642_s0, %s496_s17  ;;  %s195_s11 = scalar_lea.vmem %s646_s4, %s483_s8 }
  0x10   : > { %v197_v1 = vld [vmem:[%s191_s20] sm:$0xf]  ;;  %v484_v2 = vld [vmem:[%s191_s20 + $0x4] sm:$0xf] }
  0x11   : > { %v489_v3 = vcombine.low %v197_v1, %v197_v1  ;;  %v209_v4 = vsel %vm207_vm1, %v484_v2, 0  ;;  %v492_v6 = vcombine.low %v484_v2, %v484_v2  ;;  %v255_v7 = vsel %vm207_vm1, %v197_v1, 0 }
  0x12   : > { %506 = vmatpush3.bf16.msra.mxu1 %v209_v4 }
  0x13   : > { %302 = vrot.lane.b32.xlu0 %v489_v3, %s564_s23  ;;  %511 = vmatprep.subr.bf16.mxu1 %v562_v0 }
  0x15   : > { %508 = vmatmul.mubr.msk.bf16.vlgmr.msra.gmra.mrb[0].mxu1 %vm203_vm2, %v485_v5 }
  0x16   : > { %512 = vmatpush3.bf16.msra.mxu1 %v255_v7  ;;  %513 = vmatprep.mubr.msk.bf16.mxu1 %vm563_vm0, %v562_v0 }
  0x17   : > { %356 = vrot.lane.b32.xlu0 %v492_v6, %s564_s23 }
  0x21   : > { %514 = vmatmul.mubr.msk.bf16.vlgmr.msra.gmra.mrb[0].mxu1 %vm203_vm2, %v198_v11 }
  0x85   : > { %v303_v12 = vpop.permute.xlu0 %302 }
  0x86   : > { %v308_v13 = vsel %vm207_vm1, %v303_v12, 0 }
  0x87   : > { %518 = vmatpush3.bf16.msra.mxu0 %v308_v13 }
  0x88   : > { %523 = vmatprep.subr.bf16.mxu0 %v562_v0  ;;  %v409_v22 = vpop.permute.xlu1 %408 }
  0x89   : > { %v357_v15 = vpop.permute.xlu0 %356 }
  0x8a   : > { %v362_v16 = vsel %vm207_vm1, %v357_v15, 0  ;;  %520 = vmatmul.mubr.msk.bf16.vlgmr.msra.gmra.mrb[0].mxu0 %vm203_vm2, %v488_v14 }
  0x8b   : > { %524 = vmatpush3.bf16.msra.mxu0 %v362_v16  ;;  %525 = vmatprep.mubr.msk.bf16.mxu0 %vm563_vm0, %v562_v0 }
  0x8c   : > { %v416_v29 = vpop.permute.xlu1 %415 }
  0x96   : > { %526 = vmatmul.mubr.msk.bf16.vlgmr.msra.gmra.mrb[0].mxu0 %vm203_vm2, %v491_v17 }
  0xf4   : > { %v291_v18 = vpop.f32.mrb[0].mxu1 }
  0xf5   : > { %v515_v19 = vpop.f32.mrb[1].mxu1 }
  0xf6   : > { %v294_v20 = vpop.f32.mrb[2].mxu1 }
  0xf7   : > { %v516_v21 = vpop.f32.mrb[3].mxu1 }
 0x169   : > { %v398_v23 = vpop.f32.mrb[0].mxu0 }
 0x16a   : > { %v529_v24 = vadd.f32 %v398_v23, %v291_v18  ;;  %v527_v25 = vpop.f32.mrb[1].mxu0 }
 0x16b   : > { %v401_v26 = vpop.f32.mrb[2].mxu0 }
 0x16c   : > { %v411_v27 = vmul.f32 %v529_v24, %v409_v22  ;;  %v528_v28 = vpop.f32.mrb[3].mxu0 }
 0x16e   : > { %v418_v30 = vadd.f32 %v416_v29, %v411_v27 }
 0x170   : > { %v419_v31 = vmax.f32 %v418_v30, 0.0 }
 0x172   : > { %v420_v32 = vpack.c.bf16 %v419_v31, %v419_v31 }
 0x174   : > { %422 = vst.msk [vmem:[%s195_s11] sm:$0xf] %vm421_vm3, %v420_v32 }
 0x175 PF: > { %s14_s15 = sadd.s32 1, %s560_s15  }
 0x176   : > { %p11_p4 = scmp.ge.s32.totalorder %s14_s15, 4  }
 0x178   :  { %13 = sbr.rel (!%p11_p4) target bundleno = 1 (0x1), region = 70 }

// kernel: kart_cnn_forward.42
= control target key start
LH: loop header
LB: loop body
LE: loop exit
PB: predicated region body
PF: predicated region fallthrough
CT: control target
= control target key end

     0   :  { %s380_s15 = smov 0   ;;  %s406_s0 = inlined_call_operand.vmem [shape: bf16[2,1,8,64], index: 0, kind: input, shape index: {}]   ;;  %s407_s1 = inlined_call_operand.vmem [shape: bf16[1,3,8], index: 1, kind: input, shape index: {}]   ;;  %s408_s2 = inlined_call_operand.vmem [shape: f32[3,1], index: 2, kind: input, shape index: {}]   ;;  %s409_s3 = inlined_call_operand.vmem [shape: f32[3,1], index: 3, kind: input, shape index: {}]   ;;  %s410_s4 = inlined_call_operand.vmem [shape: f32[2,3,64], index: 4, kind: output, shape index: {}]  }
   0x1 LB: > { %s314_s16 = sadd.s32 4294967295, %s350_s15   ;;  %p318_p0 = scmp.ge.s32.totalorder %s350_s15, 1  ;;  %s350_s15 = sphi %s380_s15, %s14_s15  }
   0x2   : > { %p161_p1 = scmp.lt.s32.totalorder %s350_s15, 3 }
   0x4   : > { %p162_p2 = pnand %p318_p0, %p161_p1 }
   0x5   : > { %p185_p3 = scmp.lt.s32.totalorder (!%p162_p2), %s314_s16, 1  ;;  %v352_v0 = vmov (!%p162_p2), 0.0   ;;  %vm353_vm0 = vmmov (!%p162_p2), 0   ;;  %v244_v1 = vld [vmem:[%s408_s2] sm:$0x7] (!%p162_p2)  ;;  %v354_v2 = vmov (!%p162_p2), 0  }
   0x6   : > { %165 = sbr.rel (%p162_p2) target bundleno = 240 (0xf0), region = 36  ;;  %326 = vmatprep.subr.bf16.mxu0 (!%p162_p2), %v352_v0  ;;  %328 = vmatprep.mubr.msk.bf16.mxu0 (!%p162_p2), %vm353_vm0, %v352_v0  ;;  %vm200_vm1 = vcmask (!%p162_p2), 1043456   ;;  %v251_v3 = vld [vmem:[%s409_s3] sm:$0x7] (!%p162_p2)  ;;  %vm196_vm2 = vcmask (!%p162_p2), 64512   ;;  %vm259_vm3 = vcmask (!%p162_p2), 518144  }
   0x7   : > { %343 = vset.pattern.permute.xlu0 (!%p162_p2), %v354_v2  ;;  %v195_v6 = vld [vmem:[%s407_s1] sm:$0x3] (!%p162_p2) }
   0x8   : > { %247 = vperm.xlu0 (!%p162_p2), %343, %v244_v1  }
   0xc   : > { %254 = vperm.xlu0 (!%p162_p2), %343, %v251_v3  }
   0xd   : > { %s412_s16 = smov (!%p185_p3, %s314_s16), 1 }
   0xe   : > { %s319_s19 = sshll.u32 %s412_s16, 2 }
   0xf   : > { %s188_s24 = scalar_lea.vmem %s406_s0, %s319_s19  ;;  %s192_s29 = scalar_lea.vmem %s410_s4, %s319_s19 }
  0x10   : > { %v194_v4 = vld [vmem:[%s188_s24] sm:$0xf] }
  0x11   : > { %v202_v5 = vsel %vm200_vm1, %v194_v4, 0 }
  0x12   : > { %327 = vmatpush3.bf16.msra.mxu0 %v202_v5 }
  0x15   : > { %329 = vmatmul.mubr.msk.bf16.vlgmr.msra.gmra.mrb[0].mxu0 %vm196_vm2, %v195_v6 }
  0x87   : > { %v248_v7 = vpop.permute.xlu0 %247 }
  0x8b   : > { %v255_v11 = vpop.permute.xlu0 %254 }
  0xe8   : > { %v238_v8 = vpop.f32.mrb[0].mxu0 }
  0xe9   : > { %v250_v9 = vmul.f32 %v248_v7, %v238_v8  ;;  %v330_v10 = vpop.f32.mrb[1].mxu0 }
  0xea   : > { %v241_v12 = vpop.f32.mrb[2].mxu0 }
  0xeb   : > { %v257_v13 = vadd.f32 %v255_v11, %v250_v9  ;;  %v331_v14 = vpop.f32.mrb[3].mxu0 }
  0xed   : > { %v258_v15 = vmax.f32 %v257_v13, 0.0 }
  0xef   : > { %260 = vst.msk [vmem:[%s192_s29] sm:$0x7] %vm259_vm3, %v258_v15 }
  0xf0 PF: > { %s14_s15 = sadd.s32 1, %s350_s15  }
  0xf1   : > { %p11_p4 = scmp.ge.s32.totalorder %s14_s15, 4  }
  0xf3   :  { %13 = sbr.rel (!%p11_p4) target bundleno = 1 (0x1), region = 66 }

// kernel: kart_cnn_forward.41
= control target key start
LH: loop header
LB: loop body
LE: loop exit
PB: predicated region body
PF: predicated region fallthrough
CT: control target
= control target key end

     0   :  { %s988_s18 = smov 0   ;;  %s1090_s0 = inlined_call_operand.vmem [shape: bf16[2,3,8,80], index: 0, kind: input, shape index: {}]   ;;  %s1091_s1 = inlined_call_operand.vmem [shape: bf16[9,8,8], index: 1, kind: input, shape index: {}]   ;;  %s1092_s2 = inlined_call_operand.vmem [shape: f32[8,1], index: 2, kind: input, shape index: {}]   ;;  %s1093_s3 = inlined_call_operand.vmem [shape: f32[8,1], index: 3, kind: input, shape index: {}]   ;;  %s1094_s4 = inlined_call_operand.vmem [shape: bf16[2,8,64], index: 4, kind: input, shape index: {}]   ;;  %s1095_s5 = inlined_call_operand.vmem [shape: bf16[2,8,64], index: 5, kind: output, shape index: {}]  }
   0x1 LB: > { %s793_s19 = sadd.s32 4294967295, %s951_s18   ;;  %p797_p0 = scmp.ge.s32.totalorder %s951_s18, 1  ;;  %s951_s18 = sphi %s988_s18, %s15_s18  }
   0x2   : > { %p196_p1 = scmp.lt.s32.totalorder %s951_s18, 3 }
   0x4   : > { %p197_p2 = pnand %p797_p0, %p196_p1 }
   0x5   : > { %p227_p3 = scmp.lt.s32.totalorder (!%p197_p2), %s793_s19, 1  ;;  %v953_v0 = vmov (!%p197_p2), 0.0   ;;  %vm954_vm0 = vmmov (!%p197_p2), 0   ;;  %vm251_vm1 = vcmask (!%p197_p2), 1043456   ;;  %v802_v7 = vld [vmem:[%s1091_s1 + $0x4] sm:$0xf] (!%p197_p2) }
   0x6   : > { %200 = sbr.rel (%p197_p2) target bundleno = 412 (0x19c), region = 40  ;;  %843 = vmatprep.subr.bf16.mxu1 (!%p197_p2), %v953_v0  ;;  %845 = vmatprep.mubr.msk.bf16.mxu1 (!%p197_p2), %vm954_vm0, %v953_v0  ;;  %vm247_vm2 = vcmask (!%p197_p2), 64512   ;;  %s955_s26 = smov (!%p197_p2), 120   ;;  %v242_v10 = vld [vmem:[%s1091_s1] sm:$0xf] (!%p197_p2)  ;;  %v957_v15 = vmov (!%p197_p2), 0  }
   0x7   : > { %867 = vmatprep.subr.bf16.mxu0 (!%p197_p2), %v953_v0  ;;  %869 = vmatprep.mubr.msk.bf16.mxu0 (!%p197_p2), %vm954_vm0, %v953_v0  ;;  %s956_s27 = smov (!%p197_p2), 112   ;;  %v806_v12 = vld [vmem:[%s1091_s1 + $0x8] sm:$0xf] (!%p197_p2)  ;;  %v707_v13 = vld [vmem:[%s1092_s2] sm:$0xff] (!%p197_p2)  ;;  %v811_v18 = vld [vmem:[%s1091_s1 + $0x10] sm:$0xf] (!%p197_p2) }
   0x8   : > { %v714_v14 = vld [vmem:[%s1093_s3] sm:$0xff] (!%p197_p2)  ;;  %940 = vset.pattern.permute.xlu0 (!%p197_p2), %v957_v15  ;;  %941 = vset.pattern.permute.xlu1 (!%p197_p2), %v957_v15  ;;  %v808_v23 = vld [vmem:[%s1091_s1 + $0xc] sm:$0xf] (!%p197_p2)  ;;  %v814_v25 = vld [vmem:[%s1091_s1 + $0x14] sm:$0xf] (!%p197_p2)  ;;  %vm726_vm3 = vcmask (!%p197_p2), 519168  }
   0x9   : > { %v817_v28 = vld [vmem:[%s1091_s1 + $0x18] sm:$0xf] (!%p197_p2)  ;;  %v819_v31 = vld [vmem:[%s1091_s1 + $0x1c] sm:$0xf] (!%p197_p2)  ;;  %v821_v33 = vld [vmem:[%s1091_s1 + $0x20] sm:$0xf] (!%p197_p2) }
   0xd   : > { %s1097_s19 = smov (!%p227_p3, %s793_s19), 1 }
   0xe   : > { %s926_s20 = smul.u32 12, %s1097_s19  ;;  %s799_s25 = sshll.u32 %s1097_s19, 2 }
   0xf   : > { %s235_s28 = scalar_lea.vmem %s1094_s4, %s799_s25  ;;  %s239_s19 = scalar_lea.vmem %s1095_s5, %s799_s25 }
  0x10   : > { %s231_s23 = scalar_lea.vmem %s1090_s0, %s926_s20  ;;  %v722_v43 = vld [vmem:[%s235_s28] sm:$0xf] }
  0x11   : > { %v801_v1 = vld [vmem:[%s231_s23 + $0x4] sm:$0xf]  ;;  %v805_v2 = vld [vmem:[%s231_s23 + $0x8] sm:$0xf]  ;;  %v241_v3 = vld [vmem:[%s231_s23] sm:$0xf]  ;;  %v723_v47 = vunpack.c.l.bf16 %v722_v43 }
  0x12   : > { %v812_v4 = vcombine.low %v801_v1, %v801_v1  ;;  %v809_v5 = vcombine.low %v241_v3, %v241_v3  ;;  %v253_v6 = vsel %vm251_vm1, %v801_v1, 0  ;;  %v815_v8 = vcombine.low %v805_v2, %v805_v2 }
  0x13   : > { %844 = vmatpush3.bf16.msra.mxu1 %v253_v6  ;;  %v299_v9 = vsel %vm251_vm1, %v241_v3, 0  ;;  %v349_v11 = vsel %vm251_vm1, %v805_v2, 0 }
  0x14   : > { %451 = vrot.lane.b32.xlu0 %v812_v4, %s955_s26  ;;  %556 = vrot.lane.b32.xlu1 %v809_v5, %s956_s27 }
  0x15   : > { %849 = vmatprep.subr.bf16.mxu1 %v953_v0 }
  0x16   : > { %846 = vmatmul.mubr.msk.bf16.vlgmr.msra.gmra.mrb[0].mxu1 %vm247_vm2, %v802_v7 }
  0x17   : > { %850 = vmatpush3.bf16.msra.mxu1 %v299_v9  ;;  %851 = vmatprep.mubr.msk.bf16.mxu1 %vm954_vm0, %v953_v0 }
  0x18   : > { %505 = vrot.lane.b32.xlu0 %v815_v8, %s955_s26  ;;  %607 = vrot.lane.b32.xlu1 %v812_v4, %s956_s27 }
  0x19   : > { %855 = vmatprep.subr.bf16.mxu1 %v953_v0 }
  0x1c   : > { %397 = vrot.lane.b32.xlu0 %v809_v5, %s955_s26  ;;  %658 = vrot.lane.b32.xlu1 %v815_v8, %s956_s27 }
  0x20   : > { %710 = vperm.xlu0 %940, %v707_v13   ;;  %717 = vperm.xlu1 %941, %v714_v14  }
  0x22   : > { %852 = vmatmul.mubr.msk.bf16.vlgmr.msra.gmra.mrb[0].mxu1 %vm247_vm2, %v242_v10 }
  0x23   : > { %856 = vmatpush3.bf16.msra.mxu1 %v349_v11  ;;  %857 = vmatprep.mubr.msk.bf16.mxu1 %vm954_vm0, %v953_v0 }
  0x24   : > { %861 = vmatprep.subr.bf16.mxu1 %v953_v0 }
  0x2e   : > { %858 = vmatmul.mubr.msk.bf16.vlgmr.msra.gmra.mrb[0].mxu1 %vm247_vm2, %v806_v12 }
  0x2f   : > { %863 = vmatprep.mubr.msk.bf16.mxu1 %vm954_vm0, %v953_v0 }
  0x86   : > { %v452_v16 = vpop.permute.xlu0 %451  ;;  %v557_v24 = vpop.permute.xlu1 %556 }
  0x87   : > { %v457_v17 = vsel %vm251_vm1, %v452_v16, 0  ;;  %v562_v26 = vsel %vm251_vm1, %v557_v24, 0 }
  0x88   : > { %868 = vmatpush3.bf16.msra.mxu0 %v457_v17 }
  0x89   : > { %873 = vmatprep.subr.bf16.mxu0 %v953_v0 }
  0x8a   : > { %v506_v19 = vpop.permute.xlu0 %505  ;;  %v608_v27 = vpop.permute.xlu1 %607 }
  0x8b   : > { %v511_v20 = vsel %vm251_vm1, %v506_v19, 0  ;;  %870 = vmatmul.mubr.msk.bf16.vlgmr.msra.gmra.mrb[0].mxu0 %vm247_vm2, %v811_v18  ;;  %v613_v29 = vsel %vm251_vm1, %v608_v27, 0 }
  0x8c   : > { %874 = vmatpush3.bf16.msra.mxu0 %v511_v20  ;;  %875 = vmatprep.mubr.msk.bf16.mxu0 %vm954_vm0, %v953_v0 }
  0x8d   : > { %879 = vmatprep.subr.bf16.mxu0 %v953_v0 }
  0x8e   : > { %v398_v21 = vpop.permute.xlu0 %397  ;;  %v659_v30 = vpop.permute.xlu1 %658 }
  0x8f   : > { %v403_v22 = vsel %vm251_vm1, %v398_v21, 0  ;;  %v664_v32 = vsel %vm251_vm1, %v659_v30, 0 }
  0x90   : > { %862 = vmatpush3.bf16.msra.mxu1 %v403_v22 }
  0x93   : > { %864 = vmatmul.mubr.msk.bf16.vlgmr.msra.gmra.mrb[0].mxu1 %vm247_vm2, %v808_v23 }
  0x97   : > { %876 = vmatmul.mubr.msk.bf16.vlgmr.msra.gmra.mrb[0].mxu0 %vm247_vm2, %v814_v25 }
  0x98   : > { %880 = vmatpush3.bf16.msra.mxu0 %v562_v26  ;;  %881 = vmatprep.mubr.msk.bf16.mxu0 %vm954_vm0, %v953_v0 }
  0x99   : > { %885 = vmatprep.subr.bf16.mxu0 %v953_v0 }
  0x9f   : > { %v711_v39 = vpop.permute.xlu0 %710  ;;  %v718_v44 = vpop.permute.xlu1 %717 }
  0xa3   : > { %882 = vmatmul.mubr.msk.bf16.vlgmr.msra.gmra.mrb[0].mxu0 %vm247_vm2, %v817_v28 }
  0xa4   : > { %886 = vmatpush3.bf16.msra.mxu0 %v613_v29  ;;  %887 = vmatprep.mubr.msk.bf16.mxu0 %vm954_vm0, %v953_v0 }
  0xa5   : > { %891 = vmatprep.subr.bf16.mxu0 %v953_v0 }
  0xaf   : > { %888 = vmatmul.mubr.msk.bf16.vlgmr.msra.gmra.mrb[0].mxu0 %vm247_vm2, %v819_v31 }
  0xb0   : > { %892 = vmatpush3.bf16.msra.mxu0 %v664_v32  ;;  %893 = vmatprep.mubr.msk.bf16.mxu0 %vm954_vm0, %v953_v0 }
  0xbb   : > { %894 = vmatmul.mubr.msk.bf16.vlgmr.msra.gmra.mrb[0].mxu0 %vm247_vm2, %v821_v33 }
 0x166   : > { %v439_v34 = vpop.f32.mrb[0].mxu1 }
 0x167   : > { %v865_v35 = vpop.f32.mrb[1].mxu1 }
 0x168   : > { %v442_v36 = vpop.f32.mrb[2].mxu1 }
 0x169   : > { %v866_v37 = vpop.f32.mrb[3].mxu1 }
 0x18e   : > { %v700_v38 = vpop.f32.mrb[0].mxu0 }
 0x18f   : > { %v897_v40 = vadd.f32 %v700_v38, %v439_v34  ;;  %v895_v41 = vpop.f32.mrb[1].mxu0 }
 0x190   : > { %v703_v42 = vpop.f32.mrb[2].mxu0 }
 0x191   : > { %v713_v45 = vmul.f32 %v897_v40, %v711_v39  ;;  %v896_v46 = vpop.f32.mrb[3].mxu0 }
 0x193   : > { %v720_v48 = vadd.f32 %v718_v44, %v713_v45 }
 0x195   : > { %v721_v49 = vmax.f32 %v720_v48, 0.0 }
 0x197   : > { %v724_v50 = vadd.f32 %v723_v47, %v721_v49 }
 0x199   : > { %v725_v51 = vpack.c.bf16 %v724_v50, %v724_v50 }
 0x19b   : > { %727 = vst.msk [vmem:[%s239_s19] sm:$0xf] %vm726_vm3, %v725_v51 }
 0x19c PF: > { %s15_s18 = sadd.s32 1, %s951_s18  }
 0x19d   : > { %p12_p4 = scmp.ge.s32.totalorder %s15_s18, 4  }
 0x19f   :  { %14 = sbr.rel (!%p12_p4) target bundleno = 1 (0x1), region = 83 }

// kernel: kart_cnn_forward.45
= control target key start
LH: loop header
LB: loop body
LE: loop exit
PB: predicated region body
PF: predicated region fallthrough
CT: control target
= control target key end

     0   :  { %s447_s15 = smov 0   ;;  %s480_s0 = inlined_call_operand.vmem [shape: bf16[2,2,8,64], index: 0, kind: input, shape index: {}]   ;;  %s481_s1 = inlined_call_operand.vmem [shape: bf16[2,3,8], index: 1, kind: input, shape index: {}]   ;;  %s482_s2 = inlined_call_operand.vmem [shape: f32[3,1], index: 2, kind: input, shape index: {}]   ;;  %s483_s3 = inlined_call_operand.vmem [shape: f32[3,1], index: 3, kind: input, shape index: {}]   ;;  %s484_s4 = inlined_call_operand.vmem [shape: f32[2,3,64], index: 4, kind: output, shape index: {}]  }
   0x1 LB: > { %s367_s16 = sadd.s32 4294967295, %s417_s15   ;;  %p371_p0 = scmp.ge.s32.totalorder %s417_s15, 1  ;;  %s417_s15 = sphi %s447_s15, %s14_s15  }
   0x2   : > { %p162_p1 = scmp.lt.s32.totalorder %s417_s15, 3 }
   0x4   : > { %p163_p2 = pnand %p371_p0, %p162_p1 }
   0x5   : > { %p187_p3 = scmp.lt.s32.totalorder (!%p163_p2), %s367_s16, 1  ;;  %v419_v0 = vmov (!%p163_p2), 0.0   ;;  %v297_v1 = vld [vmem:[%s482_s2] sm:$0x7] (!%p163_p2)  ;;  %vm420_vm0 = vmmov (!%p163_p2), 0   ;;  %v421_v2 = vmov (!%p163_p2), 0  }
   0x6   : > { %166 = sbr.rel (%p163_p2) target bundleno = 242 (0xf2), region = 36  ;;  %386 = vmatprep.subr.bf16.mxu1 (!%p163_p2), %v419_v0  ;;  %392 = vmatprep.subr.bf16.mxu0 (!%p163_p2), %v419_v0  ;;  %vm207_vm1 = vcmask (!%p163_p2), 1043456   ;;  %v304_v5 = vld [vmem:[%s483_s3] sm:$0x7] (!%p163_p2)  ;;  %vm203_vm2 = vcmask (!%p163_p2), 64512   ;;  %vm312_vm3 = vcmask (!%p163_p2), 518144  }
   0x7   : > { %388 = vmatprep.mubr.msk.bf16.mxu1 (!%p163_p2), %vm420_vm0, %v419_v0  ;;  %394 = vmatprep.mubr.msk.bf16.mxu0 (!%p163_p2), %vm420_vm0, %v419_v0  ;;  %v376_v8 = vld [vmem:[%s481_s1 + $0x2] sm:$0x3] (!%p163_p2)  ;;  %v198_v9 = vld [vmem:[%s481_s1] sm:$0x3] (!%p163_p2) }
   0x8   : > { %410 = vset.pattern.permute.xlu0 (!%p163_p2), %v421_v2 }
   0x9   : > { %300 = vperm.xlu0 (!%p163_p2), %410, %v297_v1  }
   0xd   : > { %s486_s16 = smov (!%p187_p3, %s367_s16), 1  ;;  %307 = vperm.xlu0 %410, %v304_v5  }
   0xe   : > { %s381_s19 = sshll.u32 %s486_s16, 3  ;;  %s374_s29 = sshll.u32 %s486_s16, 2 }
   0xf   : > { %s191_s22 = scalar_lea.vmem %s480_s0, %s381_s19  ;;  %s195_s6 = scalar_lea.vmem %s484_s4, %s374_s29 }
  0x10   : > { %v375_v3 = vld [vmem:[%s191_s22 + $0x4] sm:$0xf]  ;;  %v197_v4 = vld [vmem:[%s191_s22] sm:$0xf] }
  0x11   : > { %v209_v6 = vsel %vm207_vm1, %v375_v3, 0  ;;  %v255_v7 = vsel %vm207_vm1, %v197_v4, 0 }
  0x12   : > { %387 = vmatpush3.bf16.msra.mxu1 %v209_v6  ;;  %393 = vmatpush3.bf16.msra.mxu0 %v255_v7 }
  0x15   : > { %389 = vmatmul.mubr.msk.bf16.vlgmr.msra.gmra.mrb[0].mxu1 %vm203_vm2, %v376_v8  ;;  %395 = vmatmul.mubr.msk.bf16.vlgmr.msra.gmra.mrb[0].mxu0 %vm203_vm2, %v198_v9 }
  0x88   : > { %v301_v10 = vpop.permute.xlu0 %300 }
  0x8c   : > { %v308_v21 = vpop.permute.xlu0 %307 }
  0xe8   : > { %v245_v11 = vpop.f32.mrb[0].mxu1  ;;  %v291_v12 = vpop.f32.mrb[0].mxu0 }
  0xe9   : > { %v292_v13 = vadd.f32 %v291_v12, %v245_v11  ;;  %v390_v14 = vpop.f32.mrb[1].mxu1  ;;  %v396_v15 = vpop.f32.mrb[1].mxu0 }
  0xea   : > { %v248_v16 = vpop.f32.mrb[2].mxu1  ;;  %v294_v17 = vpop.f32.mrb[2].mxu0 }
  0xeb   : > { %v303_v18 = vmul.f32 %v301_v10, %v292_v13  ;;  %v391_v19 = vpop.f32.mrb[3].mxu1  ;;  %v397_v20 = vpop.f32.mrb[3].mxu0 }
  0xed   : > { %v310_v22 = vadd.f32 %v308_v21, %v303_v18 }
  0xef   : > { %v311_v23 = vmax.f32 %v310_v22, 0.0 }
  0xf1   : > { %313 = vst.msk [vmem:[%s195_s6] sm:$0x7] %vm312_vm3, %v311_v23 }
  0xf2 PF: > { %s14_s15 = sadd.s32 1, %s417_s15  }
  0xf3   : > { %p11_p4 = scmp.ge.s32.totalorder %s14_s15, 4  }
  0xf5   :  { %13 = sbr.rel (!%p11_p4) target bundleno = 1 (0x1), region = 68 }

// kernel: kart_cnn_forward.54
= control target key start
LH: loop header
LB: loop body
LE: loop exit
PB: predicated region body
PF: predicated region fallthrough
CT: control target
= control target key end

     0   :  { %s449_s15 = smov 0   ;;  %s485_s0 = inlined_call_operand.vmem [shape: bf16[2,1,8,72], index: 0, kind: input, shape index: {}]   ;;  %s486_s1 = inlined_call_operand.vmem [shape: bf16[2,3,8], index: 1, kind: input, shape index: {}]   ;;  %s487_s2 = inlined_call_operand.vmem [shape: f32[3,1], index: 2, kind: input, shape index: {}]   ;;  %s488_s3 = inlined_call_operand.vmem [shape: f32[3,1], index: 3, kind: input, shape index: {}]   ;;  %s489_s4 = inlined_call_operand.vmem [shape: f32[2,3,64], index: 4, kind: output, shape index: {}]  }
   0x1 LB: > { %s367_s16 = sadd.s32 4294967295, %s418_s15   ;;  %p371_p0 = scmp.ge.s32.totalorder %s418_s15, 1  ;;  %s418_s15 = sphi %s449_s15, %s14_s15  }
   0x2   : > { %p161_p1 = scmp.lt.s32.totalorder %s418_s15, 3 }
   0x4   : > { %p162_p2 = pnand %p371_p0, %p161_p1 }
   0x5   : > { %p185_p3 = scmp.lt.s32.totalorder (!%p162_p2), %s367_s16, 1  ;;  %v420_v0 = vmov (!%p162_p2), 0.0   ;;  %vm421_vm0 = vmmov (!%p162_p2), 0   ;;  %v304_v1 = vld [vmem:[%s488_s3] sm:$0x7] (!%p162_p2)  ;;  %v422_v2 = vmov (!%p162_p2), 0  }
   0x6   : > { %165 = sbr.rel (%p162_p2) target bundleno = 359 (0x167), region = 36  ;;  %390 = vmatprep.subr.bf16.mxu0 (!%p162_p2), %v420_v0  ;;  %384 = vmatprep.subr.bf16.mxu1 (!%p162_p2), %v420_v0  ;;  %vm207_vm1 = vcmask (!%p162_p2), 1043456   ;;  %v195_v6 = vld [vmem:[%s486_s1] sm:$0x3] (!%p162_p2)  ;;  %vm203_vm2 = vcmask (!%p162_p2), 64512   ;;  %s423_s25 = smov (!%p162_p2), 120  }
   0x7   : > { %392 = vmatprep.mubr.msk.bf16.mxu0 (!%p162_p2), %vm421_vm0, %v420_v0  ;;  %386 = vmatprep.mubr.msk.bf16.mxu1 (!%p162_p2), %vm421_vm0, %v420_v0  ;;  %v297_v7 = vld [vmem:[%s487_s2] sm:$0x7] (!%p162_p2)  ;;  %vm312_vm3 = vcmask (!%p162_p2), 518144  }
   0x8   : > { %409 = vset.pattern.permute.xlu0 (!%p162_p2), %v422_v2  ;;  %410 = vset.pattern.permute.xlu1 (!%p162_p2), %v422_v2  ;;  %v374_v10 = vld [vmem:[%s486_s1 + $0x2] sm:$0x3] (!%p162_p2) }
   0x9   : > { %307 = vperm.xlu1 (!%p162_p2), %410, %v304_v1  }
   0xd   : > { %s491_s16 = smov (!%p185_p3, %s367_s16), 1 }
   0xe   : > { %s372_s19 = sshll.u32 %s491_s16, 2 }
   0xf   : > { %s188_s22 = scalar_lea.vmem %s485_s0, %s372_s19  ;;  %s192_s6 = scalar_lea.vmem %s489_s4, %s372_s19 }
  0x10   : > { %v194_v3 = vld [vmem:[%s188_s22] sm:$0xf] }
  0x11   : > { %v375_v4 = vcombine.low %v194_v3, %v194_v3  ;;  %v255_v5 = vsel %vm207_vm1, %v194_v3, 0 }
  0x12   : > { %391 = vmatpush3.bf16.msra.mxu0 %v255_v5 }
  0x13   : > { %201 = vrot.lane.b32.xlu0 %v375_v4, %s423_s25 }
  0x15   : > { %393 = vmatmul.mubr.msk.bf16.vlgmr.msra.gmra.mrb[0].mxu0 %vm203_vm2, %v195_v6 }
  0x17   : > { %300 = vperm.xlu0 %409, %v297_v7  }
  0x85   : > { %v202_v8 = vpop.permute.xlu0 %201 }
  0x86   : > { %v209_v9 = vsel %vm207_vm1, %v202_v8, 0 }
  0x87   : > { %385 = vmatpush3.bf16.msra.mxu1 %v209_v9 }
  0x88   : > { %v308_v20 = vpop.permute.xlu1 %307 }
  0x8a   : > { %387 = vmatmul.mubr.msk.bf16.vlgmr.msra.gmra.mrb[0].mxu1 %vm203_vm2, %v374_v10 }
  0x96   : > { %v301_v16 = vpop.permute.xlu0 %300 }
  0xe8   : > { %v291_v11 = vpop.f32.mrb[0].mxu0 }
  0xe9   : > { %v394_v12 = vpop.f32.mrb[1].mxu0 }
  0xea   : > { %v294_v13 = vpop.f32.mrb[2].mxu0 }
  0xeb   : > { %v395_v14 = vpop.f32.mrb[3].mxu0 }
 0x15d   : > { %v245_v15 = vpop.f32.mrb[0].mxu1 }
 0x15e   : > { %v292_v17 = vadd.f32 %v291_v11, %v245_v15  ;;  %v388_v18 = vpop.f32.mrb[1].mxu1 }
 0x15f   : > { %v248_v19 = vpop.f32.mrb[2].mxu1 }
 0x160   : > { %v303_v21 = vmul.f32 %v301_v16, %v292_v17  ;;  %v389_v22 = vpop.f32.mrb[3].mxu1 }
 0x162   : > { %v310_v23 = vadd.f32 %v308_v20, %v303_v21 }
 0x164   : > { %v311_v24 = vmax.f32 %v310_v23, 0.0 }
 0x166   : > { %313 = vst.msk [vmem:[%s192_s6] sm:$0x7] %vm312_vm3, %v311_v24 }
 0x167 PF: > { %s14_s15 = sadd.s32 1, %s418_s15  }
 0x168   : > { %p11_p4 = scmp.ge.s32.totalorder %s14_s15, 4  }
 0x16a   :  { %13 = sbr.rel (!%p11_p4) target bundleno = 1 (0x1), region = 67 }

// kernel: kart_cnn_forward.57
= control target key start
LH: loop header
LB: loop body
LE: loop exit
PB: predicated region body
PF: predicated region fallthrough
CT: control target
= control target key end

     0   :  { %s590_s15 = smov 0   ;;  %s641_s0 = inlined_call_operand.vmem [shape: bf16[2,2,8,72], index: 0, kind: input, shape index: {}]   ;;  %s642_s1 = inlined_call_operand.vmem [shape: bf16[4,3,8], index: 1, kind: input, shape index: {}]   ;;  %s643_s2 = inlined_call_operand.vmem [shape: f32[3,1], index: 2, kind: input, shape index: {}]   ;;  %s644_s3 = inlined_call_operand.vmem [shape: f32[3,1], index: 3, kind: input, shape index: {}]   ;;  %s645_s4 = inlined_call_operand.vmem [shape: f32[2,3,64], index: 4, kind: output, shape index: {}]  }
   0x1 LB: > { %s475_s16 = sadd.s32 4294967295, %s559_s15   ;;  %p479_p0 = scmp.ge.s32.totalorder %s559_s15, 1  ;;  %s559_s15 = sphi %s590_s15, %s14_s15  }
   0x2   : > { %p162_p1 = scmp.lt.s32.totalorder %s559_s15, 3 }
   0x4   : > { %p163_p2 = pnand %p479_p0, %p162_p1 }
   0x5   : > { %p187_p3 = scmp.lt.s32.totalorder (!%p163_p2), %s475_s16, 1  ;;  %v561_v0 = vmov (!%p163_p2), 0.0   ;;  %vm562_vm0 = vmmov (!%p163_p2), 0   ;;  %vm207_vm1 = vcmask (!%p163_p2), 1043456   ;;  %v484_v5 = vld [vmem:[%s642_s1 + $0x2] sm:$0x3] (!%p163_p2) }
   0x6   : > { %166 = sbr.rel (%p163_p2) target bundleno = 371 (0x173), region = 36  ;;  %504 = vmatprep.subr.bf16.mxu1 (!%p163_p2), %v561_v0  ;;  %506 = vmatprep.mubr.msk.bf16.mxu1 (!%p163_p2), %vm562_vm0, %v561_v0  ;;  %vm203_vm2 = vcmask (!%p163_p2), 64512   ;;  %s563_s23 = smov (!%p163_p2), 120   ;;  %v405_v8 = vld [vmem:[%s643_s2] sm:$0x7] (!%p163_p2)  ;;  %v564_v9 = vmov (!%p163_p2), 0  }
   0x7   : > { %516 = vmatprep.subr.bf16.mxu0 (!%p163_p2), %v561_v0  ;;  %518 = vmatprep.mubr.msk.bf16.mxu0 (!%p163_p2), %vm562_vm0, %v561_v0  ;;  %v412_v10 = vld [vmem:[%s644_s3] sm:$0x7] (!%p163_p2)  ;;  %v487_v14 = vld [vmem:[%s642_s1 + $0x4] sm:$0x3] (!%p163_p2)  ;;  %v490_v17 = vld [vmem:[%s642_s1 + $0x6] sm:$0x3] (!%p163_p2) }
   0x8   : > { %549 = vset.pattern.permute.xlu1 (!%p163_p2), %v564_v9  ;;  %550 = vset.pattern.permute.xlu0 (!%p163_p2), %v564_v9  ;;  %v198_v11 = vld [vmem:[%s642_s1] sm:$0x3] (!%p163_p2)  ;;  %vm420_vm3 = vcmask (!%p163_p2), 518144  }
   0x9   : > { %408 = vperm.xlu1 (!%p163_p2), %549, %v405_v8  }
   0xd   : > { %s647_s16 = smov (!%p187_p3, %s475_s16), 1  ;;  %415 = vperm.xlu1 %549, %v412_v10  }
   0xe   : > { %s495_s17 = sshll.u32 %s647_s16, 3  ;;  %s482_s8 = sshll.u32 %s647_s16, 2 }
   0xf   : > { %s191_s20 = scalar_lea.vmem %s641_s0, %s495_s17  ;;  %s195_s11 = scalar_lea.vmem %s645_s4, %s482_s8 }
  0x10   : > { %v197_v1 = vld [vmem:[%s191_s20] sm:$0xf]  ;;  %v483_v2 = vld [vmem:[%s191_s20 + $0x4] sm:$0xf] }
  0x11   : > { %v488_v3 = vcombine.low %v197_v1, %v197_v1  ;;  %v209_v4 = vsel %vm207_vm1, %v483_v2, 0  ;;  %v491_v6 = vcombine.low %v483_v2, %v483_v2  ;;  %v255_v7 = vsel %vm207_vm1, %v197_v1, 0 }
  0x12   : > { %505 = vmatpush3.bf16.msra.mxu1 %v209_v4 }
  0x13   : > { %302 = vrot.lane.b32.xlu0 %v488_v3, %s563_s23  ;;  %510 = vmatprep.subr.bf16.mxu1 %v561_v0 }
  0x15   : > { %507 = vmatmul.mubr.msk.bf16.vlgmr.msra.gmra.mrb[0].mxu1 %vm203_vm2, %v484_v5 }
  0x16   : > { %511 = vmatpush3.bf16.msra.mxu1 %v255_v7  ;;  %512 = vmatprep.mubr.msk.bf16.mxu1 %vm562_vm0, %v561_v0 }
  0x17   : > { %356 = vrot.lane.b32.xlu0 %v491_v6, %s563_s23 }
  0x21   : > { %513 = vmatmul.mubr.msk.bf16.vlgmr.msra.gmra.mrb[0].mxu1 %vm203_vm2, %v198_v11 }
  0x85   : > { %v303_v12 = vpop.permute.xlu0 %302 }
  0x86   : > { %v308_v13 = vsel %vm207_vm1, %v303_v12, 0 }
  0x87   : > { %517 = vmatpush3.bf16.msra.mxu0 %v308_v13 }
  0x88   : > { %522 = vmatprep.subr.bf16.mxu0 %v561_v0  ;;  %v409_v22 = vpop.permute.xlu1 %408 }
  0x89   : > { %v357_v15 = vpop.permute.xlu0 %356 }
  0x8a   : > { %v362_v16 = vsel %vm207_vm1, %v357_v15, 0  ;;  %519 = vmatmul.mubr.msk.bf16.vlgmr.msra.gmra.mrb[0].mxu0 %vm203_vm2, %v487_v14 }
  0x8b   : > { %523 = vmatpush3.bf16.msra.mxu0 %v362_v16  ;;  %524 = vmatprep.mubr.msk.bf16.mxu0 %vm562_vm0, %v561_v0 }
  0x8c   : > { %v416_v29 = vpop.permute.xlu1 %415 }
  0x96   : > { %525 = vmatmul.mubr.msk.bf16.vlgmr.msra.gmra.mrb[0].mxu0 %vm203_vm2, %v490_v17 }
  0xf4   : > { %v291_v18 = vpop.f32.mrb[0].mxu1 }
  0xf5   : > { %v514_v19 = vpop.f32.mrb[1].mxu1 }
  0xf6   : > { %v294_v20 = vpop.f32.mrb[2].mxu1 }
  0xf7   : > { %v515_v21 = vpop.f32.mrb[3].mxu1 }
 0x169   : > { %v398_v23 = vpop.f32.mrb[0].mxu0 }
 0x16a   : > { %v528_v24 = vadd.f32 %v398_v23, %v291_v18  ;;  %v526_v25 = vpop.f32.mrb[1].mxu0 }
 0x16b   : > { %v401_v26 = vpop.f32.mrb[2].mxu0 }
 0x16c   : > { %v411_v27 = vmul.f32 %v528_v24, %v409_v22  ;;  %v527_v28 = vpop.f32.mrb[3].mxu0 }
 0x16e   : > { %v418_v30 = vadd.f32 %v416_v29, %v411_v27 }
 0x170   : > { %v419_v31 = vmax.f32 %v418_v30, 0.0 }
 0x172   : > { %421 = vst.msk [vmem:[%s195_s11] sm:$0x7] %vm420_vm3, %v419_v31 }
 0x173 PF: > { %s14_s15 = sadd.s32 1, %s559_s15  }
 0x174   : > { %p11_p4 = scmp.ge.s32.totalorder %s14_s15, 4  }
 0x176   :  { %13 = sbr.rel (!%p11_p4) target bundleno = 1 (0x1), region = 70 }

</bundles_post_ra>
